<compile_context>
chip_gen: v7x
topology: tpu7x:2x2x1
jax: 0.10.0
libtpu: 0.0.40
codegen_flags: <defaults>
</compile_context>

<pallas_src>
import functools

import numpy as np
import jax
import jax.numpy as jnp
from jax.experimental import pallas as pl
from jax.experimental.pallas import tpu as pltpu


def _window_attention_kernel(*refs, num_heads, compute_dtype, has_mask,
                             mask_slice, nblk, n_mask):
    if has_mask:
        (x_ref, wqkv_ref, bqkv_ref, wo_ref, bo_ref, bias_ref, mask_ref, o_ref) = refs
    else:
        (x_ref, wqkv_ref, bqkv_ref, wo_ref, bo_ref, bias_ref, o_ref) = refs
        mask_ref = None

    BW, N, C = x_ref.shape                  # BW windows per tile, N tokens, C channels
    hd = C // num_heads
    rows = BW * N
    cd = compute_dtype

    # Fused QKV projection: one (rows, C) @ (C, 3C) MXU matmul, f32 accumulation.
    # (The qk scale is already folded into the q columns of wqkv/bqkv host-side.)
    x2 = x_ref[...].reshape(rows, C).astype(cd)
    qkv = jnp.dot(x2, wqkv_ref[...], preferred_element_type=jnp.float32) + bqkv_ref[...]

    # Additive window mask tile for this grid step (f32), shape (BW, N, N).
    m = None
    if has_mask:
        if mask_slice:                      # nW % BW == 0: slice the resident mask
            start = pl.multiple_of((pl.program_id(0) % nblk) * BW, BW)
            m = mask_ref[pl.ds(start, BW)]
        else:                               # BW % nW == 0: tile spans whole images
            r = BW // n_mask
            if r == 1:
                m = mask_ref[...]
            else:
                m = jnp.broadcast_to(mask_ref[...][None],
                                     (r, n_mask, N, N)).reshape(BW, N, N)

    # Per-head attention (static unroll; nH is small in Swin).
    # TODO(synk): a (BW*nH)-batched einsum would shrink the live set further, but
    # multi-batch-dim dot_general does not lower on Mosaic, so the static head
    # loop (with lane-aligned slices of the fused qkv) is kept.
    ctxs = []
    for h in range(num_heads):
        qh = qkv[:, h * hd:(h + 1) * hd].reshape(BW, N, hd).astype(cd)
        kh = qkv[:, C + h * hd:C + (h + 1) * hd].reshape(BW, N, hd).astype(cd)
        vh = qkv[:, 2 * C + h * hd:2 * C + (h + 1) * hd].reshape(BW, N, hd).astype(cd)

        attn = jnp.einsum('bqd,bkd->bqk', qh, kh,
                          preferred_element_type=jnp.float32)           # (BW, N, N)
        attn = attn + bias_ref[h]                                       # rel-pos bias
        if m is not None:
            attn = attn + m                                             # window mask

        amax = jnp.max(attn, axis=-1, keepdims=True)
        p = jnp.exp(attn - amax)
        inv = pl.reciprocal(jnp.sum(p, axis=-1, keepdims=True), approx=True)
        probs = (p * inv).astype(cd)

        oh = jnp.einsum('bqk,bkd->bqd', probs, vh,
                        preferred_element_type=jnp.float32)             # (BW, N, hd)
        ctxs.append(oh.reshape(rows, hd))

    # Heads concatenated along lanes (nH*hd = C) -> single K=C output projection.
    ctx = jnp.concatenate(ctxs, axis=-1).astype(cd)                      # (rows, C)
    out = jnp.dot(ctx, wo_ref[...], preferred_element_type=jnp.float32) + bo_ref[...]
    o_ref[...] = out.reshape(BW, N, C).astype(o_ref.dtype)


def make_relative_position_index(window_size):
    """Replicates the PyTorch buffer `relative_position_index` (N, N) int array."""
    Wh, Ww = window_size
    coords = np.stack(np.meshgrid(np.arange(Wh), np.arange(Ww), indexing='ij'))  # (2, Wh, Ww)
    coords_flatten = coords.reshape(2, -1)                                        # (2, N)
    rel = coords_flatten[:, :, None] - coords_flatten[:, None, :]                 # (2, N, N)
    rel = rel.transpose(1, 2, 0).copy()                                           # (N, N, 2)
    rel[:, :, 0] += Wh - 1
    rel[:, :, 1] += Ww - 1
    rel[:, :, 0] *= 2 * Ww - 1
    return rel.sum(-1)                                                            # (N, N)


def _vmem_bytes_estimate(bw, N, C, num_heads, nW, io_bytes, cd_bytes):
    """Rough per-grid-step VMEM working-set estimate (bytes)."""
    rows = bw * N
    hd = C // num_heads
    stream = 2 * rows * C * (io_bytes + io_bytes)           # double-buffered x + out tiles
    resident = (3 * C * C + C * C) * cd_bytes               # wqkv + wo
    resident += (3 * C + C) * 4                             # biases (f32)
    resident += (num_heads + nW) * N * N * 4                # rel bias + mask (f32)
    interm = rows * (C * cd_bytes                           # x cast
                     + 3 * C * 4                            # fused qkv (f32)
                     + 3 * hd * cd_bytes                    # per-head q/k/v slices
                     + C * 4 + C * cd_bytes                 # ctx f32 + cast
                     + C * 4)                               # out f32
    interm += (3 + (1 if nW else 0)) * bw * N * N * 4       # logits/exp/probs (+ mask tile)
    return stream + resident + interm


def _pick_bw(B_, N, C, num_heads, nW, io_bytes, cd_bytes,
             rows_target=1024, vmem_cap=40 * 1024 * 1024):
    """Windows per grid step: fat tiles (~1024 rows), >=2 (preferably even) grid
    steps for v7x's dual TensorCores, working set capped for v7x's 64 MiB VMEM."""
    cands = [b for b in range(1, max(1, B_ // 2) + 1) if B_ % b == 0]
    if nW:
        cands = [b for b in cands if (nW % b == 0 or b % nW == 0)]
    cands = [b for b in cands
             if _vmem_bytes_estimate(b, N, C, num_heads, nW, io_bytes, cd_bytes) <= vmem_cap]
    if not cands:
        cands = [1]
    target = max(1, rows_target // N)
    pool = [b for b in cands if b <= target] or [min(cands)]
    even = [b for b in pool if (B_ // b) % 2 == 0]
    pool = even or pool
    return max(pool)


def window_attention_pallas(x, params, window_size, num_heads, mask=None, *,
                            bw=None, qk_scale=None, compute_dtype=jnp.bfloat16):
    """Pallas forward of Swin WindowAttention.

    x:     (B_, N, C) with N == Wh*Ww, windows laid out image-major (B, nW).
    mask:  (nW, N, N) additive 0/-inf mask or None.
    params: dict with 'wqkv' (C, 3C), 'bqkv' (3C,), 'wo' (C, C), 'bo' (C,),
            'rel_table' ((2Wh-1)*(2Ww-1), num_heads).
    """
    B_, N, C = x.shape
    Wh, Ww = window_size
    assert N == Wh * Ww
    assert C % num_heads == 0
    hd = C // num_heads
    scale = float(qk_scale) if qk_scale is not None else hd ** (-0.5)
    cd = jnp.dtype(compute_dtype)
    # TODO(synk): for window sizes with N not a multiple of 8 (e.g. 7x7 -> N=49),
    # pad tokens host-side (with a -inf additive bias) for dense 8x128 tiles.

    nW = None
    if mask is not None:
        nW = int(mask.shape[0])
        assert mask.shape[1:] == (N, N)
        assert B_ % nW == 0, "B_ must be num_images * nW with image-major window layout"

    io_bytes = jnp.dtype(x.dtype).itemsize
    if bw is None:
        bw = _pick_bw(B_, N, C, num_heads, nW or 0, io_bytes, cd.itemsize)
    assert bw >= 1 and B_ % bw == 0
    if mask is not None:
        assert nW % bw == 0 or bw % nW == 0, "window tile (bw) incompatible with nW"
    grid = B_ // bw

    # --- host-side parameter prep (layout plumbing, done once per call) -------
    wqkv = jnp.asarray(params['wqkv'], jnp.float32)
    bqkv = jnp.asarray(params['bqkv'], jnp.float32)
    # Fold the qk scale into the q-projection weights/bias; cast weights to the
    # compute dtype host-side (removes per-step in-kernel VPU casts).
    wqkv = jnp.concatenate([wqkv[:, :C] * scale, wqkv[:, C:]], axis=1).astype(cd)
    bqkv = jnp.concatenate([bqkv[:C] * scale, bqkv[C:]]).reshape(1, 3 * C).astype(jnp.float32)
    wo = jnp.asarray(params['wo'], jnp.float32).astype(cd)
    bo = jnp.asarray(params['bo'], jnp.float32).reshape(1, C)

    # Relative-position bias gather -> (nH, N, N) f32, fully VMEM-resident.
    rel_index = jnp.asarray(make_relative_position_index(window_size).reshape(-1))
    rel_bias = jnp.asarray(params['rel_table'], jnp.float32)[rel_index]
    rel_bias = jnp.transpose(rel_bias.reshape(N, N, num_heads), (2, 0, 1))

    c2 = lambda i: (0, 0)
    c3 = lambda i: (0, 0, 0)
    in_specs = [
        pl.BlockSpec((bw, N, C), lambda i: (i, 0, 0)),       # x tile (streamed)
        pl.BlockSpec((C, 3 * C), c2),                        # wqkv   (VMEM-resident)
        pl.BlockSpec((1, 3 * C), c2),                        # bqkv
        pl.BlockSpec((C, C), c2),                            # wo
        pl.BlockSpec((1, C), c2),                            # bo
        pl.BlockSpec((num_heads, N, N), c3),                 # rel-pos bias (resident)
    ]
    inputs = [x, wqkv, bqkv, wo, bo, rel_bias]

    has_mask = mask is not None
    mask_slice, nblk = False, 1
    if has_mask:
        in_specs.append(pl.BlockSpec((nW, N, N), c3))        # whole mask, VMEM-resident
        inputs.append(jnp.asarray(mask, jnp.float32))
        if nW % bw == 0:
            mask_slice, nblk = True, nW // bw

    kernel = functools.partial(
        _window_attention_kernel, num_heads=num_heads, compute_dtype=cd,
        has_mask=has_mask, mask_slice=mask_slice, nblk=nblk, n_mask=(nW or 1))

    est = _vmem_bytes_estimate(bw, N, C, num_heads, nW or 0, io_bytes, cd.itemsize)
    vmem_limit = int(min(48 * 2**20, max(32 * 2**20, 2 * est)))

    out = pl.pallas_call(
        kernel,
        out_shape=jax.ShapeDtypeStruct((B_, N, C), x.dtype),
        grid=(grid,),
        in_specs=in_specs,
        out_specs=pl.BlockSpec((bw, N, C), lambda i: (i, 0, 0)),
        compiler_params=pltpu.CompilerParams(
            dimension_semantics=("parallel",),
            vmem_limit_bytes=vmem_limit),
    )(*inputs)
    return out


def init_window_attention_params(key, dim, window_size, num_heads, dtype=jnp.float32):
    """Mimics nn.Linear uniform init + trunc_normal(std=0.02) bias table."""
    Wh, Ww = window_size
    k1, k2, k3, k4, k5 = jax.random.split(key, 5)
    lim = 1.0 / np.sqrt(dim)
    wqkv = jax.random.uniform(k1, (dim, 3 * dim), dtype, -lim, lim)   # stored (in, out)
    bqkv = jax.random.uniform(k2, (3 * dim,), dtype, -lim, lim)
    wo = jax.random.uniform(k3, (dim, dim), dtype, -lim, lim)
    bo = jax.random.uniform(k4, (dim,), dtype, -lim, lim)
    table = 0.02 * jax.random.truncated_normal(
        k5, -2.0, 2.0, ((2 * Wh - 1) * (2 * Ww - 1), num_heads), dtype)
    return dict(wqkv=wqkv, bqkv=bqkv, wo=wo, bo=bo, rel_table=table)


def window_attention_ref(x, params, window_size, num_heads, mask=None, qk_scale=None):
    """Plain-JAX reference mirroring the PyTorch forward exactly."""
    B_, N, C = x.shape
    hd = C // num_heads
    scale = qk_scale if qk_scale is not None else hd ** (-0.5)
    qkv = x @ params['wqkv'] + params['bqkv']
    qkv = qkv.reshape(B_, N, 3, num_heads, hd).transpose(2, 0, 3, 1, 4)
    q, k, v = qkv[0] * scale, qkv[1], qkv[2]                          # (B_, nH, N, hd)
    attn = q @ jnp.swapaxes(k, -2, -1)                                # (B_, nH, N, N)

    rel_index = jnp.asarray(make_relative_position_index(window_size).reshape(-1))
    rel_bias = params['rel_table'][rel_index].reshape(N, N, num_heads)
    rel_bias = jnp.transpose(rel_bias, (2, 0, 1))
    attn = attn + rel_bias[None]
    if mask is not None:
        nW = mask.shape[0]
        attn = attn.reshape(B_ // nW, nW, num_heads, N, N) + mask[None, :, None]
        attn = attn.reshape(B_, num_heads, N, N)
    attn = jax.nn.softmax(attn, axis=-1)
    out = jnp.swapaxes(attn @ v, 1, 2).reshape(B_, N, C)
    return out @ params['wo'] + params['bo']


if __name__ == "__main__":
    key = jax.random.PRNGKey(0)
    dim, num_heads = 128, 4              # head_dim = 32 (Swin-style)
    window_size = (8, 8)
    N = window_size[0] * window_size[1]  # 64 tokens per window
    B, nW = 2, 4
    B_ = B * nW                          # 8 windows total -> auto bw=4, 2 grid steps

    kx, kp = jax.random.split(key)
    x = jax.random.normal(kx, (B_, N, dim), jnp.float32)
    params = init_window_attention_params(kp, dim, window_size, num_heads)

    # Shifted-window style additive mask (0 / -100) on the last window of each image.
    half = N // 2
    group = (np.arange(N) >= half).astype(np.int32)
    blocked = (group[:, None] != group[None, :]).astype(np.float32) * (-100.0)
    mask_np = np.zeros((nW, N, N), np.float32)
    mask_np[-1] = blocked
    mask = jnp.asarray(mask_np)

    # f32 compute path (tight check) and bf16 compute path (shipping config).
    out_plain = window_attention_pallas(x, params, window_size, num_heads,
                                        mask=None, compute_dtype=jnp.float32)
    out_masked = window_attention_pallas(x, params, window_size, num_heads,
                                         mask=mask, compute_dtype=jnp.float32)
    out_masked_bf16 = window_attention_pallas(x, params, window_size, num_heads,
                                              mask=mask, compute_dtype=jnp.bfloat16)
    out_plain, out_masked, out_masked_bf16 = jax.block_until_ready(
        (out_plain, out_masked, out_masked_bf16))

    # Reference at highest matmul precision so the f32 comparison is meaningful.
    with jax.default_matmul_precision('float32'):
        ref_plain = window_attention_ref(x, params, window_size, num_heads, mask=None)
        ref_masked = window_attention_ref(x, params, window_size, num_heads, mask=mask)
    ref_plain, ref_masked = jax.block_until_ready((ref_plain, ref_masked))

    assert out_plain.shape == (B_, N, dim)
    assert out_masked.shape == (B_, N, dim)
    # f32 kernel accumulates in f32 on the MXU; margin covers the EUP approx recip.
    assert jnp.allclose(out_plain, ref_plain, atol=1e-2, rtol=1e-2), "mismatch (f32, no mask)"
    assert jnp.allclose(out_masked, ref_masked, atol=1e-2, rtol=1e-2), "mismatch (f32, masked)"
    # bf16 operands (f32 accumulation) vs the f32 reference.
    assert jnp.allclose(out_masked_bf16, ref_masked, atol=5e-2, rtol=5e-2), "mismatch (bf16, masked)"

    # TODO(synk): attn_drop / proj_drop are p=0.0 (identity) and therefore omitted.
    print("KERNEL_OK")
</pallas_src>

<mosaic_0001>
module attributes {stable_mosaic.version = 11 : i64} {
  func.func @_window_attention_kernel(%arg0: i32, %arg1: memref<4x64x128xf32, #tpu.memory_space<vmem>>, %arg2: memref<128x384xf32, #tpu.memory_space<vmem>>, %arg3: memref<1x384xf32, #tpu.memory_space<vmem>>, %arg4: memref<128x128xf32, #tpu.memory_space<vmem>>, %arg5: memref<1x128xf32, #tpu.memory_space<vmem>>, %arg6: memref<4x64x64xf32, #tpu.memory_space<vmem>>, %arg7: memref<4x64x128xf32, #tpu.memory_space<vmem>>) attributes {dimension_semantics = [#tpu.dimension_semantics<parallel>], iteration_bounds = array<i64: 2>, scalar_prefetch = 0 : i64, scratch_operands = 0 : i64, tpu.core_type = #tpu.core_type<tc>, window_params = [{transform_indices = @transform_0, window_bounds = array<i64: 4, 64, 128>}, {pipeline_mode = #tpu.pipeline_mode<synchronous>, transform_indices = @transform_1, window_bounds = array<i64: 128, 384>}, {pipeline_mode = #tpu.pipeline_mode<synchronous>, transform_indices = @transform_2, window_bounds = array<i64: 1, 384>}, {pipeline_mode = #tpu.pipeline_mode<synchronous>, transform_indices = @transform_3, window_bounds = array<i64: 128, 128>}, {pipeline_mode = #tpu.pipeline_mode<synchronous>, transform_indices = @transform_4, window_bounds = array<i64: 1, 128>}, {pipeline_mode = #tpu.pipeline_mode<synchronous>, transform_indices = @transform_5, window_bounds = array<i64: 4, 64, 64>}, {transform_indices = @transform_6, window_bounds = array<i64: 4, 64, 128>}]} {
    %c0 = arith.constant 0 : index
    %c0_0 = arith.constant 0 : index
    %c0_1 = arith.constant 0 : index
    %0 = vector.load %arg1[%c0, %c0_0, %c0_1] : memref<4x64x128xf32, #tpu.memory_space<vmem>>, vector<4x64x128xf32>
    %1 = vector.shape_cast %0 : vector<4x64x128xf32> to vector<256x128xf32>
    %c0_2 = arith.constant 0 : index
    %c0_3 = arith.constant 0 : index
    %2 = vector.load %arg2[%c0_2, %c0_3] : memref<128x384xf32, #tpu.memory_space<vmem>>, vector<128x384xf32>
    %cst = arith.constant dense<0.000000e+00> : vector<256x384xf32>
    %3 = tpu.matmul %1, %2, %cst {dimension_numbers = #tpu.dot_dimension_numbers<[1], [0], [0], [1], [0, 0, 1, 1], [], []>} : vector<256x128xf32>, vector<128x384xf32>, vector<256x384xf32> -> vector<256x384xf32>
    %c0_4 = arith.constant 0 : index
    %c0_5 = arith.constant 0 : index
    %4 = vector.load %arg3[%c0_4, %c0_5] : memref<1x384xf32, #tpu.memory_space<vmem>>, vector<1x384xf32>
    %5 = vector.broadcast %4 : vector<1x384xf32> to vector<256x384xf32>
    %6 = arith.addf %3, %5 : vector<256x384xf32>
    %7 = vector.extract_strided_slice %6 {offsets = [0, 0], sizes = [256, 32], strides = [1, 1]} : vector<256x384xf32> to vector<256x32xf32>
    %8 = vector.shape_cast %7 : vector<256x32xf32> to vector<4x64x32xf32>
    %9 = vector.extract_strided_slice %6 {offsets = [0, 128], sizes = [256, 32], strides = [1, 1]} : vector<256x384xf32> to vector<256x32xf32>
    %10 = vector.shape_cast %9 : vector<256x32xf32> to vector<4x64x32xf32>
    %11 = vector.extract_strided_slice %6 {offsets = [0, 256], sizes = [256, 32], strides = [1, 1]} : vector<256x384xf32> to vector<256x32xf32>
    %12 = vector.shape_cast %11 : vector<256x32xf32> to vector<4x64x32xf32>
    "tpu.trace_start"() <{level = 10 : i32, message = "bqd,bkd->bqk"}> : () -> ()
    %cst_6 = arith.constant dense<0.000000e+00> : vector<4x64x64xf32>
    %13 = tpu.matmul %8, %10, %cst_6 {dimension_numbers = #tpu.dot_dimension_numbers<[2], [2], [1], [1], [0, 0, 0, 1, 1, 1], [0], [0]>} : vector<4x64x32xf32>, vector<4x64x32xf32>, vector<4x64x64xf32> -> vector<4x64x64xf32>
    "tpu.trace_stop"() : () -> ()
    %c0_7 = arith.constant 0 : index
    %c0_8 = arith.constant 0 : index
    %c0_9 = arith.constant 0 : index
    %14 = vector.load %arg6[%c0_7, %c0_8, %c0_9] : memref<4x64x64xf32, #tpu.memory_space<vmem>>, vector<1x64x64xf32>
    %15 = vector.shape_cast %14 : vector<1x64x64xf32> to vector<64x64xf32>
    %16 = vector.shape_cast %15 : vector<64x64xf32> to vector<1x64x64xf32>
    %17 = vector.broadcast %16 : vector<1x64x64xf32> to vector<4x64x64xf32>
    %18 = arith.addf %13, %17 : vector<4x64x64xf32>
    %cst_10 = arith.constant dense<0xFF800000> : vector<4x64xf32>
    %19 = vector.multi_reduction <maximumf>, %18, %cst_10 [2] : vector<4x64x64xf32> to vector<4x64xf32>
    %20 = vector.shape_cast %19 : vector<4x64xf32> to vector<4x64x1xf32>
    %21 = vector.broadcast %20 : vector<4x64x1xf32> to vector<4x64x64xf32>
    %22 = arith.subf %18, %21 : vector<4x64x64xf32>
    %23 = math.exp %22 : vector<4x64x64xf32>
    %cst_11 = arith.constant dense<0.000000e+00> : vector<4x64xf32>
    %24 = vector.multi_reduction <add>, %23, %cst_11 [2] : vector<4x64x64xf32> to vector<4x64xf32>
    %25 = vector.shape_cast %24 : vector<4x64xf32> to vector<4x64x1xf32>
    %26 = tpu.reciprocal %25 {approx = true} : vector<4x64x1xf32> -> vector<4x64x1xf32>
    %27 = vector.broadcast %26 : vector<4x64x1xf32> to vector<4x64x64xf32>
    %28 = arith.mulf %23, %27 : vector<4x64x64xf32>
    "tpu.trace_start"() <{level = 10 : i32, message = "bqk,bkd->bqd"}> : () -> ()
    %cst_12 = arith.constant dense<0.000000e+00> : vector<4x64x32xf32>
    %29 = tpu.matmul %28, %12, %cst_12 {dimension_numbers = #tpu.dot_dimension_numbers<[2], [1], [1], [2], [0, 0, 0, 1, 1, 2], [0], [0]>} : vector<4x64x64xf32>, vector<4x64x32xf32>, vector<4x64x32xf32> -> vector<4x64x32xf32>
    "tpu.trace_stop"() : () -> ()
    %30 = vector.shape_cast %29 : vector<4x64x32xf32> to vector<256x32xf32>
    %31 = vector.extract_strided_slice %6 {offsets = [0, 32], sizes = [256, 32], strides = [1, 1]} : vector<256x384xf32> to vector<256x32xf32>
    %32 = vector.shape_cast %31 : vector<256x32xf32> to vector<4x64x32xf32>
    %33 = vector.extract_strided_slice %6 {offsets = [0, 160], sizes = [256, 32], strides = [1, 1]} : vector<256x384xf32> to vector<256x32xf32>
    %34 = vector.shape_cast %33 : vector<256x32xf32> to vector<4x64x32xf32>
    %35 = vector.extract_strided_slice %6 {offsets = [0, 288], sizes = [256, 32], strides = [1, 1]} : vector<256x384xf32> to vector<256x32xf32>
    %36 = vector.shape_cast %35 : vector<256x32xf32> to vector<4x64x32xf32>
    "tpu.trace_start"() <{level = 10 : i32, message = "bqd,bkd->bqk"}> : () -> ()
    %cst_13 = arith.constant dense<0.000000e+00> : vector<4x64x64xf32>
    %37 = tpu.matmul %32, %34, %cst_13 {dimension_numbers = #tpu.dot_dimension_numbers<[2], [2], [1], [1], [0, 0, 0, 1, 1, 1], [0], [0]>} : vector<4x64x32xf32>, vector<4x64x32xf32>, vector<4x64x64xf32> -> vector<4x64x64xf32>
    "tpu.trace_stop"() : () -> ()
    %c1 = arith.constant 1 : index
    %c0_14 = arith.constant 0 : index
    %c0_15 = arith.constant 0 : index
    %38 = vector.load %arg6[%c1, %c0_14, %c0_15] : memref<4x64x64xf32, #tpu.memory_space<vmem>>, vector<1x64x64xf32>
    %39 = vector.shape_cast %38 : vector<1x64x64xf32> to vector<64x64xf32>
    %40 = vector.shape_cast %39 : vector<64x64xf32> to vector<1x64x64xf32>
    %41 = vector.broadcast %40 : vector<1x64x64xf32> to vector<4x64x64xf32>
    %42 = arith.addf %37, %41 : vector<4x64x64xf32>
    %cst_16 = arith.constant dense<0xFF800000> : vector<4x64xf32>
    %43 = vector.multi_reduction <maximumf>, %42, %cst_16 [2] : vector<4x64x64xf32> to vector<4x64xf32>
    %44 = vector.shape_cast %43 : vector<4x64xf32> to vector<4x64x1xf32>
    %45 = vector.broadcast %44 : vector<4x64x1xf32> to vector<4x64x64xf32>
    %46 = arith.subf %42, %45 : vector<4x64x64xf32>
    %47 = math.exp %46 : vector<4x64x64xf32>
    %cst_17 = arith.constant dense<0.000000e+00> : vector<4x64xf32>
    %48 = vector.multi_reduction <add>, %47, %cst_17 [2] : vector<4x64x64xf32> to vector<4x64xf32>
    %49 = vector.shape_cast %48 : vector<4x64xf32> to vector<4x64x1xf32>
    %50 = tpu.reciprocal %49 {approx = true} : vector<4x64x1xf32> -> vector<4x64x1xf32>
    %51 = vector.broadcast %50 : vector<4x64x1xf32> to vector<4x64x64xf32>
    %52 = arith.mulf %47, %51 : vector<4x64x64xf32>
    "tpu.trace_start"() <{level = 10 : i32, message = "bqk,bkd->bqd"}> : () -> ()
    %cst_18 = arith.constant dense<0.000000e+00> : vector<4x64x32xf32>
    %53 = tpu.matmul %52, %36, %cst_18 {dimension_numbers = #tpu.dot_dimension_numbers<[2], [1], [1], [2], [0, 0, 0, 1, 1, 2], [0], [0]>} : vector<4x64x64xf32>, vector<4x64x32xf32>, vector<4x64x32xf32> -> vector<4x64x32xf32>
    "tpu.trace_stop"() : () -> ()
    %54 = vector.shape_cast %53 : vector<4x64x32xf32> to vector<256x32xf32>
    %55 = vector.extract_strided_slice %6 {offsets = [0, 64], sizes = [256, 32], strides = [1, 1]} : vector<256x384xf32> to vector<256x32xf32>
    %56 = vector.shape_cast %55 : vector<256x32xf32> to vector<4x64x32xf32>
    %57 = vector.extract_strided_slice %6 {offsets = [0, 192], sizes = [256, 32], strides = [1, 1]} : vector<256x384xf32> to vector<256x32xf32>
    %58 = vector.shape_cast %57 : vector<256x32xf32> to vector<4x64x32xf32>
    %59 = vector.extract_strided_slice %6 {offsets = [0, 320], sizes = [256, 32], strides = [1, 1]} : vector<256x384xf32> to vector<256x32xf32>
    %60 = vector.shape_cast %59 : vector<256x32xf32> to vector<4x64x32xf32>
    "tpu.trace_start"() <{level = 10 : i32, message = "bqd,bkd->bqk"}> : () -> ()
    %cst_19 = arith.constant dense<0.000000e+00> : vector<4x64x64xf32>
    %61 = tpu.matmul %56, %58, %cst_19 {dimension_numbers = #tpu.dot_dimension_numbers<[2], [2], [1], [1], [0, 0, 0, 1, 1, 1], [0], [0]>} : vector<4x64x32xf32>, vector<4x64x32xf32>, vector<4x64x64xf32> -> vector<4x64x64xf32>
    "tpu.trace_stop"() : () -> ()
    %c2 = arith.constant 2 : index
    %c0_20 = arith.constant 0 : index
    %c0_21 = arith.constant 0 : index
    %62 = vector.load %arg6[%c2, %c0_20, %c0_21] : memref<4x64x64xf32, #tpu.memory_space<vmem>>, vector<1x64x64xf32>
    %63 = vector.shape_cast %62 : vector<1x64x64xf32> to vector<64x64xf32>
    %64 = vector.shape_cast %63 : vector<64x64xf32> to vector<1x64x64xf32>
    %65 = vector.broadcast %64 : vector<1x64x64xf32> to vector<4x64x64xf32>
    %66 = arith.addf %61, %65 : vector<4x64x64xf32>
    %cst_22 = arith.constant dense<0xFF800000> : vector<4x64xf32>
    %67 = vector.multi_reduction <maximumf>, %66, %cst_22 [2] : vector<4x64x64xf32> to vector<4x64xf32>
    %68 = vector.shape_cast %67 : vector<4x64xf32> to vector<4x64x1xf32>
    %69 = vector.broadcast %68 : vector<4x64x1xf32> to vector<4x64x64xf32>
    %70 = arith.subf %66, %69 : vector<4x64x64xf32>
    %71 = math.exp %70 : vector<4x64x64xf32>
    %cst_23 = arith.constant dense<0.000000e+00> : vector<4x64xf32>
    %72 = vector.multi_reduction <add>, %71, %cst_23 [2] : vector<4x64x64xf32> to vector<4x64xf32>
    %73 = vector.shape_cast %72 : vector<4x64xf32> to vector<4x64x1xf32>
    %74 = tpu.reciprocal %73 {approx = true} : vector<4x64x1xf32> -> vector<4x64x1xf32>
    %75 = vector.broadcast %74 : vector<4x64x1xf32> to vector<4x64x64xf32>
    %76 = arith.mulf %71, %75 : vector<4x64x64xf32>
    "tpu.trace_start"() <{level = 10 : i32, message = "bqk,bkd->bqd"}> : () -> ()
    %cst_24 = arith.constant dense<0.000000e+00> : vector<4x64x32xf32>
    %77 = tpu.matmul %76, %60, %cst_24 {dimension_numbers = #tpu.dot_dimension_numbers<[2], [1], [1], [2], [0, 0, 0, 1, 1, 2], [0], [0]>} : vector<4x64x64xf32>, vector<4x64x32xf32>, vector<4x64x32xf32> -> vector<4x64x32xf32>
    "tpu.trace_stop"() : () -> ()
    %78 = vector.shape_cast %77 : vector<4x64x32xf32> to vector<256x32xf32>
    %79 = vector.extract_strided_slice %6 {offsets = [0, 96], sizes = [256, 32], strides = [1, 1]} : vector<256x384xf32> to vector<256x32xf32>
    %80 = vector.shape_cast %79 : vector<256x32xf32> to vector<4x64x32xf32>
    %81 = vector.extract_strided_slice %6 {offsets = [0, 224], sizes = [256, 32], strides = [1, 1]} : vector<256x384xf32> to vector<256x32xf32>
    %82 = vector.shape_cast %81 : vector<256x32xf32> to vector<4x64x32xf32>
    %83 = vector.extract_strided_slice %6 {offsets = [0, 352], sizes = [256, 32], strides = [1, 1]} : vector<256x384xf32> to vector<256x32xf32>
    %84 = vector.shape_cast %83 : vector<256x32xf32> to vector<4x64x32xf32>
    "tpu.trace_start"() <{level = 10 : i32, message = "bqd,bkd->bqk"}> : () -> ()
    %cst_25 = arith.constant dense<0.000000e+00> : vector<4x64x64xf32>
    %85 = tpu.matmul %80, %82, %cst_25 {dimension_numbers = #tpu.dot_dimension_numbers<[2], [2], [1], [1], [0, 0, 0, 1, 1, 1], [0], [0]>} : vector<4x64x32xf32>, vector<4x64x32xf32>, vector<4x64x64xf32> -> vector<4x64x64xf32>
    "tpu.trace_stop"() : () -> ()
    %c3 = arith.constant 3 : index
    %c0_26 = arith.constant 0 : index
    %c0_27 = arith.constant 0 : index
    %86 = vector.load %arg6[%c3, %c0_26, %c0_27] : memref<4x64x64xf32, #tpu.memory_space<vmem>>, vector<1x64x64xf32>
    %87 = vector.shape_cast %86 : vector<1x64x64xf32> to vector<64x64xf32>
    %88 = vector.shape_cast %87 : vector<64x64xf32> to vector<1x64x64xf32>
    %89 = vector.broadcast %88 : vector<1x64x64xf32> to vector<4x64x64xf32>
    %90 = arith.addf %85, %89 : vector<4x64x64xf32>
    %cst_28 = arith.constant dense<0xFF800000> : vector<4x64xf32>
    %91 = vector.multi_reduction <maximumf>, %90, %cst_28 [2] : vector<4x64x64xf32> to vector<4x64xf32>
    %92 = vector.shape_cast %91 : vector<4x64xf32> to vector<4x64x1xf32>
    %93 = vector.broadcast %92 : vector<4x64x1xf32> to vector<4x64x64xf32>
    %94 = arith.subf %90, %93 : vector<4x64x64xf32>
    %95 = math.exp %94 : vector<4x64x64xf32>
    %cst_29 = arith.constant dense<0.000000e+00> : vector<4x64xf32>
    %96 = vector.multi_reduction <add>, %95, %cst_29 [2] : vector<4x64x64xf32> to vector<4x64xf32>
    %97 = vector.shape_cast %96 : vector<4x64xf32> to vector<4x64x1xf32>
    %98 = tpu.reciprocal %97 {approx = true} : vector<4x64x1xf32> -> vector<4x64x1xf32>
    %99 = vector.broadcast %98 : vector<4x64x1xf32> to vector<4x64x64xf32>
    %100 = arith.mulf %95, %99 : vector<4x64x64xf32>
    "tpu.trace_start"() <{level = 10 : i32, message = "bqk,bkd->bqd"}> : () -> ()
    %cst_30 = arith.constant dense<0.000000e+00> : vector<4x64x32xf32>
    %101 = tpu.matmul %100, %84, %cst_30 {dimension_numbers = #tpu.dot_dimension_numbers<[2], [1], [1], [2], [0, 0, 0, 1, 1, 2], [0], [0]>} : vector<4x64x64xf32>, vector<4x64x32xf32>, vector<4x64x32xf32> -> vector<4x64x32xf32>
    "tpu.trace_stop"() : () -> ()
    %102 = vector.shape_cast %101 : vector<4x64x32xf32> to vector<256x32xf32>
    %103 = tpu.concatenate %30, %54, %78, %102 in 1 : vector<256x32xf32>, vector<256x32xf32>, vector<256x32xf32>, vector<256x32xf32> -> vector<256x128xf32>
    %c0_31 = arith.constant 0 : index
    %c0_32 = arith.constant 0 : index
    %104 = vector.load %arg4[%c0_31, %c0_32] : memref<128x128xf32, #tpu.memory_space<vmem>>, vector<128x128xf32>
    %cst_33 = arith.constant dense<0.000000e+00> : vector<256x128xf32>
    %105 = tpu.matmul %103, %104, %cst_33 {dimension_numbers = #tpu.dot_dimension_numbers<[1], [0], [0], [1], [0, 0, 1, 1], [], []>} : vector<256x128xf32>, vector<128x128xf32>, vector<256x128xf32> -> vector<256x128xf32>
    %c0_34 = arith.constant 0 : index
    %c0_35 = arith.constant 0 : index
    %106 = vector.load %arg5[%c0_34, %c0_35] : memref<1x128xf32, #tpu.memory_space<vmem>>, vector<1x128xf32>
    %107 = vector.broadcast %106 : vector<1x128xf32> to vector<256x128xf32>
    %108 = arith.addf %105, %107 : vector<256x128xf32>
    %109 = vector.shape_cast %108 : vector<256x128xf32> to vector<4x64x128xf32>
    %c0_36 = arith.constant 0 : index
    %c0_37 = arith.constant 0 : index
    %c0_38 = arith.constant 0 : index
    %110 = vector.load %arg7[%c0_36, %c0_37, %c0_38] : memref<4x64x128xf32, #tpu.memory_space<vmem>>, vector<4x64x128xf32>
    tpu.vector_store %arg7[%c0_36, %c0_37, %c0_38], %109 {strides = array<i32>} : memref<4x64x128xf32, #tpu.memory_space<vmem>>, vector<4x64x128xf32>,
    return
  }
  func.func @transform_0(%arg0: i32) -> (i32, i32, i32) {
    %c0_i32 = arith.constant 0 : i32
    %c0_i32_0 = arith.constant 0 : i32
    %c0_i32_1 = arith.constant 0 : i32
    return %arg0, %c0_i32, %c0_i32_0 : i32, i32, i32
  }
  func.func @transform_1(%arg0: i32) -> (i32, i32) {
    %c0_i32 = arith.constant 0 : i32
    %c0_i32_0 = arith.constant 0 : i32
    %c0_i32_1 = arith.constant 0 : i32
    return %c0_i32, %c0_i32_0 : i32, i32
  }
  func.func @transform_2(%arg0: i32) -> (i32, i32) {
    %c0_i32 = arith.constant 0 : i32
    %c0_i32_0 = arith.constant 0 : i32
    %c0_i32_1 = arith.constant 0 : i32
    return %c0_i32, %c0_i32_0 : i32, i32
  }
  func.func @transform_3(%arg0: i32) -> (i32, i32) {
    %c0_i32 = arith.constant 0 : i32
    %c0_i32_0 = arith.constant 0 : i32
    %c0_i32_1 = arith.constant 0 : i32
    return %c0_i32, %c0_i32_0 : i32, i32
  }
  func.func @transform_4(%arg0: i32) -> (i32, i32) {
    %c0_i32 = arith.constant 0 : i32
    %c0_i32_0 = arith.constant 0 : i32
    %c0_i32_1 = arith.constant 0 : i32
    return %c0_i32, %c0_i32_0 : i32, i32
  }
  func.func @transform_5(%arg0: i32) -> (i32, i32, i32) {
    %c0_i32 = arith.constant 0 : i32
    %c0_i32_0 = arith.constant 0 : i32
    %c0_i32_1 = arith.constant 0 : i32
    %c0_i32_2 = arith.constant 0 : i32
    return %c0_i32, %c0_i32_0, %c0_i32_1 : i32, i32, i32
  }
  func.func @transform_6(%arg0: i32) -> (i32, i32, i32) {
    %c0_i32 = arith.constant 0 : i32
    %c0_i32_0 = arith.constant 0 : i32
    %c0_i32_1 = arith.constant 0 : i32
    return %arg0, %c0_i32, %c0_i32_0 : i32, i32, i32
  }
}

</mosaic_0001>

<bundles_post_ra>
// kernel: tpu_custom_call.1
= control target key start
LH: loop header
LB: loop body
LE: loop exit
PB: predicated region body
PF: predicated region fallthrough
CT: control target
= control target key end

     0   :  { %s16934_s0 = inlined_call_operand.hbm [shape: f32[8,64,128], index: 0, kind: input, shape index: {}]   ;;  %s16935_s1 = inlined_call_operand.hbm [shape: f32[128,384], index: 1, kind: input, shape index: {}]   ;;  %s16936_s2 = inlined_call_operand.vmem [shape: f32[1,384], index: 2, kind: input, shape index: {}]   ;;  %s16937_s3 = inlined_call_operand.hbm [shape: f32[128,128], index: 3, kind: input, shape index: {}]   ;;  %s16938_s4 = inlined_call_operand.vmem [shape: f32[1,128], index: 4, kind: input, shape index: {}]   ;;  %s16939_s5 = inlined_call_operand.hbm [shape: f32[4,64,64], index: 5, kind: input, shape index: {}]   ;;  %s16940_s6 = inlined_call_operand.hbm [shape: f32[8,64,128], index: 6, kind: output, shape index: {}]  }
   0x1   :  { %17138 = sst [smem:[#allocation134_spill]] %s16935_s1 }
   0x2   :  { %11 = vsyncpa [#allocation3], 0 }
   0x3   :  { %13 = vsyncpa [#allocation3 + $0x1], 0 }
   0x4   :  { %14 = vsyncpa [#allocation6], 0 }
   0x5   :  { %15 = vsyncpa [#allocation9], 0 }
   0x6   :  { %16 = vsyncpa [#allocation4], 0 }
   0x7   :  { %18 = vsyncpa [#allocation4 + $0x1], 0  ;;  %s12629_s21 = smov 0   ;;  %s12631_s22 = smov 0  }
   0x8   :  { %s12633_s23 = smov 0   ;;  %s12635_s24 = smov 0  }
   0x9 LB: > { %s12650_s25 = sadd.s32 4294967295, %s12577_s24   ;;  %s8243_s26 = sadd.s32 4294967294, %s12577_s24   ;;  %s12577_s24 = sphi %s12635_s24, %s17657_s24   ;;  %s12573_s23 = sphi %s12633_s23, %s17656_s23   ;;  %s12569_s22 = sphi %s12631_s22, %s17655_s22   ;;  %s12565_s21 = sphi %s12629_s21, %s17654_s21  }
   0xa   : > { %p44_p0 = scmp.ne.s32.totalorder %s12569_s22, %s12565_s21  ;;  %p16941_p1 = scmp.eq.s32.totalorder %s12650_s25, 0 }
   0xb   : > { %p179_p3 = scmp.eq.s32.totalorder %s8243_s26, 1  ;;  %p8244_p5 = scmp.ge.s32.totalorder %s12577_s24, 1 }
   0xc   : > { %p12659_p4 = por %p16941_p1, %p44_p0  ;;  %p186_p7 = scmp.lt.s32.totalorder %s12577_s24, 3 }
   0xd   : > { %p12664_p6 = por %p179_p3, %p44_p0  ;;  %s12579_s30 = smov [#allocation5]  }
   0xe   : > { %s17139_s27 = scalar_select %p12659_p4, 1, 0 }
   0xf   : > { %s17140_s28 = scalar_select %p12664_p6, 1, 0 }
  0x10   : > { %p12669_p8 = pnand %p8244_p5, %p186_p7  ;;  %s198_s7 = sshll.u32 %s12579_s30, 4  ;;  %s12673_s7 = int_to_ptr.vmem [resolvable:$true] %s198_s7 }
  0x11   : > { %s12580_s9 = smov [#allocation7]   ;;  %s17143_s1 = sld [smem:[#allocation134_spill]] }
  0x12   : > { %s17141_s29 = scalar_select %p12669_p8, 1, 0 }
  0x13   : > { %p11086_p9 = pneg %p12669_p8  ;;  %s214_s10 = sshll.u32 %s12580_s9, 4  ;;  %s12684_s10 = int_to_ptr.vmem [resolvable:$true] %s214_s10 }
  0x15   : > { %p12680_p11 = pnand %p11086_p9, %p16941_p1 }
  0x17   : > { %s12389_s13 = scalar_lea.hbm %s17143_s1, 6144  ;;  %p12694_p13 = pneg %p12680_p11 }
  0x18   : > { %p12390_p12 = scmp.ne.s32.totalorder %s17143_s1, %s12389_s13  ;;  %p12396_p5 = scmp.lt.u32.totalorder %s12389_s13, %s17143_s1 }
  0x1a   : > { %p12392_p0 = pnand %p12694_p13, %p12390_p12 }
  0x1c   : > { %p12393_p3 = pneg %p12392_p0 }
  0x1e   : > { %p12398_p7 = pnand %p12396_p5, %p12393_p3 }
  0x20   : > { %12401 = shalt.err (!%p12398_p7)
}
  0x21   : > { %s12402_s19 = scalar_lea.vmem %s12673_s7, 6144  ;;  %p12410_p2 = scmp.lt.s32.totalorder %s12673_s7, %s12673_s7 }
  0x22   : > { %p12403_p9 = scmp.ne.s32.totalorder %s12673_s7, %s12402_s19  ;;  %p12411_p6 = scmp.lt.s32.totalorder %s12402_s19, %s12402_s19 }
  0x24   : > { %p12405_p10 = pnand %p12403_p9, %p12694_p13  ;;  %p12412_p12 = por %p12411_p6, %p12410_p2 }
  0x26   : > { %p12406_p1 = pneg %p12405_p10 }
  0x28   : > { %p12413_p0 = pnand %p12412_p12, %p12406_p1 }
  0x2a   : > { %12416 = shalt.err (!%p12413_p0)
}
  0x2b   : > { %s12581_s20 = smov 384   ;;  %s12582_s26 = smov 24  }
  0x2c   : > { %11089 = dma.hbm_to_vmem [thread:$0]  (!%p12680_p11), %s17143_s1, 6144, %s12673_s7, [#allocation6], %s12581_s20, %s12581_s20, %s12582_s26  }
  0x2d   : > { %s12417_s13 = scalar_lea.hbm %s16937_s3, 2048 }
  0x2e   : > { %p12418_p2 = scmp.ne.s32.totalorder %s16937_s3, %s12417_s13  ;;  %p12424_p10 = scmp.lt.u32.totalorder %s12417_s13, %s16937_s3 }
  0x30   : > { %p12420_p1 = pnand %p12418_p2, %p12694_p13 }
  0x32   : > { %p12421_p6 = pneg %p12420_p1 }
  0x34   : > { %p12426_p3 = pnand %p12424_p10, %p12421_p6 }
  0x36   : > { %12429 = shalt.err (!%p12426_p3)
}
  0x37   : > { %s12430_s7 = scalar_lea.vmem %s12684_s10, 2048  ;;  %p12438_p12 = scmp.lt.s32.totalorder %s12684_s10, %s12684_s10 }
  0x38   : > { %p12431_p5 = scmp.ne.s32.totalorder %s12684_s10, %s12430_s7  ;;  %p12439_p0 = scmp.lt.s32.totalorder %s12430_s7, %s12430_s7 }
  0x3a   : > { %p12433_p7 = pnand %p12431_p5, %p12694_p13  ;;  %p12440_p2 = por %p12439_p0, %p12438_p12 }
  0x3c   : > { %p12434_p9 = pneg %p12433_p7 }
  0x3e   : > { %p12441_p1 = pnand %p12440_p2, %p12434_p9 }
  0x40   : > { %12444 = shalt.err (!%p12441_p1)
}
  0x41   : > { %s12583_s19 = smov 128   ;;  %s12584_s20 = smov 8  }
  0x42   : > { %11092 = dma.hbm_to_vmem [thread:$0]  (!%p12680_p11), %s16937_s3, 2048, %s12684_s10, [#allocation6], %s12583_s19, %s12583_s19, %s12584_s20  }
  0x43   : > { %s12585_s9 = smov [#allocation8]   ;;  %s12742_s12 = sadd.s32 1, %s12577_s24  }
  0x44   : > { %s230_s11 = sshll.u32 %s12585_s9, 4  ;;  %s12445_s15 = scalar_lea.hbm %s16939_s5, 4096  ;;  %s231_s11 = int_to_ptr.vmem [resolvable:$true] %s230_s11 }
  0x45   : > { %p12446_p6 = scmp.ne.s32.totalorder %s16939_s5, %s12445_s15  ;;  %p12452_p5 = scmp.lt.u32.totalorder %s12445_s15, %s16939_s5 }
  0x47   : > { %p12448_p10 = pnand %p12446_p6, %p12694_p13 }
  0x49   : > { %p12449_p3 = pneg %p12448_p10 }
  0x4b   : > { %p12454_p7 = pnand %p12452_p5, %p12449_p3 }
  0x4d   : > { %12457 = shalt.err (!%p12454_p7)
}
  0x4e   : > { %s12458_s10 = scalar_lea.vmem %s231_s11, 4096  ;;  %p12466_p2 = scmp.lt.s32.totalorder %s231_s11, %s231_s11 }
  0x4f   : > { %p12459_p9 = scmp.ne.s32.totalorder %s231_s11, %s12458_s10  ;;  %p12467_p1 = scmp.lt.s32.totalorder %s12458_s10, %s12458_s10 }
  0x51   : > { %p12461_p12 = pnand %p12459_p9, %p12694_p13  ;;  %p12468_p4 = por %p12467_p1, %p12466_p2 }
  0x53   : > { %p12462_p0 = pneg %p12461_p12 }
  0x55   : > { %p12469_p8 = pnand %p12468_p4, %p12462_p0 }
  0x57   : > { %12472 = shalt.err (!%p12469_p8)
}
  0x58   : > { %11095 = dma.hbm_to_vmem [thread:$0]  (!%p12680_p11), %s16939_s5, 4096, %s231_s11, [#allocation9], %s12583_s19, %s12583_s19, %s12584_s20  }
  0x59   : > { %s28_s16 = ssub.s32 %s12577_s24, %s12742_s12  ;;  %s31_s8 = sadd.s32 1, %s12573_s23 }
  0x5a   : > { %p29_p4 = scmp.eq.s32.totalorder %s28_s16, 0  ;;  %p38_p8 = scmp.ne.s32.totalorder %s12573_s23, %s12569_s22 }
  0x5b   : > { %p39_p13 = scmp.eq.s32.totalorder %s12577_s24, 0  ;;  %p11107_p6 = scmp.lt.s32.totalorder %s12577_s24, 2 }
  0x5c   : > { %s12773_s30 = scalar_select %p29_p4, %s12573_s23, %s31_s8  }
  0x5d   : > { %p40_p10 = por %p39_p13, %p38_p8  ;;  %p17145_p3 = scmp.eq.s32.totalorder %s12650_s25, 1 }
  0x5e   : > { %s244_s13 = sand.u32 1, %s12573_s23   ;;  %s8651_s14 = sshll.u32 %s12577_s24, 12 }
  0x5f   : > { %p12777_p5 = por %p17145_p3, %p38_p8  ;;  %s8249_s15 = sshll.u32 %s244_s13, 8 }
  0x60   : > { %s12786_s11 = scalar_lea.hbm %s16934_s0, %s8651_s14  ;;  %s248_s7 = scalar_lea.vmem [#allocation2], %s8249_s15 }
  0x61   : > { %s256_s10 = sshll.u32 %s248_s7, 4  ;;  %p12788_p11 = pnand %p11107_p6, %p40_p10  ;;  %s12792_s10 = int_to_ptr.vmem [resolvable:$true] %s256_s10 }
  0x62   : > { %s12794_s26 = scalar_lea.sflag [#allocation3], %s244_s13  ;;  %s12473_s16 = scalar_lea.hbm %s12786_s11, 4096 }
  0x63   : > { %p12474_p7 = scmp.ne.s32.totalorder %s12786_s11, %s12473_s16  ;;  %p12475_p9 = pneg %p12788_p11 }
  0x64   : > { %s12478_s15 = scalar_lea.hbm %s16934_s0, 8192  ;;  %p12479_p2 = scmp.lt.u32.totalorder %s12786_s11, %s16934_s0 }
  0x65   : > { %p12476_p12 = pnand %p12475_p9, %p12474_p7  ;;  %p12480_p1 = scmp.lt.u32.totalorder %s12478_s15, %s12473_s16 }
  0x66   : > { %p12482_p8 = scmp.lt.u32.totalorder %s12473_s16, %s12786_s11 }
  0x67   : > { %p12477_p0 = pneg %p12476_p12  ;;  %p12481_p4 = por %p12480_p1, %p12479_p2 }
  0x69   : > { %p12483_p13 = por %p12482_p8, %p12481_p4 }
  0x6b   : > { %p12484_p6 = pnand %p12483_p13, %p12477_p0 }
  0x6d   : > { %12487 = shalt.err (!%p12484_p6)
}
  0x6e   : > { %s12488_s13 = scalar_lea.vmem %s12792_s10, 4096  ;;  %s12586_s7 = smov [#allocation2]  }
  0x6f   : > { %p12489_p10 = scmp.ne.s32.totalorder %s12792_s10, %s12488_s13  ;;  %s12493_s8 = sshll.u32 %s12586_s7, 4  ;;  %s12494_s8 = int_to_ptr.vmem [resolvable:$false] %s12493_s8 }
  0x70   : > { %s12495_s14 = scalar_lea.vmem %s12494_s8, 8192  ;;  %p12496_p12 = scmp.lt.s32.totalorder %s12792_s10, %s12494_s8 }
  0x71   : > { %p12491_p3 = pnand %p12489_p10, %p12475_p9  ;;  %p12497_p2 = scmp.lt.s32.totalorder %s12495_s14, %s12488_s13 }
  0x73   : > { %p12492_p7 = pneg %p12491_p3  ;;  %p12498_p1 = por %p12497_p2, %p12496_p12 }
  0x75   : > { %p12499_p4 = pnand %p12498_p1, %p12492_p7 }
  0x77   : > { %12502 = shalt.err (!%p12499_p4)
}
  0x78   : > { %11099 = dma.hbm_to_vmem [thread:$0]  (!%p12788_p11), %s12786_s11, 4096, %s12792_s10, %s12794_s26, %s12583_s19, %s12583_s19, %s12584_s20  }
  0x79   : > { %p17148_p9 = scmp.ne.s32.totalorder %s17141_s29, 0 }
  0x7b   : > { %268 = sbr.rel (%p17148_p9) target bundleno = 3688 (0xe68), region = 44 }
  0x82   : > { %s12828_s16 = sand.u32 1, %s12569_s22   ;;  %p17149_p0 = scmp.ne.s32.totalorder %s17139_s27, 0 }
  0x83   : > { %s8254_s15 = sshll.u32 %s12828_s16, 8  ;;  %s271_s17 = scalar_lea.sflag [#allocation3], %s12828_s16 }
  0x84   : > { %s12834_s1 = scalar_lea.vmem [#allocation2], %s8254_s15 }
  0x85   : > { %12548 = dma.done.wait (%p17149_p0), %s271_s17, 4096  }
  0x86   : > { %12550 = vsyncadd (%p17149_p0), %s271_s17, 4294963200  ;;  %p17150_p11 = scmp.eq.s32.totalorder %s12650_s25, 0 }
  0x88   : > { %12552 = dma.done.wait (%p17150_p11), [#allocation6], 8192   ;;  %p17151_p8 = pmov %p17150_p11 }
  0x8a   : > { %12554 = vsyncadd (%p17151_p8), [#allocation6], 4294959104  ;;  %p17152_p13 = pmov %p17151_p8 }
  0x8b   : > { %p17153_p6 = pmov %p17151_p8 }
  0x8c   : > { %12556 = dma.done.wait (%p17152_p13), [#allocation9], 4096  }
  0x8d   : > { %12558 = vsyncadd (%p17153_p6), [#allocation9], 4294963200  ;;  %v12587_v0 = vmov 0.0   ;;  %v350_v1 = vld [vmem:[#allocation5 + $0x8] sm:$0xff]  ;;  %v353_v2 = vld [vmem:[#allocation5 + $0x20] sm:$0xff]  ;;  %vm904_vm0 = vcmask 261120  }
  0x8e   : > { %478 = vmatprep.mubr.f32.mxu0 %v12587_v0  ;;  %610 = vmatprep.mubr.f32.mxu1 %v12587_v0  ;;  %v349_v3 = vld [vmem:[#allocation5] sm:$0xff]  ;;  %v10318_v4 = vpack.c.bf16 %v353_v2, %v350_v1  ;;  %v352_v5 = vld [vmem:[#allocation5 + $0x18] sm:$0xff]  ;;  %v359_v7 = vld [vmem:[#allocation5 + $0x50] sm:$0xff]  ;;  %s12588_s19 = smov 96   ;;  %vm1517_vm2 = vcmask 523264   ;;  %s12589_s20 = smov 64  }
  0x8f   : > { %v356_v6 = vld [vmem:[#allocation5 + $0x38] sm:$0xff]  ;;  %v10320_v8 = vpack.c.bf16 %v352_v5, %v349_v3  ;;  %v355_v10 = vld [vmem:[#allocation5 + $0x30] sm:$0xff]  ;;  %v358_v11 = vld [vmem:[#allocation5 + $0x48] sm:$0xff]  ;;  %s12590_s11 = smov 32   ;;  %vm7813_vm3 = vcmask 785408   ;;  %s16819_s18 = scalar_lea.vmem [#allocation10], %s8254_s15 }
  0x90   : > { %v10322_v9 = vpack.c.bf16 %v359_v7, %v356_v6  ;;  %v362_v12 = vld [vmem:[#allocation5 + $0x68] sm:$0xff]  ;;  %10319 = vmatprep.subr.bf16.mxu0 %v10318_v4  ;;  %v365_v13 = vld [vmem:[#allocation5 + $0x80] sm:$0xff]  ;;  %11054 = vmatprep.subr.bf16.mxu1 %v10318_v4  ;;  %v10324_v14 = vpack.c.bf16 %v358_v11, %v355_v10  ;;  %v364_v17 = vld [vmem:[#allocation5 + $0x78] sm:$0xff]  ;;  %s8653_s13 = sshll.u32 %s12650_s25, 12  ;;  %s8141_s7 = sshll.u32 %s16819_s18, 4  ;;  %s16887_s7 = int_to_ptr.vmem [resolvable:$true] %s8141_s7 }
  0x91   : > { %10321 = vmatpush1.bf16.msra.mxu0 %v10320_v8  ;;  %11062 = vmatpush1.bf16.msra.mxu1 %v10320_v8  ;;  %v10326_v15 = vpack.c.bf16 %v365_v13, %v362_v12  ;;  %v361_v16 = vld [vmem:[#allocation5 + $0x60] sm:$0xff]  ;;  %v368_v18 = vld [vmem:[#allocation5 + $0x98] sm:$0xff]  ;;  %v371_v19 = vld [vmem:[#allocation5 + $0xb0] sm:$0xff]  ;;  %s16885_s15 = scalar_lea.hbm %s16940_s6, %s8653_s13  ;;  %s8127_s25 = scalar_lea.sflag [#allocation4], %s12828_s16 }
  0x92   : > { %10323 = vmatprep.subr.bf16.mxu0 %v10322_v9  ;;  %11055 = vmatprep.subr.bf16.mxu1 %v10322_v9  ;;  %v10328_v20 = vpack.c.bf16 %v364_v17, %v361_v16  ;;  %v10330_v21 = vpack.c.bf16 %v371_v19, %v368_v18  ;;  %v367_v22 = vld [vmem:[#allocation5 + $0x90] sm:$0xff]  ;;  %v370_v23 = vld [vmem:[#allocation5 + $0xa8] sm:$0xff]  ;;  %v377_v25 = vld [vmem:[#allocation5 + $0xe0] sm:$0xff]  ;;  %s12503_s17 = scalar_lea.vmem %s16887_s7, 4096 }
  0x93   : > { %v374_v24 = vld [vmem:[#allocation5 + $0xc8] sm:$0xff]  ;;  %v10332_v26 = vpack.c.bf16 %v370_v23, %v367_v22  ;;  %v373_v28 = vld [vmem:[#allocation5 + $0xc0] sm:$0xff]  ;;  %v376_v29 = vld [vmem:[#allocation5 + $0xd8] sm:$0xff]  ;;  %p12504_p10 = scmp.ne.s32.totalorder %s16887_s7, %s12503_s17 }
  0x94   : > { %v10334_v27 = vpack.c.bf16 %v377_v25, %v374_v24  ;;  %v380_v30 = vld [vmem:[#allocation5 + $0xf8] sm:$0xff]  ;;  %v383_v31 = vld [vmem:[#allocation5 + $0x110] sm:$0xff]  ;;  %v10336_v32 = vpack.c.bf16 %v376_v29, %v373_v28  ;;  %v382_v35 = vld [vmem:[#allocation5 + $0x108] sm:$0xff] }
  0x95   : > { %10325 = vmatpush1.bf16.msra.mxu0 %v10324_v14  ;;  %11063 = vmatpush1.bf16.msra.mxu1 %v10324_v14  ;;  %v10338_v33 = vpack.c.bf16 %v383_v31, %v380_v30  ;;  %v379_v34 = vld [vmem:[#allocation5 + $0xf0] sm:$0xff]  ;;  %v386_v36 = vld [vmem:[#allocation5 + $0x128] sm:$0xff]  ;;  %v389_v37 = vld [vmem:[#allocation5 + $0x140] sm:$0xff]  ;;  %p12505_p3 = pnand %p12504_p10, %p12777_p5 }
  0x96   : > { %10327 = vmatprep.subr.bf16.mxu0 %v10326_v15  ;;  %11056 = vmatprep.subr.bf16.mxu1 %v10326_v15  ;;  %v10340_v38 = vpack.c.bf16 %v382_v35, %v379_v34  ;;  %v10342_v39 = vpack.c.bf16 %v389_v37, %v386_v36  ;;  %v385_v40 = vld [vmem:[#allocation5 + $0x120] sm:$0xff]  ;;  %v388_v41 = vld [vmem:[#allocation5 + $0x138] sm:$0xff]  ;;  %v395_v43 = vld [vmem:[#allocation5 + $0x170] sm:$0xff] }
  0x97   : > { %v392_v42 = vld [vmem:[#allocation5 + $0x158] sm:$0xff]  ;;  %v10344_v44 = vpack.c.bf16 %v388_v41, %v385_v40  ;;  %v391_v46 = vld [vmem:[#allocation5 + $0x150] sm:$0xff]  ;;  %v394_v47 = vld [vmem:[#allocation5 + $0x168] sm:$0xff]  ;;  %p12506_p7 = pneg %p12505_p3 }
  0x98   : > { %v10346_v45 = vpack.c.bf16 %v395_v43, %v392_v42  ;;  %v351_v48 = vld [vmem:[#allocation5 + $0x10] sm:$0xff]  ;;  %v354_v49 = vld [vmem:[#allocation5 + $0x28] sm:$0xff]  ;;  %v10348_v50 = vpack.c.bf16 %v394_v47, %v391_v46  ;;  %v357_v52 = vld [vmem:[#allocation5 + $0x40] sm:$0xff] }
  0x99   : > { %10329 = vmatpush1.bf16.msra.mxu0 %v10328_v20  ;;  %11064 = vmatpush1.bf16.msra.mxu1 %v10328_v20  ;;  %v10350_v51 = vpack.c.bf16 %v354_v49, %v351_v48  ;;  %v360_v53 = vld [vmem:[#allocation5 + $0x58] sm:$0xff]  ;;  %v12851_v54 = vld [vmem:[%s12834_s1] sm:$0xff]  ;;  %v12854_v55 = vld [vmem:[%s12834_s1 + $0xb0] sm:$0xff] }
  0x9a   : > { %10331 = vmatprep.subr.bf16.mxu0 %v10330_v21  ;;  %11057 = vmatprep.subr.bf16.mxu1 %v10330_v21  ;;  %v10354_v56 = vpack.c.bf16 %v360_v53, %v357_v52  ;;  %v363_v57 = vld [vmem:[#allocation5 + $0x70] sm:$0xff]  ;;  %v366_v58 = vld [vmem:[#allocation5 + $0x88] sm:$0xff]  ;;  %v12864_v60 = vld [vmem:[%s12834_s1 + $0xb8] sm:$0xff] }
  0x9b   : > { %v12860_v59 = vld [vmem:[%s12834_s1 + $0x8] sm:$0xff]  ;;  %v10358_v61 = vpack.c.bf16 %v366_v58, %v363_v57  ;;  %v369_v62 = vld [vmem:[#allocation5 + $0xa0] sm:$0xff]  ;;  %v372_v63 = vld [vmem:[#allocation5 + $0xb8] sm:$0xff] }
  0x9c   : > { %v12870_v1 = vld [vmem:[%s12834_s1 + $0x10] sm:$0xff]  ;;  %v12874_v2 = vld [vmem:[%s12834_s1 + $0xc0] sm:$0xff]  ;;  %v10362_v3 = vpack.c.bf16 %v372_v63, %v369_v62  ;;  %v378_v5 = vld [vmem:[#allocation5 + $0xe8] sm:$0xff]  ;;  %v17156_v62 = vmov 0 }
  0x9d   : > { %10333 = vmatpush1.bf16.msra.mxu0 %v10332_v26  ;;  %11065 = vmatpush1.bf16.msra.mxu1 %v10332_v26  ;;  %v375_v4 = vld [vmem:[#allocation5 + $0xd0] sm:$0xff]  ;;  %v12880_v6 = vld [vmem:[%s12834_s1 + $0x18] sm:$0xff]  ;;  %v12884_v7 = vld [vmem:[%s12834_s1 + $0xc8] sm:$0xff] }
  0x9e   : > { %10335 = vmatprep.subr.bf16.mxu0 %v10334_v27  ;;  %11058 = vmatprep.subr.bf16.mxu1 %v10334_v27  ;;  %v10366_v8 = vpack.c.bf16 %v378_v5, %v375_v4  ;;  %v381_v9 = vld [vmem:[#allocation5 + $0x100] sm:$0xff]  ;;  %v384_v10 = vld [vmem:[#allocation5 + $0x118] sm:$0xff]  ;;  %v12892_v12 = vld [vmem:[%s12834_s1 + $0xd0] sm:$0xff] }
  0x9f   : > { %v321_v11 = vld [vmem:[%s12834_s1 + $0x20] sm:$0xff]  ;;  %v10370_v13 = vpack.c.bf16 %v384_v10, %v381_v9  ;;  %v387_v14 = vld [vmem:[#allocation5 + $0x130] sm:$0xff]  ;;  %v390_v15 = vld [vmem:[#allocation5 + $0x148] sm:$0xff] }
  0xa0   : > { %v322_v16 = vld [vmem:[%s12834_s1 + $0x28] sm:$0xff]  ;;  %v12899_v17 = vld [vmem:[%s12834_s1 + $0xd8] sm:$0xff]  ;;  %v10374_v18 = vpack.c.bf16 %v390_v15, %v387_v14  ;;  %v393_v19 = vld [vmem:[#allocation5 + $0x160] sm:$0xff] }
  0xa1   : > { %10337 = vmatpush1.bf16.msra.mxu0 %v10336_v32  ;;  %11066 = vmatpush1.bf16.msra.mxu1 %v10336_v32  ;;  %v396_v20 = vld [vmem:[#allocation5 + $0x178] sm:$0xff]  ;;  %v323_v21 = vld [vmem:[%s12834_s1 + $0x30] sm:$0xff]  ;;  %v12906_v22 = vld [vmem:[%s12834_s1 + $0xe0] sm:$0xff] }
  0xa2   : > { %10339 = vmatprep.subr.bf16.mxu0 %v10338_v33  ;;  %11059 = vmatprep.subr.bf16.mxu1 %v10338_v33  ;;  %v10378_v23 = vpack.c.bf16 %v396_v20, %v393_v19  ;;  %v324_v24 = vld [vmem:[%s12834_s1 + $0x38] sm:$0xff]  ;;  %v12913_v25 = vld [vmem:[%s12834_s1 + $0xe8] sm:$0xff]  ;;  %v325_v26 = vld [vmem:[%s12834_s1 + $0x40] sm:$0xff] }
  0xa3   : > { %v12920_v27 = vld [vmem:[%s12834_s1 + $0xf0] sm:$0xff]  ;;  %v326_v28 = vld [vmem:[%s12834_s1 + $0x48] sm:$0xff]  ;;  %v12927_v29 = vld [vmem:[%s12834_s1 + $0xf8] sm:$0xff] }
  0xa4   : > { %v327_v30 = vld [vmem:[%s12834_s1 + $0x50] sm:$0xff]  ;;  %v328_v31 = vld [vmem:[%s12834_s1 + $0x58] sm:$0xff]  ;;  %v329_v32 = vld [vmem:[%s12834_s1 + $0x60] sm:$0xff] }
  0xa5   : > { %10341 = vmatpush1.bf16.msra.mxu0 %v10340_v38  ;;  %11067 = vmatpush1.bf16.msra.mxu1 %v10340_v38  ;;  %v330_v33 = vld [vmem:[%s12834_s1 + $0x68] sm:$0xff]  ;;  %v331_v34 = vld [vmem:[%s12834_s1 + $0x70] sm:$0xff]  ;;  %v332_v35 = vld [vmem:[%s12834_s1 + $0x78] sm:$0xff] }
  0xa6   : > { %10343 = vmatprep.subr.bf16.mxu0 %v10342_v39  ;;  %11060 = vmatprep.subr.bf16.mxu1 %v10342_v39  ;;  %v333_v36 = vld [vmem:[%s12834_s1 + $0x80] sm:$0xff]  ;;  %v334_v37 = vld [vmem:[%s12834_s1 + $0x88] sm:$0xff]  ;;  %v335_v38 = vld [vmem:[%s12834_s1 + $0x90] sm:$0xff] }
  0xa7   : > { %v336_v39 = vld [vmem:[%s12834_s1 + $0x98] sm:$0xff]  ;;  %v337_v40 = vld [vmem:[%s12834_s1 + $0xa0] sm:$0xff]  ;;  %v338_v41 = vld [vmem:[%s12834_s1 + $0xa8] sm:$0xff]  ;;  %s12591_s1 = smov [#allocation10]  }
  0xa8   : > { %vm13005_vm1 = vmpackc.low %vm904_vm0, %vm904_vm0  ;;  %s12507_s27 = sshll.u32 %s12591_s1, 4  ;;  %s12508_s27 = int_to_ptr.vmem [resolvable:$false] %s12507_s27 }
  0xa9   : > { %10345 = vmatpush1.bf16.msra.mxu0 %v10344_v44  ;;  %11068 = vmatpush1.bf16.msra.mxu1 %v10344_v44  ;;  %v12974_v44 = vld [vmem:[%s16936_s2] sm:$0x7]  ;;  %v17157_v62 = vsel %vm13005_vm1, 4294967295, %v17156_v62  ;;  %s12509_s29 = scalar_lea.vmem %s12508_s27, 8192  ;;  %p12510_p12 = scmp.lt.s32.totalorder %s16887_s7, %s12508_s27 }
  0xaa   : > { %10347 = vmatprep.subr.bf16.mxu0 %v10346_v45  ;;  %11061 = vmatprep.subr.bf16.mxu1 %v10346_v45  ;;  %17158 = vst [vmem:[#allocation17_spill] sm:$0xff] %v17157_v62  ;;  %p12511_p2 = scmp.lt.s32.totalorder %s12509_s29, %s12503_s17 }
  0xac   : > { %p12512_p1 = por %p12511_p2, %p12510_p12 }
  0xad   : > { %10349 = vmatpush1.bf16.msra.mxu0 %v10348_v50  ;;  %11069 = vmatpush1.bf16.msra.mxu1 %v10348_v50 }
  0xae   : > { %10351 = vmatprep.subr.bf16.mxu1 %v10350_v51  ;;  %p12513_p4 = pnand %p12512_p1, %p12506_p7 }
  0xb0   : > { %479 = vmatmul.mubr.f32.vlgmr.msra.gmra.mrb[0].mxu0 %v12851_v54  ;;  %611 = vmatmul.mubr.f32.vlgmr.msra.gmra.mrb[0].mxu1 %v12854_v55 }
  0xb1   : > { %484 = vmatprep.mubr.f32.mxu0 %v12587_v0  ;;  %616 = vmatprep.mubr.f32.mxu1 %v12587_v0 }
  0xb2   : > { %10353 = vmatpush3.bf16.msra.mxu1 %v10350_v51 }
  0xb3   : > { %10355 = vmatprep.subr.bf16.mxu1 %v10354_v56 }
  0xb4   : > { %485 = vmatmul.mubr.f32.gmra.mrb[2].mxu0 %v12860_v59  ;;  %617 = vmatmul.mubr.f32.gmra.mrb[2].mxu1 %v12864_v60 }
  0xb5   : > { %490 = vmatprep.mubr.f32.mxu0 %v12587_v0  ;;  %622 = vmatprep.mubr.f32.mxu1 %v12587_v0 }
  0xb6   : > { %10357 = vmatpush3.bf16.msra.mxu1 %v10354_v56 }
  0xb7   : > { %10359 = vmatprep.subr.bf16.mxu1 %v10358_v61 }
  0xb8   : > { %491 = vmatmul.mubr.f32.gmra.mrb[4].mxu0 %v12870_v1  ;;  %623 = vmatmul.mubr.f32.gmra.mrb[4].mxu1 %v12874_v2 }
  0xb9   : > { %496 = vmatprep.mubr.f32.mxu0 %v12587_v0  ;;  %628 = vmatprep.mubr.f32.mxu1 %v12587_v0 }
  0xba   : > { %10361 = vmatpush3.bf16.msra.mxu1 %v10358_v61 }
  0xbb   : > { %10363 = vmatprep.subr.bf16.mxu1 %v10362_v3 }
  0xbc   : > { %497 = vmatmul.mubr.f32.gmra.mrb[6].mxu0 %v12880_v6  ;;  %629 = vmatmul.mubr.f32.gmra.mrb[6].mxu1 %v12884_v7 }
  0xbd   : > { %502 = vmatprep.mubr.f32.mxu0 %v12587_v0  ;;  %634 = vmatprep.mubr.f32.mxu1 %v12587_v0 }
  0xbe   : > { %10365 = vmatpush3.bf16.msra.mxu1 %v10362_v3 }
  0xbf   : > { %10367 = vmatprep.subr.bf16.mxu1 %v10366_v8 }
  0xc0   : > { %503 = vmatmul.mubr.f32.gmra.mrb[8].mxu0 %v321_v11  ;;  %635 = vmatmul.mubr.f32.gmra.mrb[8].mxu1 %v12892_v12 }
  0xc1   : > { %508 = vmatprep.mubr.f32.mxu0 %v12587_v0  ;;  %640 = vmatprep.mubr.f32.mxu1 %v12587_v0 }
  0xc2   : > { %10369 = vmatpush3.bf16.msra.mxu1 %v10366_v8 }
  0xc3   : > { %10371 = vmatprep.subr.bf16.mxu1 %v10370_v13 }
  0xc4   : > { %509 = vmatmul.mubr.f32.gmra.mrb[10].mxu0 %v322_v16  ;;  %641 = vmatmul.mubr.f32.gmra.mrb[10].mxu1 %v12899_v17 }
  0xc5   : > { %514 = vmatprep.mubr.f32.mxu0 %v12587_v0  ;;  %646 = vmatprep.mubr.f32.mxu1 %v12587_v0 }
  0xc6   : > { %10373 = vmatpush3.bf16.msra.mxu1 %v10370_v13 }
  0xc7   : > { %10375 = vmatprep.subr.bf16.mxu1 %v10374_v18 }
  0xc8   : > { %515 = vmatmul.mubr.f32.gmra.mrb[12].mxu0 %v323_v21  ;;  %647 = vmatmul.mubr.f32.gmra.mrb[12].mxu1 %v12906_v22 }
  0xc9   : > { %520 = vmatprep.mubr.f32.mxu0 %v12587_v0  ;;  %652 = vmatprep.mubr.f32.mxu1 %v12587_v0 }
  0xca   : > { %10377 = vmatpush3.bf16.msra.mxu1 %v10374_v18 }
  0xcb   : > { %10379 = vmatprep.subr.bf16.mxu1 %v10378_v23 }
  0xcc   : > { %521 = vmatmul.mubr.f32.gmra.mrb[14].mxu0 %v324_v24  ;;  %653 = vmatmul.mubr.f32.gmra.mrb[14].mxu1 %v12913_v25 }
  0xcd   : > { %526 = vmatprep.mubr.f32.mxu0 %v12587_v0  ;;  %658 = vmatprep.mubr.f32.mxu1 %v12587_v0 }
  0xce   : > { %10381 = vmatpush3.bf16.msra.mxu1 %v10378_v23 }
  0xd0   : > { %527 = vmatmul.mubr.f32.gmra.mrb[16].mxu0 %v325_v26  ;;  %659 = vmatmul.mubr.f32.gmra.mrb[16].mxu1 %v12920_v27 }
  0xd1   : > { %532 = vmatprep.mubr.f32.mxu0 %v12587_v0  ;;  %664 = vmatprep.mubr.f32.mxu1 %v12587_v0 }
  0xd4   : > { %533 = vmatmul.mubr.f32.gmra.mrb[18].mxu0 %v326_v28  ;;  %665 = vmatmul.mubr.f32.gmra.mrb[18].mxu1 %v12927_v29 }
  0xd5   : > { %538 = vmatprep.mubr.f32.mxu0 %v12587_v0  ;;  %9294 = vmatprep.mubr.f32.mxu1 %v12851_v54 }
  0xd8   : > { %539 = vmatmul.mubr.f32.gmra.mrb[20].mxu0 %v327_v30  ;;  %9295 = vmatmul.mubr.f32.vlgmr.msra.gmra.mrb[20].mxu1 %v12860_v59 }
  0xd9   : > { %544 = vmatprep.mubr.f32.mxu0 %v12587_v0  ;;  %9297 = vmatprep.mubr.f32.mxu1 %v12870_v1 }
  0xdc   : > { %545 = vmatmul.mubr.f32.gmra.mrb[22].mxu0 %v328_v31  ;;  %9298 = vmatmul.mubr.f32.gmra.mrb[22].mxu1 %v12880_v6 }
  0xdd   : > { %550 = vmatprep.mubr.f32.mxu0 %v12587_v0  ;;  %9300 = vmatprep.mubr.f32.mxu1 %v321_v11 }
  0xe0   : > { %551 = vmatmul.mubr.f32.gmra.mrb[24].mxu0 %v329_v32  ;;  %9301 = vmatmul.mubr.f32.gmra.mrb[24].mxu1 %v322_v16 }
  0xe1   : > { %556 = vmatprep.mubr.f32.mxu0 %v12587_v0  ;;  %9303 = vmatprep.mubr.f32.mxu1 %v323_v21 }
  0xe4   : > { %557 = vmatmul.mubr.f32.gmra.mrb[26].mxu0 %v330_v33  ;;  %9304 = vmatmul.mubr.f32.gmra.mrb[26].mxu1 %v324_v24 }
  0xe5   : > { %562 = vmatprep.mubr.f32.mxu0 %v12587_v0  ;;  %9306 = vmatprep.mubr.f32.mxu1 %v325_v26 }
  0xe8   : > { %563 = vmatmul.mubr.f32.gmra.mrb[28].mxu0 %v331_v34  ;;  %9307 = vmatmul.mubr.f32.gmra.mrb[28].mxu1 %v326_v28 }
  0xe9   : > { %568 = vmatprep.mubr.f32.mxu0 %v12587_v0  ;;  %9309 = vmatprep.mubr.f32.mxu1 %v327_v30 }
  0xec   : > { %569 = vmatmul.mubr.f32.gmra.mrb[30].mxu0 %v332_v35  ;;  %9310 = vmatmul.mubr.f32.gmra.mrb[30].mxu1 %v328_v31 }
  0xed   : > { %574 = vmatprep.mubr.f32.mxu0 %v12587_v0  ;;  %9312 = vmatprep.mubr.f32.mxu1 %v329_v32 }
  0xf0   : > { %575 = vmatmul.mubr.f32.gmra.mrb[32].mxu0 %v333_v36  ;;  %9313 = vmatmul.mubr.f32.gmra.mrb[32].mxu1 %v330_v33 }
  0xf1   : > { %580 = vmatprep.mubr.f32.mxu0 %v12587_v0  ;;  %9315 = vmatprep.mubr.f32.mxu1 %v331_v34 }
  0xf4   : > { %581 = vmatmul.mubr.f32.gmra.mrb[34].mxu0 %v334_v37  ;;  %9316 = vmatmul.mubr.f32.gmra.mrb[34].mxu1 %v332_v35 }
  0xf5   : > { %586 = vmatprep.mubr.f32.mxu0 %v12587_v0  ;;  %9318 = vmatprep.mubr.f32.mxu1 %v333_v36 }
  0xf8   : > { %587 = vmatmul.mubr.f32.gmra.mrb[36].mxu0 %v335_v38  ;;  %9319 = vmatmul.mubr.f32.gmra.mrb[36].mxu1 %v334_v37 }
  0xf9   : > { %592 = vmatprep.mubr.f32.mxu0 %v12587_v0  ;;  %9321 = vmatprep.mubr.f32.mxu1 %v335_v38 }
  0xfc   : > { %593 = vmatmul.mubr.f32.gmra.mrb[38].mxu0 %v336_v39  ;;  %9322 = vmatmul.mubr.f32.gmra.mrb[38].mxu1 %v336_v39 }
  0xfd   : > { %598 = vmatprep.mubr.f32.mxu0 %v12587_v0  ;;  %9324 = vmatprep.mubr.f32.mxu1 %v337_v40 }
 0x100   : > { %599 = vmatmul.mubr.f32.gmra.mrb[40].mxu0 %v337_v40  ;;  %9325 = vmatmul.mubr.f32.gmra.mrb[40].mxu1 %v338_v41 }
 0x101   : > { %604 = vmatprep.mubr.f32.mxu0 %v12587_v0  ;;  %9327 = vmatprep.mubr.f32.mxu1 %v12854_v55  ;;  %v399_v0 = vlaneseq }
 0x103   : > { %v12968_v42 = vshrl.u32 %v399_v0, 7 }
 0x104   : > { %605 = vmatmul.mubr.f32.gmra.mrb[42].mxu0 %v338_v41  ;;  %9328 = vmatmul.mubr.f32.gmra.mrb[42].mxu1 %v12864_v60 }
 0x105   : > { %9330 = vmatprep.mubr.f32.mxu1 %v12874_v2  ;;  %v401_v43 = vsub.s32 0, %v12968_v42  ;;  %v405_v46 = vsub.s32 1, %v12968_v42 }
 0x107   : > { %v12977_v45 = vrot.slane %v12974_v44, %v401_v43  ;;  %v12986_v52 = vrot.slane %v12974_v44, %v405_v46 }
 0x108   : > { %9331 = vmatmul.mubr.f32.gmra.mrb[44].mxu1 %v12884_v7 }
 0x109   : > { %9333 = vmatprep.mubr.f32.mxu1 %v12892_v12 }
 0x10c   : > { %9334 = vmatmul.mubr.f32.gmra.mrb[46].mxu1 %v12899_v17 }
 0x10d   : > { %9336 = vmatprep.mubr.f32.mxu1 %v12906_v22 }
 0x110   : > { %9337 = vmatmul.mubr.f32.gmra.mrb[48].mxu1 %v12913_v25 }
 0x111   : > { %9339 = vmatprep.mubr.f32.mxu1 %v12920_v27 }
 0x114   : > { %9340 = vmatmul.mubr.f32.gmra.mrb[50].mxu1 %v12927_v29 }
 0x183   : > { %v480_v47 = vpop.f32.mrb[0].mxu0  ;;  %v12980_v48 = vpop.f32.mrb[0].mxu1 }
 0x184   : > { %v12983_v49 = vadd.f32 %v480_v47, %v12977_v45  ;;  %v482_v50 = vpop.f32.mrb[1].mxu0  ;;  %v614_v51 = vpop.f32.mrb[1].mxu1 }
 0x185   : > { %v615_v54 = vadd.f32 %v614_v51, %v12986_v52  ;;  %v483_v59 = vadd.f32 %v482_v50, %v12986_v52 }
 0x186   : > { %17154 = vst [vmem:[#allocation15_spill] sm:$0xff] %v12983_v49  ;;  %2395 = vrot.lane.b32.xlu0 %v12983_v49, %s12588_s19  ;;  %9358 = vmatprep.mubr.msk.f32.mxu1 %vm904_vm0, %v12983_v49 }
 0x187   : > { %v486_v53 = vpop.f32.mrb[2].mxu0  ;;  %v12993_v55 = vpop.f32.mrb[2].mxu1 }
 0x188   : > { %v12996_v56 = vadd.f32 %v486_v53, %v12977_v45  ;;  %v488_v57 = vpop.f32.mrb[3].mxu0  ;;  %v620_v58 = vpop.f32.mrb[3].mxu1 }
 0x189   : > { %v489_v60 = vadd.f32 %v488_v57, %v12986_v52  ;;  %v621_v61 = vadd.f32 %v620_v58, %v12986_v52 }
 0x18a   : > { %17155 = vst [vmem:[#allocation16_spill] sm:$0xff] %v12996_v56  ;;  %2397 = vrot.lane.b32.xlu1 %v12996_v56, %s12588_s19 }
 0x18b   : > { %v13009_v63 = vpop.f32.mrb[4].mxu0  ;;  %v10382_v1 = vpack.c.bf16 %v489_v60, %v483_v59  ;;  %v13011_v2 = vpack.i.bf16 %v489_v60, %v483_v59  ;;  %v13013_v3 = vpop.f32.mrb[4].mxu1  ;;  %v13015_v4 = vpack.c.bf16 %v621_v61, %v615_v54  ;;  %v13017_v5 = vpack.i.bf16 %v621_v61, %v615_v54 }
 0x18c   : > { %v494_v6 = vpop.f32.mrb[5].mxu0  ;;  %v626_v7 = vpop.f32.mrb[5].mxu1 }
 0x18d   : > { %17159 = vst [vmem:[#allocation18_spill] sm:$0xff] %v13011_v2  ;;  %17160 = vst [vmem:[#allocation19_spill] sm:$0xff] %v13017_v5  ;;  %10384 = vmatprep.subr.msk.bf16.mxu1 %vm13005_vm1, %v10382_v1  ;;  %11158 = vrot.lane.b32.xlu0 %v13011_v2, %s12588_s19  ;;  %v627_v9 = vadd.f32 %v626_v7, %v12986_v52  ;;  %v495_v13 = vadd.f32 %v494_v6, %v12986_v52 }
 0x18e   : > { %10387 = vmatpush3.bf16.xpose.msk.msra.mxu1 %vm13005_vm1, %v10382_v1 }
 0x18f   : > { %v13025_v8 = vpop.f32.mrb[6].mxu0  ;;  %v13028_v10 = vpop.f32.mrb[6].mxu1 }
 0x190   : > { %v500_v11 = vpop.f32.mrb[7].mxu0  ;;  %v632_v12 = vpop.f32.mrb[7].mxu1 }
 0x191   : > { %v501_v14 = vadd.f32 %v500_v11, %v12986_v52  ;;  %v633_v15 = vadd.f32 %v632_v12, %v12986_v52 }
 0x193   : > { %v13033_v16 = vpop.f32.mrb[8].mxu0  ;;  %v13035_v17 = vpack.i.bf16 %v501_v14, %v495_v13  ;;  %v10388_v18 = vpack.c.bf16 %v501_v14, %v495_v13  ;;  %v13037_v19 = vpack.i.bf16 %v633_v15, %v627_v9  ;;  %v13039_v20 = vpop.f32.mrb[8].mxu1  ;;  %v13041_v21 = vpack.c.bf16 %v633_v15, %v627_v9 }
 0x194   : > { %v506_v22 = vpop.f32.mrb[9].mxu0  ;;  %v638_v23 = vpop.f32.mrb[9].mxu1 }
 0x195   : > { %17161 = vst [vmem:[#allocation20_spill] sm:$0xff] %v13035_v17  ;;  %17162 = vst [vmem:[#allocation21_spill] sm:$0xff] %v13037_v19  ;;  %11163 = vrot.lane.b32.xlu1 %v13035_v17, %s12588_s19  ;;  %10390 = vmatprep.subr.msk.bf16.mxu1 %vm13005_vm1, %v10388_v18  ;;  %v639_v25 = vadd.f32 %v638_v23, %v12986_v52  ;;  %v507_v29 = vadd.f32 %v506_v22, %v12986_v52 }
 0x196   : > { %10393 = vmatpush3.bf16.xpose.msk.msra.mxu1 %vm13005_vm1, %v10388_v18 }
 0x197   : > { %v13049_v24 = vpop.f32.mrb[10].mxu0  ;;  %v13052_v26 = vpop.f32.mrb[10].mxu1 }
 0x198   : > { %v512_v27 = vpop.f32.mrb[11].mxu0  ;;  %v644_v28 = vpop.f32.mrb[11].mxu1 }
 0x199   : > { %v513_v30 = vadd.f32 %v512_v27, %v12986_v52  ;;  %11168 = vrot.lane.b32.xlu1 %v13037_v19, %s12588_s19  ;;  %v645_v31 = vadd.f32 %v644_v28, %v12986_v52 }
 0x19b   : > { %v13059_v32 = vpop.f32.mrb[12].mxu0  ;;  %v10394_v33 = vpack.c.bf16 %v513_v30, %v507_v29  ;;  %v13061_v34 = vpack.i.bf16 %v513_v30, %v507_v29  ;;  %v13063_v35 = vpop.f32.mrb[12].mxu1  ;;  %v13065_v36 = vpack.c.bf16 %v645_v31, %v639_v25  ;;  %v13067_v37 = vpack.i.bf16 %v645_v31, %v639_v25 }
 0x19c   : > { %v518_v38 = vpop.f32.mrb[13].mxu0  ;;  %v650_v39 = vpop.f32.mrb[13].mxu1  ;;  %v13121_v30 = vadd.f32 %v13009_v63, %v12977_v45 }
 0x19d   : > { %17163 = vst [vmem:[#allocation22_spill] sm:$0xff] %v13061_v34  ;;  %17164 = vst [vmem:[#allocation23_spill] sm:$0xff] %v13067_v37  ;;  %10396 = vmatprep.subr.msk.bf16.mxu1 %vm13005_vm1, %v10394_v33  ;;  %11173 = vrot.lane.b32.xlu0 %v13061_v34, %s12588_s19  ;;  %v651_v41 = vadd.f32 %v650_v39, %v12986_v52  ;;  %v519_v47 = vadd.f32 %v518_v38, %v12986_v52 }
 0x19e   : > { %10399 = vmatpush3.bf16.xpose.msk.msra.mxu1 %vm13005_vm1, %v10394_v33  ;;  %v13133_v33 = vadd.f32 %v13025_v8, %v12977_v45  ;;  %v13141_v38 = vadd.f32 %v13033_v16, %v12977_v45  ;;  %v13149_v8 = vadd.f32 %v13049_v24, %v12977_v45 }
 0x19f   : > { %v522_v40 = vpop.f32.mrb[14].mxu0  ;;  %v13076_v0 = vpop.f32.mrb[14].mxu1 }
 0x1a0   : > { %v524_v43 = vpop.f32.mrb[15].mxu0  ;;  %v656_v46 = vpop.f32.mrb[15].mxu1  ;;  %17171 = vst [vmem:[#allocation30_spill] sm:$0xff] %v13149_v8  ;;  %v13170_v24 = vadd.f32 %v522_v40, %v12977_v45 }
 0x1a1   : > { %v525_v50 = vadd.f32 %v524_v43, %v12986_v52  ;;  %v657_v51 = vadd.f32 %v656_v46, %v12986_v52 }
 0x1a2   : > { %17173 = vst [vmem:[#allocation32_spill] sm:$0xff] %v13170_v24 }
 0x1a3   : > { %v528_v53 = vpop.f32.mrb[16].mxu0  ;;  %v10400_v54 = vpack.c.bf16 %v525_v50, %v519_v47  ;;  %v13081_v57 = vpack.i.bf16 %v525_v50, %v519_v47  ;;  %v13083_v58 = vpop.f32.mrb[16].mxu1  ;;  %v13085_v59 = vpack.c.bf16 %v657_v51, %v651_v41  ;;  %v13087_v60 = vpack.i.bf16 %v657_v51, %v651_v41 }
 0x1a4   : > { %v530_v61 = vpop.f32.mrb[17].mxu0  ;;  %v662_v1 = vpop.f32.mrb[17].mxu1  ;;  %v13096_v6 = vadd.f32 %v528_v53, %v12977_v45  ;;  %v13159_v50 = vadd.f32 %v13059_v32, %v12977_v45 }
 0x1a5   : > { %17165 = vst [vmem:[#allocation24_spill] sm:$0xff] %v13081_v57  ;;  %17166 = vst [vmem:[#allocation25_spill] sm:$0xff] %v13087_v60  ;;  %10402 = vmatprep.subr.msk.bf16.mxu1 %vm13005_vm1, %v10400_v54  ;;  %11178 = vrot.lane.b32.xlu0 %v13081_v57, %s12588_s19  ;;  %v663_v9 = vadd.f32 %v662_v1, %v12986_v52  ;;  %v531_v15 = vadd.f32 %v530_v61, %v12986_v52 }
 0x1a6   : > { %10405 = vmatpush3.bf16.xpose.msk.msra.mxu1 %vm13005_vm1, %v10400_v54  ;;  %17167 = vst [vmem:[#allocation26_spill] sm:$0xff] %v13096_v6 }
 0x1a7   : > { %v534_v7 = vpop.f32.mrb[18].mxu0  ;;  %v13099_v11 = vpop.f32.mrb[18].mxu1 }
 0x1a8   : > { %v13102_v12 = vadd.f32 %v534_v7, %v12977_v45  ;;  %v536_v13 = vpop.f32.mrb[19].mxu0  ;;  %v668_v14 = vpop.f32.mrb[19].mxu1 }
 0x1a9   : > { %v537_v18 = vadd.f32 %v536_v13, %v12986_v52  ;;  %2564 = vrot.lane.b32.xlu0 %v13096_v6, %s12588_s19  ;;  %v669_v22 = vadd.f32 %v668_v14, %v12986_v52 }
 0x1aa   : > { %17168 = vst [vmem:[#allocation27_spill] sm:$0xff] %v13102_v12  ;;  %2566 = vrot.lane.b32.xlu1 %v13102_v12, %s12588_s19 }
 0x1ab   : > { %v13111_v23 = vpop.f32.mrb[20].mxu0  ;;  %v10406_v25 = vpack.c.bf16 %v537_v18, %v531_v15  ;;  %v13113_v27 = vpack.i.bf16 %v537_v18, %v531_v15  ;;  %v13115_v28 = vpack.c.bf16 %v669_v22, %v663_v9  ;;  %v13117_v29 = vpack.i.bf16 %v669_v22, %v663_v9 }
 0x1ac   : > { %v542_v31 = vpop.f32.mrb[21].mxu0  ;;  %v409_v22 = vsub.s32 2, %v12968_v42 }
 0x1ad   : > { %17169 = vst [vmem:[#allocation28_spill] sm:$0xff] %v13113_v27  ;;  %17170 = vst [vmem:[#allocation29_spill] sm:$0xff] %v13117_v29  ;;  %9359 = vmatmul.mubr.msk.f32.vlgmr.msra.gmra.mrb[52].mxu1 %vm904_vm0, %v12996_v56  ;;  %10408 = vmatprep.subr.msk.bf16.mxu1 %vm13005_vm1, %v10406_v25  ;;  %v543_v41 = vadd.f32 %v542_v31, %v12986_v52 }
 0x1ae   : > { %11183 = vrot.lane.b32.xlu1 %v13113_v27, %s12588_s19  ;;  %9361 = vmatprep.mubr.msk.f32.mxu1 %vm904_vm0, %v13121_v30 }
 0x1af   : > { %10411 = vmatpush3.bf16.xpose.msk.msra.mxu1 %vm13005_vm1, %v10406_v25  ;;  %v13137_v63 = vpop.f32.mrb[22].mxu0 }
 0x1b0   : > { %v548_v39 = vpop.f32.mrb[23].mxu0 }
 0x1b1   : > { %v549_v43 = vadd.f32 %v548_v39, %v12986_v52  ;;  %9362 = vmatmul.mubr.msk.f32.gmra.mrb[54].mxu1 %vm904_vm0, %v13133_v33 }
 0x1b2   : > { %9364 = vmatprep.mubr.msk.f32.mxu1 %vm904_vm0, %v13141_v38 }
 0x1b3   : > { %v13153_v46 = vpop.f32.mrb[24].mxu0  ;;  %v13155_v47 = vpack.i.bf16 %v549_v43, %v543_v41  ;;  %v10412_v16 = vpack.c.bf16 %v549_v43, %v543_v41 }
 0x1b4   : > { %v554_v51 = vpop.f32.mrb[25].mxu0 }
 0x1b5   : > { %17172 = vst [vmem:[#allocation31_spill] sm:$0xff] %v13155_v47  ;;  %11188 = vrot.lane.b32.xlu1 %v13155_v47, %s12588_s19  ;;  %9365 = vmatmul.mubr.msk.f32.gmra.mrb[56].mxu1 %vm904_vm0, %v13149_v8  ;;  %v555_v54 = vadd.f32 %v554_v51, %v12986_v52  ;;  %v9296_v51 = vpop.f32.mrb[20].mxu1 }
 0x1b6   : > { %10414 = vmatprep.subr.msk.bf16.mxu1 %vm13005_vm1, %v10412_v16  ;;  %9367 = vmatprep.mubr.msk.f32.mxu1 %vm904_vm0, %v13159_v50 }
 0x1b7   : > { %10417 = vmatpush3.bf16.xpose.msk.msra.mxu1 %vm13005_vm1, %v10412_v16  ;;  %v13174_v32 = vpop.f32.mrb[26].mxu0  ;;  %v13203_v16 = vrot.slane %v12974_v44, %v409_v22 }
 0x1b8   : > { %v560_v53 = vpop.f32.mrb[27].mxu0 }
 0x1b9   : > { %v561_v61 = vadd.f32 %v560_v53, %v12986_v52  ;;  %9368 = vmatmul.mubr.msk.f32.gmra.mrb[58].mxu1 %vm904_vm0, %v13170_v24  ;;  %v737_v53 = vpop.f32.mrb[21].mxu1  ;;  %v743_v42 = vadd.f32 %v9296_v51, %v13203_v16 }
 0x1ba   : > { %9386 = vmatprep.mubr.msk.f32.mxu1 %vm904_vm0, %v13096_v6 }
 0x1bb   : > { %v13182_v1 = vpop.f32.mrb[28].mxu0  ;;  %v13184_v40 = vpack.i.bf16 %v561_v61, %v555_v54  ;;  %v10418_v7 = vpack.c.bf16 %v561_v61, %v555_v54  ;;  %v738_v54 = vadd.f32 %v737_v53, %v13203_v16 }
 0x1bc   : > { %v566_v9 = vpop.f32.mrb[29].mxu0 }
 0x1bd   : > { %17174 = vst [vmem:[#allocation33_spill] sm:$0xff] %v13184_v40  ;;  %11193 = vrot.lane.b32.xlu1 %v13184_v40, %s12588_s19  ;;  %10420 = vmatprep.subr.msk.bf16.mxu1 %vm13005_vm1, %v10418_v7  ;;  %v567_v15 = vadd.f32 %v566_v9, %v12986_v52  ;;  %v13220_v9 = vpack.c.bf16 %v743_v42, %v738_v54 }
 0x1be   : > { %v13230_v19 = vpack.i.bf16 %v743_v42, %v738_v54  ;;  %v13259_v42 = vadd.f32 %v13137_v63, %v12977_v45 }
 0x1bf   : > { %10423 = vmatpush3.bf16.xpose.msk.msra.mxu1 %vm13005_vm1, %v10418_v7  ;;  %v13192_v13 = vpop.f32.mrb[30].mxu0  ;;  %v9299_v7 = vpop.f32.mrb[22].mxu1 }
 0x1c0   : > { %v572_v14 = vpop.f32.mrb[31].mxu0  ;;  %v753_v22 = vadd.f32 %v9299_v7, %v13203_v16  ;;  %17178 = vst [vmem:[#allocation37_spill] sm:$0xff] %v13230_v19  ;;  %v13238_v7 = vadd.f32 %v13111_v23, %v12977_v45  ;;  %17181 = vst [vmem:[#allocation40_spill] sm:$0xff] %v13259_v42 }
 0x1c1   : > { %v573_v18 = vadd.f32 %v572_v14, %v12986_v52 }
 0x1c2   : > { %17179 = vst [vmem:[#allocation38_spill] sm:$0xff] %v13238_v7 }
 0x1c3   : > { %v576_v25 = vpop.f32.mrb[32].mxu0  ;;  %v13197_v31 = vpack.i.bf16 %v573_v18, %v567_v15  ;;  %v10424_v39 = vpack.c.bf16 %v573_v18, %v567_v15  ;;  %v747_v18 = vpop.f32.mrb[23].mxu1 }
 0x1c4   : > { %v13200_v41 = vadd.f32 %v576_v25, %v12977_v45  ;;  %v578_v43 = vpop.f32.mrb[33].mxu0  ;;  %v748_v25 = vadd.f32 %v747_v18, %v13203_v16  ;;  %v13269_v18 = vadd.f32 %v13153_v46, %v12977_v45 }
 0x1c5   : > { %17175 = vst [vmem:[#allocation34_spill] sm:$0xff] %v13197_v31  ;;  %11198 = vrot.lane.b32.xlu0 %v13197_v31, %s12588_s19  ;;  %10426 = vmatprep.subr.msk.bf16.mxu1 %vm13005_vm1, %v10424_v39  ;;  %v579_v14 = vadd.f32 %v578_v43, %v12986_v52 }
 0x1c6   : > { %17176 = vst [vmem:[#allocation35_spill] sm:$0xff] %v13200_v41  ;;  %9414 = vmatprep.mubr.msk.f32.mxu0 %vm904_vm0, %v13200_v41  ;;  %v13234_v49 = vpack.c.bf16 %v753_v22, %v748_v25  ;;  %v13255_v23 = vpack.i.bf16 %v753_v22, %v748_v25  ;;  %17182 = vst [vmem:[#allocation41_spill] sm:$0xff] %v13269_v18 }
 0x1c7   : > { %10429 = vmatpush3.bf16.xpose.msk.msra.mxu1 %vm13005_vm1, %v10424_v39  ;;  %v13215_v44 = vpop.f32.mrb[34].mxu0  ;;  %v9302_v39 = vpop.f32.mrb[24].mxu1 }
 0x1c8   : > { %v584_v61 = vpop.f32.mrb[35].mxu0  ;;  %10456 = vmatprep.subr.msk.bf16.mxu1 %vm13005_vm1, %v13041_v21  ;;  %v757_v31 = vpop.f32.mrb[25].mxu1  ;;  %v763_v47 = vadd.f32 %v9302_v39, %v13203_v16  ;;  %17180 = vst [vmem:[#allocation39_spill] sm:$0xff] %v13255_v23 }
 0x1c9   : > { %v585_v15 = vadd.f32 %v584_v61, %v12986_v52  ;;  %v758_v43 = vadd.f32 %v757_v31, %v13203_v16  ;;  %v9305_v61 = vpop.f32.mrb[26].mxu1 }
 0x1ca   : > { %v767_v25 = vpop.f32.mrb[27].mxu1 }
 0x1cb   : > { %v13226_v51 = vpop.f32.mrb[36].mxu0  ;;  %v10430_v53 = vpack.c.bf16 %v585_v15, %v579_v14  ;;  %v13228_v6 = vpack.i.bf16 %v585_v15, %v579_v14  ;;  %v773_v14 = vadd.f32 %v9305_v61, %v13203_v16  ;;  %v13265_v15 = vpack.c.bf16 %v763_v47, %v758_v43  ;;  %v9308_v39 = vpop.f32.mrb[28].mxu1 }
 0x1cc   : > { %v590_v56 = vpop.f32.mrb[37].mxu0  ;;  %v768_v63 = vadd.f32 %v767_v25, %v13203_v16  ;;  %v783_v40 = vadd.f32 %v9308_v39, %v13203_v16  ;;  %v13315_v39 = vadd.f32 %v13192_v13, %v12977_v45 }
 0x1cd   : > { %17177 = vst [vmem:[#allocation36_spill] sm:$0xff] %v13228_v6  ;;  %10432 = vmatprep.subr.msk.bf16.mxu0 %vm13005_vm1, %v10430_v53  ;;  %11203 = vrot.lane.b32.xlu1 %v13228_v6, %s12588_s19 }
 0x1ce   : > { %9387 = vmatmul.mubr.msk.f32.vlgmr.msra.gmra.mrb[60].mxu1 %vm904_vm0, %v13102_v12  ;;  %10435 = vmatpush3.bf16.xpose.msk.msra.mxu0 %vm13005_vm1, %v10430_v53  ;;  %v13278_v53 = vadd.f32 %v13174_v32, %v12977_v45  ;;  %v13286_v12 = vpack.i.bf16 %v763_v47, %v758_v43  ;;  %v13290_v34 = vpack.c.bf16 %v773_v14, %v768_v63 }
 0x1cf   : > { %9389 = vmatprep.mubr.msk.f32.mxu1 %vm904_vm0, %v13238_v7  ;;  %v13250_v31 = vpop.f32.mrb[38].mxu0  ;;  %10459 = vmatpush3.bf16.xpose.msk.msra.mxu1 %vm13005_vm1, %v13041_v21  ;;  %v591_v21 = vadd.f32 %v590_v56, %v12986_v52  ;;  %v13294_v32 = vadd.f32 %v13182_v1, %v12977_v45  ;;  %17188 = vst [vmem:[#allocation47_spill] sm:$0xff] %v13315_v39 }
 0x1d0   : > { %v596_v54 = vpop.f32.mrb[39].mxu0  ;;  %10462 = vmatprep.subr.msk.bf16.mxu1 %vm13005_vm1, %v13065_v36  ;;  %17183 = vst [vmem:[#allocation42_spill] sm:$0xff] %v13278_v53  ;;  %17185 = vst [vmem:[#allocation44_spill] sm:$0xff] %v13286_v12 }
 0x1d1   : > { %v597_v22 = vadd.f32 %v596_v54, %v12986_v52  ;;  %v777_v54 = vpop.f32.mrb[29].mxu1  ;;  %17186 = vst [vmem:[#allocation45_spill] sm:$0xff] %v13294_v32 }
 0x1d2   : > { %9390 = vmatmul.mubr.msk.f32.gmra.mrb[62].mxu1 %vm904_vm0, %v13259_v42  ;;  %v778_v25 = vadd.f32 %v777_v54, %v13203_v16  ;;  %v9311_v57 = vpop.f32.mrb[30].mxu1 }
 0x1d3   : > { %9392 = vmatprep.mubr.msk.f32.mxu1 %vm904_vm0, %v13269_v18  ;;  %v13282_v46 = vpop.f32.mrb[40].mxu0  ;;  %v10436_v61 = vpack.c.bf16 %v597_v22, %v591_v21  ;;  %v13284_v56 = vpack.i.bf16 %v597_v22, %v591_v21  ;;  %v787_v47 = vpop.f32.mrb[31].mxu1  ;;  %v13311_v22 = vpack.i.bf16 %v773_v14, %v768_v63 }
 0x1d4   : > { %v602_v6 = vpop.f32.mrb[41].mxu0  ;;  %v9314_v43 = vpop.f32.mrb[32].mxu1  ;;  %v13322_v12 = vpack.c.bf16 %v783_v40, %v778_v25 }
 0x1d5   : > { %17184 = vst [vmem:[#allocation43_spill] sm:$0xff] %v13284_v56  ;;  %10438 = vmatprep.subr.msk.bf16.mxu0 %vm13005_vm1, %v10436_v61  ;;  %11208 = vrot.lane.b32.xlu1 %v13284_v56, %s12588_s19  ;;  %v797_v1 = vpop.f32.mrb[33].mxu1  ;;  %17187 = vst [vmem:[#allocation46_spill] sm:$0xff] %v13311_v22  ;;  %v788_v56 = vadd.f32 %v787_v47, %v13203_v16  ;;  %v603_v14 = vadd.f32 %v602_v6, %v12986_v52 }
 0x1d6   : > { %9393 = vmatmul.mubr.msk.f32.gmra.mrb[64].mxu1 %vm904_vm0, %v13278_v53  ;;  %10441 = vmatpush3.bf16.xpose.msk.msra.mxu0 %vm13005_vm1, %v10436_v61  ;;  %v793_v61 = vadd.f32 %v9311_v57, %v13203_v16  ;;  %v9317_v2 = vpop.f32.mrb[34].mxu1  ;;  %v803_v47 = vadd.f32 %v9314_v43, %v13203_v16  ;;  %v798_v6 = vadd.f32 %v797_v1, %v13203_v16 }
 0x1d7   : > { %9395 = vmatprep.mubr.msk.f32.mxu1 %vm904_vm0, %v13294_v32  ;;  %v13306_v21 = vpop.f32.mrb[42].mxu0  ;;  %10465 = vmatpush3.bf16.xpose.msk.msra.mxu1 %vm13005_vm1, %v13065_v36  ;;  %v13326_v36 = vadd.f32 %v13013_v3, %v12977_v45  ;;  %v807_v63 = vpop.f32.mrb[35].mxu1  ;;  %v13337_v3 = vpack.i.bf16 %v783_v40, %v778_v25 }
 0x1d8   : > { %v608_v54 = vpop.f32.mrb[43].mxu0  ;;  %10468 = vmatprep.subr.msk.bf16.mxu1 %vm13005_vm1, %v13085_v59  ;;  %v9320_v19 = vpop.f32.mrb[36].mxu1 }
 0x1d9   : > { %17189 = vst [vmem:[#allocation48_spill] sm:$0xff] %v13326_v36  ;;  %v609_v13 = vadd.f32 %v608_v54, %v12986_v52  ;;  %v817_v17 = vpop.f32.mrb[37].mxu1  ;;  %17191 = vst [vmem:[#allocation50_spill] sm:$0xff] %v13337_v3  ;;  %v13340_v52 = vpack.c.bf16 %v793_v61, %v788_v56 }
 0x1da   : > { %9396 = vmatmul.mubr.msk.f32.gmra.mrb[66].mxu1 %vm904_vm0, %v13315_v39  ;;  %v9323_v22 = vpop.f32.mrb[38].mxu1  ;;  %v13373_v39 = vpack.i.bf16 %v803_v47, %v798_v6 }
 0x1db   : > { %v10442_v27 = vpack.c.bf16 %v609_v13, %v603_v14  ;;  %9442 = vmatprep.mubr.msk.f32.mxu1 %vm904_vm0, %v13326_v36  ;;  %v13334_v57 = vpack.i.bf16 %v609_v13, %v603_v14  ;;  %v833_v54 = vadd.f32 %v9323_v22, %v13203_v16  ;;  %v827_v14 = vpop.f32.mrb[39].mxu1  ;;  %v13357_v13 = vpack.i.bf16 %v793_v61, %v788_v56 }
 0x1dc   : > { %v828_v40 = vadd.f32 %v827_v14, %v13203_v16  ;;  %v9326_v25 = vpop.f32.mrb[40].mxu1  ;;  %v808_v22 = vadd.f32 %v807_v63, %v13203_v16  ;;  %17193 = vst [vmem:[#allocation52_spill] sm:$0xff] %v13373_v39  ;;  %v823_v63 = vadd.f32 %v9320_v19, %v13203_v16 }
 0x1dd   : > { %17190 = vst [vmem:[#allocation49_spill] sm:$0xff] %v13334_v57  ;;  %10444 = vmatprep.subr.msk.bf16.mxu0 %vm13005_vm1, %v10442_v27  ;;  %11213 = vrot.lane.b32.xlu0 %v13334_v57, %s12588_s19  ;;  %v843_v43 = vadd.f32 %v9326_v25, %v13203_v16  ;;  %v837_v1 = vpop.f32.mrb[41].mxu1  ;;  %17192 = vst [vmem:[#allocation51_spill] sm:$0xff] %v13357_v13  ;;  %v13365_v57 = vpack.c.bf16 %v803_v47, %v798_v6 }
 0x1de   : > { %10447 = vmatpush3.bf16.xpose.msk.msra.mxu0 %vm13005_vm1, %v10442_v27  ;;  %v813_v27 = vadd.f32 %v9317_v2, %v13203_v16  ;;  %v838_v14 = vadd.f32 %v837_v1, %v13203_v16  ;;  %v818_v1 = vadd.f32 %v817_v17, %v13203_v16 }
 0x1df   : > { %10471 = vmatpush3.bf16.xpose.msk.msra.mxu1 %vm13005_vm1, %v13085_v59  ;;  %10450 = vmatprep.subr.msk.bf16.mxu0 %vm13005_vm1, %v13015_v4  ;;  %v9329_v59 = vpop.f32.mrb[42].mxu1 }
 0x1e0   : > { %10474 = vmatprep.subr.msk.bf16.mxu1 %vm13005_vm1, %v13115_v28  ;;  %v13368_v3 = vadd.f32 %v9329_v59, %v13203_v16  ;;  %v847_v25 = vpop.f32.mrb[43].mxu1  ;;  %v13375_v2 = vpack.c.bf16 %v813_v27, %v808_v22  ;;  %v13404_v29 = vpack.c.bf16 %v823_v63, %v818_v1 }
 0x1e1   : > { %v13371_v56 = vadd.f32 %v847_v25, %v13203_v16  ;;  %v9332_v61 = vpop.f32.mrb[44].mxu1 }
 0x1e2   : > { %v857_v13 = vpop.f32.mrb[45].mxu1 }
 0x1e3   : > { %v9335_v53 = vpop.f32.mrb[46].mxu1 }
 0x1e4   : > { %v13380_v23 = vadd.f32 %v9335_v53, %v13203_v16  ;;  %v867_v59 = vpop.f32.mrb[47].mxu1  ;;  %v13395_v53 = vpack.i.bf16 %v813_v27, %v808_v22  ;;  %v13411_v27 = vpack.i.bf16 %v823_v63, %v818_v1  ;;  %v13415_v22 = vadd.f32 %v13028_v10, %v12977_v45  ;;  %v13567_v1 = vld [vmem:[#allocation8 + $0x10] sm:$0xff] }
 0x1e5   : > { %v13386_v25 = vadd.f32 %v867_v59, %v13203_v16  ;;  %v9338_v47 = vpop.f32.mrb[48].mxu1  ;;  %v13435_v10 = vadd.f32 %v13250_v31, %v12977_v45  ;;  %v13454_v31 = vadd.f32 %v13063_v35, %v12977_v45  ;;  %v13472_v35 = vpack.i.bf16 %v843_v43, %v838_v14 }
 0x1e6   : > { %10453 = vmatpush3.bf16.xpose.msk.msra.mxu0 %vm13005_vm1, %v13015_v4  ;;  %v13392_v19 = vadd.f32 %v9338_v47, %v13203_v16  ;;  %v877_v17 = vpop.f32.mrb[49].mxu1  ;;  %17194 = vst [vmem:[#allocation53_spill] sm:$0xff] %v13395_v53  ;;  %v13409_v47 = vadd.f32 %v13215_v44, %v12977_v45  ;;  %17196 = vst [vmem:[#allocation55_spill] sm:$0xff] %v13411_v27  ;;  %v13431_v44 = vpack.c.bf16 %v833_v54, %v828_v40 }
 0x1e7   : > { %10477 = vmatpush3.bf16.xpose.msk.msra.mxu1 %vm13005_vm1, %v13115_v28  ;;  %10479 = vmatprep.subr.bf16.mxu0 %v13220_v9  ;;  %v13398_v6 = vadd.f32 %v877_v17, %v13203_v16  ;;  %v9341_v4 = vpop.f32.mrb[50].mxu1  ;;  %17197 = vst [vmem:[#allocation56_spill] sm:$0xff] %v13415_v22  ;;  %v13419_v17 = vadd.f32 %v13226_v51, %v12977_v45  ;;  %17200 = vst [vmem:[#allocation59_spill] sm:$0xff] %v13435_v10 }
 0x1e8   : > { %10495 = vmatprep.subr.bf16.mxu1 %v13322_v12  ;;  %v13402_v59 = vadd.f32 %v9341_v4, %v13203_v16  ;;  %v887_v39 = vpop.f32.mrb[51].mxu1  ;;  %17195 = vst [vmem:[#allocation54_spill] sm:$0xff] %v13409_v47  ;;  %v13423_v4 = vadd.f32 %v13039_v20, %v12977_v45  ;;  %v13440_v20 = vpack.i.bf16 %v833_v54, %v828_v40  ;;  %17204 = vst [vmem:[#allocation63_spill] sm:$0xff] %v13454_v31  ;;  %v13553_v40 = vld [vmem:[#allocation8 + $0x8] sm:$0xff] }
 0x1e9   : > { %v888_v28 = vadd.f32 %v887_v39, %v13203_v16  ;;  %17198 = vst [vmem:[#allocation57_spill] sm:$0xff] %v13419_v17  ;;  %v13444_v51 = vadd.f32 %v13052_v26, %v12977_v45  ;;  %v13448_v39 = vadd.f32 %v13282_v46, %v12977_v45  ;;  %v13463_v26 = vpack.c.bf16 %v843_v43, %v838_v14 }
 0x1ea   : > { %17199 = vst [vmem:[#allocation58_spill] sm:$0xff] %v13423_v4  ;;  %17201 = vst [vmem:[#allocation60_spill] sm:$0xff] %v13440_v20  ;;  %v13480_v46 = vadd.f32 %v13076_v0, %v12977_v45  ;;  %v13484_v54 = vadd.f32 %v13083_v58, %v12977_v45  ;;  %v13499_v0 = vpack.c.bf16 %v13368_v3, %v13371_v56 }
 0x1eb   : > { %17202 = vst [vmem:[#allocation61_spill] sm:$0xff] %v13444_v51  ;;  %17203 = vst [vmem:[#allocation62_spill] sm:$0xff] %v13448_v39  ;;  %v13503_v58 = vadd.f32 %v12993_v55, %v12977_v45 }
 0x1ec   : > { %17206 = vst [vmem:[#allocation65_spill] sm:$0xff] %v13472_v35  ;;  %17208 = vst [vmem:[#allocation67_spill] sm:$0xff] %v13480_v46 }
 0x1ed   : > { %9415 = vmatmul.mubr.msk.f32.vlgmr.msra.gmra.mrb[44].mxu0 %vm904_vm0, %v13409_v47  ;;  %17209 = vst [vmem:[#allocation68_spill] sm:$0xff] %v13484_v54  ;;  %17210 = vst [vmem:[#allocation69_spill] sm:$0xff] %v13503_v58 }
 0x1ee   : > { %9417 = vmatprep.mubr.msk.f32.mxu0 %vm904_vm0, %v13419_v17  ;;  %9443 = vmatmul.mubr.msk.f32.vlgmr.msra.gmra.mrb[68].mxu1 %vm904_vm0, %v13415_v22 }
 0x1ef   : > { %9445 = vmatprep.mubr.msk.f32.mxu1 %vm904_vm0, %v13423_v4  ;;  %10481 = vmatpush3.bf16.msra.mxu0 %v13220_v9  ;;  %v13476_v9 = vadd.f32 %v12980_v48, %v12977_v45  ;;  %v858_v48 = vadd.f32 %v857_v13, %v13203_v16  ;;  %v13555_v13 = vld [vmem:[#allocation8] sm:$0xff] }
 0x1f0   : > { %10483 = vmatprep.subr.bf16.mxu0 %v13234_v49  ;;  %10497 = vmatpush3.bf16.msra.mxu1 %v13322_v12  ;;  %v13467_v12 = vadd.f32 %v13306_v21, %v12977_v45  ;;  %v13514_v21 = vadd.f32 %v13099_v11, %v12977_v45  ;;  %v13533_v45 = vpack.c.bf16 %v13380_v23, %v13386_v25 }
 0x1f1   : > { %9418 = vmatmul.mubr.msk.f32.gmra.mrb[46].mxu0 %vm904_vm0, %v13435_v10  ;;  %10499 = vmatprep.subr.bf16.mxu1 %v13340_v52  ;;  %17207 = vst [vmem:[#allocation66_spill] sm:$0xff] %v13476_v9  ;;  %v13537_v11 = vpack.i.bf16 %v13380_v23, %v13386_v25 }
 0x1f2   : > { %9420 = vmatprep.mubr.msk.f32.mxu0 %vm904_vm0, %v13448_v39  ;;  %9446 = vmatmul.mubr.msk.f32.gmra.mrb[70].mxu1 %vm904_vm0, %v13444_v51  ;;  %17205 = vst [vmem:[#allocation64_spill] sm:$0xff] %v13467_v12  ;;  %17212 = vst [vmem:[#allocation71_spill] sm:$0xff] %v13514_v21 }
 0x1f3   : > { %9448 = vmatprep.mubr.msk.f32.mxu1 %vm904_vm0, %v13454_v31  ;;  %10485 = vmatpush3.bf16.msra.mxu0 %v13234_v49  ;;  %v863_v49 = vadd.f32 %v9332_v61, %v13203_v16  ;;  %v13510_v16 = vpack.i.bf16 %v13368_v3, %v13371_v56  ;;  %17214 = vst [vmem:[#allocation73_spill] sm:$0xff] %v13533_v45  ;;  %17215 = vst [vmem:[#allocation74_spill] sm:$0xff] %v13537_v11  ;;  %v13560_v56 = vld [vmem:[#allocation8 + $0x18] sm:$0xff] }
 0x1f4   : > { %10487 = vmatprep.subr.bf16.mxu0 %v13265_v15  ;;  %10501 = vmatpush3.bf16.msra.mxu1 %v13340_v52  ;;  %v13548_v3 = vpack.c.bf16 %v13402_v59, %v888_v28  ;;  %v13551_v52 = vpack.i.bf16 %v13402_v59, %v888_v28 }
 0x1f5   : > { %9421 = vmatmul.mubr.msk.f32.gmra.mrb[48].mxu0 %vm904_vm0, %v13467_v12  ;;  %10503 = vmatprep.subr.bf16.mxu1 %v13365_v57  ;;  %17211 = vst [vmem:[#allocation70_spill] sm:$0xff] %v13510_v16  ;;  %v13521_v55 = vpack.c.bf16 %v863_v49, %v858_v48 }
 0x1f6   : > { %9423 = vmatprep.mubr.msk.f32.mxu0 %vm904_vm0, %v13476_v9  ;;  %9449 = vmatmul.mubr.msk.f32.gmra.mrb[72].mxu1 %vm904_vm0, %v13480_v46  ;;  %17218 = vst [vmem:[#allocation77_spill] sm:$0xff] %v13548_v3  ;;  %17219 = vst [vmem:[#allocation78_spill] sm:$0xff] %v13551_v52  ;;  %v13591_v52 = vld [vmem:[#allocation8 + $0x38] sm:$0xff] }
 0x1f7   : > { %9451 = vmatprep.mubr.msk.f32.mxu1 %vm904_vm0, %v13484_v54  ;;  %10489 = vmatpush3.bf16.msra.mxu0 %v13265_v15  ;;  %v13526_v15 = vpack.i.bf16 %v863_v49, %v858_v48  ;;  %v13579_v49 = vld [vmem:[#allocation8 + $0x20] sm:$0xff]  ;;  %v13581_v48 = vld [vmem:[#allocation8 + $0x28] sm:$0xff] }
 0x1f8   : > { %10491 = vmatprep.subr.bf16.mxu0 %v13290_v34  ;;  %10505 = vmatpush3.bf16.msra.mxu1 %v13365_v57  ;;  %v13541_v57 = vpack.c.bf16 %v13392_v19, %v13398_v6 }
 0x1f9   : > { %9424 = vmatmul.mubr.msk.f32.gmra.mrb[50].mxu0 %vm904_vm0, %v13503_v58  ;;  %10507 = vmatprep.subr.bf16.mxu1 %v13375_v2  ;;  %17213 = vst [vmem:[#allocation72_spill] sm:$0xff] %v13526_v15 }
 0x1fa   : > { %9452 = vmatmul.mubr.msk.f32.gmra.mrb[74].mxu1 %vm904_vm0, %v13514_v21  ;;  %17216 = vst [vmem:[#allocation75_spill] sm:$0xff] %v13541_v57 }
 0x1fb   : > { %10493 = vmatpush3.bf16.msra.mxu0 %v13290_v34  ;;  %v13545_v34 = vpack.i.bf16 %v13392_v19, %v13398_v6 }
 0x1fc   : > { %10509 = vmatpush3.bf16.msra.mxu1 %v13375_v2  ;;  %10511 = vmatprep.subr.bf16.mxu0 %v13404_v29 }
 0x1fd   : > { %10527 = vmatprep.subr.bf16.mxu1 %v13521_v55  ;;  %17217 = vst [vmem:[#allocation76_spill] sm:$0xff] %v13545_v34 }
 0x280   : > { %v9360_v43 = vpop.f32.mrb[52].mxu1 }
 0x281   : > { %v13558_v23 = vadd.f32 %v9360_v43, %v13553_v40  ;;  %v1019_v14 = vpop.f32.mrb[53].mxu1 }
 0x282   : > { %v13563_v61 = vadd.f32 %v1019_v14, %v13555_v13 }
 0x283   : > { %v1521_v2 = vsel %vm1517_vm2, %v13558_v23, -inf }
 0x284   : > { %1522 = vmax.xlane.f32.xlu0 %v1521_v2  ;;  %v9363_v63 = vpop.f32.mrb[54].mxu1  ;;  %v1518_v28 = vsel %vm1517_vm2, %v13563_v61, -inf }
 0x285   : > { %v13570_v25 = vadd.f32 %v9363_v63, %v13560_v56  ;;  %v1029_v19 = vpop.f32.mrb[55].mxu1 }
 0x286   : > { %v13573_v6 = vadd.f32 %v1029_v19, %v13567_v1 }
 0x287   : > { %v1527_v59 = vsel %vm1517_vm2, %v13570_v25, -inf }
 0x288   : > { %1528 = vmax.xlane.f32.xlu1 %v1527_v59  ;;  %v9366_v43 = vpop.f32.mrb[56].mxu1  ;;  %1519 = vmax.xlane.f32.xlu0 %v1518_v28  ;;  %v1524_v19 = vsel %vm1517_vm2, %v13573_v6, -inf }
 0x289   : > { %v1039_v14 = vpop.f32.mrb[57].mxu1  ;;  %v13587_v63 = vadd.f32 %v9366_v43, %v13581_v48  ;;  %v13600_v43 = vld [vmem:[#allocation8 + $0x30] sm:$0xff] }
 0x28a   : > { %v13584_v2 = vadd.f32 %v1039_v14, %v13579_v49 }
 0x28b   : > { %v1533_v14 = vsel %vm1517_vm2, %v13587_v63, -inf }
 0x28c   : > { %v9369_v34 = vpop.f32.mrb[58].mxu1  ;;  %1525 = vmax.xlane.f32.xlu1 %v1524_v19  ;;  %v1530_v59 = vsel %vm1517_vm2, %v13584_v2, -inf }
 0x28d   : > { %v1049_v11 = vpop.f32.mrb[59].mxu1  ;;  %1531 = vmax.xlane.f32.xlu0 %v1530_v59  ;;  %v13596_v28 = vadd.f32 %v9369_v34, %v13591_v52 }
 0x28e   : > { %v13603_v15 = vadd.f32 %v1049_v11, %v13600_v43 }
 0x28f   : > { %v1539_v19 = vsel %vm1517_vm2, %v13596_v28, -inf }
 0x290   : > { %1534 = vmax.xlane.f32.xlu1 %v1533_v14  ;;  %v1536_v53 = vsel %vm1517_vm2, %v13603_v15, -inf }
 0x294   : > { %1540 = vmax.xlane.f32.xlu1 %v1539_v19 }
 0x298   : > { %1537 = vmax.xlane.f32.xlu1 %v1536_v53 }
 0x2a1   : > { %v9388_v59 = vpop.f32.mrb[60].mxu1 }
 0x2a2   : > { %v13610_v34 = vadd.f32 %v9388_v59, %v13553_v40  ;;  %v1172_v21 = vpop.f32.mrb[61].mxu1 }
 0x2a3   : > { %v13613_v46 = vadd.f32 %v1172_v21, %v13555_v13 }
 0x2a4   : > { %v1545_v11 = vsel %vm1517_vm2, %v13610_v34, -inf }
 0x2a5   : > { %v9391_v14 = vpop.f32.mrb[62].mxu1  ;;  %1546 = vmax.xlane.f32.xlu0 %v1545_v11  ;;  %v1542_v59 = vsel %vm1517_vm2, %v13613_v46, -inf }
 0x2a6   : > { %v13618_v51 = vadd.f32 %v9391_v14, %v13560_v56  ;;  %v1182_v19 = vpop.f32.mrb[63].mxu1 }
 0x2a7   : > { %v13621_v58 = vadd.f32 %v1182_v19, %v13567_v1 }
 0x2a8   : > { %v1551_v53 = vsel %vm1517_vm2, %v13618_v51, -inf }
 0x2a9   : > { %v9394_v21 = vpop.f32.mrb[64].mxu1  ;;  %1552 = vmax.xlane.f32.xlu1 %v1551_v53  ;;  %1543 = vmax.xlane.f32.xlu0 %v1542_v59  ;;  %v1548_v12 = vsel %vm1517_vm2, %v13621_v58, -inf }
 0x2aa   : > { %v13628_v16 = vadd.f32 %v9394_v21, %v13581_v48  ;;  %v1192_v11 = vpop.f32.mrb[65].mxu1 }
 0x2ab   : > { %v13631_v14 = vadd.f32 %v1192_v11, %v13579_v49 }
 0x2ac   : > { %v1557_v19 = vsel %vm1517_vm2, %v13628_v16, -inf }
 0x2ad   : > { %v9397_v35 = vpop.f32.mrb[66].mxu1  ;;  %1558 = vmax.xlane.f32.xlu1 %v1557_v19  ;;  %1549 = vmax.xlane.f32.xlu0 %v1548_v12  ;;  %v1554_v11 = vsel %vm1517_vm2, %v13631_v14, -inf }
 0x2ae   : > { %v13638_v10 = vadd.f32 %v9397_v35, %v13591_v52  ;;  %v1202_v53 = vpop.f32.mrb[67].mxu1 }
 0x2af   : > { %v13641_v59 = vadd.f32 %v1202_v53, %v13600_v43 }
 0x2b0   : > { %v1563_v21 = vsel %vm1517_vm2, %v13638_v10, -inf }
 0x2b1   : > { %1564 = vmax.xlane.f32.xlu1 %v1563_v21  ;;  %1555 = vmax.xlane.f32.xlu0 %v1554_v11  ;;  %v1560_v20 = vsel %vm1517_vm2, %v13641_v59, -inf }
 0x2b5   : > { %1561 = vmax.xlane.f32.xlu0 %v1560_v20 }
 0x2c0   : > { %v9416_v12 = vpop.f32.mrb[44].mxu0 }
 0x2c1   : > { %v13650_v35 = vadd.f32 %v9416_v12, %v13553_v40  ;;  %v1325_v19 = vpop.f32.mrb[45].mxu0  ;;  %v9444_v22 = vpop.f32.mrb[68].mxu1 }
 0x2c2   : > { %v13653_v53 = vadd.f32 %v1325_v19, %v13555_v13  ;;  %v1478_v27 = vpop.f32.mrb[69].mxu1  ;;  %v13656_v54 = vadd.f32 %v9444_v22, %v13553_v40 }
 0x2c3   : > { %v1569_v21 = vsel %vm1517_vm2, %v13650_v35, -inf  ;;  %v13661_v20 = vadd.f32 %v1478_v27, %v13555_v13 }
 0x2c4   : > { %v9419_v11 = vpop.f32.mrb[46].mxu0  ;;  %1570 = vmax.xlane.f32.xlu1 %v1569_v21  ;;  %v1566_v12 = vsel %vm1517_vm2, %v13653_v53, -inf  ;;  %v1593_v22 = vsel %vm1517_vm2, %v13656_v54, -inf }
 0x2c5   : > { %v1335_v7 = vpop.f32.mrb[47].mxu0  ;;  %1567 = vmax.xlane.f32.xlu0 %v1566_v12  ;;  %v9447_v31 = vpop.f32.mrb[70].mxu1  ;;  %v13666_v41 = vadd.f32 %v9419_v11, %v13560_v56  ;;  %v1590_v27 = vsel %vm1517_vm2, %v13661_v20, -inf }
 0x2c6   : > { %v1488_v19 = vpop.f32.mrb[71].mxu1  ;;  %v13671_v40 = vadd.f32 %v1335_v7, %v13567_v1  ;;  %v13676_v24 = vadd.f32 %v9447_v31, %v13560_v56 }
 0x2c7   : > { %v1575_v11 = vsel %vm1517_vm2, %v13666_v41, -inf  ;;  %v13681_v9 = vadd.f32 %v1488_v19, %v13567_v1 }
 0x2c8   : > { %v9422_v21 = vpop.f32.mrb[48].mxu0  ;;  %1594 = vmax.xlane.f32.xlu1 %v1593_v22  ;;  %v1572_v7 = vsel %vm1517_vm2, %v13671_v40, -inf  ;;  %v1599_v31 = vsel %vm1517_vm2, %v13676_v24, -inf }
 0x2c9   : > { %v1345_v13 = vpop.f32.mrb[49].mxu0  ;;  %1591 = vmax.xlane.f32.xlu0 %v1590_v27  ;;  %v9450_v4 = vpop.f32.mrb[72].mxu1  ;;  %v13686_v3 = vadd.f32 %v9422_v21, %v13581_v48  ;;  %v1596_v1 = vsel %vm1517_vm2, %v13681_v9, -inf }
 0x2ca   : > { %v1498_v12 = vpop.f32.mrb[73].mxu1  ;;  %v13691_v56 = vadd.f32 %v1345_v13, %v13579_v49  ;;  %v13696_v19 = vadd.f32 %v9450_v4, %v13581_v48 }
 0x2cb   : > { %v13701_v21 = vadd.f32 %v1498_v12, %v13579_v49 }
 0x2cc   : > { %1576 = vmax.xlane.f32.xlu1 %v1575_v11  ;;  %v9425_v22 = vpop.f32.mrb[50].mxu0  ;;  %v1581_v11 = vsel %vm1517_vm2, %v13686_v3, -inf }
 0x2cd   : > { %1573 = vmax.xlane.f32.xlu0 %v1572_v7  ;;  %v1355_v8 = vpop.f32.mrb[51].mxu0  ;;  %v9453_v39 = vpop.f32.mrb[74].mxu1  ;;  %v1578_v7 = vsel %vm1517_vm2, %v13691_v56, -inf  ;;  %v13706_v13 = vadd.f32 %v9425_v22, %v13591_v52  ;;  %v1602_v48 = vsel %vm1517_vm2, %v13701_v21, -inf }
 0x2ce   : > { %v1508_v27 = vpop.f32.mrb[75].mxu1  ;;  %v13711_v4 = vadd.f32 %v1355_v8, %v13600_v43  ;;  %v13716_v49 = vadd.f32 %v9453_v39, %v13591_v52  ;;  %v13729_v39 = vpop.permute.xlu1 %2397 }
 0x2cf   : > { %v1587_v12 = vsel %vm1517_vm2, %v13706_v13, -inf  ;;  %v13721_v22 = vadd.f32 %v1508_v27, %v13600_v43  ;;  %17220 = vst [vmem:[#allocation79_spill] sm:$0xff] %v13729_v39 }
 0x2d0   : > { %1600 = vmax.xlane.f32.xlu1 %v1599_v31  ;;  %v1605_v31 = vsel %vm1517_vm2, %v13696_v19, -inf  ;;  %v1611_v8 = vsel %vm1517_vm2, %v13716_v49, -inf }
 0x2d1   : > { %1597 = vmax.xlane.f32.xlu0 %v1596_v1  ;;  %v1584_v1 = vsel %vm1517_vm2, %v13711_v4, -inf }
 0x2d2   : > { %v13731_v52 = vpop.permute.xlu1 %11163 }
 0x2d3   : > { %17221 = vst [vmem:[#allocation80_spill] sm:$0xff] %v13731_v52 }
 0x2d4   : > { %1582 = vmax.xlane.f32.xlu1 %v1581_v11  ;;  %v1608_v11 = vsel %vm1517_vm2, %v13721_v22, -inf }
 0x2d5   : > { %1579 = vmax.xlane.f32.xlu0 %v1578_v7  ;;  %v13733_v7 = vpop.permute.xlu0 %2395 }
 0x2d6   : > { %17222 = vst [vmem:[#allocation81_spill] sm:$0xff] %v13733_v7  ;;  %v13735_v43 = vpop.permute.xlu1 %11168 }
 0x2d7   : > { %17223 = vst [vmem:[#allocation82_spill] sm:$0xff] %v13735_v43 }
 0x2d8   : > { %1606 = vmax.xlane.f32.xlu1 %v1605_v31 }
 0x2d9   : > { %1603 = vmax.xlane.f32.xlu0 %v1602_v48  ;;  %v13737_v27 = vpop.permute.xlu0 %11158 }
 0x2da   : > { %v13741_v48 = vpop.permute.xlu1 %2566 }
 0x2db   : > { %17225 = vst [vmem:[#allocation84_spill] sm:$0xff] %v13741_v48 }
 0x2dc   : > { %1588 = vmax.xlane.f32.xlu1 %v1587_v12 }
 0x2dd   : > { %1585 = vmax.xlane.f32.xlu0 %v1584_v1  ;;  %v13739_v31 = vpop.permute.xlu0 %11173 }
 0x2de   : > { %17224 = vst [vmem:[#allocation83_spill] sm:$0xff] %v13739_v31  ;;  %v13745_v1 = vpop.permute.xlu1 %11183 }
 0x2df   : > { %17227 = vst [vmem:[#allocation86_spill] sm:$0xff] %v13745_v1 }
 0x2e0   : > { %1612 = vmax.xlane.f32.xlu1 %v1611_v8 }
 0x2e1   : > { %1609 = vmax.xlane.f32.xlu0 %v1608_v11  ;;  %v13743_v12 = vpop.permute.xlu0 %11178 }
 0x2e2   : > { %17226 = vst [vmem:[#allocation85_spill] sm:$0xff] %v13743_v12  ;;  %v13749_v11 = vpop.permute.xlu1 %11188 }
 0x2e3   : > { %17229 = vst [vmem:[#allocation88_spill] sm:$0xff] %v13749_v11 }
 0x2e5   : > { %v13747_v8 = vpop.permute.xlu0 %2564 }
 0x2e6   : > { %17228 = vst [vmem:[#allocation87_spill] sm:$0xff] %v13747_v8  ;;  %v13751_v39 = vpop.permute.xlu1 %11193 }
 0x2e7   : > { %17230 = vst [vmem:[#allocation89_spill] sm:$0xff] %v13751_v39 }
 0x2e9   : > { %v13753_v52 = vpop.permute.xlu0 %11198 }
 0x2ea   : > { %17231 = vst [vmem:[#allocation90_spill] sm:$0xff] %v13753_v52  ;;  %v13755_v7 = vpop.permute.xlu1 %11203 }
 0x2eb   : > { %17232 = vst [vmem:[#allocation91_spill] sm:$0xff] %v13755_v7 }
 0x2ed   : > { %v13757_v43 = vpop.permute.xlu0 %11213 }
 0x2ee   : > { %17233 = vst [vmem:[#allocation92_spill] sm:$0xff] %v13757_v43  ;;  %v13759_v17 = vpop.permute.xlu1 %11208 }
 0x2ef   : > { %17234 = vst [vmem:[#allocation93_spill] sm:$0xff] %v13759_v17 }
 0x311   : > { %v1523_v31 = vpop.xlane.xlu0 %1522 }
 0x312   : > { %v1615_v48 = vsub.f32 %v13558_v23, %v1523_v31 }
 0x314   : > { %v1648_v12 = vmul.f32 1.442695, %v1615_v48 }
 0x315   : > { %v1529_v57 = vpop.xlane.xlu1 %1528  ;;  %v1520_v1 = vpop.xlane.xlu0 %1519 }
 0x316   : > { %11877 = vpow2.f32 %v1648_v12  ;;  %v1617_v8 = vsub.f32 %v13570_v25, %v1529_v57  ;;  %v1614_v11 = vsub.f32 %v13563_v61, %v1520_v1 }
 0x318   : > { %v1652_v39 = vmul.f32 1.442695, %v1617_v8  ;;  %v1646_v36 = vmul.f32 1.442695, %v1614_v11 }
 0x319   : > { %v1526_v52 = vpop.xlane.xlu1 %1525 }
 0x31a   : > { %11879 = vpow2.f32 %v1652_v39  ;;  %v1616_v7 = vsub.f32 %v13573_v6, %v1526_v52  ;;  %v1532_v43 = vpop.xlane.xlu0 %1531 }
 0x31b   : > { %11881 = vpow2.f32 %v1646_v36  ;;  %v1618_v17 = vsub.f32 %v13584_v2, %v1532_v43 }
 0x31c   : > { %v1650_v45 = vmul.f32 1.442695, %v1616_v7 }
 0x31d   : > { %v1654_v23 = vmul.f32 1.442695, %v1618_v17  ;;  %v1535_v31 = vpop.xlane.xlu1 %1534 }
 0x31e   : > { %11883 = vpow2.f32 %v1650_v45  ;;  %v1619_v48 = vsub.f32 %v13587_v63, %v1535_v31 }
 0x31f   : > { %11885 = vpow2.f32 %v1654_v23 }
 0x320   : > { %v13767_v12 = vpop.eup %11877  ;;  %v1656_v57 = vmul.f32 1.442695, %v1619_v48 }
 0x321   : > { %v1541_v61 = vpop.xlane.xlu1 %1540  ;;  %v1713_v25 = vsel %vm1517_vm2, %v13767_v12, 0.0 }
 0x322   : > { %11887 = vpow2.f32 %v1656_v57  ;;  %v1621_v6 = vsub.f32 %v13596_v28, %v1541_v61  ;;  %1714 = vadd.xlane.f32.xlu1 %v1713_v25 }
 0x324   : > { %v13772_v36 = vpop.eup %11879  ;;  %v1660_v2 = vmul.f32 1.442695, %v1621_v6 }
 0x325   : > { %v13774_v17 = vpop.eup %11881  ;;  %v1538_v45 = vpop.xlane.xlu1 %1537  ;;  %v1719_v63 = vsel %vm1517_vm2, %v13772_v36, 0.0 }
 0x326   : > { %11889 = vpow2.f32 %v1660_v2  ;;  %v1620_v39 = vsub.f32 %v13603_v15, %v1538_v45  ;;  %1720 = vadd.xlane.f32.xlu1 %v1719_v63  ;;  %v1710_v52 = vsel %vm1517_vm2, %v13774_v17, 0.0 }
 0x327   : > { %1711 = vadd.xlane.f32.xlu0 %v1710_v52 }
 0x328   : > { %v13781_v7 = vpop.eup %11883  ;;  %v1658_v28 = vmul.f32 1.442695, %v1620_v39 }
 0x329   : > { %v1716_v43 = vsel %vm1517_vm2, %v13781_v7, 0.0  ;;  %v13785_v1 = vpop.eup %11885 }
 0x32a   : > { %11891 = vpow2.f32 %v1658_v28  ;;  %v1722_v11 = vsel %vm1517_vm2, %v13785_v1, 0.0 }
 0x32b   : > { %1717 = vadd.xlane.f32.xlu0 %v1716_v43 }
 0x32c   : > { %v13787_v8 = vpop.eup %11887 }
 0x32d   : > { %v1725_v15 = vsel %vm1517_vm2, %v13787_v8, 0.0 }
 0x32e   : > { %1726 = vadd.xlane.f32.xlu1 %v1725_v15 }
 0x32f   : > { %1723 = vadd.xlane.f32.xlu0 %v1722_v11 }
 0x330   : > { %v13793_v23 = vpop.eup %11889 }
 0x331   : > { %v1731_v31 = vsel %vm1517_vm2, %v13793_v23, 0.0 }
 0x332   : > { %v1547_v48 = vpop.xlane.xlu0 %1546  ;;  %1732 = vadd.xlane.f32.xlu1 %v1731_v31 }
 0x333   : > { %v1623_v57 = vsub.f32 %v13610_v34, %v1547_v48 }
 0x334   : > { %v13798_v61 = vpop.eup %11891 }
 0x335   : > { %v1664_v25 = vmul.f32 1.442695, %v1623_v57  ;;  %v1728_v6 = vsel %vm1517_vm2, %v13798_v61, 0.0 }
 0x336   : > { %v1553_v2 = vpop.xlane.xlu1 %1552  ;;  %v1544_v45 = vpop.xlane.xlu0 %1543  ;;  %1729 = vadd.xlane.f32.xlu1 %v1728_v6 }
 0x337   : > { %11893 = vpow2.f32 %v1664_v25  ;;  %v1625_v63 = vsub.f32 %v13618_v51, %v1553_v2  ;;  %v1622_v39 = vsub.f32 %v13613_v46, %v1544_v45 }
 0x339   : > { %v1668_v52 = vmul.f32 1.442695, %v1625_v63  ;;  %v1662_v28 = vmul.f32 1.442695, %v1622_v39 }
 0x33a   : > { %v1559_v43 = vpop.xlane.xlu1 %1558  ;;  %v1550_v15 = vpop.xlane.xlu0 %1549 }
 0x33b   : > { %11895 = vpow2.f32 %v1668_v52  ;;  %v1627_v34 = vsub.f32 %v13628_v16, %v1559_v43  ;;  %v1624_v11 = vsub.f32 %v13621_v58, %v1550_v15 }
 0x33c   : > { %11897 = vpow2.f32 %v1662_v28 }
 0x33d   : > { %v1672_v31 = vmul.f32 1.442695, %v1627_v34  ;;  %v1666_v48 = vmul.f32 1.442695, %v1624_v11 }
 0x33e   : > { %v1565_v57 = vpop.xlane.xlu1 %1564  ;;  %v1556_v32 = vpop.xlane.xlu0 %1555 }
 0x33f   : > { %11899 = vpow2.f32 %v1672_v31  ;;  %v1629_v25 = vsub.f32 %v13638_v10, %v1565_v57  ;;  %v1626_v51 = vsub.f32 %v13631_v14, %v1556_v32 }
 0x340   : > { %11901 = vpow2.f32 %v1666_v48 }
 0x341   : > { %v13808_v46 = vpop.eup %11893  ;;  %v1676_v6 = vmul.f32 1.442695, %v1629_v25  ;;  %v1670_v2 = vmul.f32 1.442695, %v1626_v51 }
 0x342   : > { %v1562_v45 = vpop.xlane.xlu0 %1561  ;;  %v1737_v16 = vsel %vm1517_vm2, %v13808_v46, 0.0 }
 0x343   : > { %11903 = vpow2.f32 %v1676_v6  ;;  %v1628_v58 = vsub.f32 %v13641_v59, %v1562_v45  ;;  %1738 = vadd.xlane.f32.xlu0 %v1737_v16 }
 0x344   : > { %11905 = vpow2.f32 %v1670_v2 }
 0x345   : > { %v13813_v63 = vpop.eup %11895  ;;  %v1674_v39 = vmul.f32 1.442695, %v1628_v58 }
 0x346   : > { %v13815_v10 = vpop.eup %11897  ;;  %v1743_v32 = vsel %vm1517_vm2, %v13813_v63, 0.0 }
 0x347   : > { %11907 = vpow2.f32 %v1674_v39  ;;  %1744 = vadd.xlane.f32.xlu1 %v1743_v32  ;;  %v1734_v14 = vsel %vm1517_vm2, %v13815_v10, 0.0 }
 0x348   : > { %1735 = vadd.xlane.f32.xlu0 %v1734_v14 }
 0x349   : > { %v13821_v52 = vpop.eup %11899 }
 0x34a   : > { %v13823_v28 = vpop.eup %11901  ;;  %v1749_v59 = vsel %vm1517_vm2, %v13821_v52, 0.0 }
 0x34b   : > { %1750 = vadd.xlane.f32.xlu1 %v1749_v59  ;;  %v1740_v43 = vsel %vm1517_vm2, %v13823_v28, 0.0 }
 0x34c   : > { %1741 = vadd.xlane.f32.xlu0 %v1740_v43 }
 0x34d   : > { %v13829_v15 = vpop.eup %11903 }
 0x34e   : > { %v13831_v34 = vpop.eup %11905  ;;  %v1755_v11 = vsel %vm1517_vm2, %v13829_v15, 0.0 }
 0x34f   : > { %1756 = vadd.xlane.f32.xlu1 %v1755_v11  ;;  %v1746_v31 = vsel %vm1517_vm2, %v13831_v34, 0.0 }
 0x350   : > { %1747 = vadd.xlane.f32.xlu0 %v1746_v31 }
 0x351   : > { %v13837_v48 = vpop.eup %11907  ;;  %v1571_v57 = vpop.xlane.xlu1 %1570 }
 0x352   : > { %v1631_v25 = vsub.f32 %v13650_v35, %v1571_v57  ;;  %v1752_v51 = vsel %vm1517_vm2, %v13837_v48, 0.0  ;;  %v1568_v6 = vpop.xlane.xlu0 %1567 }
 0x353   : > { %v1630_v2 = vsub.f32 %v13653_v53, %v1568_v6 }
 0x354   : > { %v1680_v45 = vmul.f32 1.442695, %v1631_v25  ;;  %1753 = vadd.xlane.f32.xlu0 %v1752_v51 }
 0x355   : > { %v1678_v16 = vmul.f32 1.442695, %v1630_v2  ;;  %v1595_v58 = vpop.xlane.xlu1 %1594 }
 0x356   : > { %11909 = vpow2.f32 %v1680_v45  ;;  %v1639_v39 = vsub.f32 %v13656_v54, %v1595_v58  ;;  %v1592_v32 = vpop.xlane.xlu0 %1591 }
 0x357   : > { %11911 = vpow2.f32 %v1678_v16  ;;  %v1638_v14 = vsub.f32 %v13661_v20, %v1592_v32 }
 0x358   : > { %v1696_v59 = vmul.f32 1.442695, %v1639_v39 }
 0x359   : > { %v1694_v43 = vmul.f32 1.442695, %v1638_v14  ;;  %v1577_v35 = vpop.xlane.xlu1 %1576 }
 0x35a   : > { %11913 = vpow2.f32 %v1696_v59  ;;  %v1633_v11 = vsub.f32 %v13666_v41, %v1577_v35  ;;  %v1574_v31 = vpop.xlane.xlu0 %1573 }
 0x35b   : > { %11915 = vpow2.f32 %v1694_v43  ;;  %v1632_v53 = vsub.f32 %v13671_v40, %v1574_v31 }
 0x35c   : > { %v1684_v57 = vmul.f32 1.442695, %v1633_v11 }
 0x35d   : > { %v1682_v25 = vmul.f32 1.442695, %v1632_v53  ;;  %v1601_v51 = vpop.xlane.xlu1 %1600 }
 0x35e   : > { %11917 = vpow2.f32 %v1684_v57  ;;  %v1641_v54 = vsub.f32 %v13676_v24, %v1601_v51  ;;  %v1598_v6 = vpop.xlane.xlu0 %1597 }
 0x35f   : > { %11919 = vpow2.f32 %v1682_v25  ;;  %v1640_v20 = vsub.f32 %v13681_v9, %v1598_v6 }
 0x360   : > { %v13849_v2 = vpop.eup %11909  ;;  %v1700_v45 = vmul.f32 1.442695, %v1641_v54 }
 0x361   : > { %v13851_v16 = vpop.eup %11911  ;;  %v1698_v41 = vmul.f32 1.442695, %v1640_v20  ;;  %v1583_v58 = vpop.xlane.xlu1 %1582  ;;  %v1761_v40 = vsel %vm1517_vm2, %v13849_v2, 0.0 }
 0x362   : > { %11921 = vpow2.f32 %v1700_v45  ;;  %v1635_v39 = vsub.f32 %v13686_v3, %v1583_v58  ;;  %1762 = vadd.xlane.f32.xlu1 %v1761_v40  ;;  %v1580_v32 = vpop.xlane.xlu0 %1579  ;;  %v1758_v24 = vsel %vm1517_vm2, %v13851_v16, 0.0 }
 0x363   : > { %11923 = vpow2.f32 %v1698_v41  ;;  %1759 = vadd.xlane.f32.xlu0 %v1758_v24  ;;  %v1634_v59 = vsub.f32 %v13691_v56, %v1580_v32 }
 0x364   : > { %v13858_v9 = vpop.eup %11913  ;;  %v1688_v14 = vmul.f32 1.442695, %v1635_v39 }
 0x365   : > { %v13861_v43 = vpop.eup %11915  ;;  %v1607_v35 = vpop.xlane.xlu1 %1606  ;;  %v1785_v11 = vsel %vm1517_vm2, %v13858_v9, 0.0  ;;  %v1686_v57 = vmul.f32 1.442695, %v1634_v59 }
 0x366   : > { %11925 = vpow2.f32 %v1688_v14  ;;  %v1643_v3 = vsub.f32 %v13696_v19, %v1607_v35  ;;  %1786 = vadd.xlane.f32.xlu1 %v1785_v11  ;;  %v1782_v31 = vsel %vm1517_vm2, %v13861_v43, 0.0  ;;  %v1604_v14 = vpop.xlane.xlu0 %1603 }
 0x367   : > { %1783 = vadd.xlane.f32.xlu0 %v1782_v31 }
 0x368   : > { %v13868_v53 = vpop.eup %11917  ;;  %v1704_v25 = vmul.f32 1.442695, %v1643_v3 }
 0x369   : > { %v13870_v51 = vpop.eup %11919  ;;  %v1767_v56 = vsel %vm1517_vm2, %v13868_v53, 0.0  ;;  %v1589_v59 = vpop.xlane.xlu1 %1588 }
 0x36a   : > { %11927 = vpow2.f32 %v1704_v25  ;;  %1768 = vadd.xlane.f32.xlu1 %v1767_v56  ;;  %v1764_v54 = vsel %vm1517_vm2, %v13870_v51, 0.0  ;;  %v1637_v35 = vsub.f32 %v13706_v13, %v1589_v59  ;;  %v1586_v11 = vpop.xlane.xlu0 %1585 }
 0x36b   : > { %1765 = vadd.xlane.f32.xlu0 %v1764_v54  ;;  %11929 = vpow2.f32 %v1686_v57  ;;  %v1636_v31 = vsub.f32 %v13711_v4, %v1586_v11  ;;  %v1642_v57 = vsub.f32 %v13701_v21, %v1604_v14 }
 0x36c   : > { %v13876_v19 = vpop.eup %11921  ;;  %v1692_v3 = vmul.f32 1.442695, %v1637_v35 }
 0x36d   : > { %v13878_v6 = vpop.eup %11923  ;;  %v1791_v20 = vsel %vm1517_vm2, %v13876_v19, 0.0  ;;  %v1690_v25 = vmul.f32 1.442695, %v1636_v31  ;;  %v1613_v56 = vpop.xlane.xlu1 %1612  ;;  %v1702_v54 = vmul.f32 1.442695, %v1642_v57 }
 0x36e   : > { %1792 = vadd.xlane.f32.xlu1 %v1791_v20  ;;  %v1788_v45 = vsel %vm1517_vm2, %v13878_v6, 0.0  ;;  %11931 = vpow2.f32 %v1692_v3  ;;  %v1645_v20 = vsub.f32 %v13716_v49, %v1613_v56  ;;  %v1610_v59 = vpop.xlane.xlu0 %1609 }
 0x36f   : > { %1789 = vadd.xlane.f32.xlu0 %v1788_v45  ;;  %11933 = vpow2.f32 %v1690_v25 }
 0x370   : > { %v13884_v41 = vpop.eup %11925  ;;  %11935 = vpow2.f32 %v1702_v54  ;;  %v1708_v45 = vmul.f32 1.442695, %v1645_v20 }
 0x371   : > { %v1773_v58 = vsel %vm1517_vm2, %v13884_v41, 0.0 }
 0x372   : > { %1774 = vadd.xlane.f32.xlu1 %v1773_v58  ;;  %11937 = vpow2.f32 %v1708_v45 }
 0x374   : > { %v13888_v40 = vpop.eup %11927 }
 0x375   : > { %v1797_v39 = vsel %vm1517_vm2, %v13888_v40, 0.0  ;;  %v13892_v32 = vpop.eup %11929 }
 0x376   : > { %1798 = vadd.xlane.f32.xlu0 %v1797_v39  ;;  %v1770_v24 = vsel %vm1517_vm2, %v13892_v32, 0.0 }
 0x378   : > { %v13904_v58 = vpop.eup %11931 }
 0x379   : > { %v1779_v13 = vsel %vm1517_vm2, %v13904_v58, 0.0  ;;  %v13908_v39 = vpop.eup %11933 }
 0x37a   : > { %1771 = vadd.xlane.f32.xlu0 %v1770_v24  ;;  %v1776_v21 = vsel %vm1517_vm2, %v13908_v39, 0.0  ;;  %v13912_v4 = vpop.eup %11935 }
 0x37b   : > { %v1794_v49 = vsel %vm1517_vm2, %v13912_v4, 0.0 }
 0x37c   : > { %v13916_v24 = vpop.eup %11937 }
 0x37d   : > { %v1803_v35 = vsel %vm1517_vm2, %v13916_v24, 0.0 }
 0x383   : > { %2401 = vrot.lane.b32.xlu1 %v13133_v33, %s12588_s19 }
 0x390   : > { %2399 = vrot.lane.b32.xlu0 %v13121_v30, %s12588_s19 }
 0x3a7   : > { %1780 = vadd.xlane.f32.xlu1 %v1779_v13 }
 0x3ab   : > { %1777 = vadd.xlane.f32.xlu1 %v1776_v21 }
 0x3af   : > { %v1715_v14 = vpop.xlane.xlu1 %1714  ;;  %1795 = vadd.xlane.f32.xlu0 %v1794_v49 }
 0x3b0   : > { %11939 = vrcp.f32 %v1715_v14 }
 0x3b3   : > { %1804 = vadd.xlane.f32.xlu0 %v1803_v35  ;;  %v1721_v3 = vpop.xlane.xlu1 %1720 }
 0x3b4   : > { %v1712_v11 = vpop.xlane.xlu0 %1711 }
 0x3b5   : > { %11941 = vrcp.f32 %v1712_v11 }
 0x3b6   : > { %11943 = vrcp.f32 %v1721_v3 }
 0x3b8   : > { %v1718_v31 = vpop.xlane.xlu0 %1717 }
 0x3b9   : > { %11945 = vrcp.f32 %v1718_v31 }
 0x3ba   : > { %v11940_v56 = vpop.eup %11939 }
 0x3bb   : > { %v1727_v57 = vpop.xlane.xlu1 %1726  ;;  %v1839_v13 = vmul.f32 %v11940_v56, %v13767_v12 }
 0x3bc   : > { %11947 = vrcp.f32 %v1727_v57  ;;  %v1724_v25 = vpop.xlane.xlu0 %1723  ;;  %11223 = vrot.lane.b32.xlu1 %v13067_v37, %s12588_s19 }
 0x3bd   : > { %11949 = vrcp.f32 %v1724_v25 }
 0x3bf   : > { %v11942_v54 = vpop.eup %11941  ;;  %v1733_v20 = vpop.xlane.xlu1 %1732 }
 0x3c0   : > { %v1838_v45 = vmul.f32 %v11942_v54, %v13774_v17  ;;  %v11944_v21 = vpop.eup %11943  ;;  %11951 = vrcp.f32 %v1733_v20 }
 0x3c1   : > { %v1841_v11 = vmul.f32 %v11944_v21, %v13772_v36  ;;  %v11161_v36 = vunpack.i.h.bf16 %v13737_v27 }
 0x3c2   : > { %9470 = vmatprep.mubr.msk.f32.mxu0 %vm1517_vm2, %v1838_v45 }
 0x3c3   : > { %v11946_v49 = vpop.eup %11945  ;;  %9471 = vmatmul.mubr.msk.f32.vlgmr.msra.gmra.mrb[52].mxu0 %vm1517_vm2, %v1839_v13  ;;  %v1730_v14 = vpop.xlane.xlu1 %1729 }
 0x3c4   : > { %10513 = vmatpush3.bf16.msra.mxu0 %v13404_v29  ;;  %11953 = vrcp.f32 %v1730_v14  ;;  %v1840_v35 = vmul.f32 %v11946_v49, %v13781_v7  ;;  %v1644_v29 = vsub.f32 %v13721_v22, %v1610_v59  ;;  %v11160_v7 = vunpack.i.l.bf16 %v13737_v27 }
 0x3c5   : > { %10515 = vmatprep.subr.bf16.mxu0 %v13431_v44 }
 0x3c6   : > { %v11948_v17 = vpop.eup %11947  ;;  %9473 = vmatprep.mubr.msk.f32.mxu0 %vm1517_vm2, %v1840_v35  ;;  %v13947_v57 = vpack.c.bf16 %v11161_v36, %v11160_v7  ;;  %v17238_v36 = vld [vmem:[#allocation75_spill] sm:$0xff] }
 0x3c7   : > { %v11950_v12 = vpop.eup %11949  ;;  %9474 = vmatmul.mubr.msk.f32.gmra.mrb[54].mxu0 %vm1517_vm2, %v1841_v11  ;;  %v1843_v3 = vmul.f32 %v11948_v17, %v13787_v8  ;;  %v1706_v8 = vmul.f32 1.442695, %v1644_v29  ;;  %v17235_v17 = vld [vmem:[#allocation45_spill] sm:$0xff]  ;;  %v17237_v29 = vld [vmem:[#allocation48_spill] sm:$0xff] }
 0x3c8   : > { %10517 = vmatpush3.bf16.msra.mxu0 %v13431_v44  ;;  %v1842_v31 = vmul.f32 %v11950_v12, %v13785_v1 }
 0x3c9   : > { %10519 = vmatprep.subr.bf16.mxu0 %v13463_v26  ;;  %11218 = vrot.lane.b32.xlu0 %v13017_v5, %s12588_s19  ;;  %11955 = vpow2.f32 %v1706_v8 }
 0x3ca   : > { %9476 = vmatprep.mubr.msk.f32.mxu0 %vm1517_vm2, %v1842_v31  ;;  %v11952_v44 = vpop.eup %11951 }
 0x3cb   : > { %9477 = vmatmul.mubr.msk.f32.gmra.mrb[56].mxu0 %vm1517_vm2, %v1843_v3  ;;  %v17236_v3 = vld [vmem:[#allocation73_spill] sm:$0xff] }
 0x3cc   : > { %10521 = vmatpush3.bf16.msra.mxu0 %v13463_v26  ;;  %v1845_v26 = vmul.f32 %v11952_v44, %v13793_v23  ;;  %v17239_v44 = vld [vmem:[#allocation86_spill] sm:$0xff] }
 0x3cd   : > { %10523 = vmatprep.subr.bf16.mxu0 %v13499_v0  ;;  %2403 = vrot.lane.b32.xlu0 %v13141_v38, %s12588_s19  ;;  %v11185_v8 = vunpack.i.l.bf16 %v17239_v44 }
 0x3ce   : > { %v11954_v1 = vpop.eup %11953 }
 0x3cf   : > { %v1844_v22 = vmul.f32 %v11954_v1, %v13798_v61  ;;  %v11186_v1 = vunpack.i.h.bf16 %v17239_v44  ;;  %v17251_v44 = vld [vmem:[#allocation88_spill] sm:$0xff] }
 0x3d0   : > { %10525 = vmatpush3.bf16.msra.mxu0 %v13499_v0  ;;  %v1739_v59 = vpop.xlane.xlu0 %1738 }
 0x3d1   : > { %10544 = vmatprep.subr.msk.bf16.mxu0 %vm13005_vm1, %v13947_v57  ;;  %2407 = vrot.lane.b32.xlu0 %v13159_v50, %s12588_s19  ;;  %11957 = vrcp.f32 %v1739_v59  ;;  %v17241_v59 = vld [vmem:[#allocation77_spill] sm:$0xff] }
 0x3d2   : > { %9479 = vmatprep.mubr.msk.f32.mxu0 %vm1517_vm2, %v1844_v22  ;;  %v17240_v22 = vld [vmem:[#allocation57_spill] sm:$0xff] }
 0x3d3   : > { %9480 = vmatmul.mubr.msk.f32.gmra.mrb[58].mxu0 %vm1517_vm2, %v1845_v26  ;;  %v13963_v23 = vpop.eup %11955 }
 0x3d4   : > { %v1745_v27 = vpop.xlane.xlu1 %1744  ;;  %v1800_v45 = vsel %vm1517_vm2, %v13963_v23, 0.0 }
 0x3d5   : > { %v1736_v61 = vpop.xlane.xlu0 %1735  ;;  %11228 = vrot.lane.b32.xlu0 %v13087_v60, %s12588_s19 }
 0x3d6   : > { %11959 = vrcp.f32 %v1736_v61 }
 0x3d7   : > { %11961 = vrcp.f32 %v1745_v27  ;;  %v10566_v27 = vpack.c.bf16 %v11186_v1, %v11185_v8  ;;  %v11191_v1 = vunpack.i.h.bf16 %v17251_v44  ;;  %v11190_v8 = vunpack.i.l.bf16 %v17251_v44 }
 0x3d8   : > { %v1751_v0 = vpop.xlane.xlu1 %1750 }
 0x3d9   : > { %v1742_v25 = vpop.xlane.xlu0 %1741  ;;  %2735 = vrot.lane.b32.xlu0 %v13409_v47, %s12588_s19 }
 0x3da   : > { %11963 = vrcp.f32 %v1742_v25 }
 0x3db   : > { %11965 = vrcp.f32 %v1751_v0  ;;  %v11958_v20 = vpop.eup %11957  ;;  %v17242_v0 = vld [vmem:[#allocation62_spill] sm:$0xff] }
 0x3dc   : > { %v1757_v54 = vpop.xlane.xlu1 %1756  ;;  %v1847_v14 = vmul.f32 %v11958_v20, %v13808_v46 }
 0x3dd   : > { %v1748_v56 = vpop.xlane.xlu0 %1747  ;;  %2570 = vrot.lane.b32.xlu0 %v13259_v42, %s12588_s19 }
 0x3de   : > { %11967 = vrcp.f32 %v1748_v56  ;;  %v17244_v56 = vld [vmem:[#allocation66_spill] sm:$0xff] }
 0x3df   : > { %11969 = vrcp.f32 %v1757_v54  ;;  %v17245_v54 = vld [vmem:[#allocation32_spill] sm:$0xff] }
 0x3e0   : > { %v11960_v13 = vpop.eup %11959  ;;  %1801 = vadd.xlane.f32.xlu1 %v1800_v45 }
 0x3e1   : > { %v1754_v21 = vpop.xlane.xlu0 %1753  ;;  %2572 = vrot.lane.b32.xlu0 %v13269_v18, %s12588_s19  ;;  %v1846_v49 = vmul.f32 %v11960_v13, %v13815_v10  ;;  %v11962_v35 = vpop.eup %11961  ;;  %v17246_v13 = vld [vmem:[#allocation58_spill] sm:$0xff] }
 0x3e2   : > { %11971 = vrcp.f32 %v1754_v21  ;;  %v1849_v10 = vmul.f32 %v11962_v35, %v13813_v63  ;;  %v17248_v35 = vld [vmem:[#allocation80_spill] sm:$0xff] }
 0x3e3   : > { %9498 = vmatprep.mubr.msk.f32.mxu1 %vm1517_vm2, %v1846_v49  ;;  %v17247_v49 = vld [vmem:[#allocation35_spill] sm:$0xff] }
 0x3e4   : > { %v11964_v11 = vpop.eup %11963  ;;  %9499 = vmatmul.mubr.msk.f32.vlgmr.msra.gmra.mrb[76].mxu1 %vm1517_vm2, %v1847_v14 }
 0x3e5   : > { %10529 = vmatpush3.bf16.msra.mxu1 %v13521_v55  ;;  %2576 = vrot.lane.b32.xlu0 %v17235_v17, %s12588_s19  ;;  %v1848_v12 = vmul.f32 %v11964_v11, %v13823_v28  ;;  %v11966_v31 = vpop.eup %11965  ;;  %v11166_v11 = vunpack.i.h.bf16 %v17248_v35 }
 0x3e6   : > { %10531 = vmatprep.subr.bf16.mxu1 %v17236_v3  ;;  %v1851_v28 = vmul.f32 %v11966_v31, %v13821_v52 }
 0x3e7   : > { %9501 = vmatprep.mubr.msk.f32.mxu1 %vm1517_vm2, %v1848_v12  ;;  %v11165_v12 = vunpack.i.l.bf16 %v17248_v35  ;;  %v17256_v35 = vld [vmem:[#allocation42_spill] sm:$0xff] }
 0x3e8   : > { %v11968_v46 = vpop.eup %11967  ;;  %9502 = vmatmul.mubr.msk.f32.gmra.mrb[78].mxu1 %vm1517_vm2, %v1849_v10 }
 0x3e9   : > { %10533 = vmatpush3.bf16.msra.mxu1 %v17236_v3  ;;  %2902 = vrot.lane.b32.xlu0 %v17237_v29, %s12588_s19  ;;  %v1850_v55 = vmul.f32 %v11968_v46, %v13831_v34  ;;  %v11970_v7 = vpop.eup %11969 }
 0x3ea   : > { %10535 = vmatprep.subr.bf16.mxu1 %v17238_v36  ;;  %v1853_v52 = vmul.f32 %v11970_v7, %v13829_v15 }
 0x3eb   : > { %9504 = vmatprep.mubr.msk.f32.mxu1 %vm1517_vm2, %v1850_v55  ;;  %v17249_v55 = vld [vmem:[#allocation63_spill] sm:$0xff] }
 0x3ec   : > { %v11972_v63 = vpop.eup %11971  ;;  %9505 = vmatmul.mubr.msk.f32.gmra.mrb[80].mxu1 %vm1517_vm2, %v1851_v28  ;;  %v17250_v28 = vld [vmem:[#allocation38_spill] sm:$0xff] }
 0x3ed   : > { %10537 = vmatpush3.bf16.msra.mxu1 %v17238_v36  ;;  %2737 = vrot.lane.b32.xlu0 %v17240_v22, %s12588_s19  ;;  %v1852_v34 = vmul.f32 %v11972_v63, %v13837_v48  ;;  %v17243_v48 = vld [vmem:[#allocation30_spill] sm:$0xff]  ;;  %v10548_v63 = vpack.c.bf16 %v11166_v11, %v11165_v12 }
 0x3ee   : > { %10539 = vmatprep.subr.bf16.mxu1 %v17241_v59 }
 0x3ef   : > { %9507 = vmatprep.mubr.msk.f32.mxu1 %vm1517_vm2, %v1852_v34  ;;  %v1763_v26 = vpop.xlane.xlu1 %1762  ;;  %v17252_v34 = vld [vmem:[#allocation68_spill] sm:$0xff] }
 0x3f0   : > { %9508 = vmatmul.mubr.msk.f32.gmra.mrb[82].mxu1 %vm1517_vm2, %v1853_v52  ;;  %11973 = vrcp.f32 %v1763_v26  ;;  %v1760_v61 = vpop.xlane.xlu0 %1759  ;;  %v17253_v52 = vld [vmem:[#allocation29_spill] sm:$0xff] }
 0x3f1   : > { %10541 = vmatpush3.bf16.msra.mxu1 %v17241_v59  ;;  %11975 = vrcp.f32 %v1760_v61  ;;  %2741 = vrot.lane.b32.xlu0 %v17242_v0, %s12588_s19  ;;  %v17254_v61 = vld [vmem:[#allocation83_spill] sm:$0xff] }
 0x3f2   : > { %10568 = vmatprep.subr.msk.bf16.mxu1 %vm13005_vm1, %v10566_v27  ;;  %2405 = vrot.lane.b32.xlu1 %v17243_v48, %s12588_s19 }
 0x3f3   : > { %v1787_v15 = vpop.xlane.xlu1 %1786 }
 0x3f4   : > { %11977 = vrcp.f32 %v1787_v15  ;;  %v1784_v25 = vpop.xlane.xlu0 %1783  ;;  %v11176_v15 = vunpack.i.h.bf16 %v17254_v61 }
 0x3f5   : > { %11979 = vrcp.f32 %v1784_v25  ;;  %2745 = vrot.lane.b32.xlu0 %v17244_v56, %s12588_s19 }
 0x3f6   : > { %2409 = vrot.lane.b32.xlu1 %v17245_v54, %s12588_s19 }
 0x3f7   : > { %v1769_v20 = vpop.xlane.xlu1 %1768 }
 0x3f8   : > { %11981 = vrcp.f32 %v1769_v20  ;;  %v1766_v45 = vpop.xlane.xlu0 %1765 }
 0x3f9   : > { %11983 = vrcp.f32 %v1766_v45  ;;  %2906 = vrot.lane.b32.xlu0 %v17246_v13, %s12588_s19  ;;  %v17255_v45 = vld [vmem:[#allocation39_spill] sm:$0xff] }
 0x3fa   : > { %v11974_v21 = vpop.eup %11973  ;;  %2733 = vrot.lane.b32.xlu1 %v17247_v49, %s12588_s19 }
 0x3fb   : > { %v11976_v14 = vpop.eup %11975  ;;  %v1793_v3 = vpop.xlane.xlu1 %1792  ;;  %v1855_v46 = vmul.f32 %v11974_v21, %v13849_v2 }
 0x3fc   : > { %11985 = vrcp.f32 %v1793_v3  ;;  %v1790_v10 = vpop.xlane.xlu0 %1789  ;;  %v1854_v31 = vmul.f32 %v11976_v14, %v13851_v16  ;;  %v17257_v3 = vld [vmem:[#allocation89_spill] sm:$0xff] }
 0x3fd   : > { %11987 = vrcp.f32 %v1790_v10  ;;  %2910 = vrot.lane.b32.xlu0 %v17249_v55, %s12588_s19 }
 0x3fe   : > { %v11978_v36 = vpop.eup %11977  ;;  %2568 = vrot.lane.b32.xlu1 %v17250_v28, %s12588_s19  ;;  %9526 = vmatprep.mubr.msk.f32.mxu0 %vm1517_vm2, %v1854_v31  ;;  %v17258_v31 = vld [vmem:[#allocation46_spill] sm:$0xff] }
 0x3ff   : > { %v11980_v7 = vpop.eup %11979  ;;  %9527 = vmatmul.mubr.msk.f32.vlgmr.msra.gmra.mrb[60].mxu0 %vm1517_vm2, %v1855_v46  ;;  %v1863_v16 = vmul.f32 %v11978_v36, %v13858_v9  ;;  %v1775_v25 = vpop.xlane.xlu1 %1774  ;;  %v17259_v36 = vld [vmem:[#allocation47_spill] sm:$0xff] }
 0x400   : > { %10547 = vmatpush3.bf16.xpose.msk.msra.mxu0 %vm13005_vm1, %v13947_v57  ;;  %v1862_v2 = vmul.f32 %v11980_v7, %v13861_v43  ;;  %v11175_v57 = vunpack.i.l.bf16 %v17254_v61  ;;  %v10572_v43 = vpack.c.bf16 %v11191_v1, %v11190_v8  ;;  %11989 = vrcp.f32 %v1775_v25  ;;  %v17260_v7 = vld [vmem:[#allocation85_spill] sm:$0xff]  ;;  %v17264_v61 = vld [vmem:[#allocation60_spill] sm:$0xff]  ;;  %v17266_v25 = vld [vmem:[#allocation91_spill] sm:$0xff] }
 0x401   : > { %10550 = vmatprep.subr.msk.bf16.mxu0 %vm13005_vm1, %v10548_v63  ;;  %2914 = vrot.lane.b32.xlu0 %v17252_v34, %s12588_s19  ;;  %v11181_v44 = vunpack.i.h.bf16 %v17260_v7 }
 0x402   : > { %v11982_v59 = vpop.eup %11981  ;;  %11233 = vrot.lane.b32.xlu1 %v17253_v52, %s12588_s19  ;;  %9554 = vmatprep.mubr.msk.f32.mxu1 %vm1517_vm2, %v1862_v2  ;;  %v10554_v12 = vpack.c.bf16 %v11176_v15, %v11175_v57  ;;  %v17263_v2 = vld [vmem:[#allocation90_spill] sm:$0xff]  ;;  %v17265_v57 = vld [vmem:[#allocation59_spill] sm:$0xff] }
 0x403   : > { %v11984_v26 = vpop.eup %11983  ;;  %9555 = vmatmul.mubr.msk.f32.vlgmr.msra.gmra.mrb[84].mxu1 %vm1517_vm2, %v1863_v16  ;;  %v14043_v9 = vpop.xlane.xlu0 %1798  ;;  %v1857_v21 = vmul.f32 %v11982_v59, %v13868_v53  ;;  %v11201_v16 = vunpack.i.h.bf16 %v17263_v2  ;;  %v11200_v59 = vunpack.i.l.bf16 %v17263_v2  ;;  %v17277_v2 = vld [vmem:[#allocation37_spill] sm:$0xff] }
 0x404   : > { %10571 = vmatpush3.bf16.xpose.msk.msra.mxu1 %vm13005_vm1, %v10566_v27  ;;  %v1856_v20 = vmul.f32 %v11984_v26, %v13870_v51  ;;  %v11196_v27 = vunpack.i.h.bf16 %v17257_v3  ;;  %v11195_v51 = vunpack.i.l.bf16 %v17257_v3  ;;  %v17268_v3 = vld [vmem:[#allocation64_spill] sm:$0xff] }
 0x405   : > { %10574 = vmatprep.subr.msk.bf16.mxu1 %vm13005_vm1, %v10572_v43  ;;  %11243 = vrot.lane.b32.xlu0 %v17255_v45, %s12588_s19 }
 0x406   : > { %v11986_v14 = vpop.eup %11985  ;;  %2574 = vrot.lane.b32.xlu1 %v17256_v35, %s12588_s19  ;;  %9529 = vmatprep.mubr.msk.f32.mxu0 %vm1517_vm2, %v1856_v20  ;;  %v10578_v1 = vpack.c.bf16 %v11196_v27, %v11195_v51  ;;  %v11206_v20 = vunpack.i.h.bf16 %v17266_v25  ;;  %v17269_v27 = vld [vmem:[#allocation82_spill] sm:$0xff] }
 0x407   : > { %v11988_v11 = vpop.eup %11987  ;;  %9530 = vmatmul.mubr.msk.f32.gmra.mrb[62].mxu0 %vm1517_vm2, %v1857_v21  ;;  %v1772_v10 = vpop.xlane.xlu0 %1771  ;;  %v1865_v46 = vmul.f32 %v11986_v14, %v13876_v19  ;;  %v17261_v19 = vld [vmem:[#allocation55_spill] sm:$0xff]  ;;  %v11205_v21 = vunpack.i.l.bf16 %v17266_v25  ;;  %v11171_v51 = vunpack.i.h.bf16 %v17269_v27 }
 0x408   : > { %10553 = vmatpush3.bf16.xpose.msk.msra.mxu0 %vm13005_vm1, %v10548_v63  ;;  %11991 = vrcp.f32 %v1772_v10  ;;  %v1864_v53 = vmul.f32 %v11988_v11, %v13878_v6  ;;  %v11180_v63 = vunpack.i.l.bf16 %v17260_v7  ;;  %v17262_v6 = vld [vmem:[#allocation56_spill] sm:$0xff]  ;;  %v17267_v11 = vld [vmem:[#allocation65_spill] sm:$0xff] }
 0x409   : > { %10556 = vmatprep.subr.msk.bf16.mxu0 %vm13005_vm1, %v10554_v12  ;;  %11253 = vrot.lane.b32.xlu0 %v17258_v31, %s12588_s19  ;;  %v10590_v10 = vpack.c.bf16 %v11206_v20, %v11205_v21  ;;  %v17272_v7 = vld [vmem:[#allocation20_spill] sm:$0xff]  ;;  %v14380_v31 = vld [vmem:[#allocation8 + $0x60] sm:$0xff] }
 0x40a   : > { %2578 = vrot.lane.b32.xlu1 %v17259_v36, %s12588_s19  ;;  %9557 = vmatprep.mubr.msk.f32.mxu1 %vm1517_vm2, %v1864_v53  ;;  %v10560_v8 = vpack.c.bf16 %v11181_v44, %v11180_v63  ;;  %v11990_v26 = vpop.eup %11989  ;;  %v17271_v53 = vld [vmem:[#allocation69_spill] sm:$0xff]  ;;  %v17274_v63 = vld [vmem:[#allocation28_spill] sm:$0xff] }
 0x40b   : > { %9558 = vmatmul.mubr.msk.f32.gmra.mrb[86].mxu1 %vm1517_vm2, %v1865_v46  ;;  %v17273_v44 = vld [vmem:[#allocation61_spill] sm:$0xff]  ;;  %v2400_v25 = vpop.permute.xlu0 %2399  ;;  %v17281_v21 = vld [vmem:[#allocation52_spill] sm:$0xff] }
 0x40c   : > { %10577 = vmatpush3.bf16.xpose.msk.msra.mxu1 %vm13005_vm1, %v10572_v43  ;;  %v10584_v43 = vpack.c.bf16 %v11201_v16, %v11200_v59  ;;  %v17278_v16 = vld [vmem:[#allocation44_spill] sm:$0xff]  ;;  %v2402_v59 = vpop.permute.xlu1 %2401 }
 0x40d   : > { %10580 = vmatprep.subr.msk.bf16.mxu1 %vm13005_vm1, %v10578_v1  ;;  %11263 = vrot.lane.b32.xlu0 %v17261_v19, %s12588_s19 }
 0x40e   : > { %2904 = vrot.lane.b32.xlu1 %v17262_v6, %s12588_s19 }
 0x410   : > { %10559 = vmatpush3.bf16.xpose.msk.msra.mxu0 %vm13005_vm1, %v10554_v12  ;;  %v1859_v12 = vmul.f32 %v11990_v26, %v13884_v41  ;;  %v17270_v41 = vld [vmem:[#allocation70_spill] sm:$0xff] }
 0x411   : > { %10562 = vmatprep.subr.msk.bf16.mxu0 %vm13005_vm1, %v10560_v8  ;;  %11273 = vrot.lane.b32.xlu0 %v17264_v61, %s12588_s19  ;;  %v17279_v26 = vld [vmem:[#allocation50_spill] sm:$0xff] }
 0x412   : > { %v11992_v15 = vpop.eup %11991  ;;  %2739 = vrot.lane.b32.xlu1 %v17265_v57, %s12588_s19  ;;  %v14382_v57 = vld [vmem:[#allocation8 + $0x70] sm:$0xff] }
 0x413   : > { %v1858_v14 = vmul.f32 %v11992_v15, %v13892_v32  ;;  %v11170_v32 = vunpack.i.l.bf16 %v17269_v27 }
 0x414   : > { %10583 = vmatpush3.bf16.xpose.msk.msra.mxu1 %vm13005_vm1, %v10578_v1  ;;  %v17275_v1 = vld [vmem:[#allocation67_spill] sm:$0xff] }
 0x415   : > { %10586 = vmatprep.subr.msk.bf16.mxu1 %vm13005_vm1, %v10584_v43  ;;  %11283 = vrot.lane.b32.xlu0 %v17267_v11, %s12588_s19  ;;  %v14115_v46 = vpack.c.bf16 %v11171_v51, %v11170_v32  ;;  %v17283_v32 = vld [vmem:[#allocation72_spill] sm:$0xff]  ;;  %v14356_v11 = vld [vmem:[#allocation8 + $0x50] sm:$0xff] }
 0x416   : > { %2743 = vrot.lane.b32.xlu1 %v17268_v3, %s12588_s19  ;;  %9532 = vmatprep.mubr.msk.f32.mxu0 %vm1517_vm2, %v1858_v14 }
 0x417   : > { %9533 = vmatmul.mubr.msk.f32.gmra.mrb[64].mxu0 %vm1517_vm2, %v1859_v12  ;;  %v17282_v12 = vld [vmem:[#allocation53_spill] sm:$0xff] }
 0x418   : > { %10565 = vmatpush3.bf16.xpose.msk.msra.mxu0 %vm13005_vm1, %v10560_v8  ;;  %v17276_v8 = vld [vmem:[#allocation71_spill] sm:$0xff] }
 0x419   : > { %10592 = vmatprep.subr.msk.bf16.mxu0 %vm13005_vm1, %v10590_v10  ;;  %11293 = vrot.lane.b32.xlu0 %v17270_v41, %s12588_s19 }
 0x41a   : > { %2747 = vrot.lane.b32.xlu1 %v17271_v53, %s12588_s19 }
 0x41c   : > { %10589 = vmatpush3.bf16.xpose.msk.msra.mxu1 %vm13005_vm1, %v10584_v43  ;;  %v17280_v43 = vld [vmem:[#allocation51_spill] sm:$0xff] }
 0x41d   : > { %10616 = vmatprep.subr.msk.bf16.mxu1 %vm13005_vm1, %v14115_v46  ;;  %11323 = vrot.lane.b32.xlu0 %v17272_v7, %s12589_s20 }
 0x41e   : > { %2908 = vrot.lane.b32.xlu1 %v17273_v44, %s12588_s19  ;;  %v14358_v44 = vld [vmem:[#allocation8 + $0x78] sm:$0xff] }
 0x421   : > { %11333 = vrot.lane.b32.xlu0 %v17274_v63, %s12589_s20 }
 0x422   : > { %2912 = vrot.lane.b32.xlu1 %v17275_v1, %s12588_s19 }
 0x426   : > { %2916 = vrot.lane.b32.xlu1 %v17276_v8, %s12588_s19 }
 0x42a   : > { %11238 = vrot.lane.b32.xlu1 %v17277_v2, %s12588_s19 }
 0x42e   : > { %11248 = vrot.lane.b32.xlu1 %v17278_v16, %s12588_s19  ;;  %v17288_v16 = vld [vmem:[#allocation79_spill] sm:$0xff] }
 0x432   : > { %11258 = vrot.lane.b32.xlu1 %v17279_v26, %s12588_s19 }
 0x434   : > { %v1781_v15 = vpop.xlane.xlu1 %1780 }
 0x435   : > { %11993 = vrcp.f32 %v1781_v15 }
 0x436   : > { %11268 = vrot.lane.b32.xlu1 %v17280_v43, %s12588_s19 }
 0x438   : > { %v1778_v20 = vpop.xlane.xlu1 %1777 }
 0x439   : > { %11995 = vrcp.f32 %v1778_v20 }
 0x43a   : > { %11278 = vrot.lane.b32.xlu1 %v17281_v21, %s12588_s19  ;;  %11997 = vrcp.f32 %v14043_v9  ;;  %v17284_v21 = vld [vmem:[#allocation74_spill] sm:$0xff] }
 0x43c   : > { %v1796_v14 = vpop.xlane.xlu0 %1795 }
 0x43d   : > { %11999 = vrcp.f32 %v1796_v14  ;;  %v17285_v14 = vld [vmem:[#allocation93_spill] sm:$0xff] }
 0x43e   : > { %11288 = vrot.lane.b32.xlu1 %v17282_v12, %s12588_s19  ;;  %v11211_v12 = vunpack.i.h.bf16 %v17285_v14  ;;  %v11210_v26 = vunpack.i.l.bf16 %v17285_v14 }
 0x43f   : > { %v11994_v51 = vpop.eup %11993 }
 0x440   : > { %v1805_v27 = vpop.xlane.xlu0 %1804  ;;  %v1861_v20 = vmul.f32 %v11994_v51, %v13904_v58  ;;  %v10596_v51 = vpack.c.bf16 %v11211_v12, %v11210_v26  ;;  %v17291_v12 = vld [vmem:[#allocation78_spill] sm:$0xff] }
 0x441   : > { %12001 = vrcp.f32 %v1805_v27 }
 0x442   : > { %11298 = vrot.lane.b32.xlu1 %v17283_v32, %s12588_s19  ;;  %v17286_v32 = vld [vmem:[#allocation81_spill] sm:$0xff] }
 0x443   : > { %v11996_v63 = vpop.eup %11995 }
 0x444   : > { %v1860_v15 = vmul.f32 %v11996_v63, %v13908_v39  ;;  %v11219_v7 = vpop.permute.xlu0 %11218  ;;  %v11998_v43 = vpop.eup %11997  ;;  %v17287_v63 = vld [vmem:[#allocation18_spill] sm:$0xff] }
 0x445   : > { %v1867_v58 = vmul.f32 %v11998_v43, %v13888_v40  ;;  %v17289_v40 = vld [vmem:[#allocation76_spill] sm:$0xff] }
 0x446   : > { %11303 = vrot.lane.b32.xlu1 %v17284_v21, %s12588_s19  ;;  %9535 = vmatprep.mubr.msk.f32.mxu0 %vm1517_vm2, %v1860_v15 }
 0x447   : > { %v12000_v9 = vpop.eup %11999  ;;  %9536 = vmatmul.mubr.msk.f32.gmra.mrb[66].mxu0 %vm1517_vm2, %v1861_v20  ;;  %v11220_v20 = vunpack.i.l.bf16 %v11219_v7 }
 0x448   : > { %9582 = vmatprep.mubr.msk.f32.mxu0 %vm904_vm0, %v17286_v32  ;;  %v1866_v39 = vmul.f32 %v12000_v9, %v13912_v4  ;;  %v2404_v15 = vpop.permute.xlu0 %2403  ;;  %v17290_v4 = vld [vmem:[#allocation92_spill] sm:$0xff]  ;;  %v11221_v32 = vunpack.i.h.bf16 %v11219_v7 }
 0x449   : > { %v11216_v43 = vunpack.i.h.bf16 %v17290_v4  ;;  %v11215_v26 = vunpack.i.l.bf16 %v17290_v4 }
 0x44a   : > { %11308 = vrot.lane.b32.xlu1 %v17287_v63, %s12589_s20  ;;  %9560 = vmatprep.mubr.msk.f32.mxu1 %vm1517_vm2, %v1866_v39  ;;  %v10608_v14 = vpack.c.bf16 %v11221_v32, %v11220_v20  ;;  %v17294_v63 = vld [vmem:[#allocation87_spill] sm:$0xff] }
 0x44b   : > { %9561 = vmatmul.mubr.msk.f32.gmra.mrb[88].mxu1 %vm1517_vm2, %v1867_v58  ;;  %9583 = vmatmul.mubr.msk.f32.vlgmr.msra.gmra.mrb[68].mxu0 %vm904_vm0, %v17288_v16  ;;  %v12002_v32 = vpop.eup %12001 }
 0x44c   : > { %10595 = vmatpush3.bf16.xpose.msk.msra.mxu0 %vm13005_vm1, %v10590_v10  ;;  %9585 = vmatprep.mubr.msk.f32.mxu0 %vm904_vm0, %v2400_v25  ;;  %v2408_v16 = vpop.permute.xlu0 %2407  ;;  %v10602_v10 = vpack.c.bf16 %v11216_v43, %v11215_v26  ;;  %v17292_v25 = vld [vmem:[#allocation22_spill] sm:$0xff]  ;;  %v1869_v27 = vmul.f32 %v12002_v32, %v13916_v24 }
 0x44d   : > { %10598 = vmatprep.subr.msk.bf16.mxu0 %vm13005_vm1, %v10596_v51 }
 0x44e   : > { %11313 = vrot.lane.b32.xlu1 %v17289_v40, %s12588_s19 }
 0x44f   : > { %9586 = vmatmul.mubr.msk.f32.gmra.mrb[70].mxu0 %vm904_vm0, %v2402_v59  ;;  %v17293_v59 = vld [vmem:[#allocation24_spill] sm:$0xff] }
 0x450   : > { %9588 = vmatprep.mubr.msk.f32.mxu0 %vm904_vm0, %v2404_v15  ;;  %v11229_v9 = vpop.permute.xlu0 %11228 }
 0x452   : > { %11318 = vrot.lane.b32.xlu1 %v17291_v12, %s12588_s19 }
 0x454   : > { %10601 = vmatpush3.bf16.xpose.msk.msra.mxu0 %vm13005_vm1, %v10596_v51  ;;  %v2736_v39 = vpop.permute.xlu0 %2735  ;;  %v11224_v51 = vpop.permute.xlu1 %11223 }
 0x455   : > { %10604 = vmatprep.subr.msk.bf16.mxu0 %vm13005_vm1, %v10602_v10 }
 0x456   : > { %11328 = vrot.lane.b32.xlu1 %v17292_v25, %s12589_s20  ;;  %v14329_v25 = vld [vmem:[#allocation8 + $0x58] sm:$0xff] }
 0x458   : > { %v2571_v58 = vpop.permute.xlu0 %2570 }
 0x45a   : > { %11338 = vrot.lane.b32.xlu1 %v17293_v59, %s12589_s20 }
 0x45c   : > { %10607 = vmatpush3.bf16.xpose.msk.msra.mxu0 %vm13005_vm1, %v10602_v10  ;;  %v2573_v15 = vpop.permute.xlu0 %2572 }
 0x45d   : > { %10610 = vmatprep.subr.msk.bf16.mxu0 %vm13005_vm1, %v10608_v14 }
 0x460   : > { %v2577_v4 = vpop.permute.xlu0 %2576 }
 0x464   : > { %10613 = vmatpush3.bf16.xpose.msk.msra.mxu0 %vm13005_vm1, %v10608_v14  ;;  %v2903_v26 = vpop.permute.xlu0 %2902 }
 0x46d   : > { %v1802_v7 = vpop.xlane.xlu1 %1801 }
 0x46e   : > { %12003 = vrcp.f32 %v1802_v7  ;;  %v2738_v7 = vpop.permute.xlu0 %2737 }
 0x471   : > { %v2406_v43 = vpop.permute.xlu1 %2405 }
 0x472   : > { %9589 = vmatmul.mubr.msk.f32.gmra.mrb[72].mxu0 %vm904_vm0, %v2406_v43  ;;  %v11226_v43 = vunpack.i.h.bf16 %v11224_v51  ;;  %v2742_v32 = vpop.permute.xlu0 %2741 }
 0x473   : > { %9591 = vmatprep.mubr.msk.f32.mxu0 %vm904_vm0, %v2408_v16  ;;  %v11225_v16 = vunpack.i.l.bf16 %v11224_v51 }
 0x475   : > { %v2410_v10 = vpop.permute.xlu1 %2409 }
 0x476   : > { %9592 = vmatmul.mubr.msk.f32.gmra.mrb[74].mxu0 %vm904_vm0, %v2410_v10 }
 0x478   : > { %v12004_v20 = vpop.eup %12003 }
 0x479   : > { %v2734_v40 = vpop.permute.xlu1 %2733  ;;  %v1868_v14 = vmul.f32 %v12004_v20, %v13963_v23  ;;  %v10620_v23 = vpack.c.bf16 %v11226_v43, %v11225_v16  ;;  %v17295_v20 = vld [vmem:[#allocation84_spill] sm:$0xff] }
 0x47a   : > { %9638 = vmatprep.mubr.msk.f32.mxu0 %vm904_vm0, %v2734_v40  ;;  %v11231_v40 = vunpack.i.h.bf16 %v11229_v9 }
 0x47b   : > { %9563 = vmatprep.mubr.msk.f32.mxu1 %vm1517_vm2, %v1868_v14  ;;  %9639 = vmatmul.mubr.msk.f32.vlgmr.msra.gmra.mrb[76].mxu0 %vm904_vm0, %v2736_v39  ;;  %v11230_v39 = vunpack.i.l.bf16 %v11229_v9 }
 0x47c   : > { %9564 = vmatmul.mubr.msk.f32.gmra.mrb[90].mxu1 %vm1517_vm2, %v1869_v27  ;;  %9641 = vmatprep.mubr.msk.f32.mxu0 %vm904_vm0, %v2738_v7 }
 0x47d   : > { %v2569_v10 = vpop.permute.xlu1 %2568  ;;  %9610 = vmatprep.mubr.msk.f32.mxu1 %vm904_vm0, %v17294_v63  ;;  %v10626_v63 = vpack.c.bf16 %v11231_v40, %v11230_v39 }
 0x480   : > { %9611 = vmatmul.mubr.msk.f32.vlgmr.msra.gmra.mrb[92].mxu1 %vm904_vm0, %v17295_v20 }
 0x481   : > { %10619 = vmatpush3.bf16.xpose.msk.msra.mxu1 %vm13005_vm1, %v14115_v46  ;;  %v11234_v24 = vpop.permute.xlu1 %11233  ;;  %9613 = vmatprep.mubr.msk.f32.mxu1 %vm904_vm0, %v2569_v10 }
 0x482   : > { %10622 = vmatprep.subr.msk.bf16.mxu1 %vm13005_vm1, %v10620_v23  ;;  %v11236_v14 = vunpack.i.h.bf16 %v11234_v24  ;;  %v11235_v9 = vunpack.i.l.bf16 %v11234_v24 }
 0x484   : > { %9614 = vmatmul.mubr.msk.f32.gmra.mrb[94].mxu1 %vm904_vm0, %v2571_v58  ;;  %v10632_v27 = vpack.c.bf16 %v11236_v14, %v11235_v9 }
 0x485   : > { %v2575_v51 = vpop.permute.xlu1 %2574  ;;  %9616 = vmatprep.mubr.msk.f32.mxu1 %vm904_vm0, %v2573_v15  ;;  %v2746_v15 = vpop.permute.xlu0 %2745 }
 0x488   : > { %9617 = vmatmul.mubr.msk.f32.gmra.mrb[96].mxu1 %vm904_vm0, %v2575_v51 }
 0x489   : > { %10625 = vmatpush3.bf16.xpose.msk.msra.mxu1 %vm13005_vm1, %v10620_v23  ;;  %v2579_v46 = vpop.permute.xlu1 %2578  ;;  %9619 = vmatprep.mubr.msk.f32.mxu1 %vm904_vm0, %v2577_v4  ;;  %v2907_v4 = vpop.permute.xlu0 %2906 }
 0x48a   : > { %10628 = vmatprep.subr.msk.bf16.mxu1 %vm13005_vm1, %v10626_v63 }
 0x48c   : > { %9620 = vmatmul.mubr.msk.f32.gmra.mrb[98].mxu1 %vm904_vm0, %v2579_v46 }
 0x48d   : > { %v2905_v58 = vpop.permute.xlu1 %2904  ;;  %9666 = vmatprep.mubr.msk.f32.mxu1 %vm904_vm0, %v2903_v26  ;;  %v2911_v20 = vpop.permute.xlu0 %2910 }
 0x491   : > { %10631 = vmatpush3.bf16.xpose.msk.msra.mxu1 %vm13005_vm1, %v10626_v63  ;;  %v2740_v7 = vpop.permute.xlu1 %2739  ;;  %v2915_v63 = vpop.permute.xlu0 %2914 }
 0x492   : > { %10634 = vmatprep.subr.msk.bf16.mxu1 %vm13005_vm1, %v10632_v27  ;;  %9642 = vmatmul.mubr.msk.f32.gmra.mrb[78].mxu0 %vm904_vm0, %v2740_v7 }
 0x493   : > { %9644 = vmatprep.mubr.msk.f32.mxu0 %vm904_vm0, %v2742_v32 }
 0x495   : > { %v2744_v43 = vpop.permute.xlu1 %2743  ;;  %v11244_v9 = vpop.permute.xlu0 %11243 }
 0x496   : > { %v14228_v16 = vpop.f32.mrb[52].mxu0  ;;  %9645 = vmatmul.mubr.msk.f32.gmra.mrb[80].mxu0 %vm904_vm0, %v2744_v43  ;;  %v11245_v7 = vunpack.i.l.bf16 %v11244_v9 }
 0x497   : > { %17296 = vst [vmem:[#allocation73_spill] sm:$0xff] %v14228_v16  ;;  %v14231_v26 = vpop.f32.mrb[53].mxu0  ;;  %9647 = vmatprep.mubr.msk.f32.mxu0 %vm904_vm0, %v2746_v15 }
 0x498   : > { %17297 = vst [vmem:[#allocation75_spill] sm:$0xff] %v14231_v26 }
 0x499   : > { %10637 = vmatpush3.bf16.xpose.msk.msra.mxu1 %vm13005_vm1, %v10632_v27  ;;  %v2748_v10 = vpop.permute.xlu1 %2747 }
 0x49a   : > { %v14236_v23 = vpop.f32.mrb[54].mxu0  ;;  %9648 = vmatmul.mubr.msk.f32.gmra.mrb[82].mxu0 %vm904_vm0, %v2748_v10 }
 0x49b   : > { %17298 = vst [vmem:[#allocation86_spill] sm:$0xff] %v14236_v23  ;;  %v14239_v24 = vpop.f32.mrb[55].mxu0 }
 0x49c   : > { %17299 = vst [vmem:[#allocation77_spill] sm:$0xff] %v14239_v24 }
 0x49d   : > { %v2909_v40 = vpop.permute.xlu1 %2908 }
 0x49e   : > { %v14241_v39 = vpop.f32.mrb[56].mxu0 }
 0x49f   : > { %17300 = vst [vmem:[#allocation30_spill] sm:$0xff] %v14241_v39  ;;  %v14243_v51 = vpop.f32.mrb[57].mxu0 }
 0x4a0   : > { %17301 = vst [vmem:[#allocation32_spill] sm:$0xff] %v14243_v51  ;;  %9667 = vmatmul.mubr.msk.f32.vlgmr.msra.gmra.mrb[100].mxu1 %vm904_vm0, %v2905_v58  ;;  %v11246_v58 = vunpack.i.h.bf16 %v11244_v9 }
 0x4a1   : > { %9669 = vmatprep.mubr.msk.f32.mxu1 %vm904_vm0, %v2907_v4  ;;  %v2913_v32 = vpop.permute.xlu1 %2912 }
 0x4a4   : > { %9670 = vmatmul.mubr.msk.f32.gmra.mrb[102].mxu1 %vm904_vm0, %v2909_v40  ;;  %v11254_v40 = vpop.permute.xlu0 %11253 }
 0x4a5   : > { %9672 = vmatprep.mubr.msk.f32.mxu1 %vm904_vm0, %v2911_v20  ;;  %v2917_v46 = vpop.permute.xlu1 %2916 }
 0x4a6   : > { %v14249_v14 = vpop.f32.mrb[58].mxu0 }
 0x4a7   : > { %17302 = vst [vmem:[#allocation80_spill] sm:$0xff] %v14249_v14  ;;  %v14251_v15 = vpop.f32.mrb[59].mxu0  ;;  %v10642_v14 = vpack.c.bf16 %v11246_v58, %v11245_v7 }
 0x4a8   : > { %17303 = vst [vmem:[#allocation88_spill] sm:$0xff] %v14251_v15  ;;  %9673 = vmatmul.mubr.msk.f32.gmra.mrb[104].mxu1 %vm904_vm0, %v2913_v32  ;;  %v11256_v15 = vunpack.i.h.bf16 %v11254_v40  ;;  %v11255_v32 = vunpack.i.l.bf16 %v11254_v40  ;;  %v11264_v9 = vpop.permute.xlu0 %11263 }
 0x4a9   : > { %9675 = vmatprep.mubr.msk.f32.mxu1 %vm904_vm0, %v2915_v63  ;;  %v11239_v27 = vpop.permute.xlu1 %11238  ;;  %v11265_v51 = vunpack.i.l.bf16 %v11264_v9 }
 0x4aa   : > { %v11241_v43 = vunpack.i.h.bf16 %v11239_v27  ;;  %v11240_v4 = vunpack.i.l.bf16 %v11239_v27 }
 0x4ac   : > { %9676 = vmatmul.mubr.msk.f32.gmra.mrb[106].mxu1 %vm904_vm0, %v2917_v46  ;;  %v10638_v10 = vpack.c.bf16 %v11241_v43, %v11240_v4  ;;  %v10650_v43 = vpack.c.bf16 %v11256_v15, %v11255_v32  ;;  %v11266_v4 = vunpack.i.h.bf16 %v11264_v9 }
 0x4ad   : > { %v11249_v20 = vpop.permute.xlu1 %11248 }
 0x4ae   : > { %v11251_v26 = vunpack.i.h.bf16 %v11249_v20  ;;  %v11250_v16 = vunpack.i.l.bf16 %v11249_v20  ;;  %10639 = vmatprep.subr.bf16.mxu0 %v10638_v10 }
 0x4af   : > { %10641 = vmatpush3.bf16.msra.mxu0 %v10638_v10 }
 0x4b0   : > { %10643 = vmatprep.subr.bf16.mxu0 %v10642_v14  ;;  %v10646_v39 = vpack.c.bf16 %v11251_v26, %v11250_v16 }
 0x4b1   : > { %v11259_v23 = vpop.permute.xlu1 %11258 }
 0x4b2   : > { %v11261_v63 = vunpack.i.h.bf16 %v11259_v23  ;;  %v11260_v24 = vunpack.i.l.bf16 %v11259_v23 }
 0x4b3   : > { %10645 = vmatpush3.bf16.msra.mxu0 %v10642_v14 }
 0x4b4   : > { %10647 = vmatprep.subr.bf16.mxu0 %v10646_v39  ;;  %v10654_v27 = vpack.c.bf16 %v11261_v63, %v11260_v24  ;;  %v14260_v24 = vpack.c.bf16 %v11266_v4, %v11265_v51 }
 0x4b5   : > { %v11269_v46 = vpop.permute.xlu1 %11268 }
 0x4b6   : > { %v11271_v59 = vunpack.i.h.bf16 %v11269_v46  ;;  %v11270_v20 = vunpack.i.l.bf16 %v11269_v46  ;;  %10655 = vmatprep.subr.bf16.mxu1 %v10654_v27  ;;  %17306 = vst [vmem:[#allocation85_spill] sm:$0xff] %v14260_v24 }
 0x4b7   : > { %v14256_v58 = vpop.f32.mrb[76].mxu1  ;;  %10649 = vmatpush3.bf16.msra.mxu0 %v10646_v39  ;;  %10657 = vmatpush3.bf16.msra.mxu1 %v10654_v27 }
 0x4b8   : > { %17304 = vst [vmem:[#allocation83_spill] sm:$0xff] %v14256_v58  ;;  %v14258_v7 = vpop.f32.mrb[77].mxu1  ;;  %10651 = vmatprep.subr.bf16.mxu0 %v10650_v43  ;;  %v10658_v23 = vpack.c.bf16 %v11271_v59, %v11270_v20 }
 0x4b9   : > { %17305 = vst [vmem:[#allocation89_spill] sm:$0xff] %v14258_v7  ;;  %v11279_v16 = vpop.permute.xlu1 %11278 }
 0x4ba   : > { %v11281_v26 = vunpack.i.h.bf16 %v11279_v16  ;;  %v11280_v14 = vunpack.i.l.bf16 %v11279_v16  ;;  %10659 = vmatprep.subr.bf16.mxu1 %v10658_v23 }
 0x4bb   : > { %v14262_v15 = vpop.f32.mrb[78].mxu1  ;;  %10653 = vmatpush3.bf16.msra.mxu0 %v10650_v43  ;;  %10661 = vmatpush3.bf16.msra.mxu1 %v10658_v23 }
 0x4bc   : > { %17307 = vst [vmem:[#allocation90_spill] sm:$0xff] %v14262_v15  ;;  %v14264_v10 = vpop.f32.mrb[79].mxu1  ;;  %10671 = vmatprep.subr.bf16.mxu0 %v14260_v24  ;;  %v10662_v39 = vpack.c.bf16 %v11281_v26, %v11280_v14 }
 0x4bd   : > { %17308 = vst [vmem:[#allocation91_spill] sm:$0xff] %v14264_v10  ;;  %v11289_v40 = vpop.permute.xlu1 %11288 }
 0x4be   : > { %v11291_v32 = vunpack.i.h.bf16 %v11289_v40  ;;  %v11290_v63 = vunpack.i.l.bf16 %v11289_v40  ;;  %10663 = vmatprep.subr.bf16.mxu1 %v10662_v39 }
 0x4bf   : > { %v14267_v59 = vpop.f32.mrb[80].mxu1  ;;  %10665 = vmatpush3.bf16.msra.mxu1 %v10662_v39 }
 0x4c0   : > { %17309 = vst [vmem:[#allocation82_spill] sm:$0xff] %v14267_v59  ;;  %v14269_v9 = vpop.f32.mrb[81].mxu1  ;;  %v10666_v51 = vpack.c.bf16 %v11291_v32, %v11290_v63  ;;  %v14319_v59 = vld [vmem:[#allocation8 + $0x40] sm:$0xff] }
 0x4c1   : > { %17310 = vst [vmem:[#allocation93_spill] sm:$0xff] %v14269_v9  ;;  %v11299_v27 = vpop.permute.xlu1 %11298 }
 0x4c2   : > { %v11301_v46 = vunpack.i.h.bf16 %v11299_v27  ;;  %v11300_v4 = vunpack.i.l.bf16 %v11299_v27  ;;  %10667 = vmatprep.subr.bf16.mxu1 %v10666_v51 }
 0x4c3   : > { %v14271_v43 = vpop.f32.mrb[82].mxu1  ;;  %10669 = vmatpush3.bf16.msra.mxu1 %v10666_v51 }
 0x4c4   : > { %17311 = vst [vmem:[#allocation81_spill] sm:$0xff] %v14271_v43  ;;  %v14273_v20 = vpop.f32.mrb[83].mxu1  ;;  %v14275_v23 = vpack.c.bf16 %v11301_v46, %v11300_v4 }
 0x4c5   : > { %17312 = vst [vmem:[#allocation79_spill] sm:$0xff] %v14273_v20 }
 0x4c6   : > { %17313 = vst [vmem:[#allocation92_spill] sm:$0xff] %v14275_v23  ;;  %10687 = vmatprep.subr.bf16.mxu1 %v14275_v23 }
 0x4d2   : > { %v14278_v16 = vpop.f32.mrb[60].mxu0 }
 0x4d3   : > { %17314 = vst [vmem:[#allocation87_spill] sm:$0xff] %v14278_v16  ;;  %v14280_v26 = vpop.f32.mrb[61].mxu0 }
 0x4d4   : > { %17315 = vst [vmem:[#allocation84_spill] sm:$0xff] %v14280_v26  ;;  %v14302_v26 = vld [vmem:[#allocation8 + $0x48] sm:$0xff] }
 0x4d6   : > { %v14282_v14 = vpop.f32.mrb[84].mxu1 }
 0x4d7   : > { %17316 = vst [vmem:[#allocation94_spill] sm:$0xff] %v14282_v14  ;;  %v14284_v39 = vpop.f32.mrb[85].mxu1 }
 0x4d8   : > { %17317 = vst [vmem:[#allocation95_spill] sm:$0xff] %v14284_v39 }
 0x4da   : > { %v14286_v40 = vpop.f32.mrb[62].mxu0 }
 0x4db   : > { %17318 = vst [vmem:[#allocation96_spill] sm:$0xff] %v14286_v40  ;;  %v14288_v32 = vpop.f32.mrb[63].mxu0 }
 0x4dc   : > { %17319 = vst [vmem:[#allocation97_spill] sm:$0xff] %v14288_v32 }
 0x4de   : > { %v14290_v63 = vpop.f32.mrb[86].mxu1 }
 0x4df   : > { %17320 = vst [vmem:[#allocation98_spill] sm:$0xff] %v14290_v63  ;;  %v14292_v51 = vpop.f32.mrb[87].mxu1 }
 0x4e0   : > { %17321 = vst [vmem:[#allocation99_spill] sm:$0xff] %v14292_v51 }
 0x4ea   : > { %v14294_v27 = vpop.f32.mrb[64].mxu0 }
 0x4eb   : > { %17322 = vst [vmem:[#allocation100_spill] sm:$0xff] %v14294_v27  ;;  %v14296_v46 = vpop.f32.mrb[65].mxu0 }
 0x4ec   : > { %17323 = vst [vmem:[#allocation101_spill] sm:$0xff] %v14296_v46 }
 0x51a   : > { %v14298_v4 = vpop.f32.mrb[66].mxu0 }
 0x51b   : > { %17324 = vst [vmem:[#allocation102_spill] sm:$0xff] %v14298_v4  ;;  %v14300_v16 = vpop.f32.mrb[67].mxu0 }
 0x51c   : > { %17325 = vst [vmem:[#allocation103_spill] sm:$0xff] %v14300_v16 }
 0x51e   : > { %v14304_v14 = vpop.f32.mrb[88].mxu1  ;;  %v9584_v39 = vpop.f32.mrb[68].mxu0 }
 0x51f   : > { %17326 = vst [vmem:[#allocation104_spill] sm:$0xff] %v14304_v14  ;;  %v14307_v40 = vadd.f32 %v9584_v39, %v14302_v26  ;;  %v14309_v32 = vpop.f32.mrb[89].mxu1  ;;  %v2525_v63 = vpop.f32.mrb[69].mxu0 }
 0x520   : > { %17327 = vst [vmem:[#allocation105_spill] sm:$0xff] %v14309_v32  ;;  %v14325_v58 = vadd.f32 %v2525_v63, %v14319_v59 }
 0x521   : > { %v3074_v51 = vsel %vm1517_vm2, %v14307_v40, -inf }
 0x522   : > { %3075 = vmax.xlane.f32.xlu1 %v3074_v51  ;;  %v9587_v27 = vpop.f32.mrb[70].mxu0  ;;  %v3071_v63 = vsel %vm1517_vm2, %v14325_v58, -inf }
 0x523   : > { %v2535_v46 = vpop.f32.mrb[71].mxu0 }
 0x545   : > { %v9590_v4 = vpop.f32.mrb[72].mxu0 }
 0x546   : > { %v2545_v43 = vpop.f32.mrb[73].mxu0 }
 0x549   : > { %v9593_v16 = vpop.f32.mrb[74].mxu0 }
 0x54a   : > { %v2555_v20 = vpop.f32.mrb[75].mxu0 }
 0x54e   : > { %v9640_v15 = vpop.f32.mrb[76].mxu0 }
 0x54f   : > { %v14313_v10 = vpop.f32.mrb[90].mxu1  ;;  %v14315_v14 = vpop.f32.mrb[77].mxu0 }
 0x550   : > { %17328 = vst [vmem:[#allocation106_spill] sm:$0xff] %v14313_v10  ;;  %v14317_v39 = vpop.f32.mrb[91].mxu1  ;;  %v14331_v10 = vld [vmem:[#allocation8 + $0x68] sm:$0xff] }
 0x551   : > { %17329 = vst [vmem:[#allocation107_spill] sm:$0xff] %v14317_v39 }
 0x553   : > { %v9612_v32 = vpop.f32.mrb[92].mxu1 }
 0x554   : > { %v14322_v9 = vadd.f32 %v9612_v32, %v14302_v26  ;;  %v2694_v51 = vpop.f32.mrb[93].mxu1  ;;  %v14337_v32 = vadd.f32 %v9590_v4, %v14331_v10 }
 0x555   : > { %v14340_v21 = vadd.f32 %v2694_v51, %v14319_v59 }
 0x556   : > { %v3098_v7 = vsel %vm1517_vm2, %v14322_v9, -inf  ;;  %v3086_v51 = vsel %vm1517_vm2, %v14337_v32, -inf }
 0x557   : > { %3099 = vmax.xlane.f32.xlu0 %v3098_v7  ;;  %v9615_v12 = vpop.f32.mrb[94].mxu1  ;;  %v3095_v4 = vsel %vm1517_vm2, %v14340_v21, -inf }
 0x558   : > { %v14334_v39 = vadd.f32 %v9615_v12, %v14329_v25  ;;  %v2704_v2 = vpop.f32.mrb[95].mxu1  ;;  %v14347_v12 = vadd.f32 %v9587_v27, %v14329_v25  ;;  %v14361_v27 = vadd.f32 %v2535_v46, %v14356_v11 }
 0x55a   : > { %v3104_v8 = vsel %vm1517_vm2, %v14334_v39, -inf  ;;  %v3080_v61 = vsel %vm1517_vm2, %v14347_v12, -inf }
 0x55b   : > { %3072 = vmax.xlane.f32.xlu0 %v3071_v63  ;;  %3105 = vmax.xlane.f32.xlu1 %v3104_v8  ;;  %v9618_v7 = vpop.f32.mrb[96].mxu1 }
 0x55c   : > { %v2714_v41 = vpop.f32.mrb[97].mxu1  ;;  %v14350_v1 = vadd.f32 %v9618_v7, %v14331_v10  ;;  %v14364_v7 = vadd.f32 %v9593_v16, %v14358_v44  ;;  %v3077_v16 = vsel %vm1517_vm2, %v14361_v27, -inf }
 0x55e   : > { %v3110_v53 = vsel %vm1517_vm2, %v14350_v1, -inf  ;;  %v3092_v3 = vsel %vm1517_vm2, %v14364_v7, -inf }
 0x55f   : > { %3096 = vmax.xlane.f32.xlu0 %v3095_v4  ;;  %3087 = vmax.xlane.f32.xlu1 %v3086_v51  ;;  %v9621_v8 = vpop.f32.mrb[98].mxu1  ;;  %v14371_v4 = vadd.f32 %v2704_v2, %v14356_v11  ;;  %v14388_v2 = vadd.f32 %v2555_v20, %v14382_v57 }
 0x560   : > { %v2724_v63 = vpop.f32.mrb[99].mxu1  ;;  %v14374_v51 = vadd.f32 %v9621_v8, %v14358_v44 }
 0x561   : > { %v3101_v45 = vsel %vm1517_vm2, %v14371_v4, -inf  ;;  %v3089_v34 = vsel %vm1517_vm2, %v14388_v2, -inf  ;;  %v14405_v36 = vadd.f32 %v2724_v63, %v14382_v57 }
 0x562   : > { %v3116_v62 = vsel %vm1517_vm2, %v14374_v51, -inf }
 0x563   : > { %3081 = vmax.xlane.f32.xlu0 %v3080_v61  ;;  %3111 = vmax.xlane.f32.xlu1 %v3110_v53  ;;  %v14385_v53 = vadd.f32 %v2545_v43, %v14380_v31  ;;  %v3113_v63 = vsel %vm1517_vm2, %v14405_v36, -inf }
 0x565   : > { %v9643_v19 = vpop.f32.mrb[78].mxu0  ;;  %v3083_v20 = vsel %vm1517_vm2, %v14385_v53, -inf }
 0x566   : > { %v2873_v46 = vpop.f32.mrb[79].mxu0 }
 0x567   : > { %3078 = vmax.xlane.f32.xlu0 %v3077_v16  ;;  %3093 = vmax.xlane.f32.xlu1 %v3092_v3  ;;  %v14395_v16 = vadd.f32 %v9640_v15, %v14302_v26  ;;  %v14398_v3 = vadd.f32 %v2714_v41, %v14380_v31 }
 0x569   : > { %v9646_v61 = vpop.f32.mrb[80].mxu0 }
 0x56a   : > { %v2883_v8 = vpop.f32.mrb[81].mxu0 }
 0x56b   : > { %3102 = vmax.xlane.f32.xlu0 %v3101_v45  ;;  %3117 = vmax.xlane.f32.xlu1 %v3116_v62  ;;  %v3107_v62 = vsel %vm1517_vm2, %v14398_v3, -inf  ;;  %v3122_v45 = vsel %vm1517_vm2, %v14395_v16, -inf }
 0x56d   : > { %v9649_v6 = vpop.f32.mrb[82].mxu0 }
 0x56e   : > { %v2893_v43 = vpop.f32.mrb[83].mxu0 }
 0x56f   : > { %3084 = vmax.xlane.f32.xlu0 %v3083_v20  ;;  %3090 = vmax.xlane.f32.xlu1 %v3089_v34  ;;  %v14416_v20 = vadd.f32 %v14315_v14, %v14319_v59  ;;  %v14419_v34 = vadd.f32 %v9643_v19, %v14329_v25 }
 0x571   : > { %v3128_v19 = vsel %vm1517_vm2, %v14419_v34, -inf  ;;  %v3119_v14 = vsel %vm1517_vm2, %v14416_v20, -inf }
 0x573   : > { %v9668_v41 = vpop.f32.mrb[100].mxu1  ;;  %3108 = vmax.xlane.f32.xlu0 %v3107_v62  ;;  %3123 = vmax.xlane.f32.xlu1 %v3122_v45 }
 0x574   : > { %v14412_v15 = vadd.f32 %v9668_v41, %v14302_v26  ;;  %v3032_v55 = vpop.f32.mrb[101].mxu1 }
 0x575   : > { %v14426_v26 = vadd.f32 %v3032_v55, %v14319_v59 }
 0x576   : > { %v3146_v23 = vsel %vm1517_vm2, %v14412_v15, -inf }
 0x577   : > { %v9671_v35 = vpop.f32.mrb[102].mxu1  ;;  %3114 = vmax.xlane.f32.xlu0 %v3113_v63  ;;  %3147 = vmax.xlane.f32.xlu1 %v3146_v23  ;;  %v14436_v63 = vadd.f32 %v2873_v46, %v14356_v11  ;;  %v14439_v23 = vadd.f32 %v9646_v61, %v14331_v10 }
 0x578   : > { %v3042_v62 = vpop.f32.mrb[103].mxu1  ;;  %v14429_v45 = vadd.f32 %v9671_v35, %v14329_v25  ;;  %v3143_v35 = vsel %vm1517_vm2, %v14426_v26, -inf }
 0x579   : > { %v3134_v61 = vsel %vm1517_vm2, %v14439_v23, -inf  ;;  %v3125_v24 = vsel %vm1517_vm2, %v14436_v63, -inf }
 0x57a   : > { %v3152_v55 = vsel %vm1517_vm2, %v14429_v45, -inf }
 0x57b   : > { %v9674_v41 = vpop.f32.mrb[104].mxu1  ;;  %3129 = vmax.xlane.f32.xlu1 %v3128_v19  ;;  %3120 = vmax.xlane.f32.xlu0 %v3119_v14  ;;  %v14449_v14 = vadd.f32 %v3042_v62, %v14356_v11 }
 0x57c   : > { %v3052_v13 = vpop.f32.mrb[105].mxu1  ;;  %v14452_v46 = vadd.f32 %v9674_v41, %v14331_v10 }
 0x57d   : > { %v3149_v10 = vsel %vm1517_vm2, %v14449_v14, -inf  ;;  %v14469_v62 = vadd.f32 %v3052_v13, %v14380_v31 }
 0x57e   : > { %v3158_v11 = vsel %vm1517_vm2, %v14452_v46, -inf }
 0x57f   : > { %v9677_v25 = vpop.f32.mrb[106].mxu1  ;;  %3153 = vmax.xlane.f32.xlu1 %v3152_v55  ;;  %3144 = vmax.xlane.f32.xlu0 %v3143_v35  ;;  %v14459_v55 = vadd.f32 %v2883_v8, %v14380_v31  ;;  %v14462_v35 = vadd.f32 %v9649_v6, %v14358_v44  ;;  %v14479_v8 = vadd.f32 %v2893_v43, %v14382_v57  ;;  %v3155_v13 = vsel %vm1517_vm2, %v14469_v62, -inf  ;;  %v17334_v43 = vld [vmem:[#allocation36_spill] sm:$0xff] }
 0x580   : > { %v3062_v59 = vpop.f32.mrb[107].mxu1  ;;  %v14472_v41 = vadd.f32 %v9677_v25, %v14358_v44  ;;  %v14487_v44 = vpop.permute.xlu1 %11303 }
 0x581   : > { %v14446_v19 = vadd.f32 %v3062_v59, %v14382_v57  ;;  %v3131_v6 = vsel %vm1517_vm2, %v14459_v55, -inf  ;;  %v3137_v31 = vsel %vm1517_vm2, %v14479_v8, -inf  ;;  %17330 = vst [vmem:[#allocation108_spill] sm:$0xff] %v14487_v44 }
 0x582   : > { %v3164_v59 = vsel %vm1517_vm2, %v14472_v41, -inf }
 0x583   : > { %3135 = vmax.xlane.f32.xlu1 %v3134_v61  ;;  %3126 = vmax.xlane.f32.xlu0 %v3125_v24  ;;  %v3140_v24 = vsel %vm1517_vm2, %v14462_v35, -inf  ;;  %v17332_v61 = vld [vmem:[#allocation33_spill] sm:$0xff] }
 0x584   : > { %v14489_v25 = vpop.permute.xlu1 %11308 }
 0x585   : > { %17331 = vst [vmem:[#allocation109_spill] sm:$0xff] %v14489_v25 }
 0x587   : > { %3159 = vmax.xlane.f32.xlu1 %v3158_v11  ;;  %3150 = vmax.xlane.f32.xlu0 %v3149_v10  ;;  %v17336_v10 = vld [vmem:[#allocation15_spill] sm:$0xff] }
 0x588   : > { %v14493_v57 = vpop.permute.xlu1 %11313 }
 0x589   : > { %17333 = vst [vmem:[#allocation110_spill] sm:$0xff] %v14493_v57 }
 0x58b   : > { %3141 = vmax.xlane.f32.xlu1 %v3140_v24  ;;  %3132 = vmax.xlane.f32.xlu0 %v3131_v6  ;;  %v17337_v24 = vld [vmem:[#allocation31_spill] sm:$0xff]  ;;  %v17338_v6 = vld [vmem:[#allocation16_spill] sm:$0xff] }
 0x58c   : > { %v14497_v11 = vpop.permute.xlu1 %11318 }
 0x58d   : > { %17335 = vst [vmem:[#allocation111_spill] sm:$0xff] %v14497_v11  ;;  %v14512_v11 = vpop.permute.xlu0 %11273 }
 0x58f   : > { %3165 = vmax.xlane.f32.xlu1 %v3164_v59  ;;  %3156 = vmax.xlane.f32.xlu0 %v3155_v13 }
 0x590   : > { %v14505_v59 = vpop.permute.xlu1 %11328 }
 0x591   : > { %17339 = vst [vmem:[#allocation112_spill] sm:$0xff] %v14505_v59 }
 0x593   : > { %3138 = vmax.xlane.f32.xlu0 %v3137_v31 }
 0x594   : > { %v14507_v13 = vpop.permute.xlu1 %11338 }
 0x595   : > { %17340 = vst [vmem:[#allocation113_spill] sm:$0xff] %v14507_v13 }
 0x5a0   : > { %11348 = vrot.lane.b32.xlu1 %v17332_v61, %s12589_s20 }
 0x5a4   : > { %11353 = vrot.lane.b32.xlu1 %v17334_v43, %s12589_s20  ;;  %v3161_v43 = vsel %vm1517_vm2, %v14446_v19, -inf }
 0x5a8   : > { %4076 = vrot.lane.b32.xlu1 %v17336_v10, %s12589_s20 }
 0x5a9   : > { %11343 = vrot.lane.b32.xlu0 %v17337_v24, %s12589_s20  ;;  %v14516_v24 = vpop.permute.xlu0 %11283 }
 0x5aa   : > { %17342 = vst [vmem:[#allocation115_spill] sm:$0xff] %v14516_v24 }
 0x5ac   : > { %4078 = vrot.lane.b32.xlu1 %v17338_v6, %s12589_s20 }
 0x5ad   : > { %v14520_v13 = vpop.permute.xlu0 %11293 }
 0x5ae   : > { %17343 = vst [vmem:[#allocation116_spill] sm:$0xff] %v14520_v13 }
 0x5af   : > { %v3076_v31 = vpop.xlane.xlu1 %3075 }
 0x5b0   : > { %v3168_v61 = vsub.f32 %v14307_v40, %v3076_v31 }
 0x5b1   : > { %v14522_v59 = vpop.permute.xlu0 %11323 }
 0x5b2   : > { %v3201_v25 = vmul.f32 1.442695, %v3168_v61  ;;  %17344 = vst [vmem:[#allocation117_spill] sm:$0xff] %v14522_v59 }
 0x5b4   : > { %12005 = vpow2.f32 %v3201_v25 }
 0x5b5   : > { %v14524_v40 = vpop.permute.xlu0 %11333 }
 0x5b6   : > { %17345 = vst [vmem:[#allocation118_spill] sm:$0xff] %v14524_v40 }
 0x5be   : > { %v14514_v10 = vpop.eup %12005 }
 0x5bf   : > { %17341 = vst [vmem:[#allocation114_spill] sm:$0xff] %v14514_v10  ;;  %v3266_v6 = vsel %vm1517_vm2, %v14514_v10, 0.0 }
 0x5c8   : > { %3162 = vmax.xlane.f32.xlu0 %v3161_v43 }
 0x5d0   : > { %3267 = vadd.xlane.f32.xlu1 %v3266_v6 }
 0x5e4   : > { %v3100_v25 = vpop.xlane.xlu0 %3099 }
 0x5e5   : > { %v3176_v61 = vsub.f32 %v14322_v9, %v3100_v25 }
 0x5e7   : > { %v3217_v31 = vmul.f32 1.442695, %v3176_v61 }
 0x5e8   : > { %v3106_v57 = vpop.xlane.xlu1 %3105  ;;  %v3073_v43 = vpop.xlane.xlu0 %3072 }
 0x5e9   : > { %12007 = vpow2.f32 %v3217_v31  ;;  %v3178_v44 = vsub.f32 %v14334_v39, %v3106_v57  ;;  %v3167_v52 = vsub.f32 %v14325_v58, %v3073_v43 }
 0x5eb   : > { %v3221_v24 = vmul.f32 1.442695, %v3178_v44  ;;  %v3199_v56 = vmul.f32 1.442695, %v3167_v52 }
 0x5ec   : > { %v3088_v6 = vpop.xlane.xlu1 %3087  ;;  %v3097_v10 = vpop.xlane.xlu0 %3096 }
 0x5ed   : > { %12009 = vpow2.f32 %v3221_v24  ;;  %v3172_v59 = vsub.f32 %v14337_v32, %v3088_v6  ;;  %v3175_v40 = vsub.f32 %v14340_v21, %v3097_v10 }
 0x5ee   : > { %12011 = vpow2.f32 %v3199_v56 }
 0x5ef   : > { %v3209_v13 = vmul.f32 1.442695, %v3172_v59  ;;  %v3215_v9 = vmul.f32 1.442695, %v3175_v40 }
 0x5f0   : > { %v3112_v25 = vpop.xlane.xlu1 %3111  ;;  %v3082_v61 = vpop.xlane.xlu0 %3081 }
 0x5f1   : > { %12013 = vpow2.f32 %v3209_v13  ;;  %v3180_v31 = vsub.f32 %v14350_v1, %v3112_v25  ;;  %v3170_v39 = vsub.f32 %v14347_v12, %v3082_v61 }
 0x5f2   : > { %12015 = vpow2.f32 %v3215_v9 }
 0x5f3   : > { %v14533_v58 = vpop.eup %12007  ;;  %v3225_v52 = vmul.f32 1.442695, %v3180_v31  ;;  %v3205_v44 = vmul.f32 1.442695, %v3170_v39 }
 0x5f4   : > { %v3094_v57 = vpop.xlane.xlu1 %3093  ;;  %v3079_v24 = vpop.xlane.xlu0 %3078  ;;  %v3290_v21 = vsel %vm1517_vm2, %v14533_v58, 0.0 }
 0x5f5   : > { %12017 = vpow2.f32 %v3225_v52  ;;  %v3169_v56 = vsub.f32 %v14361_v27, %v3079_v24  ;;  %3291 = vadd.xlane.f32.xlu1 %v3290_v21 }
 0x5f6   : > { %12019 = vpow2.f32 %v3205_v44 }
 0x5f7   : > { %v14538_v32 = vpop.eup %12009  ;;  %v3203_v1 = vmul.f32 1.442695, %v3169_v56 }
 0x5f8   : > { %v14540_v10 = vpop.eup %12011  ;;  %v3118_v12 = vpop.xlane.xlu1 %3117  ;;  %v3296_v13 = vsel %vm1517_vm2, %v14538_v32, 0.0 }
 0x5f9   : > { %v3103_v59 = vpop.xlane.xlu0 %3102  ;;  %v3182_v40 = vsub.f32 %v14374_v51, %v3118_v12  ;;  %3297 = vadd.xlane.f32.xlu1 %v3296_v13  ;;  %v3263_v27 = vsel %vm1517_vm2, %v14540_v10, 0.0  ;;  %12021 = vpow2.f32 %v3203_v1  ;;  %v3174_v12 = vsub.f32 %v14364_v7, %v3094_v57 }
 0x5fa   : > { %v3177_v43 = vsub.f32 %v14371_v4, %v3103_v59  ;;  %3264 = vadd.xlane.f32.xlu0 %v3263_v27 }
 0x5fb   : > { %v14548_v6 = vpop.eup %12013  ;;  %v3229_v9 = vmul.f32 1.442695, %v3182_v40  ;;  %v3213_v7 = vmul.f32 1.442695, %v3174_v12 }
 0x5fc   : > { %v3219_v25 = vmul.f32 1.442695, %v3177_v43  ;;  %v14550_v61 = vpop.eup %12015  ;;  %v3091_v31 = vpop.xlane.xlu1 %3090  ;;  %v3278_v52 = vsel %vm1517_vm2, %v14548_v6, 0.0 }
 0x5fd   : > { %v3085_v39 = vpop.xlane.xlu0 %3084  ;;  %12023 = vpow2.f32 %v3229_v9  ;;  %v3173_v4 = vsub.f32 %v14388_v2, %v3091_v31  ;;  %3279 = vadd.xlane.f32.xlu1 %v3278_v52  ;;  %v3287_v44 = vsel %vm1517_vm2, %v14550_v61, 0.0 }
 0x5fe   : > { %v3171_v51 = vsub.f32 %v14385_v53, %v3085_v39  ;;  %12025 = vpow2.f32 %v3219_v25  ;;  %3288 = vadd.xlane.f32.xlu0 %v3287_v44 }
 0x5ff   : > { %v14558_v24 = vpop.eup %12017  ;;  %v3211_v21 = vmul.f32 1.442695, %v3173_v4 }
 0x600   : > { %v3207_v56 = vmul.f32 1.442695, %v3171_v51  ;;  %v14560_v1 = vpop.eup %12019  ;;  %v3124_v13 = vpop.xlane.xlu1 %3123  ;;  %v3302_v2 = vsel %vm1517_vm2, %v14558_v24, 0.0 }
 0x601   : > { %v3109_v59 = vpop.xlane.xlu0 %3108  ;;  %12027 = vpow2.f32 %v3211_v21  ;;  %v3184_v40 = vsub.f32 %v14395_v16, %v3124_v13  ;;  %3303 = vadd.xlane.f32.xlu1 %v3302_v2  ;;  %v3272_v43 = vsel %vm1517_vm2, %v14560_v1, 0.0 }
 0x602   : > { %v3179_v53 = vsub.f32 %v14398_v3, %v3109_v59  ;;  %12029 = vpow2.f32 %v3207_v56  ;;  %3273 = vadd.xlane.f32.xlu0 %v3272_v43 }
 0x603   : > { %v3233_v9 = vmul.f32 1.442695, %v3184_v40  ;;  %v14569_v25 = vpop.eup %12021 }
 0x604   : > { %v3223_v27 = vmul.f32 1.442695, %v3179_v53  ;;  %v3148_v31 = vpop.xlane.xlu1 %3147  ;;  %v3269_v16 = vsel %vm1517_vm2, %v14569_v25, 0.0 }
 0x605   : > { %v3115_v57 = vpop.xlane.xlu0 %3114  ;;  %v3192_v3 = vsub.f32 %v14412_v15, %v3148_v31 }
 0x606   : > { %12031 = vpow2.f32 %v3223_v27  ;;  %v3181_v39 = vsub.f32 %v14405_v36, %v3115_v57  ;;  %3270 = vadd.xlane.f32.xlu0 %v3269_v16 }
 0x607   : > { %12033 = vpow2.f32 %v3233_v9  ;;  %v14575_v52 = vpop.eup %12023  ;;  %v3249_v4 = vmul.f32 1.442695, %v3192_v3 }
 0x608   : > { %v14577_v51 = vpop.eup %12025  ;;  %12035 = vpow2.f32 %v3213_v7  ;;  %v3227_v44 = vmul.f32 1.442695, %v3181_v39  ;;  %v3130_v21 = vpop.xlane.xlu1 %3129  ;;  %v3308_v12 = vsel %vm1517_vm2, %v14575_v52, 0.0 }
 0x609   : > { %v3121_v56 = vpop.xlane.xlu0 %3120  ;;  %3309 = vadd.xlane.f32.xlu1 %v3308_v12  ;;  %v3293_v15 = vsel %vm1517_vm2, %v14577_v51, 0.0  ;;  %12037 = vpow2.f32 %v3249_v4  ;;  %v3186_v57 = vsub.f32 %v14419_v34, %v3130_v21 }
 0x60a   : > { %v3183_v36 = vsub.f32 %v14416_v20, %v3121_v56  ;;  %3294 = vadd.xlane.f32.xlu0 %v3293_v15  ;;  %12039 = vpow2.f32 %v3227_v44 }
 0x60b   : > { %v14584_v59 = vpop.eup %12027  ;;  %v3237_v56 = vmul.f32 1.442695, %v3186_v57 }
 0x60c   : > { %v14586_v13 = vpop.eup %12029  ;;  %v3231_v2 = vmul.f32 1.442695, %v3183_v36  ;;  %v3154_v53 = vpop.xlane.xlu1 %3153  ;;  %v3281_v43 = vsel %vm1517_vm2, %v14584_v59, 0.0 }
 0x60d   : > { %v3145_v40 = vpop.xlane.xlu0 %3144  ;;  %3282 = vadd.xlane.f32.xlu1 %v3281_v43  ;;  %v3275_v20 = vsel %vm1517_vm2, %v14586_v13, 0.0  ;;  %v3194_v12 = vsub.f32 %v14429_v45, %v3154_v53 }
 0x60e   : > { %v3191_v27 = vsub.f32 %v14426_v26, %v3145_v40  ;;  %3276 = vadd.xlane.f32.xlu0 %v3275_v20  ;;  %12041 = vpow2.f32 %v3231_v2 }
 0x60f   : > { %v3253_v45 = vmul.f32 1.442695, %v3194_v12 }
 0x610   : > { %v14593_v9 = vpop.eup %12031  ;;  %v3247_v31 = vmul.f32 1.442695, %v3191_v27  ;;  %v3136_v39 = vpop.xlane.xlu1 %3135 }
 0x611   : > { %v14595_v7 = vpop.eup %12033  ;;  %v3127_v3 = vpop.xlane.xlu0 %3126  ;;  %v3299_v16 = vsel %vm1517_vm2, %v14593_v9, 0.0 }
 0x612   : > { %v3314_v26 = vsel %vm1517_vm2, %v14595_v7, 0.0  ;;  %v14602_v4 = vpop.eup %12035  ;;  %3300 = vadd.xlane.f32.xlu0 %v3299_v16  ;;  %12043 = vpow2.f32 %v3247_v31  ;;  %v3185_v53 = vsub.f32 %v14436_v63, %v3127_v3  ;;  %v3188_v31 = vsub.f32 %v14439_v23, %v3136_v39 }
 0x613   : > { %3315 = vadd.xlane.f32.xlu1 %v3314_v26  ;;  %v14604_v44 = vpop.eup %12037  ;;  %v3284_v40 = vsel %vm1517_vm2, %v14602_v4, 0.0  ;;  %12045 = vpow2.f32 %v3237_v56 }
 0x614   : > { %v3160_v34 = vpop.xlane.xlu1 %3159  ;;  %v3338_v2 = vsel %vm1517_vm2, %v14604_v44, 0.0  ;;  %v14613_v43 = vpop.eup %12039  ;;  %v3235_v16 = vmul.f32 1.442695, %v3185_v53 }
 0x615   : > { %v3151_v21 = vpop.xlane.xlu0 %3150  ;;  %v3196_v36 = vsub.f32 %v14452_v46, %v3160_v34 }
 0x616   : > { %v3193_v15 = vsub.f32 %v14449_v14, %v3151_v21  ;;  %3285 = vadd.xlane.f32.xlu0 %v3284_v40  ;;  %v3305_v14 = vsel %vm1517_vm2, %v14613_v43, 0.0  ;;  %v3241_v21 = vmul.f32 1.442695, %v3188_v31 }
 0x617   : > { %3339 = vadd.xlane.f32.xlu1 %v3338_v2  ;;  %v3257_v57 = vmul.f32 1.442695, %v3196_v36 }
 0x618   : > { %v3251_v27 = vmul.f32 1.442695, %v3193_v15  ;;  %v14618_v46 = vpop.eup %12041  ;;  %v3142_v12 = vpop.xlane.xlu1 %3141 }
 0x619   : > { %v3133_v20 = vpop.xlane.xlu0 %3132  ;;  %v3311_v63 = vsel %vm1517_vm2, %v14618_v46, 0.0  ;;  %v3190_v15 = vsub.f32 %v14462_v35, %v3142_v12 }
 0x61a   : > { %12047 = vpow2.f32 %v3251_v27  ;;  %3306 = vadd.xlane.f32.xlu0 %v3305_v14  ;;  %v3187_v36 = vsub.f32 %v14459_v55, %v3133_v20 }
 0x61b   : > { %12049 = vpow2.f32 %v3253_v45  ;;  %v3245_v20 = vmul.f32 1.442695, %v3190_v15 }
 0x61c   : > { %12051 = vpow2.f32 %v3257_v57  ;;  %v14624_v3 = vpop.eup %12043  ;;  %v3239_v2 = vmul.f32 1.442695, %v3187_v36  ;;  %v3166_v40 = vpop.xlane.xlu1 %3165 }
 0x61d   : > { %v3157_v26 = vpop.xlane.xlu0 %3156  ;;  %12053 = vpow2.f32 %v3235_v16  ;;  %v3335_v23 = vsel %vm1517_vm2, %v14624_v3, 0.0  ;;  %v14629_v39 = vpop.eup %12045  ;;  %v3198_v57 = vsub.f32 %v14472_v41, %v3166_v40 }
 0x61e   : > { %v3195_v56 = vsub.f32 %v14469_v62, %v3157_v26  ;;  %3312 = vadd.xlane.f32.xlu0 %v3311_v63  ;;  %v3320_v27 = vsel %vm1517_vm2, %v14629_v39, 0.0 }
 0x620   : > { %v3255_v34 = vmul.f32 1.442695, %v3195_v56  ;;  %v3261_v56 = vmul.f32 1.442695, %v3198_v57 }
 0x621   : > { %v3139_v14 = vpop.xlane.xlu0 %3138 }
 0x622   : > { %12055 = vpow2.f32 %v3255_v34  ;;  %3336 = vadd.xlane.f32.xlu0 %v3335_v23  ;;  %v3189_v63 = vsub.f32 %v14479_v8, %v3139_v14  ;;  %v17348_v14 = vld [vmem:[#allocation21_spill] sm:$0xff] }
 0x623   : > { %12057 = vpow2.f32 %v3241_v21 }
 0x624   : > { %v14631_v62 = vpop.eup %12047  ;;  %12059 = vpow2.f32 %v3239_v2  ;;  %v3243_v21 = vmul.f32 1.442695, %v3189_v63 }
 0x625   : > { %v14636_v45 = vpop.eup %12049  ;;  %v3341_v55 = vsel %vm1517_vm2, %v14631_v62, 0.0  ;;  %12061 = vpow2.f32 %v3245_v20  ;;  %v17347_v20 = vld [vmem:[#allocation43_spill] sm:$0xff] }
 0x626   : > { %3321 = vadd.xlane.f32.xlu0 %v3320_v27  ;;  %v14640_v53 = vpop.eup %12051  ;;  %3342 = vadd.xlane.f32.xlu1 %v3341_v55  ;;  %v3344_v35 = vsel %vm1517_vm2, %v14636_v45, 0.0  ;;  %12063 = vpow2.f32 %v3261_v56  ;;  %v17350_v56 = vld [vmem:[#allocation34_spill] sm:$0xff] }
 0x627   : > { %v14645_v31 = vpop.eup %12053  ;;  %v3350_v16 = vsel %vm1517_vm2, %v14640_v53, 0.0  ;;  %12065 = vpow2.f32 %v3243_v21  ;;  %v17352_v21 = vld [vmem:[#allocation26_spill] sm:$0xff] }
 0x628   : > { %v3317_v41 = vsel %vm1517_vm2, %v14645_v31, 0.0 }
 0x62a   : > { %3345 = vadd.xlane.f32.xlu0 %v3344_v35  ;;  %3351 = vadd.xlane.f32.xlu1 %v3350_v16  ;;  %v17349_v35 = vld [vmem:[#allocation27_spill] sm:$0xff]  ;;  %v14686_v16 = vpop.permute.xlu0 %11343 }
 0x62c   : > { %v14649_v26 = vpop.eup %12055 }
 0x62d   : > { %v3347_v12 = vsel %vm1517_vm2, %v14649_v26, 0.0  ;;  %v14656_v34 = vpop.eup %12057 }
 0x62e   : > { %3318 = vadd.xlane.f32.xlu0 %v3317_v41  ;;  %3348 = vadd.xlane.f32.xlu1 %v3347_v12  ;;  %v3326_v36 = vsel %vm1517_vm2, %v14656_v34, 0.0  ;;  %v14660_v23 = vpop.eup %12059  ;;  %v17351_v41 = vld [vmem:[#allocation49_spill] sm:$0xff] }
 0x62f   : > { %v3323_v8 = vsel %vm1517_vm2, %v14660_v23, 0.0  ;;  %v14664_v15 = vpop.eup %12061 }
 0x630   : > { %v3332_v2 = vsel %vm1517_vm2, %v14664_v15, 0.0  ;;  %v14668_v40 = vpop.eup %12063 }
 0x631   : > { %17346 = vst [vmem:[#allocation119_spill] sm:$0xff] %v14668_v40  ;;  %v3356_v27 = vsel %vm1517_vm2, %v14668_v40, 0.0  ;;  %v14672_v55 = vpop.eup %12065  ;;  %v17356_v40 = vld [vmem:[#allocation115_spill] sm:$0xff] }
 0x632   : > { %3327 = vadd.xlane.f32.xlu0 %v3326_v36  ;;  %v3329_v57 = vsel %vm1517_vm2, %v14672_v55, 0.0 }
 0x636   : > { %3324 = vadd.xlane.f32.xlu0 %v3323_v8  ;;  %v14697_v8 = vpop.permute.xlu1 %11348 }
 0x63a   : > { %3333 = vadd.xlane.f32.xlu0 %v3332_v2  ;;  %v14703_v2 = vpop.permute.xlu1 %11353 }
 0x63e   : > { %3357 = vadd.xlane.f32.xlu0 %v3356_v27 }
 0x63f   : > { %11363 = vrot.lane.b32.xlu1 %v17347_v20, %s12589_s20 }
 0x642   : > { %3330 = vadd.xlane.f32.xlu0 %v3329_v57  ;;  %v14711_v57 = vpop.permute.xlu1 %4076 }
 0x643   : > { %11373 = vrot.lane.b32.xlu1 %v17348_v14, %s12589_s20 }
 0x647   : > { %4247 = vrot.lane.b32.xlu1 %v17349_v35, %s12589_s20  ;;  %v11286_v35 = vunpack.i.h.bf16 %v17356_v40 }
 0x64b   : > { %4082 = vrot.lane.b32.xlu1 %v13133_v33, %s12589_s20 }
 0x64f   : > { %11383 = vrot.lane.b32.xlu1 %v13067_v37, %s12589_s20  ;;  %v17354_v37 = vld [vmem:[#allocation114_spill] sm:$0xff] }
 0x655   : > { %v3163_v63 = vpop.xlane.xlu0 %3162 }
 0x656   : > { %v3197_v12 = vsub.f32 %v14446_v19, %v3163_v63  ;;  %v14717_v63 = vpop.permute.xlu1 %4078 }
 0x658   : > { %11358 = vrot.lane.b32.xlu0 %v17350_v56, %s12589_s20  ;;  %v3259_v36 = vmul.f32 1.442695, %v3197_v12 }
 0x65a   : > { %12067 = vpow2.f32 %v3259_v36 }
 0x65c   : > { %11368 = vrot.lane.b32.xlu0 %v17351_v41, %s12589_s20 }
 0x65d   : > { %v3268_v12 = vpop.xlane.xlu1 %3267 }
 0x65e   : > { %12069 = vrcp.f32 %v3268_v12 }
 0x660   : > { %4245 = vrot.lane.b32.xlu0 %v17352_v21, %s12589_s20 }
 0x664   : > { %4080 = vrot.lane.b32.xlu0 %v13121_v30, %s12589_s20  ;;  %v14705_v27 = vpop.eup %12067 }
 0x665   : > { %17353 = vst [vmem:[#allocation43_spill] sm:$0xff] %v14705_v27  ;;  %v3353_v19 = vsel %vm1517_vm2, %v14705_v27, 0.0  ;;  %v17357_v27 = vld [vmem:[#allocation29_spill] sm:$0xff] }
 0x668   : > { %11378 = vrot.lane.b32.xlu0 %v13017_v5, %s12589_s20 }
 0x66c   : > { %4084 = vrot.lane.b32.xlu0 %v13141_v38, %s12589_s20 }
 0x670   : > { %4088 = vrot.lane.b32.xlu0 %v13159_v50, %s12589_s20 }
 0x673   : > { %3354 = vadd.xlane.f32.xlu1 %v3353_v19 }
 0x674   : > { %11388 = vrot.lane.b32.xlu0 %v13087_v60, %s12589_s20 }
 0x678   : > { %4416 = vrot.lane.b32.xlu0 %v13409_v47, %s12589_s20 }
 0x67c   : > { %4251 = vrot.lane.b32.xlu0 %v13259_v42, %s12589_s20  ;;  %v17355_v42 = vld [vmem:[#allocation66_spill] sm:$0xff] }
 0x680   : > { %4253 = vrot.lane.b32.xlu0 %v13269_v18, %s12589_s20 }
 0x682   : > { %v3292_v36 = vpop.xlane.xlu1 %3291 }
 0x684   : > { %4257 = vrot.lane.b32.xlu0 %v17235_v17, %s12589_s20  ;;  %4086 = vrot.lane.b32.xlu1 %v17243_v48, %s12589_s20 }
 0x686   : > { %v3298_v19 = vpop.xlane.xlu1 %3297 }
 0x687   : > { %v3265_v60 = vpop.xlane.xlu0 %3264 }
 0x688   : > { %12071 = vrcp.f32 %v3265_v60  ;;  %4583 = vrot.lane.b32.xlu0 %v17237_v29, %s12589_s20  ;;  %4090 = vrot.lane.b32.xlu1 %v17245_v54, %s12589_s20  ;;  %v12070_v60 = vpop.eup %12069  ;;  %v11275_v29 = vunpack.i.l.bf16 %v14512_v11 }
 0x689   : > { %12073 = vrcp.f32 %v3292_v36  ;;  %v11276_v36 = vunpack.i.h.bf16 %v14512_v11  ;;  %v17358_v11 = vld [vmem:[#allocation108_spill] sm:$0xff] }
 0x68a   : > { %v3280_v18 = vpop.xlane.xlu1 %3279  ;;  %v11306_v14 = vunpack.i.h.bf16 %v17358_v11 }
 0x68b   : > { %v3289_v47 = vpop.xlane.xlu0 %3288 }
 0x68c   : > { %12075 = vrcp.f32 %v3289_v47  ;;  %4418 = vrot.lane.b32.xlu0 %v17240_v22, %s12589_s20  ;;  %4414 = vrot.lane.b32.xlu1 %v17247_v49, %s12589_s20  ;;  %v3392_v49 = vmul.f32 %v12070_v60, %v17354_v37  ;;  %v10674_v37 = vpack.c.bf16 %v11276_v36, %v11275_v29  ;;  %v17359_v60 = vld [vmem:[#allocation85_spill] sm:$0xff]  ;;  %v17363_v36 = vld [vmem:[#allocation110_spill] sm:$0xff] }
 0x68e   : > { %v3304_v47 = vpop.xlane.xlu1 %3303 }
 0x68f   : > { %v3274_v17 = vpop.xlane.xlu0 %3273 }
 0x690   : > { %4422 = vrot.lane.b32.xlu0 %v17242_v0, %s12589_s20  ;;  %4249 = vrot.lane.b32.xlu1 %v17250_v28, %s12589_s20  ;;  %12077 = vrcp.f32 %v3274_v17  ;;  %v11285_v28 = vunpack.i.l.bf16 %v17356_v40 }
 0x692   : > { %v12072_v12 = vpop.eup %12071  ;;  %v10678_v29 = vpack.c.bf16 %v11286_v35, %v11285_v28  ;;  %v17366_v28 = vld [vmem:[#allocation47_spill] sm:$0xff] }
 0x693   : > { %v3271_v5 = vpop.xlane.xlu0 %3270  ;;  %v3391_v22 = vmul.f32 %v12072_v12, %v14540_v10  ;;  %v12074_v0 = vpop.eup %12073  ;;  %v11305_v10 = vunpack.i.l.bf16 %v17358_v11 }
 0x694   : > { %12079 = vrcp.f32 %v3271_v5  ;;  %4426 = vrot.lane.b32.xlu0 %v17355_v42, %s12589_s20  ;;  %11393 = vrot.lane.b32.xlu1 %v17357_v27, %s12589_s20  ;;  %v3400_v27 = vmul.f32 %v12074_v0, %v14533_v58  ;;  %v17361_v42 = vld [vmem:[#allocation116_spill] sm:$0xff] }
 0x695   : > { %9694 = vmatprep.mubr.msk.f32.mxu0 %vm1517_vm2, %v3391_v22  ;;  %12081 = vrcp.f32 %v3298_v19  ;;  %v17360_v22 = vld [vmem:[#allocation58_spill] sm:$0xff]  ;;  %v11296_v11 = vunpack.i.h.bf16 %v17361_v42  ;;  %v11295_v19 = vunpack.i.l.bf16 %v17361_v42  ;;  %v10690_v58 = vpack.c.bf16 %v11306_v14, %v11305_v10  ;;  %v17365_v42 = vld [vmem:[#allocation63_spill] sm:$0xff] }
 0x696   : > { %v12076_v17 = vpop.eup %12075  ;;  %9695 = vmatmul.mubr.msk.f32.vlgmr.msra.gmra.mrb[84].mxu0 %vm1517_vm2, %v3392_v49  ;;  %v14753_v5 = vpop.xlane.xlu1 %3309  ;;  %v17362_v49 = vld [vmem:[#allocation42_spill] sm:$0xff] }
 0x697   : > { %10673 = vmatpush3.bf16.msra.mxu0 %v17359_v60  ;;  %v3295_v12 = vpop.xlane.xlu0 %3294  ;;  %v3399_v40 = vmul.f32 %v12076_v17, %v14550_v61  ;;  %v11316_v60 = vunpack.i.h.bf16 %v17363_v36  ;;  %v11315_v61 = vunpack.i.l.bf16 %v17363_v36  ;;  %v17364_v17 = vld [vmem:[#allocation92_spill] sm:$0xff]  ;;  %v10682_v14 = vpack.c.bf16 %v11296_v11, %v11295_v19 }
 0x698   : > { %10675 = vmatprep.subr.bf16.mxu0 %v10674_v37  ;;  %12083 = vrcp.f32 %v3295_v12  ;;  %4587 = vrot.lane.b32.xlu0 %v17360_v22, %s12589_s20  ;;  %v17370_v11 = vld [vmem:[#allocation56_spill] sm:$0xff] }
 0x699   : > { %4255 = vrot.lane.b32.xlu1 %v17362_v49, %s12589_s20  ;;  %9722 = vmatprep.mubr.msk.f32.mxu1 %vm1517_vm2, %v3399_v40  ;;  %12085 = vrcp.f32 %v3280_v18  ;;  %v10694_v10 = vpack.c.bf16 %v11316_v60, %v11315_v61  ;;  %v17371_v61 = vld [vmem:[#allocation118_spill] sm:$0xff] }
 0x69a   : > { %9723 = vmatmul.mubr.msk.f32.vlgmr.msra.gmra.mrb[108].mxu1 %vm1517_vm2, %v3400_v27  ;;  %v3283_v0 = vpop.xlane.xlu1 %3282  ;;  %v12078_v40 = vpop.eup %12077  ;;  %v17367_v27 = vld [vmem:[#allocation111_spill] sm:$0xff] }
 0x69b   : > { %10677 = vmatpush3.bf16.msra.mxu0 %v10674_v37  ;;  %10689 = vmatpush3.bf16.msra.mxu1 %v17364_v17  ;;  %v3277_v12 = vpop.xlane.xlu0 %3276  ;;  %v11321_v36 = vunpack.i.h.bf16 %v17367_v27  ;;  %v11320_v18 = vunpack.i.l.bf16 %v17367_v27  ;;  %v17368_v37 = vld [vmem:[#allocation109_spill] sm:$0xff]  ;;  %v3394_v19 = vmul.f32 %v12078_v40, %v14560_v1  ;;  %v17373_v40 = vld [vmem:[#allocation39_spill] sm:$0xff] }
 0x69c   : > { %10679 = vmatprep.subr.bf16.mxu0 %v10678_v29  ;;  %10691 = vmatprep.subr.bf16.mxu1 %v10690_v58  ;;  %12087 = vrcp.f32 %v3277_v12  ;;  %v11311_v17 = vunpack.i.h.bf16 %v17368_v37  ;;  %v11310_v49 = vunpack.i.l.bf16 %v17368_v37 }
 0x69d   : > { %12089 = vrcp.f32 %v3283_v0  ;;  %4591 = vrot.lane.b32.xlu0 %v17365_v42, %s12589_s20  ;;  %4259 = vrot.lane.b32.xlu1 %v17366_v28, %s12589_s20  ;;  %v17369_v42 = vld [vmem:[#allocation68_spill] sm:$0xff] }
 0x69e   : > { %v12080_v35 = vpop.eup %12079  ;;  %12091 = vrcp.f32 %v3304_v47  ;;  %v14786_v47 = vpack.c.bf16 %v11311_v17, %v11310_v49 }
 0x69f   : > { %10681 = vmatpush3.bf16.msra.mxu0 %v10678_v29  ;;  %10693 = vmatpush3.bf16.msra.mxu1 %v10690_v58  ;;  %v3301_v0 = vpop.xlane.xlu0 %3300  ;;  %v3393_v12 = vmul.f32 %v12080_v35, %v14569_v25  ;;  %v12082_v28 = vpop.eup %12081  ;;  %v10698_v29 = vpack.c.bf16 %v11321_v36, %v11320_v18  ;;  %v11336_v58 = vunpack.i.h.bf16 %v17371_v61  ;;  %v11335_v25 = vunpack.i.l.bf16 %v17371_v61 }
 0x6a0   : > { %10683 = vmatprep.subr.bf16.mxu0 %v10682_v14  ;;  %10695 = vmatprep.subr.bf16.mxu1 %v10694_v10  ;;  %12093 = vrcp.f32 %v3301_v0  ;;  %v3402_v49 = vmul.f32 %v12082_v28, %v14538_v32  ;;  %v3316_v18 = vpop.xlane.xlu1 %3315  ;;  %v17375_v32 = vld [vmem:[#allocation46_spill] sm:$0xff] }
 0x6a1   : > { %4595 = vrot.lane.b32.xlu0 %v17369_v42, %s12589_s20  ;;  %4585 = vrot.lane.b32.xlu1 %v17370_v11, %s12589_s20 }
 0x6a2   : > { %v12084_v60 = vpop.eup %12083  ;;  %9697 = vmatprep.mubr.msk.f32.mxu0 %vm1517_vm2, %v3393_v12 }
 0x6a3   : > { %9698 = vmatmul.mubr.msk.f32.gmra.mrb[86].mxu0 %vm1517_vm2, %v3394_v19  ;;  %10697 = vmatpush3.bf16.msra.mxu1 %v10694_v10  ;;  %v3286_v35 = vpop.xlane.xlu0 %3285  ;;  %v3401_v27 = vmul.f32 %v12084_v60, %v14577_v51  ;;  %v12086_v37 = vpop.eup %12085  ;;  %v17374_v10 = vld [vmem:[#allocation59_spill] sm:$0xff]  ;;  %v17376_v19 = vld [vmem:[#allocation64_spill] sm:$0xff] }
 0x6a4   : > { %10685 = vmatpush3.bf16.msra.mxu0 %v10682_v14  ;;  %10699 = vmatprep.subr.bf16.mxu1 %v10698_v29  ;;  %12095 = vrcp.f32 %v3286_v35  ;;  %v14799_v14 = vpack.c.bf16 %v11336_v58, %v11335_v25  ;;  %v3396_v28 = vmul.f32 %v12086_v37, %v14548_v6  ;;  %v17377_v6 = vld [vmem:[#allocation55_spill] sm:$0xff]  ;;  %v17378_v25 = vld [vmem:[#allocation69_spill] sm:$0xff] }
 0x6a5   : > { %10704 = vmatprep.subr.msk.bf16.mxu0 %vm13005_vm1, %v14786_v47  ;;  %11403 = vrot.lane.b32.xlu0 %v17373_v40, %s12589_s20  ;;  %12097 = vrcp.f32 %v14753_v5 }
 0x6a6   : > { %v12088_v36 = vpop.eup %12087  ;;  %4420 = vrot.lane.b32.xlu1 %v17374_v10, %s12589_s20  ;;  %9725 = vmatprep.mubr.msk.f32.mxu1 %vm1517_vm2, %v3401_v27 }
 0x6a7   : > { %v12090_v51 = vpop.eup %12089  ;;  %9726 = vmatmul.mubr.msk.f32.gmra.mrb[110].mxu1 %vm1517_vm2, %v3402_v49  ;;  %v3307_v17 = vpop.xlane.xlu0 %3306  ;;  %v3395_v0 = vmul.f32 %v12088_v36, %v14586_v13 }
 0x6a8   : > { %10701 = vmatpush3.bf16.msra.mxu1 %v10698_v29  ;;  %12099 = vrcp.f32 %v3307_v17  ;;  %v12092_v12 = vpop.eup %12091  ;;  %v3397_v5 = vmul.f32 %v12090_v51, %v14584_v59  ;;  %v3340_v29 = vpop.xlane.xlu1 %3339 }
 0x6a9   : > { %10728 = vmatprep.subr.msk.bf16.mxu1 %vm13005_vm1, %v14799_v14  ;;  %11413 = vrot.lane.b32.xlu0 %v17375_v32, %s12589_s20  ;;  %12101 = vrcp.f32 %v3316_v18  ;;  %v3404_v58 = vmul.f32 %v12092_v12, %v14558_v24  ;;  %v17380_v24 = vld [vmem:[#allocation61_spill] sm:$0xff] }
 0x6aa   : > { %4424 = vrot.lane.b32.xlu1 %v17376_v19, %s12589_s20  ;;  %9700 = vmatprep.mubr.msk.f32.mxu0 %vm1517_vm2, %v3395_v0  ;;  %v12094_v13 = vpop.eup %12093  ;;  %v17382_v12 = vld [vmem:[#allocation117_spill] sm:$0xff] }
 0x6ab   : > { %9701 = vmatmul.mubr.msk.f32.gmra.mrb[88].mxu0 %vm1517_vm2, %v3396_v28  ;;  %v3313_v60 = vpop.xlane.xlu0 %3312  ;;  %v3403_v61 = vmul.f32 %v12094_v13, %v14593_v9  ;;  %v17379_v9 = vld [vmem:[#allocation60_spill] sm:$0xff]  ;;  %v11325_v13 = vunpack.i.l.bf16 %v17382_v12 }
 0x6ac   : > { %9703 = vmatprep.mubr.msk.f32.mxu0 %vm1517_vm2, %v3397_v5  ;;  %12103 = vrcp.f32 %v3313_v60  ;;  %v11326_v5 = vunpack.i.h.bf16 %v17382_v12  ;;  %v17383_v60 = vld [vmem:[#allocation67_spill] sm:$0xff] }
 0x6ad   : > { %11423 = vrot.lane.b32.xlu0 %v17377_v6, %s12589_s20  ;;  %9728 = vmatprep.mubr.msk.f32.mxu1 %vm1517_vm2, %v3403_v61  ;;  %12105 = vrcp.f32 %v3340_v29 }
 0x6ae   : > { %4428 = vrot.lane.b32.xlu1 %v17378_v25, %s12589_s20  ;;  %v12096_v59 = vpop.eup %12095  ;;  %9729 = vmatmul.mubr.msk.f32.gmra.mrb[112].mxu1 %vm1517_vm2, %v3404_v58 }
 0x6af   : > { %v3337_v35 = vpop.xlane.xlu0 %3336  ;;  %v3398_v27 = vmul.f32 %v12096_v59, %v14602_v4  ;;  %v12098_v37 = vpop.eup %12097  ;;  %v17381_v4 = vld [vmem:[#allocation65_spill] sm:$0xff]  ;;  %v17384_v59 = vld [vmem:[#allocation70_spill] sm:$0xff] }
 0x6b0   : > { %12107 = vrcp.f32 %v3337_v35  ;;  %v3406_v17 = vmul.f32 %v12098_v37, %v14575_v52  ;;  %v11346_v37 = vunpack.i.h.bf16 %v14686_v16 }
 0x6b1   : > { %11433 = vrot.lane.b32.xlu0 %v17379_v9, %s12589_s20  ;;  %9704 = vmatmul.mubr.msk.f32.gmra.mrb[90].mxu0 %vm1517_vm2, %v3398_v27  ;;  %v10708_v27 = vpack.c.bf16 %v11326_v5, %v11325_v13  ;;  %v17389_v13 = vld [vmem:[#allocation78_spill] sm:$0xff] }
 0x6b2   : > { %v12100_v49 = vpop.eup %12099  ;;  %4589 = vrot.lane.b32.xlu1 %v17380_v24, %s12589_s20 }
 0x6b3   : > { %v3322_v36 = vpop.xlane.xlu0 %3321  ;;  %v3405_v18 = vmul.f32 %v12100_v49, %v14613_v43  ;;  %v3343_v51 = vpop.xlane.xlu1 %3342  ;;  %v11345_v49 = vunpack.i.l.bf16 %v14686_v16  ;;  %v17386_v16 = vld [vmem:[#allocation74_spill] sm:$0xff] }
 0x6b4   : > { %v12102_v0 = vpop.eup %12101  ;;  %12109 = vrcp.f32 %v3343_v51 }
 0x6b5   : > { %11443 = vrot.lane.b32.xlu0 %v17381_v4, %s12589_s20  ;;  %9731 = vmatprep.mubr.msk.f32.mxu1 %vm1517_vm2, %v3405_v18  ;;  %v3408_v29 = vmul.f32 %v12102_v0, %v14595_v7  ;;  %v17385_v18 = vld [vmem:[#allocation71_spill] sm:$0xff] }
 0x6b6   : > { %v12104_v28 = vpop.eup %12103  ;;  %4593 = vrot.lane.b32.xlu1 %v17383_v60, %s12589_s20  ;;  %9732 = vmatmul.mubr.msk.f32.gmra.mrb[114].mxu1 %vm1517_vm2, %v3406_v17 }
 0x6b7   : > { %v3346_v43 = vpop.xlane.xlu0 %3345  ;;  %v3407_v52 = vmul.f32 %v12104_v28, %v14618_v46  ;;  %v3352_v61 = vpop.xlane.xlu1 %3351  ;;  %v10732_v28 = vpack.c.bf16 %v11346_v37, %v11345_v49 }
 0x6b8   : > { %12111 = vrcp.f32 %v3346_v43  ;;  %v12106_v58 = vpop.eup %12105 }
 0x6b9   : > { %11453 = vrot.lane.b32.xlu0 %v17384_v59, %s12589_s20  ;;  %9750 = vmatprep.mubr.msk.f32.mxu0 %vm1517_vm2, %v3407_v52  ;;  %12113 = vrcp.f32 %v3322_v36  ;;  %v3416_v51 = vmul.f32 %v12106_v58, %v14604_v44  ;;  %v17387_v36 = vld [vmem:[#allocation112_spill] sm:$0xff] }
 0x6ba   : > { %v12108_v35 = vpop.eup %12107  ;;  %4597 = vrot.lane.b32.xlu1 %v17385_v18, %s12589_s20  ;;  %9751 = vmatmul.mubr.msk.f32.vlgmr.msra.gmra.mrb[92].mxu0 %vm1517_vm2, %v3408_v29  ;;  %12115 = vrcp.f32 %v3352_v61  ;;  %v11331_v0 = vunpack.i.h.bf16 %v17387_v36  ;;  %v11351_v29 = vunpack.i.h.bf16 %v14697_v8  ;;  %v11350_v61 = vunpack.i.l.bf16 %v14697_v8  ;;  %v17390_v58 = vld [vmem:[#allocation44_spill] sm:$0xff]  ;;  %v17391_v8 = vld [vmem:[#allocation22_spill] sm:$0xff] }
 0x6bb   : > { %10707 = vmatpush3.bf16.xpose.msk.msra.mxu0 %vm13005_vm1, %v14786_v47  ;;  %v3319_v7 = vpop.xlane.xlu0 %3318  ;;  %v3415_v46 = vmul.f32 %v12108_v35, %v14624_v3  ;;  %v3349_v17 = vpop.xlane.xlu1 %3348  ;;  %v11330_v47 = vunpack.i.l.bf16 %v17387_v36  ;;  %v17388_v3 = vld [vmem:[#allocation37_spill] sm:$0xff] }
 0x6bc   : > { %10710 = vmatprep.subr.msk.bf16.mxu0 %vm13005_vm1, %v10708_v27  ;;  %12117 = vrcp.f32 %v3319_v7  ;;  %v10738_v7 = vpack.c.bf16 %v11351_v29, %v11350_v61  ;;  %v17397_v61 = vld [vmem:[#allocation52_spill] sm:$0xff] }
 0x6bd   : > { %12119 = vrcp.f32 %v3349_v17  ;;  %11463 = vrot.lane.b32.xlu0 %v17386_v16, %s12589_s20  ;;  %9778 = vmatprep.mubr.msk.f32.mxu1 %vm1517_vm2, %v3415_v46  ;;  %v10714_v52 = vpack.c.bf16 %v11331_v0, %v11330_v47  ;;  %v17392_v46 = vld [vmem:[#allocation50_spill] sm:$0xff] }
 0x6be   : > { %11398 = vrot.lane.b32.xlu1 %v17388_v3, %s12589_s20  ;;  %9779 = vmatmul.mubr.msk.f32.vlgmr.msra.gmra.mrb[116].mxu1 %vm1517_vm2, %v3416_v51  ;;  %v12110_v44 = vpop.eup %12109  ;;  %v17393_v51 = vld [vmem:[#allocation113_spill] sm:$0xff] }
 0x6bf   : > { %10731 = vmatpush3.bf16.xpose.msk.msra.mxu1 %vm13005_vm1, %v14799_v14  ;;  %v3328_v12 = vpop.xlane.xlu0 %3327  ;;  %v3417_v5 = vmul.f32 %v12110_v44, %v14631_v62  ;;  %v11340_v17 = vunpack.i.l.bf16 %v17393_v51  ;;  %v17394_v44 = vld [vmem:[#allocation24_spill] sm:$0xff] }
 0x6c0   : > { %10734 = vmatprep.subr.msk.bf16.mxu1 %vm13005_vm1, %v10732_v28  ;;  %12121 = vrcp.f32 %v3328_v12 }
 0x6c1   : > { %11478 = vrot.lane.b32.xlu0 %v17389_v13, %s12589_s20  ;;  %9781 = vmatprep.mubr.msk.f32.mxu1 %vm1517_vm2, %v3417_v5 }
 0x6c2   : > { %v12112_v43 = vpop.eup %12111  ;;  %11408 = vrot.lane.b32.xlu1 %v17390_v58, %s12589_s20 }
 0x6c3   : > { %10713 = vmatpush3.bf16.xpose.msk.msra.mxu0 %vm13005_vm1, %v10708_v27  ;;  %v3325_v14 = vpop.xlane.xlu0 %3324  ;;  %v3418_v62 = vmul.f32 %v12112_v43, %v14636_v45  ;;  %v12114_v35 = vpop.eup %12113  ;;  %v11341_v45 = vunpack.i.h.bf16 %v17393_v51  ;;  %v17395_v43 = vld [vmem:[#allocation51_spill] sm:$0xff] }
 0x6c4   : > { %10716 = vmatprep.subr.msk.bf16.mxu0 %vm13005_vm1, %v10714_v52  ;;  %12123 = vrcp.f32 %v3325_v14  ;;  %v12116_v37 = vpop.eup %12115  ;;  %v3410_v12 = vmul.f32 %v12114_v35, %v14629_v39  ;;  %v17396_v39 = vld [vmem:[#allocation15_spill] sm:$0xff]  ;;  %v11356_v14 = vunpack.i.h.bf16 %v14703_v2 }
 0x6c5   : > { %11488 = vrot.lane.b32.xlu0 %v17391_v8, %s12590_s11  ;;  %9782 = vmatmul.mubr.msk.f32.gmra.mrb[118].mxu1 %vm1517_vm2, %v3418_v62  ;;  %v3420_v5 = vmul.f32 %v12116_v37, %v14640_v53  ;;  %v11355_v62 = vunpack.i.l.bf16 %v14703_v2 }
 0x6c6   : > { %v12118_v49 = vpop.eup %12117  ;;  %11418 = vrot.lane.b32.xlu1 %v17392_v46, %s12589_s20 }
 0x6c7   : > { %v12120_v27 = vpop.eup %12119  ;;  %10737 = vmatpush3.bf16.xpose.msk.msra.mxu1 %vm13005_vm1, %v10732_v28  ;;  %v3334_v36 = vpop.xlane.xlu0 %3333  ;;  %v3409_v0 = vmul.f32 %v12118_v49, %v14645_v31  ;;  %v10720_v31 = vpack.c.bf16 %v11341_v45, %v11340_v17  ;;  %v17398_v49 = vld [vmem:[#allocation53_spill] sm:$0xff]  ;;  %v10750_v2 = vpack.c.bf16 %v11356_v14, %v11355_v62  ;;  %v17399_v45 = vld [vmem:[#allocation72_spill] sm:$0xff] }
 0x6c8   : > { %10740 = vmatprep.subr.msk.bf16.mxu1 %vm13005_vm1, %v10738_v7  ;;  %v3419_v47 = vmul.f32 %v12120_v27, %v14649_v26  ;;  %v11364_v28 = vpop.permute.xlu1 %11363  ;;  %12125 = vrcp.f32 %v3334_v36  ;;  %v17403_v14 = vld [vmem:[#allocation28_spill] sm:$0xff] }
 0x6c9   : > { %11498 = vrot.lane.b32.xlu0 %v17394_v44, %s12590_s11  ;;  %9753 = vmatprep.mubr.msk.f32.mxu0 %vm1517_vm2, %v3409_v0 }
 0x6ca   : > { %11428 = vrot.lane.b32.xlu1 %v17395_v43, %s12589_s20  ;;  %9784 = vmatprep.mubr.msk.f32.mxu1 %vm1517_vm2, %v3419_v47  ;;  %v12122_v29 = vpop.eup %12121 }
 0x6cb   : > { %9754 = vmatmul.mubr.msk.f32.gmra.mrb[94].mxu0 %vm1517_vm2, %v3410_v12  ;;  %9785 = vmatmul.mubr.msk.f32.gmra.mrb[120].mxu1 %vm1517_vm2, %v3420_v5  ;;  %v14906_v26 = vpop.xlane.xlu0 %3357  ;;  %v3412_v37 = vmul.f32 %v12122_v29, %v14656_v34  ;;  %v17401_v29 = vld [vmem:[#allocation76_spill] sm:$0xff] }
 0x6cc   : > { %10719 = vmatpush3.bf16.xpose.msk.msra.mxu0 %vm13005_vm1, %v10714_v52  ;;  %v11374_v8 = vpop.permute.xlu1 %11373 }
 0x6cd   : > { %10722 = vmatprep.subr.msk.bf16.mxu0 %vm13005_vm1, %v10720_v31  ;;  %5725 = vrot.lane.b32.xlu0 %v17396_v39, %s12590_s11  ;;  %v11375_v51 = vunpack.i.l.bf16 %v11374_v8 }
 0x6ce   : > { %v12124_v53 = vpop.eup %12123  ;;  %11438 = vrot.lane.b32.xlu1 %v17397_v61, %s12589_s20 }
 0x6cf   : > { %10743 = vmatpush3.bf16.xpose.msk.msra.mxu1 %vm13005_vm1, %v10738_v7  ;;  %v3331_v52 = vpop.xlane.xlu0 %3330  ;;  %v3411_v35 = vmul.f32 %v12124_v53, %v14660_v23  ;;  %v11376_v7 = vunpack.i.h.bf16 %v11374_v8  ;;  %v17405_v8 = vld [vmem:[#allocation33_spill] sm:$0xff] }
 0x6d0   : > { %12127 = vrcp.f32 %v3331_v52  ;;  %v14959_v39 = vpop.permute.xlu1 %4247  ;;  %v17404_v52 = vld [vmem:[#allocation31_spill] sm:$0xff] }
 0x6d1   : > { %5729 = vrot.lane.b32.xlu0 %v13121_v30, %s12590_s11  ;;  %9756 = vmatprep.mubr.msk.f32.mxu0 %vm1517_vm2, %v3411_v35  ;;  %v14936_v36 = vpack.c.bf16 %v11376_v7, %v11375_v51  ;;  %v17406_v7 = vld [vmem:[#allocation36_spill] sm:$0xff]  ;;  %12129 = vrcp.f32 %v14906_v26 }
 0x6d2   : > { %11448 = vrot.lane.b32.xlu1 %v17398_v49, %s12589_s20  ;;  %9757 = vmatmul.mubr.msk.f32.gmra.mrb[96].mxu0 %vm1517_vm2, %v3412_v37  ;;  %v12126_v0 = vpop.eup %12125 }
 0x6d3   : > { %v11359_v27 = vpop.permute.xlu0 %11358  ;;  %v3414_v5 = vmul.f32 %v12126_v0, %v14664_v15 }
 0x6d4   : > { %10725 = vmatpush3.bf16.xpose.msk.msra.mxu0 %vm13005_vm1, %v10720_v31  ;;  %v11361_v23 = vunpack.i.h.bf16 %v11359_v27  ;;  %v11360_v34 = vunpack.i.l.bf16 %v11359_v27  ;;  %v11365_v31 = vunpack.i.l.bf16 %v11364_v28 }
 0x6d5   : > { %10752 = vmatprep.subr.msk.bf16.mxu0 %vm13005_vm1, %v10750_v2  ;;  %11518 = vrot.lane.b32.xlu0 %v17350_v56, %s12590_s11  ;;  %v17400_v56 = vld [vmem:[#allocation18_spill] sm:$0xff] }
 0x6d6   : > { %v10744_v30 = vpack.c.bf16 %v11361_v23, %v11360_v34  ;;  %11458 = vrot.lane.b32.xlu1 %v17399_v45, %s12589_s20  ;;  %v17407_v23 = vld [vmem:[#allocation16_spill] sm:$0xff] }
 0x6d7   : > { %v11369_v17 = vpop.permute.xlu0 %11368 }
 0x6d8   : > { %10746 = vmatprep.subr.msk.bf16.mxu1 %vm13005_vm1, %v10744_v30  ;;  %v11370_v53 = vunpack.i.l.bf16 %v11369_v17 }
 0x6d9   : > { %5733 = vrot.lane.b32.xlu0 %v13141_v38, %s12590_s11  ;;  %10749 = vmatpush3.bf16.xpose.msk.msra.mxu1 %vm13005_vm1, %v10744_v30  ;;  %v11366_v38 = vunpack.i.h.bf16 %v11364_v28 }
 0x6da   : > { %v12128_v47 = vpop.eup %12127  ;;  %11468 = vrot.lane.b32.xlu1 %v17400_v56, %s12590_s11  ;;  %10776 = vmatprep.subr.msk.bf16.mxu1 %vm13005_vm1, %v14936_v36 }
 0x6db   : > { %v14949_v44 = vpop.permute.xlu0 %4245  ;;  %v3413_v12 = vmul.f32 %v12128_v47, %v14672_v55  ;;  %v10756_v15 = vpack.c.bf16 %v11366_v38, %v11365_v31  ;;  %v12130_v26 = vpop.eup %12129  ;;  %v17409_v38 = vld [vmem:[#allocation43_spill] sm:$0xff] }
 0x6dd   : > { %5737 = vrot.lane.b32.xlu0 %v13159_v50, %s12590_s11  ;;  %9759 = vmatprep.mubr.msk.f32.mxu0 %vm1517_vm2, %v3413_v12  ;;  %v17402_v50 = vld [vmem:[#allocation20_spill] sm:$0xff] }
 0x6de   : > { %11473 = vrot.lane.b32.xlu1 %v17401_v29, %s12589_s20  ;;  %9760 = vmatmul.mubr.msk.f32.gmra.mrb[98].mxu0 %vm1517_vm2, %v3414_v5  ;;  %v15237_v29 = vld [vmem:[#allocation8 + $0xa0] sm:$0xff] }
 0x6df   : > { %9806 = vmatprep.mubr.msk.f32.mxu0 %vm904_vm0, %v14711_v57  ;;  %v4081_v55 = vpop.permute.xlu0 %4080  ;;  %v4083_v57 = vpop.permute.xlu1 %4082 }
 0x6e1   : > { %11528 = vrot.lane.b32.xlu0 %v17351_v41, %s12590_s11  ;;  %v11371_v41 = vunpack.i.h.bf16 %v11369_v17 }
 0x6e2   : > { %11483 = vrot.lane.b32.xlu1 %v17402_v50, %s12590_s11  ;;  %9807 = vmatmul.mubr.msk.f32.vlgmr.msra.gmra.mrb[100].mxu0 %vm904_vm0, %v14717_v63 }
 0x6e3   : > { %10755 = vmatpush3.bf16.xpose.msk.msra.mxu0 %vm13005_vm1, %v10750_v2  ;;  %9809 = vmatprep.mubr.msk.f32.mxu0 %vm904_vm0, %v4081_v55  ;;  %v11379_v28 = vpop.permute.xlu0 %11378  ;;  %v10762_v62 = vpack.c.bf16 %v11371_v41, %v11370_v53  ;;  %v11384_v30 = vpop.permute.xlu1 %11383  ;;  %v17410_v55 = vld [vmem:[#allocation27_spill] sm:$0xff] }
 0x6e4   : > { %10758 = vmatprep.subr.msk.bf16.mxu0 %vm13005_vm1, %v10756_v15  ;;  %v11380_v37 = vunpack.i.l.bf16 %v11379_v28 }
 0x6e5   : > { %5894 = vrot.lane.b32.xlu0 %v17352_v21, %s12590_s11  ;;  %v11381_v21 = vunpack.i.h.bf16 %v11379_v28  ;;  %v11386_v28 = vunpack.i.h.bf16 %v11384_v30 }
 0x6e6   : > { %11493 = vrot.lane.b32.xlu1 %v17403_v14, %s12590_s11  ;;  %9810 = vmatmul.mubr.msk.f32.gmra.mrb[102].mxu0 %vm904_vm0, %v4083_v57  ;;  %v11385_v57 = vunpack.i.l.bf16 %v11384_v30 }
 0x6e7   : > { %v4085_v63 = vpop.permute.xlu0 %4084  ;;  %v10768_v27 = vpack.c.bf16 %v11381_v21, %v11380_v37 }
 0x6e8   : > { %9812 = vmatprep.mubr.msk.f32.mxu0 %vm904_vm0, %v4085_v63  ;;  %v10780_v53 = vpack.c.bf16 %v11386_v28, %v11385_v57 }
 0x6ea   : > { %11503 = vrot.lane.b32.xlu1 %v17404_v52, %s12590_s11 }
 0x6eb   : > { %10761 = vmatpush3.bf16.xpose.msk.msra.mxu0 %vm13005_vm1, %v10756_v15  ;;  %v4089_v35 = vpop.permute.xlu0 %4088 }
 0x6ec   : > { %10764 = vmatprep.subr.msk.bf16.mxu0 %vm13005_vm1, %v10762_v62 }
 0x6ee   : > { %11508 = vrot.lane.b32.xlu1 %v17405_v8, %s12590_s11 }
 0x6ef   : > { %v11389_v2 = vpop.permute.xlu0 %11388 }
 0x6f0   : > { %v11391_v63 = vunpack.i.h.bf16 %v11389_v2 }
 0x6f2   : > { %11513 = vrot.lane.b32.xlu1 %v17406_v7, %s12590_s11 }
 0x6f3   : > { %10767 = vmatpush3.bf16.xpose.msk.msra.mxu0 %vm13005_vm1, %v10762_v62  ;;  %v4417_v51 = vpop.permute.xlu0 %4416  ;;  %v11390_v62 = vunpack.i.l.bf16 %v11389_v2 }
 0x6f4   : > { %10770 = vmatprep.subr.msk.bf16.mxu0 %vm13005_vm1, %v10768_v27 }
 0x6f6   : > { %5727 = vrot.lane.b32.xlu1 %v17407_v23, %s12590_s11 }
 0x6f7   : > { %v4252_v34 = vpop.permute.xlu0 %4251 }
 0x6fa   : > { %5731 = vrot.lane.b32.xlu1 %v13133_v33, %s12590_s11 }
 0x6fb   : > { %10773 = vmatpush3.bf16.xpose.msk.msra.mxu0 %vm13005_vm1, %v10768_v27  ;;  %v4254_v17 = vpop.permute.xlu0 %4253 }
 0x6fe   : > { %11523 = vrot.lane.b32.xlu1 %v17347_v20, %s12590_s11  ;;  %v17408_v20 = vld [vmem:[#allocation21_spill] sm:$0xff] }
 0x6ff   : > { %v4258_v47 = vpop.permute.xlu0 %4257 }
 0x700   : > { %v3355_v0 = vpop.xlane.xlu1 %3354 }
 0x701   : > { %12131 = vrcp.f32 %v3355_v0 }
 0x702   : > { %5735 = vrot.lane.b32.xlu1 %v17243_v48, %s12590_s11 }
 0x703   : > { %v4584_v33 = vpop.permute.xlu0 %4583 }
 0x704   : > { %v4087_v56 = vpop.permute.xlu1 %4086 }
 0x705   : > { %9813 = vmatmul.mubr.msk.f32.gmra.mrb[104].mxu0 %vm904_vm0, %v4087_v56 }
 0x706   : > { %5739 = vrot.lane.b32.xlu1 %v17245_v54, %s12590_s11  ;;  %9815 = vmatprep.mubr.msk.f32.mxu0 %vm904_vm0, %v4089_v35  ;;  %v17411_v54 = vld [vmem:[#allocation119_spill] sm:$0xff] }
 0x707   : > { %v3422_v15 = vmul.f32 %v12130_v26, %v17411_v54  ;;  %v4419_v50 = vpop.permute.xlu0 %4418 }
 0x708   : > { %v4091_v12 = vpop.permute.xlu1 %4090 }
 0x709   : > { %9816 = vmatmul.mubr.msk.f32.gmra.mrb[106].mxu0 %vm904_vm0, %v4091_v12 }
 0x70a   : > { %11533 = vrot.lane.b32.xlu1 %v17408_v20, %s12590_s11 }
 0x70b   : > { %v12132_v5 = vpop.eup %12131 }
 0x70c   : > { %v4415_v48 = vpop.permute.xlu1 %4414  ;;  %v3421_v31 = vmul.f32 %v12132_v5, %v17409_v38 }
 0x70d   : > { %9862 = vmatprep.mubr.msk.f32.mxu0 %vm904_vm0, %v4415_v48 }
 0x70e   : > { %5896 = vrot.lane.b32.xlu1 %v17410_v55, %s12590_s11  ;;  %9787 = vmatprep.mubr.msk.f32.mxu1 %vm1517_vm2, %v3421_v31 }
 0x70f   : > { %9863 = vmatmul.mubr.msk.f32.vlgmr.msra.gmra.mrb[108].mxu0 %vm904_vm0, %v4417_v51  ;;  %9788 = vmatmul.mubr.msk.f32.gmra.mrb[122].mxu1 %vm1517_vm2, %v3422_v15 }
 0x710   : > { %9865 = vmatprep.mubr.msk.f32.mxu0 %vm904_vm0, %v4419_v50  ;;  %v4250_v41 = vpop.permute.xlu1 %4249  ;;  %9834 = vmatprep.mubr.msk.f32.mxu1 %vm904_vm0, %v14949_v44  ;;  %v10786_v44 = vpack.c.bf16 %v11391_v63, %v11390_v62 }
 0x713   : > { %9835 = vmatmul.mubr.msk.f32.vlgmr.msra.gmra.mrb[124].mxu1 %vm904_vm0, %v14959_v39  ;;  %v4423_v39 = vpop.permute.xlu0 %4422 }
 0x714   : > { %10779 = vmatpush3.bf16.xpose.msk.msra.mxu1 %vm13005_vm1, %v14936_v36  ;;  %v11394_v14 = vpop.permute.xlu1 %11393  ;;  %9837 = vmatprep.mubr.msk.f32.mxu1 %vm904_vm0, %v4250_v41 }
 0x715   : > { %10782 = vmatprep.subr.msk.bf16.mxu1 %vm13005_vm1, %v10780_v53  ;;  %v11396_v35 = vunpack.i.h.bf16 %v11394_v14  ;;  %v11395_v21 = vunpack.i.l.bf16 %v11394_v14 }
 0x717   : > { %9838 = vmatmul.mubr.msk.f32.gmra.mrb[126].mxu1 %vm904_vm0, %v4252_v34  ;;  %v4427_v8 = vpop.permute.xlu0 %4426  ;;  %v10792_v2 = vpack.c.bf16 %v11396_v35, %v11395_v21 }
 0x718   : > { %v4256_v52 = vpop.permute.xlu1 %4255  ;;  %9840 = vmatprep.mubr.msk.f32.mxu1 %vm904_vm0, %v4254_v17 }
 0x71b   : > { %9841 = vmatmul.mubr.msk.f32.gmra.mrb[128].mxu1 %vm904_vm0, %v4256_v52  ;;  %v4588_v7 = vpop.permute.xlu0 %4587 }
 0x71c   : > { %10785 = vmatpush3.bf16.xpose.msk.msra.mxu1 %vm13005_vm1, %v10780_v53  ;;  %v4260_v36 = vpop.permute.xlu1 %4259  ;;  %9843 = vmatprep.mubr.msk.f32.mxu1 %vm904_vm0, %v4258_v47 }
 0x71d   : > { %10788 = vmatprep.subr.msk.bf16.mxu1 %vm13005_vm1, %v10786_v44 }
 0x71f   : > { %9844 = vmatmul.mubr.msk.f32.gmra.mrb[130].mxu1 %vm904_vm0, %v4260_v36  ;;  %v4592_v34 = vpop.permute.xlu0 %4591 }
 0x720   : > { %v4586_v37 = vpop.permute.xlu1 %4585  ;;  %9890 = vmatprep.mubr.msk.f32.mxu1 %vm904_vm0, %v4584_v33 }
 0x723   : > { %v4596_v17 = vpop.permute.xlu0 %4595 }
 0x724   : > { %10791 = vmatpush3.bf16.xpose.msk.msra.mxu1 %vm13005_vm1, %v10786_v44  ;;  %v4421_v27 = vpop.permute.xlu1 %4420 }
 0x725   : > { %10794 = vmatprep.subr.msk.bf16.mxu1 %vm13005_vm1, %v10792_v2  ;;  %9866 = vmatmul.mubr.msk.f32.gmra.mrb[110].mxu0 %vm904_vm0, %v4421_v27 }
 0x726   : > { %9868 = vmatprep.mubr.msk.f32.mxu0 %vm904_vm0, %v4423_v39 }
 0x727   : > { %v11404_v56 = vpop.permute.xlu0 %11403 }
 0x728   : > { %v4425_v51 = vpop.permute.xlu1 %4424  ;;  %v11406_v12 = vunpack.i.h.bf16 %v11404_v56  ;;  %v11405_v20 = vunpack.i.l.bf16 %v11404_v56 }
 0x729   : > { %9869 = vmatmul.mubr.msk.f32.gmra.mrb[112].mxu0 %vm904_vm0, %v4425_v51 }
 0x72a   : > { %9871 = vmatprep.mubr.msk.f32.mxu0 %vm904_vm0, %v4427_v8  ;;  %v10802_v15 = vpack.c.bf16 %v11406_v12, %v11405_v20 }
 0x72b   : > { %v11414_v38 = vpop.permute.xlu0 %11413 }
 0x72c   : > { %10797 = vmatpush3.bf16.xpose.msk.msra.mxu1 %vm13005_vm1, %v10792_v2  ;;  %v4429_v23 = vpop.permute.xlu1 %4428  ;;  %v11416_v50 = vunpack.i.h.bf16 %v11414_v38  ;;  %v11415_v28 = vunpack.i.l.bf16 %v11414_v38 }
 0x72d   : > { %9872 = vmatmul.mubr.msk.f32.gmra.mrb[114].mxu0 %vm904_vm0, %v4429_v23 }
 0x72e   : > { %v10810_v44 = vpack.c.bf16 %v11416_v50, %v11415_v28 }
 0x72f   : > { %v11424_v63 = vpop.permute.xlu0 %11423 }
 0x730   : > { %v4590_v30 = vpop.permute.xlu1 %4589  ;;  %v11426_v39 = vunpack.i.h.bf16 %v11424_v63  ;;  %v11425_v36 = vunpack.i.l.bf16 %v11424_v63 }
 0x733   : > { %9891 = vmatmul.mubr.msk.f32.vlgmr.msra.gmra.mrb[132].mxu1 %vm904_vm0, %v4586_v37 }
 0x734   : > { %9893 = vmatprep.mubr.msk.f32.mxu1 %vm904_vm0, %v4588_v7  ;;  %v4594_v0 = vpop.permute.xlu1 %4593  ;;  %v15059_v7 = vpack.c.bf16 %v11426_v39, %v11425_v36 }
 0x737   : > { %9894 = vmatmul.mubr.msk.f32.gmra.mrb[134].mxu1 %vm904_vm0, %v4590_v30 }
 0x738   : > { %9896 = vmatprep.mubr.msk.f32.mxu1 %vm904_vm0, %v4592_v34  ;;  %v4598_v47 = vpop.permute.xlu1 %4597 }
 0x73b   : > { %9897 = vmatmul.mubr.msk.f32.gmra.mrb[136].mxu1 %vm904_vm0, %v4594_v0 }
 0x73c   : > { %9899 = vmatprep.mubr.msk.f32.mxu1 %vm904_vm0, %v4596_v17  ;;  %v11399_v33 = vpop.permute.xlu1 %11398 }
 0x73d   : > { %v11401_v26 = vunpack.i.h.bf16 %v11399_v33  ;;  %v11400_v5 = vunpack.i.l.bf16 %v11399_v33 }
 0x73f   : > { %9900 = vmatmul.mubr.msk.f32.gmra.mrb[138].mxu1 %vm904_vm0, %v4598_v47  ;;  %v10798_v48 = vpack.c.bf16 %v11401_v26, %v11400_v5 }
 0x740   : > { %v11409_v31 = vpop.permute.xlu1 %11408 }
 0x741   : > { %v11411_v55 = vunpack.i.h.bf16 %v11409_v31  ;;  %v11410_v54 = vunpack.i.l.bf16 %v11409_v31  ;;  %10799 = vmatprep.subr.bf16.mxu0 %v10798_v48 }
 0x742   : > { %10801 = vmatpush3.bf16.msra.mxu0 %v10798_v48 }
 0x743   : > { %10803 = vmatprep.subr.bf16.mxu0 %v10802_v15  ;;  %v10806_v14 = vpack.c.bf16 %v11411_v55, %v11410_v54  ;;  %v15155_v54 = vld [vmem:[#allocation8 + $0x88] sm:$0xff] }
 0x744   : > { %v11419_v57 = vpop.permute.xlu1 %11418 }
 0x745   : > { %v11421_v41 = vunpack.i.h.bf16 %v11419_v57  ;;  %v11420_v53 = vunpack.i.l.bf16 %v11419_v57 }
 0x746   : > { %10805 = vmatpush3.bf16.msra.mxu0 %v10802_v15 }
 0x747   : > { %10807 = vmatprep.subr.bf16.mxu0 %v10806_v14  ;;  %v10814_v62 = vpack.c.bf16 %v11421_v41, %v11420_v53 }
 0x748   : > { %v11429_v52 = vpop.permute.xlu1 %11428 }
 0x749   : > { %v11431_v35 = vunpack.i.h.bf16 %v11429_v52  ;;  %v11430_v21 = vunpack.i.l.bf16 %v11429_v52  ;;  %10815 = vmatprep.subr.bf16.mxu1 %v10814_v62 }
 0x74a   : > { %10809 = vmatpush3.bf16.msra.mxu0 %v10806_v14  ;;  %10817 = vmatpush3.bf16.msra.mxu1 %v10814_v62 }
 0x74b   : > { %10811 = vmatprep.subr.bf16.mxu0 %v10810_v44  ;;  %v10818_v37 = vpack.c.bf16 %v11431_v35, %v11430_v21 }
 0x74c   : > { %v11439_v8 = vpop.permute.xlu1 %11438 }
 0x74d   : > { %v11441_v2 = vunpack.i.h.bf16 %v11439_v8  ;;  %v11440_v27 = vunpack.i.l.bf16 %v11439_v8  ;;  %10819 = vmatprep.subr.bf16.mxu1 %v10818_v37 }
 0x74e   : > { %10813 = vmatpush3.bf16.msra.mxu0 %v10810_v44  ;;  %10821 = vmatpush3.bf16.msra.mxu1 %v10818_v37 }
 0x74f   : > { %10831 = vmatprep.subr.bf16.mxu0 %v15059_v7  ;;  %v10822_v51 = vpack.c.bf16 %v11441_v2, %v11440_v27 }
 0x750   : > { %v11449_v23 = vpop.permute.xlu1 %11448 }
 0x751   : > { %v11451_v34 = vunpack.i.h.bf16 %v11449_v23  ;;  %v11450_v30 = vunpack.i.l.bf16 %v11449_v23  ;;  %10823 = vmatprep.subr.bf16.mxu1 %v10822_v51 }
 0x752   : > { %10825 = vmatpush3.bf16.msra.mxu1 %v10822_v51 }
 0x753   : > { %v10826_v17 = vpack.c.bf16 %v11451_v34, %v11450_v30 }
 0x754   : > { %v11459_v0 = vpop.permute.xlu1 %11458 }
 0x755   : > { %v11461_v47 = vunpack.i.h.bf16 %v11459_v0  ;;  %v11460_v56 = vunpack.i.l.bf16 %v11459_v0  ;;  %10827 = vmatprep.subr.bf16.mxu1 %v10826_v17 }
 0x756   : > { %10829 = vmatpush3.bf16.msra.mxu1 %v10826_v17 }
 0x757   : > { %v15062_v33 = vpack.c.bf16 %v11461_v47, %v11460_v56 }
 0x759   : > { %10847 = vmatprep.subr.bf16.mxu1 %v15062_v33 }
 0x769   : > { %v15065_v12 = vpop.f32.mrb[84].mxu0 }
 0x76a   : > { %17412 = vst [vmem:[#allocation34_spill] sm:$0xff] %v15065_v12  ;;  %v15067_v20 = vpop.f32.mrb[85].mxu0 }
 0x76b   : > { %17413 = vst [vmem:[#allocation49_spill] sm:$0xff] %v15067_v20 }
 0x76d   : > { %v15071_v5 = vpop.f32.mrb[108].mxu1 }
 0x76e   : > { %17414 = vst [vmem:[#allocation26_spill] sm:$0xff] %v15071_v5  ;;  %v15073_v48 = vpop.f32.mrb[109].mxu1  ;;  %v15211_v5 = vld [vmem:[#allocation8 + $0xb8] sm:$0xff] }
 0x76f   : > { %17415 = vst [vmem:[#allocation114_spill] sm:$0xff] %v15073_v48  ;;  %v15209_v48 = vld [vmem:[#allocation8 + $0x90] sm:$0xff] }
 0x776   : > { %v15077_v31 = vpop.f32.mrb[86].mxu0 }
 0x777   : > { %17416 = vst [vmem:[#allocation115_spill] sm:$0xff] %v15077_v31  ;;  %v15079_v55 = vpop.f32.mrb[87].mxu0 }
 0x778   : > { %17417 = vst [vmem:[#allocation108_spill] sm:$0xff] %v15079_v55 }
 0x77a   : > { %v15083_v15 = vpop.f32.mrb[110].mxu1 }
 0x77b   : > { %17418 = vst [vmem:[#allocation85_spill] sm:$0xff] %v15083_v15  ;;  %v15085_v50 = vpop.f32.mrb[111].mxu1 }
 0x77c   : > { %17419 = vst [vmem:[#allocation58_spill] sm:$0xff] %v15085_v50 }
 0x77e   : > { %v15089_v57 = vpop.f32.mrb[88].mxu0 }
 0x77f   : > { %17420 = vst [vmem:[#allocation116_spill] sm:$0xff] %v15089_v57  ;;  %v15091_v41 = vpop.f32.mrb[89].mxu0 }
 0x780   : > { %17421 = vst [vmem:[#allocation110_spill] sm:$0xff] %v15091_v41 }
 0x781   : > { %v15095_v14 = vpop.f32.mrb[112].mxu1 }
 0x782   : > { %17422 = vst [vmem:[#allocation92_spill] sm:$0xff] %v15095_v14  ;;  %v15097_v63 = vpop.f32.mrb[113].mxu1 }
 0x783   : > { %17423 = vst [vmem:[#allocation111_spill] sm:$0xff] %v15097_v63 }
 0x784   : > { %v15101_v52 = vpop.f32.mrb[90].mxu0 }
 0x785   : > { %17424 = vst [vmem:[#allocation109_spill] sm:$0xff] %v15101_v52  ;;  %v15103_v44 = vpop.f32.mrb[91].mxu0 }
 0x786   : > { %17425 = vst [vmem:[#allocation68_spill] sm:$0xff] %v15103_v44 }
 0x789   : > { %v15107_v36 = vpop.f32.mrb[114].mxu1 }
 0x78a   : > { %17426 = vst [vmem:[#allocation118_spill] sm:$0xff] %v15107_v36  ;;  %v15109_v35 = vpop.f32.mrb[115].mxu1  ;;  %v15184_v36 = vld [vmem:[#allocation8 + $0xa8] sm:$0xff] }
 0x78b   : > { %17427 = vst [vmem:[#allocation17_spill] sm:$0xff] %v15109_v35  ;;  %v15182_v35 = vld [vmem:[#allocation8 + $0x98] sm:$0xff] }
 0x78d   : > { %v15113_v37 = vpop.f32.mrb[92].mxu0 }
 0x78e   : > { %17428 = vst [vmem:[#allocation59_spill] sm:$0xff] %v15113_v37  ;;  %v15115_v8 = vpop.f32.mrb[93].mxu0 }
 0x78f   : > { %17429 = vst [vmem:[#allocation117_spill] sm:$0xff] %v15115_v8 }
 0x791   : > { %v15119_v27 = vpop.f32.mrb[116].mxu1 }
 0x792   : > { %17430 = vst [vmem:[#allocation112_spill] sm:$0xff] %v15119_v27  ;;  %v15121_v51 = vpop.f32.mrb[117].mxu1 }
 0x793   : > { %17431 = vst [vmem:[#allocation37_spill] sm:$0xff] %v15121_v51 }
 0x798   : > { %v15125_v34 = vpop.f32.mrb[118].mxu1 }
 0x799   : > { %17432 = vst [vmem:[#allocation44_spill] sm:$0xff] %v15125_v34  ;;  %v15127_v30 = vpop.f32.mrb[119].mxu1 }
 0x79a   : > { %17433 = vst [vmem:[#allocation22_spill] sm:$0xff] %v15127_v30 }
 0x79e   : > { %v15131_v0 = vpop.f32.mrb[94].mxu0  ;;  %v15133_v47 = vpop.f32.mrb[120].mxu1 }
 0x79f   : > { %17434 = vst [vmem:[#allocation50_spill] sm:$0xff] %v15131_v0  ;;  %17435 = vst [vmem:[#allocation113_spill] sm:$0xff] %v15133_v47  ;;  %v15135_v56 = vpop.f32.mrb[95].mxu0  ;;  %v15137_v2 = vpop.f32.mrb[121].mxu1  ;;  %v15172_v0 = vld [vmem:[#allocation8 + $0x80] sm:$0xff] }
 0x7a0   : > { %17436 = vst [vmem:[#allocation24_spill] sm:$0xff] %v15135_v56  ;;  %17437 = vst [vmem:[#allocation15_spill] sm:$0xff] %v15137_v2 }
 0x7a5   : > { %v15143_v62 = vpop.f32.mrb[96].mxu0 }
 0x7a6   : > { %17438 = vst [vmem:[#allocation18_spill] sm:$0xff] %v15143_v62  ;;  %v15145_v28 = vpop.f32.mrb[97].mxu0 }
 0x7a7   : > { %17439 = vst [vmem:[#allocation20_spill] sm:$0xff] %v15145_v28 }
 0x7b1   : > { %v15149_v38 = vpop.f32.mrb[98].mxu0 }
 0x7b2   : > { %17440 = vst [vmem:[#allocation28_spill] sm:$0xff] %v15149_v38  ;;  %v15151_v39 = vpop.f32.mrb[99].mxu0 }
 0x7b3   : > { %17441 = vst [vmem:[#allocation31_spill] sm:$0xff] %v15151_v39 }
 0x7b5   : > { %v9808_v21 = vpop.f32.mrb[100].mxu0 }
 0x7b6   : > { %v15158_v26 = vadd.f32 %v9808_v21, %v15155_v54  ;;  %v4206_v23 = vpop.f32.mrb[101].mxu0 }
 0x7b7   : > { %v15178_v8 = vadd.f32 %v4206_v23, %v15172_v0 }
 0x7b8   : > { %v4755_v2 = vsel %vm1517_vm2, %v15158_v26, -inf }
 0x7b9   : > { %4756 = vmax.xlane.f32.xlu1 %v4755_v2  ;;  %v9811_v47 = vpop.f32.mrb[102].mxu0  ;;  %v4752_v23 = vsel %vm1517_vm2, %v15178_v8, -inf }
 0x7ba   : > { %v4216_v17 = vpop.f32.mrb[103].mxu0 }
 0x7bb   : > { %v15216_v44 = vadd.f32 %v4216_v17, %v15209_v48 }
 0x7bd   : > { %v4758_v31 = vsel %vm1517_vm2, %v15216_v44, -inf }
 0x7d8   : > { %v9814_v30 = vpop.f32.mrb[104].mxu0 }
 0x7d9   : > { %v4226_v34 = vpop.f32.mrb[105].mxu0 }
 0x7dc   : > { %v9817_v51 = vpop.f32.mrb[106].mxu0 }
 0x7dd   : > { %v4236_v27 = vpop.f32.mrb[107].mxu0 }
 0x7e2   : > { %v15162_v56 = vpop.f32.mrb[108].mxu0  ;;  %v15164_v53 = vpop.f32.mrb[122].mxu1 }
 0x7e3   : > { %17442 = vst [vmem:[#allocation33_spill] sm:$0xff] %v15164_v53  ;;  %v15166_v39 = vpop.f32.mrb[109].mxu0  ;;  %v15168_v38 = vpop.f32.mrb[123].mxu1 }
 0x7e4   : > { %17443 = vst [vmem:[#allocation36_spill] sm:$0xff] %v15168_v38 }
 0x7e6   : > { %v9836_v2 = vpop.f32.mrb[124].mxu1 }
 0x7e7   : > { %v15175_v28 = vadd.f32 %v9836_v2, %v15155_v54  ;;  %v4375_v62 = vpop.f32.mrb[125].mxu1  ;;  %v15190_v2 = vadd.f32 %v9814_v30, %v15184_v36 }
 0x7e8   : > { %v15193_v53 = vadd.f32 %v4375_v62, %v15172_v0 }
 0x7e9   : > { %v4779_v37 = vsel %vm1517_vm2, %v15175_v28, -inf  ;;  %v4767_v62 = vsel %vm1517_vm2, %v15190_v2, -inf }
 0x7ea   : > { %4780 = vmax.xlane.f32.xlu0 %v4779_v37  ;;  %v9839_v63 = vpop.f32.mrb[126].mxu1  ;;  %v4776_v30 = vsel %vm1517_vm2, %v15193_v53, -inf }
 0x7eb   : > { %v15187_v21 = vadd.f32 %v9839_v63, %v15182_v35  ;;  %v4385_v38 = vpop.f32.mrb[127].mxu1  ;;  %v15200_v63 = vadd.f32 %v9811_v47, %v15182_v35 }
 0x7ed   : > { %v4785_v14 = vsel %vm1517_vm2, %v15187_v21, -inf  ;;  %v4761_v41 = vsel %vm1517_vm2, %v15200_v63, -inf }
 0x7ee   : > { %4753 = vmax.xlane.f32.xlu0 %v4752_v23  ;;  %4786 = vmax.xlane.f32.xlu1 %v4785_v14  ;;  %v9842_v37 = vpop.f32.mrb[128].mxu1  ;;  %v15213_v23 = vpop.permute.xlu1 %11468 }
 0x7ef   : > { %v4395_v50 = vpop.f32.mrb[129].mxu1  ;;  %v15203_v15 = vadd.f32 %v9842_v37, %v15184_v36  ;;  %v15219_v37 = vadd.f32 %v9817_v51, %v15211_v5 }
 0x7f1   : > { %v4791_v52 = vsel %vm1517_vm2, %v15203_v15, -inf  ;;  %v4773_v51 = vsel %vm1517_vm2, %v15219_v37, -inf }
 0x7f2   : > { %4768 = vmax.xlane.f32.xlu1 %v4767_v62  ;;  %v9845_v14 = vpop.f32.mrb[130].mxu1  ;;  %4777 = vmax.xlane.f32.xlu0 %v4776_v30  ;;  %v15225_v57 = vpop.permute.xlu1 %11473  ;;  %v15228_v30 = vadd.f32 %v4385_v38, %v15209_v48  ;;  %v15242_v38 = vadd.f32 %v4226_v34, %v15237_v29  ;;  %v15258_v34 = vadd.f32 %v4395_v50, %v15237_v29 }
 0x7f3   : > { %v4405_v47 = vpop.f32.mrb[131].mxu1  ;;  %v15231_v17 = vadd.f32 %v9845_v14, %v15211_v5 }
 0x7f4   : > { %v4782_v13 = vsel %vm1517_vm2, %v15228_v30, -inf  ;;  %v4764_v4 = vsel %vm1517_vm2, %v15242_v38, -inf  ;;  %v4788_v50 = vsel %vm1517_vm2, %v15258_v34, -inf }
 0x7f5   : > { %v4797_v12 = vsel %vm1517_vm2, %v15231_v17, -inf }
 0x7f6   : > { %4792 = vmax.xlane.f32.xlu1 %v4791_v52  ;;  %4762 = vmax.xlane.f32.xlu0 %v4761_v41  ;;  %v15239_v52 = vld [vmem:[#allocation8 + $0xb0] sm:$0xff]  ;;  %v15251_v16 = vpop.permute.xlu1 %11483 }
 0x7f7   : > { %v15245_v14 = vadd.f32 %v4236_v27, %v15239_v52 }
 0x7f8   : > { %v9867_v62 = vpop.f32.mrb[110].mxu0 }
 0x7f9   : > { %v4554_v55 = vpop.f32.mrb[111].mxu0  ;;  %v4770_v45 = vsel %vm1517_vm2, %v15245_v14, -inf }
 0x7fa   : > { %4774 = vmax.xlane.f32.xlu1 %v4773_v51  ;;  %4759 = vmax.xlane.f32.xlu0 %v4758_v31  ;;  %v15255_v31 = vadd.f32 %v15162_v56, %v15155_v54  ;;  %v15302_v24 = vadd.f32 %v4554_v55, %v15209_v48 }
 0x7fc   : > { %v9870_v41 = vpop.f32.mrb[112].mxu0  ;;  %v4803_v56 = vsel %vm1517_vm2, %v15255_v31, -inf }
 0x7fd   : > { %v4564_v20 = vpop.f32.mrb[113].mxu0 }
 0x7fe   : > { %4798 = vmax.xlane.f32.xlu1 %v4797_v12  ;;  %4783 = vmax.xlane.f32.xlu0 %v4782_v13  ;;  %v15264_v13 = vpop.permute.xlu1 %11493  ;;  %v15267_v12 = vadd.f32 %v4405_v47, %v15239_v52 }
 0x800   : > { %v9873_v51 = vpop.f32.mrb[114].mxu0  ;;  %v4794_v40 = vsel %vm1517_vm2, %v15267_v12, -inf }
 0x801   : > { %v4574_v27 = vpop.f32.mrb[115].mxu0 }
 0x802   : > { %4771 = vmax.xlane.f32.xlu1 %v4770_v45  ;;  %4765 = vmax.xlane.f32.xlu0 %v4764_v4  ;;  %v15278_v4 = vadd.f32 %v15166_v39, %v15172_v0  ;;  %v15281_v45 = vadd.f32 %v9867_v62, %v15182_v35 }
 0x804   : > { %v4809_v62 = vsel %vm1517_vm2, %v15281_v45, -inf }
 0x806   : > { %v9892_v6 = vpop.f32.mrb[132].mxu1  ;;  %4804 = vmax.xlane.f32.xlu1 %v4803_v56  ;;  %4789 = vmax.xlane.f32.xlu0 %v4788_v50  ;;  %v15287_v56 = vpop.permute.xlu1 %11503  ;;  %v4800_v50 = vsel %vm1517_vm2, %v15278_v4, -inf }
 0x807   : > { %v15274_v61 = vadd.f32 %v9892_v6, %v15155_v54  ;;  %v4713_v32 = vpop.f32.mrb[133].mxu1  ;;  %17444 = vst [vmem:[#allocation16_spill] sm:$0xff] %v15287_v56 }
 0x808   : > { %v15290_v54 = vadd.f32 %v4713_v32, %v15172_v0  ;;  %v15305_v32 = vadd.f32 %v9870_v41, %v15184_v36  ;;  %v4806_v41 = vsel %vm1517_vm2, %v15302_v24, -inf }
 0x809   : > { %v4827_v47 = vsel %vm1517_vm2, %v15274_v61, -inf }
 0x80a   : > { %v9895_v18 = vpop.f32.mrb[134].mxu1  ;;  %4828 = vmax.xlane.f32.xlu1 %v4827_v47  ;;  %4795 = vmax.xlane.f32.xlu0 %v4794_v40  ;;  %v15299_v40 = vpop.permute.xlu1 %11508  ;;  %v4815_v55 = vsel %vm1517_vm2, %v15305_v32, -inf }
 0x80b   : > { %v4723_v6 = vpop.f32.mrb[135].mxu1  ;;  %v15293_v39 = vadd.f32 %v9895_v18, %v15182_v35  ;;  %17445 = vst [vmem:[#allocation21_spill] sm:$0xff] %v15299_v40  ;;  %v4824_v35 = vsel %vm1517_vm2, %v15290_v54, -inf }
 0x80d   : > { %v4833_v18 = vsel %vm1517_vm2, %v15293_v39, -inf }
 0x80e   : > { %v9898_v60 = vpop.f32.mrb[136].mxu1  ;;  %4810 = vmax.xlane.f32.xlu1 %v4809_v62  ;;  %4801 = vmax.xlane.f32.xlu0 %v4800_v50  ;;  %v15312_v50 = vadd.f32 %v4723_v6, %v15209_v48  ;;  %v15321_v11 = vpop.permute.xlu1 %11513 }
 0x80f   : > { %v4733_v47 = vpop.f32.mrb[137].mxu1  ;;  %v15315_v59 = vadd.f32 %v9898_v60, %v15184_v36  ;;  %17446 = vst [vmem:[#allocation43_spill] sm:$0xff] %v15321_v11 }
 0x810   : > { %v4830_v48 = vsel %vm1517_vm2, %v15312_v50, -inf  ;;  %v15336_v6 = vadd.f32 %v4733_v47, %v15237_v29  ;;  %v15354_v47 = vpop.permute.xlu0 %11433 }
 0x811   : > { %v4839_v60 = vsel %vm1517_vm2, %v15315_v59, -inf }
 0x812   : > { %v9901_v0 = vpop.f32.mrb[138].mxu1  ;;  %4834 = vmax.xlane.f32.xlu1 %v4833_v18  ;;  %4825 = vmax.xlane.f32.xlu0 %v4824_v35  ;;  %v15324_v18 = vadd.f32 %v4564_v20, %v15237_v29  ;;  %v15327_v35 = vadd.f32 %v9873_v51, %v15211_v5  ;;  %v15333_v36 = vpop.permute.xlu1 %5727  ;;  %v4836_v29 = vsel %vm1517_vm2, %v15336_v6, -inf }
 0x813   : > { %v4743_v62 = vpop.f32.mrb[139].mxu1  ;;  %17447 = vst [vmem:[#allocation27_spill] sm:$0xff] %v15333_v36 }
 0x814   : > { %v4821_v20 = vsel %vm1517_vm2, %v15327_v35, -inf  ;;  %v4812_v51 = vsel %vm1517_vm2, %v15324_v18, -inf }
 0x816   : > { %4816 = vmax.xlane.f32.xlu1 %v4815_v55  ;;  %4807 = vmax.xlane.f32.xlu0 %v4806_v41  ;;  %v15339_v55 = vadd.f32 %v9901_v0, %v15211_v5  ;;  %v15346_v41 = vadd.f32 %v4574_v27, %v15239_v52  ;;  %v15352_v5 = vpop.permute.xlu1 %5731  ;;  %v15357_v0 = vadd.f32 %v4743_v62, %v15239_v52 }
 0x817   : > { %17448 = vst [vmem:[#allocation119_spill] sm:$0xff] %v15352_v5 }
 0x81a   : > { %4840 = vmax.xlane.f32.xlu1 %v4839_v60  ;;  %4831 = vmax.xlane.f32.xlu0 %v4830_v48  ;;  %v4845_v60 = vsel %vm1517_vm2, %v15339_v55, -inf  ;;  %v4818_v48 = vsel %vm1517_vm2, %v15346_v41, -inf  ;;  %v15361_v27 = vpop.permute.xlu1 %11523 }
 0x81b   : > { %17449 = vst [vmem:[#allocation120_spill] sm:$0xff] %v15361_v27 }
 0x81e   : > { %4822 = vmax.xlane.f32.xlu1 %v4821_v20  ;;  %4813 = vmax.xlane.f32.xlu0 %v4812_v51  ;;  %v4842_v20 = vsel %vm1517_vm2, %v15357_v0, -inf  ;;  %v15365_v51 = vpop.permute.xlu0 %11443 }
 0x822   : > { %4846 = vmax.xlane.f32.xlu1 %v4845_v60  ;;  %4837 = vmax.xlane.f32.xlu0 %v4836_v29  ;;  %v15367_v60 = vpop.permute.xlu1 %5735  ;;  %v15369_v29 = vpop.permute.xlu0 %11453 }
 0x823   : > { %17450 = vst [vmem:[#allocation121_spill] sm:$0xff] %v15367_v60 }
 0x826   : > { %4819 = vmax.xlane.f32.xlu0 %v4818_v48  ;;  %v15371_v5 = vpop.permute.xlu1 %5739  ;;  %v15373_v52 = vpop.permute.xlu0 %11463 }
 0x827   : > { %17451 = vst [vmem:[#allocation122_spill] sm:$0xff] %v15371_v5 }
 0x82a   : > { %4843 = vmax.xlane.f32.xlu0 %v4842_v20  ;;  %v15375_v62 = vpop.permute.xlu1 %11533  ;;  %v15377_v36 = vpop.permute.xlu0 %11478 }
 0x82b   : > { %17452 = vst [vmem:[#allocation123_spill] sm:$0xff] %v15375_v62 }
 0x82e   : > { %v15379_v48 = vpop.permute.xlu1 %5896  ;;  %v15381_v27 = vpop.permute.xlu0 %11488 }
 0x82f   : > { %17453 = vst [vmem:[#allocation124_spill] sm:$0xff] %v15379_v48  ;;  %17454 = vst [vmem:[#allocation125_spill] sm:$0xff] %v15381_v27 }
 0x832   : > { %v15384_v25 = vpop.permute.xlu0 %11498 }
 0x833   : > { %17455 = vst [vmem:[#allocation126_spill] sm:$0xff] %v15384_v25 }
 0x836   : > { %v15386_v60 = vpop.permute.xlu0 %5725 }
 0x837   : > { %17456 = vst [vmem:[#allocation127_spill] sm:$0xff] %v15386_v60 }
 0x83a   : > { %v15390_v40 = vpop.permute.xlu0 %5729 }
 0x83b   : > { %17457 = vst [vmem:[#allocation128_spill] sm:$0xff] %v15390_v40 }
 0x83e   : > { %v15394_v48 = vpop.permute.xlu0 %11518 }
 0x83f   : > { %17458 = vst [vmem:[#allocation129_spill] sm:$0xff] %v15394_v48 }
 0x842   : > { %v15396_v49 = vpop.permute.xlu0 %5733 }
 0x843   : > { %17459 = vst [vmem:[#allocation130_spill] sm:$0xff] %v15396_v49 }
 0x846   : > { %v4757_v11 = vpop.xlane.xlu1 %4756  ;;  %v15398_v19 = vpop.permute.xlu0 %5737 }
 0x847   : > { %v4849_v20 = vsub.f32 %v15158_v26, %v4757_v11  ;;  %17460 = vst [vmem:[#allocation131_spill] sm:$0xff] %v15398_v19 }
 0x849   : > { %v4882_v9 = vmul.f32 1.442695, %v4849_v20 }
 0x84a   : > { %v15400_v11 = vpop.permute.xlu0 %11528 }
 0x84b   : > { %12133 = vpow2.f32 %v4882_v9  ;;  %17461 = vst [vmem:[#allocation132_spill] sm:$0xff] %v15400_v11 }
 0x84e   : > { %v15402_v26 = vpop.permute.xlu0 %5894 }
 0x84f   : > { %17462 = vst [vmem:[#allocation133_spill] sm:$0xff] %v15402_v26 }
 0x855   : > { %v15388_v5 = vpop.eup %12133 }
 0x856   : > { %v4947_v62 = vsel %vm1517_vm2, %v15388_v5, 0.0 }
 0x857   : > { %4948 = vadd.xlane.f32.xlu1 %v4947_v62 }
 0x877   : > { %v4781_v9 = vpop.xlane.xlu0 %4780 }
 0x878   : > { %v4857_v20 = vsub.f32 %v15175_v28, %v4781_v9 }
 0x87a   : > { %v4898_v60 = vmul.f32 1.442695, %v4857_v20 }
 0x87b   : > { %v4754_v25 = vpop.xlane.xlu0 %4753  ;;  %v4787_v40 = vpop.xlane.xlu1 %4786 }
 0x87c   : > { %12135 = vpow2.f32 %v4898_v60  ;;  %v4848_v27 = vsub.f32 %v15178_v8, %v4754_v25  ;;  %v4859_v62 = vsub.f32 %v15187_v21, %v4787_v40 }
 0x87e   : > { %v4880_v48 = vmul.f32 1.442695, %v4848_v27  ;;  %v4902_v43 = vmul.f32 1.442695, %v4859_v62 }
 0x87f   : > { %v4769_v49 = vpop.xlane.xlu1 %4768  ;;  %v4778_v56 = vpop.xlane.xlu0 %4777 }
 0x880   : > { %12137 = vpow2.f32 %v4880_v48  ;;  %v4853_v19 = vsub.f32 %v15190_v2, %v4769_v49  ;;  %v4856_v26 = vsub.f32 %v15193_v53, %v4778_v56 }
 0x881   : > { %12139 = vpow2.f32 %v4902_v43 }
 0x882   : > { %v4890_v11 = vmul.f32 1.442695, %v4853_v19  ;;  %v4896_v28 = vmul.f32 1.442695, %v4856_v26 }
 0x883   : > { %v4793_v9 = vpop.xlane.xlu1 %4792  ;;  %v4763_v20 = vpop.xlane.xlu0 %4762 }
 0x884   : > { %12141 = vpow2.f32 %v4890_v11  ;;  %v4861_v60 = vsub.f32 %v15203_v15, %v4793_v9  ;;  %v4851_v25 = vsub.f32 %v15200_v63, %v4763_v20 }
 0x885   : > { %12143 = vpow2.f32 %v4896_v28 }
 0x886   : > { %v15411_v8 = vpop.eup %12135  ;;  %v4906_v21 = vmul.f32 1.442695, %v4861_v60  ;;  %v4886_v40 = vmul.f32 1.442695, %v4851_v25 }
 0x887   : > { %v4775_v27 = vpop.xlane.xlu1 %4774  ;;  %v4760_v48 = vpop.xlane.xlu0 %4759  ;;  %v4971_v49 = vsel %vm1517_vm2, %v15411_v8, 0.0 }
 0x888   : > { %12145 = vpow2.f32 %v4906_v21  ;;  %v4850_v19 = vsub.f32 %v15216_v44, %v4760_v48  ;;  %4972 = vadd.xlane.f32.xlu1 %v4971_v49 }
 0x889   : > { %12147 = vpow2.f32 %v4886_v40 }
 0x88a   : > { %v15416_v43 = vpop.eup %12137  ;;  %v4884_v15 = vmul.f32 1.442695, %v4850_v19 }
 0x88b   : > { %v15418_v53 = vpop.eup %12139  ;;  %v4799_v2 = vpop.xlane.xlu1 %4798  ;;  %v4944_v56 = vsel %vm1517_vm2, %v15416_v43, 0.0 }
 0x88c   : > { %v4784_v63 = vpop.xlane.xlu0 %4783  ;;  %v4863_v11 = vsub.f32 %v15231_v17, %v4799_v2  ;;  %v4977_v62 = vsel %vm1517_vm2, %v15418_v53, 0.0  ;;  %4945 = vadd.xlane.f32.xlu0 %v4944_v56  ;;  %12149 = vpow2.f32 %v4884_v15  ;;  %v4855_v2 = vsub.f32 %v15219_v37, %v4775_v27 }
 0x88d   : > { %v4858_v26 = vsub.f32 %v15228_v30, %v4784_v63  ;;  %4978 = vadd.xlane.f32.xlu1 %v4977_v62 }
 0x88e   : > { %v15426_v44 = vpop.eup %12141  ;;  %v4910_v28 = vmul.f32 1.442695, %v4863_v11  ;;  %v4894_v37 = vmul.f32 1.442695, %v4855_v2 }
 0x88f   : > { %v4900_v9 = vmul.f32 1.442695, %v4858_v26  ;;  %v15428_v20 = vpop.eup %12143  ;;  %v4772_v60 = vpop.xlane.xlu1 %4771  ;;  %v4959_v21 = vsel %vm1517_vm2, %v15426_v44, 0.0 }
 0x890   : > { %v4766_v25 = vpop.xlane.xlu0 %4765  ;;  %12151 = vpow2.f32 %v4910_v28  ;;  %v4854_v30 = vsub.f32 %v15245_v14, %v4772_v60  ;;  %v4968_v40 = vsel %vm1517_vm2, %v15428_v20, 0.0 }
 0x891   : > { %v4852_v17 = vsub.f32 %v15242_v38, %v4766_v25  ;;  %12153 = vpow2.f32 %v4900_v9  ;;  %4960 = vadd.xlane.f32.xlu1 %v4959_v21  ;;  %4969 = vadd.xlane.f32.xlu0 %v4968_v40 }
 0x892   : > { %v15436_v48 = vpop.eup %12145  ;;  %v4892_v49 = vmul.f32 1.442695, %v4854_v30 }
 0x893   : > { %v4888_v19 = vmul.f32 1.442695, %v4852_v17  ;;  %v15438_v15 = vpop.eup %12147  ;;  %v4805_v63 = vpop.xlane.xlu1 %4804  ;;  %v4983_v14 = vsel %vm1517_vm2, %v15436_v48, 0.0 }
 0x894   : > { %v4790_v56 = vpop.xlane.xlu0 %4789  ;;  %12155 = vpow2.f32 %v4892_v49  ;;  %v4865_v38 = vsub.f32 %v15255_v31, %v4805_v63  ;;  %v4953_v26 = vsel %vm1517_vm2, %v15438_v15, 0.0 }
 0x895   : > { %v4860_v11 = vsub.f32 %v15258_v34, %v4790_v56  ;;  %12157 = vpow2.f32 %v4888_v19  ;;  %4984 = vadd.xlane.f32.xlu1 %v4983_v14  ;;  %4954 = vadd.xlane.f32.xlu0 %v4953_v26 }
 0x896   : > { %v4914_v62 = vmul.f32 1.442695, %v4865_v38  ;;  %v15447_v9 = vpop.eup %12149 }
 0x897   : > { %v4904_v28 = vmul.f32 1.442695, %v4860_v11  ;;  %v4829_v27 = vpop.xlane.xlu1 %4828  ;;  %v4950_v34 = vsel %vm1517_vm2, %v15447_v9, 0.0 }
 0x898   : > { %v4796_v60 = vpop.xlane.xlu0 %4795  ;;  %12159 = vpow2.f32 %v4914_v62  ;;  %v4873_v25 = vsub.f32 %v15274_v61, %v4829_v27 }
 0x899   : > { %v4862_v31 = vsub.f32 %v15267_v12, %v4796_v60  ;;  %12161 = vpow2.f32 %v4904_v28  ;;  %4951 = vadd.xlane.f32.xlu0 %v4950_v34 }
 0x89a   : > { %v15453_v21 = vpop.eup %12151  ;;  %v4930_v30 = vmul.f32 1.442695, %v4873_v25  ;;  %12163 = vpow2.f32 %v4894_v37 }
 0x89b   : > { %v15455_v17 = vpop.eup %12153  ;;  %v4908_v40 = vmul.f32 1.442695, %v4862_v31  ;;  %v4811_v49 = vpop.xlane.xlu1 %4810  ;;  %v4989_v2 = vsel %vm1517_vm2, %v15453_v21, 0.0 }
 0x89c   : > { %v4802_v19 = vpop.xlane.xlu0 %4801  ;;  %12165 = vpow2.f32 %v4930_v30  ;;  %v4867_v61 = vsub.f32 %v15281_v45, %v4811_v49  ;;  %4990 = vadd.xlane.f32.xlu1 %v4989_v2  ;;  %v4974_v63 = vsel %vm1517_vm2, %v15455_v17, 0.0 }
 0x89d   : > { %v4864_v12 = vsub.f32 %v15278_v4, %v4802_v19  ;;  %4975 = vadd.xlane.f32.xlu0 %v4974_v63  ;;  %12167 = vpow2.f32 %v4908_v40 }
 0x89e   : > { %v15463_v56 = vpop.eup %12155  ;;  %v4918_v14 = vmul.f32 1.442695, %v4867_v61 }
 0x89f   : > { %v15465_v38 = vpop.eup %12157  ;;  %v4912_v11 = vmul.f32 1.442695, %v4864_v12  ;;  %v4835_v26 = vpop.xlane.xlu1 %4834  ;;  %v4962_v28 = vsel %vm1517_vm2, %v15463_v56, 0.0 }
 0x8a0   : > { %v4826_v62 = vpop.xlane.xlu0 %4825  ;;  %12169 = vpow2.f32 %v4918_v14  ;;  %4963 = vadd.xlane.f32.xlu1 %v4962_v28  ;;  %v4956_v45 = vsel %vm1517_vm2, %v15465_v38, 0.0  ;;  %v4875_v60 = vsub.f32 %v15293_v39, %v4835_v26 }
 0x8a1   : > { %v4872_v4 = vsub.f32 %v15290_v54, %v4826_v62  ;;  %4957 = vadd.xlane.f32.xlu0 %v4956_v45  ;;  %12171 = vpow2.f32 %v4912_v11 }
 0x8a2   : > { %v15472_v37 = vpop.eup %12159  ;;  %v4934_v2 = vmul.f32 1.442695, %v4875_v60 }
 0x8a3   : > { %v15474_v27 = vpop.eup %12161  ;;  %v4928_v25 = vmul.f32 1.442695, %v4872_v4  ;;  %v4817_v31 = vpop.xlane.xlu1 %4816  ;;  %v4995_v30 = vsel %vm1517_vm2, %v15472_v37, 0.0 }
 0x8a4   : > { %v4808_v34 = vpop.xlane.xlu0 %4807  ;;  %4996 = vadd.xlane.f32.xlu1 %v4995_v30  ;;  %v4980_v54 = vsel %vm1517_vm2, %v15474_v27, 0.0  ;;  %v15481_v40 = vpop.eup %12163  ;;  %v4869_v4 = vsub.f32 %v15305_v32, %v4817_v31 }
 0x8a5   : > { %4981 = vadd.xlane.f32.xlu0 %v4980_v54  ;;  %v4866_v19 = vsub.f32 %v15302_v24, %v4808_v34  ;;  %12173 = vpow2.f32 %v4928_v25  ;;  %v4965_v11 = vsel %vm1517_vm2, %v15481_v40, 0.0 }
 0x8a6   : > { %v15483_v49 = vpop.eup %12165  ;;  %12175 = vpow2.f32 %v4934_v2  ;;  %v4922_v34 = vmul.f32 1.442695, %v4869_v4 }
 0x8a7   : > { %v4841_v39 = vpop.xlane.xlu1 %4840  ;;  %v5019_v12 = vsel %vm1517_vm2, %v15483_v49, 0.0  ;;  %v15492_v26 = vpop.eup %12167  ;;  %v4916_v24 = vmul.f32 1.442695, %v4866_v19 }
 0x8a8   : > { %v4832_v61 = vpop.xlane.xlu0 %4831  ;;  %v4877_v63 = vsub.f32 %v15315_v59, %v4841_v39  ;;  %5020 = vadd.xlane.f32.xlu1 %v5019_v12 }
 0x8a9   : > { %v4874_v14 = vsub.f32 %v15312_v50, %v4832_v61  ;;  %4966 = vadd.xlane.f32.xlu0 %v4965_v11  ;;  %v4986_v50 = vsel %vm1517_vm2, %v15492_v26, 0.0 }
 0x8aa   : > { %v15494_v62 = vpop.eup %12169  ;;  %v4938_v45 = vmul.f32 1.442695, %v4877_v63 }
 0x8ab   : > { %v4932_v28 = vmul.f32 1.442695, %v4874_v14  ;;  %v5001_v59 = vsel %vm1517_vm2, %v15494_v62, 0.0  ;;  %v15501_v25 = vpop.eup %12171  ;;  %v4823_v32 = vpop.xlane.xlu1 %4822 }
 0x8ac   : > { %v4814_v60 = vpop.xlane.xlu0 %4813  ;;  %5002 = vadd.xlane.f32.xlu1 %v5001_v59  ;;  %v4992_v19 = vsel %vm1517_vm2, %v15501_v25, 0.0  ;;  %v4871_v61 = vsub.f32 %v15327_v35, %v4823_v32 }
 0x8ad   : > { %12177 = vpow2.f32 %v4932_v28  ;;  %4987 = vadd.xlane.f32.xlu0 %v4986_v50  ;;  %v4868_v30 = vsub.f32 %v15324_v18, %v4814_v60 }
 0x8ae   : > { %12179 = vpow2.f32 %v4916_v24 }
 0x8af   : > { %12181 = vpow2.f32 %v4938_v45  ;;  %v15507_v2 = vpop.eup %12173  ;;  %v4920_v12 = vmul.f32 1.442695, %v4868_v30 }
 0x8b0   : > { %v4838_v54 = vpop.xlane.xlu0 %4837  ;;  %12183 = vpow2.f32 %v4922_v34  ;;  %v5016_v63 = vsel %vm1517_vm2, %v15507_v2, 0.0  ;;  %v15512_v14 = vpop.eup %12175 }
 0x8b1   : > { %v4876_v31 = vsub.f32 %v15336_v6, %v4838_v54  ;;  %4993 = vadd.xlane.f32.xlu0 %v4992_v19  ;;  %v4926_v6 = vmul.f32 1.442695, %v4871_v61  ;;  %v5025_v24 = vsel %vm1517_vm2, %v15512_v14, 0.0  ;;  %v17463_v19 = vld [vmem:[#allocation40_spill] sm:$0xff]  ;;  %v17464_v61 = vld [vmem:[#allocation38_spill] sm:$0xff] }
 0x8b3   : > { %v4936_v39 = vmul.f32 1.442695, %v4876_v31 }
 0x8b5   : > { %12185 = vpow2.f32 %v4936_v39  ;;  %5017 = vadd.xlane.f32.xlu0 %v5016_v63  ;;  %v4820_v39 = vpop.xlane.xlu0 %4819 }
 0x8b6   : > { %12187 = vpow2.f32 %v4920_v12  ;;  %v4870_v12 = vsub.f32 %v15346_v41, %v4820_v39  ;;  %v17465_v41 = vld [vmem:[#allocation23_spill] sm:$0xff] }
 0x8b7   : > { %v15514_v18 = vpop.eup %12177  ;;  %12189 = vpow2.f32 %v4926_v6  ;;  %v4847_v6 = vpop.xlane.xlu1 %4846 }
 0x8b8   : > { %v15516_v11 = vpop.eup %12179  ;;  %v5022_v35 = vsel %vm1517_vm2, %v15514_v18, 0.0  ;;  %v4924_v63 = vmul.f32 1.442695, %v4870_v12 }
 0x8b9   : > { %v15522_v28 = vpop.eup %12181  ;;  %5026 = vadd.xlane.f32.xlu0 %v5025_v24  ;;  %5023 = vadd.xlane.f32.xlu1 %v5022_v35  ;;  %v4998_v4 = vsel %vm1517_vm2, %v15516_v11, 0.0  ;;  %v4879_v24 = vsub.f32 %v15339_v55, %v4847_v6  ;;  %v4844_v55 = vpop.xlane.xlu0 %4843 }
 0x8ba   : > { %v5031_v45 = vsel %vm1517_vm2, %v15522_v28, 0.0  ;;  %v15528_v60 = vpop.eup %12183  ;;  %12191 = vpow2.f32 %v4924_v63 }
 0x8bb   : > { %v5007_v50 = vsel %vm1517_vm2, %v15528_v60, 0.0  ;;  %v4942_v35 = vmul.f32 1.442695, %v4879_v24  ;;  %v17468_v24 = vld [vmem:[#allocation45_spill] sm:$0xff] }
 0x8bd   : > { %4999 = vadd.xlane.f32.xlu0 %v4998_v4  ;;  %5032 = vadd.xlane.f32.xlu1 %v5031_v45  ;;  %12193 = vpow2.f32 %v4942_v35 }
 0x8bf   : > { %v15530_v59 = vpop.eup %12185 }
 0x8c0   : > { %v5028_v34 = vsel %vm1517_vm2, %v15530_v59, 0.0  ;;  %v15536_v30 = vpop.eup %12187 }
 0x8c1   : > { %5008 = vadd.xlane.f32.xlu0 %v5007_v50  ;;  %5029 = vadd.xlane.f32.xlu1 %v5028_v34  ;;  %v5004_v54 = vsel %vm1517_vm2, %v15536_v30, 0.0  ;;  %v15540_v32 = vpop.eup %12189 }
 0x8c2   : > { %v5013_v31 = vsel %vm1517_vm2, %v15540_v32, 0.0 }
 0x8c4   : > { %v15550_v4 = vpop.eup %12191 }
 0x8c5   : > { %5005 = vadd.xlane.f32.xlu0 %v5004_v54  ;;  %v5010_v45 = vsel %vm1517_vm2, %v15550_v4, 0.0 }
 0x8c7   : > { %v15554_v50 = vpop.eup %12193 }
 0x8c8   : > { %v5037_v34 = vsel %vm1517_vm2, %v15554_v50, 0.0 }
 0x8c9   : > { %5014 = vadd.xlane.f32.xlu0 %v5013_v31  ;;  %v17466_v31 = vld [vmem:[#allocation19_spill] sm:$0xff] }
 0x8d2   : > { %5900 = vrot.lane.b32.xlu1 %v17463_v19, %s12590_s11  ;;  %v4878_v19 = vsub.f32 %v15357_v0, %v4844_v55 }
 0x8d4   : > { %v4940_v12 = vmul.f32 1.442695, %v4878_v19  ;;  %v17470_v19 = vld [vmem:[#allocation54_spill] sm:$0xff] }
 0x8df   : > { %5898 = vrot.lane.b32.xlu0 %v17464_v61, %s12590_s11  ;;  %v17467_v61 = vld [vmem:[#allocation41_spill] sm:$0xff] }
 0x8e4   : > { %v4949_v54 = vpop.xlane.xlu1 %4948 }
 0x8e5   : > { %12195 = vrcp.f32 %v4949_v54  ;;  %v11435_v54 = vunpack.i.l.bf16 %v15354_v47 }
 0x8f6   : > { %5011 = vadd.xlane.f32.xlu1 %v5010_v45 }
 0x8fe   : > { %5038 = vadd.xlane.f32.xlu0 %v5037_v34  ;;  %v17469_v34 = vld [vmem:[#allocation25_spill] sm:$0xff] }
 0x907   : > { %11543 = vrot.lane.b32.xlu1 %v17465_v41, %s12590_s11  ;;  %v12196_v41 = vpop.eup %12195 }
 0x914   : > { %11538 = vrot.lane.b32.xlu0 %v17466_v31, %s12590_s11  ;;  %v11436_v31 = vunpack.i.h.bf16 %v15354_v47 }
 0x915   : > { %v4973_v39 = vpop.xlane.xlu1 %4972 }
 0x916   : > { %v10834_v47 = vpack.c.bf16 %v11436_v31, %v11435_v54  ;;  %v11456_v31 = vunpack.i.h.bf16 %v15369_v29 }
 0x918   : > { %5902 = vrot.lane.b32.xlu0 %v17467_v61, %s12590_s11 }
 0x919   : > { %v4946_v63 = vpop.xlane.xlu0 %4945 }
 0x91a   : > { %v4979_v6 = vpop.xlane.xlu1 %4978  ;;  %12197 = vrcp.f32 %v4946_v63 }
 0x91b   : > { %12199 = vpow2.f32 %v4940_v12 }
 0x91c   : > { %5906 = vrot.lane.b32.xlu0 %v17468_v24, %s12590_s11  ;;  %12201 = vrcp.f32 %v4973_v39  ;;  %v5073_v39 = vmul.f32 %v12196_v41, %v15388_v5  ;;  %v11466_v41 = vunpack.i.h.bf16 %v15373_v52 }
 0x91e   : > { %v4970_v35 = vpop.xlane.xlu0 %4969  ;;  %v4961_v45 = vpop.xlane.xlu1 %4960 }
 0x91f   : > { %12203 = vrcp.f32 %v4970_v35  ;;  %v11446_v35 = vunpack.i.h.bf16 %v15365_v51 }
 0x920   : > { %11548 = vrot.lane.b32.xlu0 %v17469_v34, %s12590_s11  ;;  %v11445_v34 = vunpack.i.l.bf16 %v15365_v51 }
 0x922   : > { %v4955_v0 = vpop.xlane.xlu0 %4954  ;;  %v4985_v61 = vpop.xlane.xlu1 %4984 }
 0x923   : > { %12205 = vrcp.f32 %v4955_v0 }
 0x924   : > { %v12198_v55 = vpop.eup %12197  ;;  %6065 = vrot.lane.b32.xlu0 %v17470_v19, %s12590_s11 }
 0x925   : > { %v5072_v12 = vmul.f32 %v12198_v55, %v15416_v43  ;;  %v15575_v24 = vpop.eup %12199  ;;  %v11465_v55 = vunpack.i.l.bf16 %v15373_v52  ;;  %v10838_v52 = vpack.c.bf16 %v11446_v35, %v11445_v34  ;;  %v11471_v35 = vunpack.i.h.bf16 %v15213_v23 }
 0x926   : > { %v4952_v63 = vpop.xlane.xlu0 %4951  ;;  %v12202_v43 = vpop.eup %12201  ;;  %v5034_v51 = vsel %vm1517_vm2, %v15575_v24, 0.0  ;;  %v11470_v34 = vunpack.i.l.bf16 %v15213_v23 }
 0x927   : > { %12207 = vrcp.f32 %v4952_v63  ;;  %9918 = vmatprep.mubr.msk.f32.mxu0 %vm1517_vm2, %v5072_v12  ;;  %v5081_v54 = vmul.f32 %v12202_v43, %v15411_v8  ;;  %v17471_v12 = vld [vmem:[#allocation62_spill] sm:$0xff]  ;;  %v11475_v63 = vunpack.i.l.bf16 %v15225_v57  ;;  %v11481_v43 = vunpack.i.h.bf16 %v15377_v36 }
 0x928   : > { %6069 = vrot.lane.b32.xlu0 %v17374_v10, %s12590_s11  ;;  %9919 = vmatmul.mubr.msk.f32.vlgmr.msra.gmra.mrb[116].mxu0 %vm1517_vm2, %v5073_v39  ;;  %12209 = vrcp.f32 %v4979_v6  ;;  %v11476_v39 = vunpack.i.h.bf16 %v15225_v57 }
 0x929   : > { %10833 = vmatpush3.bf16.msra.mxu0 %v15059_v7  ;;  %v15584_v5 = vpop.xlane.xlu1 %4990  ;;  %v12204_v0 = vpop.eup %12203  ;;  %v11455_v7 = vunpack.i.l.bf16 %v15369_v29 }
 0x92a   : > { %10835 = vmatprep.subr.bf16.mxu0 %v10834_v47  ;;  %v4976_v19 = vpop.xlane.xlu0 %4975  ;;  %v5080_v10 = vmul.f32 %v12204_v0, %v15428_v20  ;;  %v10850_v20 = vpack.c.bf16 %v11466_v41, %v11465_v55  ;;  %v11480_v0 = vunpack.i.l.bf16 %v15377_v36  ;;  %v11496_v36 = vunpack.i.h.bf16 %v15264_v13 }
 0x92b   : > { %12211 = vrcp.f32 %v4976_v19  ;;  %5035 = vadd.xlane.f32.xlu1 %v5034_v51  ;;  %v10842_v57 = vpack.c.bf16 %v11456_v31, %v11455_v7  ;;  %v15608_v19 = vpack.c.bf16 %v11471_v35, %v11470_v34  ;;  %v17473_v51 = vld [vmem:[#allocation48_spill] sm:$0xff] }
 0x92c   : > { %6071 = vrot.lane.b32.xlu0 %v17471_v12, %s12590_s11  ;;  %9946 = vmatprep.mubr.msk.f32.mxu1 %vm1517_vm2, %v5080_v10  ;;  %12213 = vrcp.f32 %v4961_v45  ;;  %v10858_v7 = vpack.c.bf16 %v11481_v43, %v11480_v0 }
 0x92d   : > { %10837 = vmatpush3.bf16.msra.mxu0 %v10834_v47  ;;  %v4964_v6 = vpop.xlane.xlu1 %4963  ;;  %9947 = vmatmul.mubr.msk.f32.vlgmr.msra.gmra.mrb[140].mxu1 %vm1517_vm2, %v5081_v54  ;;  %v12206_v8 = vpop.eup %12205  ;;  %v17472_v47 = vld [vmem:[#allocation66_spill] sm:$0xff] }
 0x92e   : > { %10839 = vmatprep.subr.bf16.mxu0 %v10838_v52  ;;  %v4958_v29 = vpop.xlane.xlu0 %4957  ;;  %10849 = vmatpush3.bf16.msra.mxu1 %v15062_v33  ;;  %v10854_v33 = vpack.c.bf16 %v11476_v39, %v11475_v63  ;;  %v5075_v10 = vmul.f32 %v12206_v8, %v15438_v15 }
 0x92f   : > { %12215 = vrcp.f32 %v4958_v29  ;;  %10851 = vmatprep.subr.bf16.mxu1 %v10850_v20 }
 0x930   : > { %12217 = vrcp.f32 %v4964_v6  ;;  %6075 = vrot.lane.b32.xlu0 %v17472_v47, %s12590_s11 }
 0x931   : > { %v12208_v45 = vpop.eup %12207  ;;  %10841 = vmatpush3.bf16.msra.mxu0 %v10838_v52  ;;  %12219 = vrcp.f32 %v4985_v61  ;;  %v11495_v61 = vunpack.i.l.bf16 %v15264_v13 }
 0x932   : > { %10843 = vmatprep.subr.bf16.mxu0 %v10842_v57  ;;  %v4982_v41 = vpop.xlane.xlu0 %4981  ;;  %v5074_v55 = vmul.f32 %v12208_v45, %v15447_v9  ;;  %10853 = vmatpush3.bf16.msra.mxu1 %v10850_v20  ;;  %v12210_v23 = vpop.eup %12209 }
 0x933   : > { %12221 = vrcp.f32 %v4982_v41  ;;  %10855 = vmatprep.subr.bf16.mxu1 %v10854_v33  ;;  %v4997_v9 = vpop.xlane.xlu1 %4996  ;;  %v5083_v13 = vmul.f32 %v12210_v23, %v15418_v53  ;;  %v15625_v39 = vpack.c.bf16 %v11496_v36, %v11495_v61 }
 0x934   : > { %6232 = vrot.lane.b32.xlu0 %v17473_v51, %s12590_s11  ;;  %9921 = vmatprep.mubr.msk.f32.mxu0 %vm1517_vm2, %v5074_v55  ;;  %v11485_v51 = vunpack.i.l.bf16 %v15251_v16 }
 0x935   : > { %v12212_v31 = vpop.eup %12211  ;;  %10845 = vmatpush3.bf16.msra.mxu0 %v10842_v57  ;;  %v17476_v57 = vld [vmem:[#allocation47_spill] sm:$0xff] }
 0x936   : > { %9922 = vmatmul.mubr.msk.f32.gmra.mrb[118].mxu0 %vm1517_vm2, %v5075_v10  ;;  %10864 = vmatprep.subr.msk.bf16.mxu0 %vm13005_vm1, %v15608_v19  ;;  %v4967_v54 = vpop.xlane.xlu0 %4966  ;;  %v5082_v12 = vmul.f32 %v12212_v31, %v15455_v17  ;;  %v12214_v15 = vpop.eup %12213  ;;  %v17478_v10 = vld [vmem:[#allocation57_spill] sm:$0xff] }
 0x937   : > { %10857 = vmatpush3.bf16.msra.mxu1 %v10854_v33  ;;  %12223 = vrcp.f32 %v4967_v54  ;;  %v5021_v29 = vpop.xlane.xlu1 %5020  ;;  %v5077_v53 = vmul.f32 %v12214_v15, %v15426_v44 }
 0x938   : > { %10859 = vmatprep.subr.bf16.mxu1 %v10858_v7  ;;  %6236 = vrot.lane.b32.xlu0 %v17360_v22, %s12590_s11  ;;  %12225 = vrcp.f32 %v15584_v5  ;;  %v17474_v22 = vld [vmem:[#allocation63_spill] sm:$0xff]  ;;  %v17475_v5 = vld [vmem:[#allocation42_spill] sm:$0xff] }
 0x939   : > { %v12216_v52 = vpop.eup %12215  ;;  %9949 = vmatprep.mubr.msk.f32.mxu1 %vm1517_vm2, %v5082_v12  ;;  %v17480_v12 = vld [vmem:[#allocation29_spill] sm:$0xff] }
 0x93a   : > { %v12218_v6 = vpop.eup %12217  ;;  %9950 = vmatmul.mubr.msk.f32.gmra.mrb[142].mxu1 %vm1517_vm2, %v5083_v13  ;;  %v4988_v17 = vpop.xlane.xlu0 %4987  ;;  %v5076_v63 = vmul.f32 %v12216_v52, %v15465_v38  ;;  %v17481_v13 = vld [vmem:[#allocation51_spill] sm:$0xff] }
 0x93b   : > { %10861 = vmatpush3.bf16.msra.mxu1 %v10858_v7  ;;  %12227 = vrcp.f32 %v4988_v17  ;;  %v12220_v20 = vpop.eup %12219  ;;  %v5078_v38 = vmul.f32 %v12218_v6, %v15463_v56  ;;  %v5003_v56 = vpop.xlane.xlu1 %5002  ;;  %v17482_v6 = vld [vmem:[#allocation125_spill] sm:$0xff] }
 0x93c   : > { %10888 = vmatprep.subr.msk.bf16.mxu1 %vm13005_vm1, %v15625_v39  ;;  %6240 = vrot.lane.b32.xlu0 %v17474_v22, %s12590_s11  ;;  %12229 = vrcp.f32 %v4997_v9  ;;  %v5085_v47 = vmul.f32 %v12220_v20, %v15436_v48  ;;  %v17477_v48 = vld [vmem:[#allocation35_spill] sm:$0xff]  ;;  %v17479_v9 = vld [vmem:[#allocation16_spill] sm:$0xff]  ;;  %v11491_v17 = vunpack.i.h.bf16 %v17482_v6 }
 0x93d   : > { %v12222_v8 = vpop.eup %12221  ;;  %5904 = vrot.lane.b32.xlu1 %v17475_v5, %s12590_s11  ;;  %9924 = vmatprep.mubr.msk.f32.mxu0 %vm1517_vm2, %v5076_v63  ;;  %v11506_v7 = vunpack.i.h.bf16 %v17479_v9  ;;  %v11505_v54 = vunpack.i.l.bf16 %v17479_v9  ;;  %v17483_v20 = vld [vmem:[#allocation64_spill] sm:$0xff] }
 0x93e   : > { %9925 = vmatmul.mubr.msk.f32.gmra.mrb[120].mxu0 %vm1517_vm2, %v5077_v53  ;;  %v4994_v35 = vpop.xlane.xlu0 %4993  ;;  %v5084_v34 = vmul.f32 %v12222_v8, %v15474_v27  ;;  %v17484_v53 = vld [vmem:[#allocation53_spill] sm:$0xff] }
 0x93f   : > { %9927 = vmatprep.mubr.msk.f32.mxu0 %vm1517_vm2, %v5078_v38  ;;  %12231 = vrcp.f32 %v4994_v35  ;;  %v10892_v63 = vpack.c.bf16 %v11506_v7, %v11505_v54  ;;  %v17485_v38 = vld [vmem:[#allocation21_spill] sm:$0xff]  ;;  %v17497_v7 = vld [vmem:[#allocation39_spill] sm:$0xff]  ;;  %v17498_v54 = vld [vmem:[#allocation46_spill] sm:$0xff] }
 0x940   : > { %6244 = vrot.lane.b32.xlu0 %v17369_v42, %s12590_s11  ;;  %9952 = vmatprep.mubr.msk.f32.mxu1 %vm1517_vm2, %v5084_v34  ;;  %12233 = vrcp.f32 %v5021_v29  ;;  %v11511_v35 = vunpack.i.h.bf16 %v17485_v38  ;;  %v17486_v34 = vld [vmem:[#allocation69_spill] sm:$0xff] }
 0x941   : > { %v12224_v44 = vpop.eup %12223  ;;  %5908 = vrot.lane.b32.xlu1 %v17476_v57, %s12590_s11  ;;  %9953 = vmatmul.mubr.msk.f32.gmra.mrb[144].mxu1 %vm1517_vm2, %v5085_v47 }
 0x942   : > { %v5018_v45 = vpop.xlane.xlu0 %5017  ;;  %v5079_v27 = vmul.f32 %v12224_v44, %v15481_v40  ;;  %v12226_v43 = vpop.eup %12225  ;;  %v11486_v40 = vunpack.i.h.bf16 %v15251_v16  ;;  %v17487_v44 = vld [vmem:[#allocation60_spill] sm:$0xff] }
 0x943   : > { %12235 = vrcp.f32 %v5018_v45  ;;  %v5087_v55 = vmul.f32 %v12226_v43, %v15453_v21  ;;  %v17488_v45 = vld [vmem:[#allocation126_spill] sm:$0xff] }
 0x944   : > { %11558 = vrot.lane.b32.xlu0 %v17388_v3, %s12590_s11  ;;  %9928 = vmatmul.mubr.msk.f32.gmra.mrb[122].mxu0 %vm1517_vm2, %v5079_v27  ;;  %v10868_v61 = vpack.c.bf16 %v11486_v40, %v11485_v51  ;;  %v11501_v27 = vunpack.i.h.bf16 %v17488_v45  ;;  %v11500_v43 = vunpack.i.l.bf16 %v17488_v45  ;;  %v17492_v51 = vld [vmem:[#allocation61_spill] sm:$0xff]  ;;  %v17511_v45 = vld [vmem:[#allocation131_spill] sm:$0xff] }
 0x945   : > { %v12228_v42 = vpop.eup %12227  ;;  %6063 = vrot.lane.b32.xlu1 %v17477_v48, %s12590_s11  ;;  %v17489_v48 = vld [vmem:[#allocation56_spill] sm:$0xff] }
 0x946   : > { %v5024_v0 = vpop.xlane.xlu1 %5023  ;;  %v5027_v33 = vpop.xlane.xlu0 %5026  ;;  %v5086_v41 = vmul.f32 %v12228_v42, %v15492_v26 }
 0x947   : > { %12237 = vrcp.f32 %v5024_v0  ;;  %v12230_v23 = vpop.eup %12229 }
 0x948   : > { %12239 = vrcp.f32 %v5027_v33  ;;  %11568 = vrot.lane.b32.xlu0 %v17390_v58, %s12590_s11  ;;  %9955 = vmatprep.mubr.msk.f32.mxu1 %vm1517_vm2, %v5086_v41  ;;  %v5089_v36 = vmul.f32 %v12230_v23, %v15472_v37  ;;  %v17490_v33 = vld [vmem:[#allocation70_spill] sm:$0xff]  ;;  %v17491_v23 = vld [vmem:[#allocation129_spill] sm:$0xff] }
 0x949   : > { %v12232_v3 = vpop.eup %12231  ;;  %6067 = vrot.lane.b32.xlu1 %v17478_v10, %s12590_s11  ;;  %9956 = vmatmul.mubr.msk.f32.gmra.mrb[146].mxu1 %vm1517_vm2, %v5087_v55  ;;  %12241 = vrcp.f32 %v5003_v56  ;;  %v10880_v55 = vpack.c.bf16 %v11501_v27, %v11500_v43  ;;  %v11520_v40 = vunpack.i.l.bf16 %v17491_v23 }
 0x94a   : > { %v5033_v26 = vpop.xlane.xlu1 %5032  ;;  %v5000_v31 = vpop.xlane.xlu0 %4999  ;;  %v5088_v21 = vmul.f32 %v12232_v3, %v15501_v25  ;;  %v11521_v3 = vunpack.i.h.bf16 %v17491_v23 }
 0x94b   : > { %v12234_v58 = vpop.eup %12233  ;;  %12243 = vrcp.f32 %v5000_v31 }
 0x94c   : > { %11578 = vrot.lane.b32.xlu0 %v17392_v46, %s12590_s11  ;;  %9974 = vmatprep.mubr.msk.f32.mxu0 %vm1517_vm2, %v5088_v21  ;;  %12245 = vrcp.f32 %v5033_v26  ;;  %v5097_v15 = vmul.f32 %v12234_v58, %v15483_v49  ;;  %v10904_v10 = vpack.c.bf16 %v11521_v3, %v11520_v40  ;;  %v17493_v26 = vld [vmem:[#allocation43_spill] sm:$0xff] }
 0x94d   : > { %v12236_v16 = vpop.eup %12235  ;;  %11553 = vrot.lane.b32.xlu1 %v17480_v12, %s12590_s11  ;;  %9975 = vmatmul.mubr.msk.f32.vlgmr.msra.gmra.mrb[124].mxu0 %vm1517_vm2, %v5089_v36  ;;  %v11516_v31 = vunpack.i.h.bf16 %v17493_v26  ;;  %v11515_v21 = vunpack.i.l.bf16 %v17493_v26  ;;  %v17494_v36 = vld [vmem:[#allocation67_spill] sm:$0xff]  ;;  %v17499_v12 = vld [vmem:[#allocation52_spill] sm:$0xff] }
 0x94e   : > { %10867 = vmatpush3.bf16.xpose.msk.msra.mxu0 %vm13005_vm1, %v15608_v19  ;;  %v5030_v37 = vpop.xlane.xlu1 %5029  ;;  %v5009_v46 = vpop.xlane.xlu0 %5008  ;;  %v5096_v25 = vmul.f32 %v12236_v16, %v15507_v2  ;;  %v11490_v19 = vunpack.i.l.bf16 %v17482_v6 }
 0x94f   : > { %12247 = vrcp.f32 %v5030_v37  ;;  %10870 = vmatprep.subr.msk.bf16.mxu0 %vm13005_vm1, %v10868_v61  ;;  %v17500_v37 = vld [vmem:[#allocation55_spill] sm:$0xff] }
 0x950   : > { %11583 = vrot.lane.b32.xlu0 %v17481_v13, %s12590_s11  ;;  %10002 = vmatprep.mubr.msk.f32.mxu1 %vm1517_vm2, %v5096_v25  ;;  %12249 = vrcp.f32 %v5009_v46  ;;  %v10874_v5 = vpack.c.bf16 %v11491_v17, %v11490_v19  ;;  %v17501_v46 = vld [vmem:[#allocation65_spill] sm:$0xff]  ;;  %v17502_v25 = vld [vmem:[#allocation72_spill] sm:$0xff] }
 0x951   : > { %v12238_v52 = vpop.eup %12237  ;;  %6073 = vrot.lane.b32.xlu1 %v17483_v20, %s12590_s11  ;;  %10003 = vmatmul.mubr.msk.f32.vlgmr.msra.gmra.mrb[148].mxu1 %vm1517_vm2, %v5097_v15 }
 0x952   : > { %v12240_v49 = vpop.eup %12239  ;;  %10891 = vmatpush3.bf16.xpose.msk.msra.mxu1 %vm13005_vm1, %v15625_v39  ;;  %v5006_v2 = vpop.xlane.xlu0 %5005  ;;  %v5098_v29 = vmul.f32 %v12238_v52, %v15514_v18  ;;  %v11510_v39 = vunpack.i.l.bf16 %v17485_v38 }
 0x953   : > { %10894 = vmatprep.subr.msk.bf16.mxu1 %vm13005_vm1, %v10892_v63  ;;  %12251 = vrcp.f32 %v5006_v2  ;;  %v5099_v22 = vmul.f32 %v12240_v49, %v15512_v14  ;;  %v12242_v8 = vpop.eup %12241  ;;  %v15777_v15 = vpop.permute.xlu1 %5900 }
 0x954   : > { %11593 = vrot.lane.b32.xlu0 %v17484_v53, %s12590_s11  ;;  %10005 = vmatprep.mubr.msk.f32.mxu1 %vm1517_vm2, %v5098_v29  ;;  %v5091_v57 = vmul.f32 %v12242_v8, %v15494_v62  ;;  %v10898_v42 = vpack.c.bf16 %v11511_v35, %v11510_v39  ;;  %v17503_v29 = vld [vmem:[#allocation120_spill] sm:$0xff]  ;;  %v17504_v8 = vld [vmem:[#allocation127_spill] sm:$0xff] }
 0x955   : > { %6077 = vrot.lane.b32.xlu1 %v17486_v34, %s12590_s11  ;;  %10006 = vmatmul.mubr.msk.f32.gmra.mrb[150].mxu1 %vm1517_vm2, %v5099_v22  ;;  %v12244_v18 = vpop.eup %12243  ;;  %v11526_v22 = vunpack.i.h.bf16 %v17503_v29  ;;  %v11525_v53 = vunpack.i.l.bf16 %v17503_v29  ;;  %v17505_v35 = vld [vmem:[#allocation27_spill] sm:$0xff]  ;;  %v17507_v39 = vld [vmem:[#allocation132_spill] sm:$0xff] }
 0x956   : > { %10873 = vmatpush3.bf16.xpose.msk.msra.mxu0 %vm13005_vm1, %v10868_v61  ;;  %v5090_v14 = vmul.f32 %v12244_v18, %v15516_v11  ;;  %v12246_v47 = vpop.eup %12245  ;;  %v17496_v61 = vld [vmem:[#allocation71_spill] sm:$0xff]  ;;  %v5015_v13 = vpop.xlane.xlu0 %5014  ;;  %v11531_v34 = vunpack.i.h.bf16 %v17507_v39  ;;  %v11530_v18 = vunpack.i.l.bf16 %v17507_v39 }
 0x957   : > { %10876 = vmatprep.subr.msk.bf16.mxu0 %vm13005_vm1, %v10874_v5  ;;  %v5101_v62 = vmul.f32 %v12246_v47, %v15522_v28  ;;  %12253 = vrcp.f32 %v5015_v13  ;;  %v10916_v38 = vpack.c.bf16 %v11526_v22, %v11525_v53  ;;  %v17509_v47 = vld [vmem:[#allocation130_spill] sm:$0xff] }
 0x958   : > { %11603 = vrot.lane.b32.xlu0 %v17487_v44, %s12590_s11  ;;  %9977 = vmatprep.mubr.msk.f32.mxu0 %vm1517_vm2, %v5090_v14  ;;  %v17508_v14 = vld [vmem:[#allocation119_spill] sm:$0xff] }
 0x959   : > { %v12248_v56 = vpop.eup %12247  ;;  %6234 = vrot.lane.b32.xlu1 %v17489_v48, %s12590_s11  ;;  %9978 = vmatmul.mubr.msk.f32.gmra.mrb[126].mxu0 %vm1517_vm2, %v5091_v57  ;;  %v10922_v57 = vpack.c.bf16 %v11531_v34, %v11530_v18  ;;  %v17512_v48 = vld [vmem:[#allocation122_spill] sm:$0xff] }
 0x95a   : > { %10897 = vmatpush3.bf16.xpose.msk.msra.mxu1 %vm13005_vm1, %v10892_v63  ;;  %v5100_v11 = vmul.f32 %v12248_v56, %v15530_v59  ;;  %v12250_v0 = vpop.eup %12249  ;;  %v15779_v6 = vpop.permute.xlu0 %5898  ;;  %v17510_v56 = vld [vmem:[#allocation121_spill] sm:$0xff] }
 0x95b   : > { %10900 = vmatprep.subr.msk.bf16.mxu1 %vm13005_vm1, %v10898_v42  ;;  %v5093_v59 = vmul.f32 %v12250_v0, %v15528_v60  ;;  %v17495_v60 = vld [vmem:[#allocation123_spill] sm:$0xff] }
 0x95c   : > { %11613 = vrot.lane.b32.xlu0 %v17490_v33, %s12590_s11  ;;  %10008 = vmatprep.mubr.msk.f32.mxu1 %vm1517_vm2, %v5100_v11  ;;  %v11536_v58 = vunpack.i.h.bf16 %v17495_v60  ;;  %v11535_v16 = vunpack.i.l.bf16 %v17495_v60 }
 0x95d   : > { %v12252_v41 = vpop.eup %12251  ;;  %6238 = vrot.lane.b32.xlu1 %v17492_v51, %s12590_s11  ;;  %10009 = vmatmul.mubr.msk.f32.gmra.mrb[152].mxu1 %vm1517_vm2, %v5101_v62 }
 0x95e   : > { %10879 = vmatpush3.bf16.xpose.msk.msra.mxu0 %vm13005_vm1, %v10874_v5  ;;  %v5092_v28 = vmul.f32 %v12252_v41, %v15536_v30  ;;  %v10910_v30 = vpack.c.bf16 %v11516_v31, %v11515_v21  ;;  %v15758_v9 = vpack.c.bf16 %v11536_v58, %v11535_v16 }
 0x95f   : > { %10882 = vmatprep.subr.msk.bf16.mxu0 %vm13005_vm1, %v10880_v55 }
 0x960   : > { %9980 = vmatprep.mubr.msk.f32.mxu0 %vm1517_vm2, %v5092_v28 }
 0x961   : > { %6242 = vrot.lane.b32.xlu1 %v17494_v36, %s12590_s11  ;;  %9981 = vmatmul.mubr.msk.f32.gmra.mrb[128].mxu0 %vm1517_vm2, %v5093_v59  ;;  %v12254_v19 = vpop.eup %12253 }
 0x962   : > { %10903 = vmatpush3.bf16.xpose.msk.msra.mxu1 %vm13005_vm1, %v10898_v42  ;;  %v5095_v2 = vmul.f32 %v12254_v19, %v15540_v32  ;;  %v17506_v32 = vld [vmem:[#allocation128_spill] sm:$0xff] }
 0x963   : > { %10906 = vmatprep.subr.msk.bf16.mxu1 %vm13005_vm1, %v10904_v10 }
 0x965   : > { %6246 = vrot.lane.b32.xlu1 %v17496_v61, %s12590_s11 }
 0x966   : > { %10885 = vmatpush3.bf16.xpose.msk.msra.mxu0 %vm13005_vm1, %v10880_v55 }
 0x967   : > { %10912 = vmatprep.subr.msk.bf16.mxu0 %vm13005_vm1, %v10910_v30 }
 0x969   : > { %11563 = vrot.lane.b32.xlu1 %v17497_v7, %s12590_s11 }
 0x96a   : > { %10909 = vmatpush3.bf16.xpose.msk.msra.mxu1 %vm13005_vm1, %v10904_v10 }
 0x96b   : > { %10936 = vmatprep.subr.msk.bf16.mxu1 %vm13005_vm1, %v15758_v9 }
 0x96d   : > { %11573 = vrot.lane.b32.xlu1 %v17498_v54, %s12590_s11 }
 0x971   : > { %11588 = vrot.lane.b32.xlu1 %v17499_v12, %s12590_s11  ;;  %v17513_v12 = vld [vmem:[#allocation133_spill] sm:$0xff] }
 0x975   : > { %11598 = vrot.lane.b32.xlu1 %v17500_v37, %s12590_s11  ;;  %v17514_v37 = vld [vmem:[#allocation124_spill] sm:$0xff] }
 0x979   : > { %11608 = vrot.lane.b32.xlu1 %v17501_v46, %s12590_s11 }
 0x97d   : > { %11618 = vrot.lane.b32.xlu1 %v17502_v25, %s12590_s11 }
 0x983   : > { %v5012_v52 = vpop.xlane.xlu1 %5011 }
 0x984   : > { %12255 = vrcp.f32 %v5012_v52 }
 0x987   : > { %v11544_v23 = vpop.permute.xlu1 %11543 }
 0x988   : > { %v11546_v61 = vunpack.i.h.bf16 %v11544_v23  ;;  %v11545_v7 = vunpack.i.l.bf16 %v11544_v23 }
 0x98b   : > { %v5039_v17 = vpop.xlane.xlu0 %5038 }
 0x98c   : > { %12257 = vrcp.f32 %v5039_v17 }
 0x98e   : > { %v12256_v63 = vpop.eup %12255 }
 0x98f   : > { %v11539_v20 = vpop.permute.xlu0 %11538  ;;  %v5094_v49 = vmul.f32 %v12256_v63, %v15550_v4 }
 0x990   : > { %v11541_v43 = vunpack.i.h.bf16 %v11539_v20  ;;  %v11540_v42 = vunpack.i.l.bf16 %v11539_v20 }
 0x991   : > { %9983 = vmatprep.mubr.msk.f32.mxu0 %vm1517_vm2, %v5094_v49 }
 0x992   : > { %9984 = vmatmul.mubr.msk.f32.gmra.mrb[130].mxu0 %vm1517_vm2, %v5095_v2  ;;  %v10928_v62 = vpack.c.bf16 %v11541_v43, %v11540_v42 }
 0x993   : > { %10030 = vmatprep.mubr.msk.f32.mxu0 %vm904_vm0, %v17504_v8  ;;  %v15789_v5 = vpop.permute.xlu0 %5902 }
 0x996   : > { %10031 = vmatmul.mubr.msk.f32.vlgmr.msra.gmra.mrb[132].mxu0 %vm904_vm0, %v17505_v35  ;;  %v12258_v21 = vpop.eup %12257 }
 0x997   : > { %10915 = vmatpush3.bf16.xpose.msk.msra.mxu0 %vm13005_vm1, %v10910_v30  ;;  %10033 = vmatprep.mubr.msk.f32.mxu0 %vm904_vm0, %v17506_v32  ;;  %v15797_v4 = vpop.permute.xlu0 %5906  ;;  %v5103_v16 = vmul.f32 %v12258_v21, %v15554_v50 }
 0x998   : > { %10918 = vmatprep.subr.msk.bf16.mxu0 %vm13005_vm1, %v10916_v38 }
 0x99a   : > { %10034 = vmatmul.mubr.msk.f32.gmra.mrb[134].mxu0 %vm904_vm0, %v17508_v14 }
 0x99b   : > { %10036 = vmatprep.mubr.msk.f32.mxu0 %vm904_vm0, %v17509_v47  ;;  %v15807_v44 = vpop.permute.xlu0 %11548 }
 0x99c   : > { %v11551_v46 = vunpack.i.h.bf16 %v15807_v44  ;;  %v11550_v25 = vunpack.i.l.bf16 %v15807_v44 }
 0x99e   : > { %10037 = vmatmul.mubr.msk.f32.gmra.mrb[136].mxu0 %vm904_vm0, %v17510_v56 }
 0x99f   : > { %10921 = vmatpush3.bf16.xpose.msk.msra.mxu0 %vm13005_vm1, %v10916_v38  ;;  %10039 = vmatprep.mubr.msk.f32.mxu0 %vm904_vm0, %v17511_v45  ;;  %v6066_v27 = vpop.permute.xlu0 %6065 }
 0x9a0   : > { %10924 = vmatprep.subr.msk.bf16.mxu0 %vm13005_vm1, %v10922_v57 }
 0x9a2   : > { %10040 = vmatmul.mubr.msk.f32.gmra.mrb[138].mxu0 %vm904_vm0, %v17512_v48 }
 0x9a3   : > { %v6070_v11 = vpop.permute.xlu0 %6069 }
 0x9a7   : > { %10927 = vmatpush3.bf16.xpose.msk.msra.mxu0 %vm13005_vm1, %v10922_v57  ;;  %v6072_v0 = vpop.permute.xlu0 %6071 }
 0x9a8   : > { %10930 = vmatprep.subr.msk.bf16.mxu0 %vm13005_vm1, %v10928_v62 }
 0x9ab   : > { %v6076_v33 = vpop.permute.xlu0 %6075 }
 0x9af   : > { %10933 = vmatpush3.bf16.xpose.msk.msra.mxu0 %vm13005_vm1, %v10928_v62  ;;  %v6233_v41 = vpop.permute.xlu0 %6232 }
 0x9b3   : > { %v15825_v55 = vpop.permute.xlu0 %6236 }
 0x9b7   : > { %v15827_v3 = vpop.permute.xlu0 %6240 }
 0x9b8   : > { %v5036_v40 = vpop.xlane.xlu1 %5035 }
 0x9b9   : > { %12259 = vrcp.f32 %v5036_v40 }
 0x9bb   : > { %v15829_v51 = vpop.permute.xlu0 %6244 }
 0x9bc   : > { %v5905_v28 = vpop.permute.xlu1 %5904 }
 0x9bf   : > { %v11559_v59 = vpop.permute.xlu0 %11558 }
 0x9c0   : > { %v11561_v10 = vunpack.i.h.bf16 %v11559_v59  ;;  %v11560_v26 = vunpack.i.l.bf16 %v11559_v59  ;;  %v5909_v31 = vpop.permute.xlu1 %5908 }
 0x9c2   : > { %v10958_v36 = vpack.c.bf16 %v11561_v10, %v11560_v26 }
 0x9c3   : > { %v12260_v30 = vpop.eup %12259 }
 0x9c4   : > { %v6064_v60 = vpop.permute.xlu1 %6063  ;;  %10959 = vmatprep.subr.bf16.mxu0 %v10958_v36  ;;  %v5102_v58 = vmul.f32 %v12260_v30, %v15575_v24  ;;  %v10940_v24 = vpack.c.bf16 %v11546_v61, %v11545_v7 }
 0x9c5   : > { %10086 = vmatprep.mubr.msk.f32.mxu0 %vm904_vm0, %v6064_v60  ;;  %v16026_v60 = vld [vmem:[#allocation8 + $0xd0] sm:$0xff] }
 0x9c6   : > { %10011 = vmatprep.mubr.msk.f32.mxu1 %vm1517_vm2, %v5102_v58  ;;  %10087 = vmatmul.mubr.msk.f32.vlgmr.msra.gmra.mrb[140].mxu0 %vm904_vm0, %v6066_v27 }
 0x9c7   : > { %10961 = vmatpush3.bf16.msra.mxu0 %v10958_v36  ;;  %10012 = vmatmul.mubr.msk.f32.gmra.mrb[154].mxu1 %vm1517_vm2, %v5103_v16 }
 0x9c8   : > { %v6068_v54 = vpop.permute.xlu1 %6067  ;;  %10058 = vmatprep.mubr.msk.f32.mxu1 %vm904_vm0, %v17513_v12 }
 0x9c9   : > { %10089 = vmatprep.mubr.msk.f32.mxu0 %vm904_vm0, %v6068_v54 }
 0x9ca   : > { %10090 = vmatmul.mubr.msk.f32.gmra.mrb[142].mxu0 %vm904_vm0, %v6070_v11 }
 0x9cb   : > { %10059 = vmatmul.mubr.msk.f32.vlgmr.msra.gmra.mrb[156].mxu1 %vm904_vm0, %v17514_v37  ;;  %10092 = vmatprep.mubr.msk.f32.mxu0 %vm904_vm0, %v6072_v0 }
 0x9cc   : > { %10939 = vmatpush3.bf16.xpose.msk.msra.mxu1 %vm13005_vm1, %v15758_v9  ;;  %v11554_v50 = vpop.permute.xlu1 %11553  ;;  %10061 = vmatprep.mubr.msk.f32.mxu1 %vm904_vm0, %v15779_v6  ;;  %v10946_v9 = vpack.c.bf16 %v11551_v46, %v11550_v25 }
 0x9cd   : > { %10942 = vmatprep.subr.msk.bf16.mxu1 %vm13005_vm1, %v10940_v24  ;;  %v11556_v6 = vunpack.i.h.bf16 %v11554_v50  ;;  %v11555_v17 = vunpack.i.l.bf16 %v11554_v50 }
 0x9cf   : > { %10062 = vmatmul.mubr.msk.f32.gmra.mrb[158].mxu1 %vm904_vm0, %v15777_v15  ;;  %v11569_v15 = vpop.permute.xlu0 %11568  ;;  %v10952_v63 = vpack.c.bf16 %v11556_v6, %v11555_v17 }
 0x9d0   : > { %v6074_v13 = vpop.permute.xlu1 %6073  ;;  %10064 = vmatprep.mubr.msk.f32.mxu1 %vm904_vm0, %v15789_v5  ;;  %v11570_v39 = vunpack.i.l.bf16 %v11569_v15 }
 0x9d1   : > { %10093 = vmatmul.mubr.msk.f32.gmra.mrb[144].mxu0 %vm904_vm0, %v6074_v13 }
 0x9d2   : > { %10095 = vmatprep.mubr.msk.f32.mxu0 %vm904_vm0, %v6076_v33 }
 0x9d3   : > { %10065 = vmatmul.mubr.msk.f32.gmra.mrb[160].mxu1 %vm904_vm0, %v5905_v28  ;;  %v11579_v20 = vpop.permute.xlu0 %11578 }
 0x9d4   : > { %10945 = vmatpush3.bf16.xpose.msk.msra.mxu1 %vm13005_vm1, %v10940_v24  ;;  %v6078_v52 = vpop.permute.xlu1 %6077  ;;  %10067 = vmatprep.mubr.msk.f32.mxu1 %vm904_vm0, %v15797_v4  ;;  %v11581_v2 = vunpack.i.h.bf16 %v11579_v20  ;;  %v11580_v29 = vunpack.i.l.bf16 %v11579_v20  ;;  %v11571_v4 = vunpack.i.h.bf16 %v11569_v15 }
 0x9d5   : > { %10948 = vmatprep.subr.msk.bf16.mxu1 %vm13005_vm1, %v10946_v9  ;;  %10096 = vmatmul.mubr.msk.f32.gmra.mrb[146].mxu0 %vm904_vm0, %v6078_v52 }
 0x9d6   : > { %v10974_v53 = vpack.c.bf16 %v11581_v2, %v11580_v29  ;;  %v10966_v45 = vpack.c.bf16 %v11571_v4, %v11570_v39 }
 0x9d7   : > { %10068 = vmatmul.mubr.msk.f32.gmra.mrb[162].mxu1 %vm904_vm0, %v5909_v31  ;;  %v11584_v8 = vpop.permute.xlu0 %11583 }
 0x9d8   : > { %v6235_v19 = vpop.permute.xlu1 %6234  ;;  %10114 = vmatprep.mubr.msk.f32.mxu1 %vm904_vm0, %v6233_v41  ;;  %v11586_v38 = vunpack.i.h.bf16 %v11584_v8  ;;  %v11585_v35 = vunpack.i.l.bf16 %v11584_v8 }
 0x9da   : > { %v10978_v14 = vpack.c.bf16 %v11586_v38, %v11585_v35 }
 0x9db   : > { %v11594_v1 = vpop.permute.xlu0 %11593 }
 0x9dc   : > { %10951 = vmatpush3.bf16.xpose.msk.msra.mxu1 %vm13005_vm1, %v10946_v9  ;;  %v6239_v49 = vpop.permute.xlu1 %6238  ;;  %v11596_v27 = vunpack.i.h.bf16 %v11594_v1  ;;  %v11595_v42 = vunpack.i.l.bf16 %v11594_v1 }
 0x9dd   : > { %10954 = vmatprep.subr.msk.bf16.mxu1 %vm13005_vm1, %v10952_v63 }
 0x9de   : > { %v10986_v23 = vpack.c.bf16 %v11596_v27, %v11595_v42 }
 0x9e0   : > { %v6243_v22 = vpop.permute.xlu1 %6242 }
 0x9e4   : > { %10957 = vmatpush3.bf16.xpose.msk.msra.mxu1 %vm13005_vm1, %v10952_v63  ;;  %v6247_v5 = vpop.permute.xlu1 %6246 }
 0x9e5   : > { %10975 = vmatprep.subr.bf16.mxu1 %v10974_v53 }
 0x9e8   : > { %v11564_v32 = vpop.permute.xlu1 %11563 }
 0x9e9   : > { %v11566_v34 = vunpack.i.h.bf16 %v11564_v32  ;;  %v11565_v18 = vunpack.i.l.bf16 %v11564_v32 }
 0x9eb   : > { %10115 = vmatmul.mubr.msk.f32.vlgmr.msra.gmra.mrb[164].mxu1 %vm904_vm0, %v6235_v19  ;;  %v10962_v47 = vpack.c.bf16 %v11566_v34, %v11565_v18 }
 0x9ec   : > { %10117 = vmatprep.mubr.msk.f32.mxu1 %vm904_vm0, %v15825_v55  ;;  %10977 = vmatpush3.bf16.msra.mxu1 %v10974_v53  ;;  %v11574_v44 = vpop.permute.xlu1 %11573 }
 0x9ed   : > { %v11576_v57 = vunpack.i.h.bf16 %v11574_v44  ;;  %v11575_v56 = vunpack.i.l.bf16 %v11574_v44  ;;  %10979 = vmatprep.subr.bf16.mxu1 %v10978_v14  ;;  %10963 = vmatprep.subr.bf16.mxu0 %v10962_v47 }
 0x9ee   : > { %10965 = vmatpush3.bf16.msra.mxu0 %v10962_v47 }
 0x9ef   : > { %10118 = vmatmul.mubr.msk.f32.gmra.mrb[166].mxu1 %vm904_vm0, %v6239_v49  ;;  %10967 = vmatprep.subr.bf16.mxu0 %v10966_v45  ;;  %v10970_v62 = vpack.c.bf16 %v11576_v57, %v11575_v56  ;;  %v15983_v56 = vld [vmem:[#allocation8 + $0xc8] sm:$0xff] }
 0x9f0   : > { %10120 = vmatprep.mubr.msk.f32.mxu1 %vm904_vm0, %v15827_v3  ;;  %10981 = vmatpush3.bf16.msra.mxu1 %v10978_v14  ;;  %v11589_v43 = vpop.permute.xlu1 %11588 }
 0x9f1   : > { %v11591_v48 = vunpack.i.h.bf16 %v11589_v43  ;;  %v11590_v11 = vunpack.i.l.bf16 %v11589_v43 }
 0x9f2   : > { %10969 = vmatpush3.bf16.msra.mxu0 %v10966_v45  ;;  %v15985_v45 = vld [vmem:[#allocation8 + $0xc0] sm:$0xff] }
 0x9f3   : > { %10121 = vmatmul.mubr.msk.f32.gmra.mrb[168].mxu1 %vm904_vm0, %v6243_v22  ;;  %10971 = vmatprep.subr.bf16.mxu0 %v10970_v62  ;;  %v10982_v0 = vpack.c.bf16 %v11591_v48, %v11590_v11 }
 0x9f4   : > { %10123 = vmatprep.mubr.msk.f32.mxu1 %vm904_vm0, %v15829_v51  ;;  %v11599_v33 = vpop.permute.xlu1 %11598 }
 0x9f5   : > { %v11601_v41 = vunpack.i.h.bf16 %v11599_v33  ;;  %v11600_v55 = vunpack.i.l.bf16 %v11599_v33  ;;  %10983 = vmatprep.subr.bf16.mxu1 %v10982_v0 }
 0x9f6   : > { %10973 = vmatpush3.bf16.msra.mxu0 %v10970_v62  ;;  %10985 = vmatpush3.bf16.msra.mxu1 %v10982_v0 }
 0x9f7   : > { %10124 = vmatmul.mubr.msk.f32.gmra.mrb[170].mxu1 %vm904_vm0, %v6247_v5  ;;  %10987 = vmatprep.subr.bf16.mxu1 %v10986_v23  ;;  %v15885_v3 = vpack.c.bf16 %v11601_v41, %v11600_v55 }
 0x9f8   : > { %v15887_v40 = vpop.permute.xlu1 %11608 }
 0x9f9   : > { %10991 = vmatprep.subr.bf16.mxu0 %v15885_v3 }
 0x9fa   : > { %10989 = vmatpush3.bf16.msra.mxu1 %v10986_v23 }
 0x9fb   : > { %v15890_v28 = vpop.f32.mrb[116].mxu0 }
 0x9fc   : > { %v11619_v51 = vpop.permute.xlu1 %11618  ;;  %v15892_v59 = vpop.f32.mrb[117].mxu0 }
 0x9fd   : > { %v11621_v10 = vunpack.i.h.bf16 %v11619_v51  ;;  %v11620_v26 = vunpack.i.l.bf16 %v11619_v51 }
 0x9ff   : > { %v15896_v21 = vpack.c.bf16 %v11621_v10, %v11620_v26 }
 0xa00   : > { %v15898_v36 = vpop.f32.mrb[140].mxu1 }
 0xa01   : > { %17515 = vst [vmem:[#allocation40_spill] sm:$0xff] %v15896_v21  ;;  %11007 = vmatprep.subr.bf16.mxu1 %v15896_v21  ;;  %v15901_v30 = vpop.f32.mrb[141].mxu1 }
 0xa09   : > { %v15905_v58 = vpop.f32.mrb[118].mxu0 }
 0xa0a   : > { %v15907_v16 = vpop.f32.mrb[119].mxu0 }
 0xa0d   : > { %v15911_v7 = vpop.f32.mrb[142].mxu1 }
 0xa0e   : > { %v15913_v54 = vpop.f32.mrb[143].mxu1 }
 0xa11   : > { %v15917_v24 = vpop.f32.mrb[120].mxu0 }
 0xa12   : > { %v15919_v37 = vpop.f32.mrb[121].mxu0 }
 0xa14   : > { %v15923_v46 = vpop.f32.mrb[144].mxu1 }
 0xa15   : > { %v15925_v25 = vpop.f32.mrb[145].mxu1 }
 0xa17   : > { %v15929_v9 = vpop.f32.mrb[122].mxu0 }
 0xa18   : > { %v15931_v52 = vpop.f32.mrb[123].mxu0 }
 0xa1c   : > { %v15935_v6 = vpop.f32.mrb[146].mxu1 }
 0xa1d   : > { %v15937_v17 = vpop.f32.mrb[147].mxu1 }
 0xa1e   : > { %17516 = vst [vmem:[#allocation38_spill] sm:$0xff] %v15937_v17 }
 0xa20   : > { %v15941_v63 = vpop.f32.mrb[124].mxu0 }
 0xa21   : > { %17517 = vst [vmem:[#allocation23_spill] sm:$0xff] %v15941_v63  ;;  %v15943_v20 = vpop.f32.mrb[125].mxu0 }
 0xa22   : > { %17518 = vst [vmem:[#allocation19_spill] sm:$0xff] %v15943_v20 }
 0xa24   : > { %v15947_v2 = vpop.f32.mrb[148].mxu1 }
 0xa25   : > { %17519 = vst [vmem:[#allocation41_spill] sm:$0xff] %v15947_v2  ;;  %v15949_v29 = vpop.f32.mrb[149].mxu1 }
 0xa26   : > { %17520 = vst [vmem:[#allocation45_spill] sm:$0xff] %v15949_v29 }
 0xa28   : > { %v15953_v53 = vpop.f32.mrb[150].mxu1 }
 0xa29   : > { %17521 = vst [vmem:[#allocation25_spill] sm:$0xff] %v15953_v53  ;;  %v15955_v8 = vpop.f32.mrb[151].mxu1 }
 0xa2a   : > { %17522 = vst [vmem:[#allocation54_spill] sm:$0xff] %v15955_v8  ;;  %v16061_v8 = vld [vmem:[#allocation8 + $0xe0] sm:$0xff] }
 0xa2c   : > { %v15959_v38 = vpop.f32.mrb[126].mxu0 }
 0xa2d   : > { %17523 = vst [vmem:[#allocation62_spill] sm:$0xff] %v15959_v38  ;;  %v15961_v35 = vpop.f32.mrb[127].mxu0 }
 0xa2e   : > { %17524 = vst [vmem:[#allocation66_spill] sm:$0xff] %v15961_v35 }
 0xa30   : > { %v15965_v4 = vpop.f32.mrb[152].mxu1 }
 0xa31   : > { %17525 = vst [vmem:[#allocation48_spill] sm:$0xff] %v15965_v4  ;;  %v15967_v39 = vpop.f32.mrb[153].mxu1  ;;  %v16054_v4 = vld [vmem:[#allocation8 + $0xf8] sm:$0xff] }
 0xa32   : > { %17526 = vst [vmem:[#allocation63_spill] sm:$0xff] %v15967_v39 }
 0xa34   : > { %v15971_v18 = vpop.f32.mrb[128].mxu0 }
 0xa35   : > { %17527 = vst [vmem:[#allocation42_spill] sm:$0xff] %v15971_v18  ;;  %v15973_v14 = vpop.f32.mrb[129].mxu0 }
 0xa36   : > { %17528 = vst [vmem:[#allocation47_spill] sm:$0xff] %v15973_v14 }
 0xa65   : > { %v15977_v44 = vpop.f32.mrb[130].mxu0 }
 0xa66   : > { %17529 = vst [vmem:[#allocation35_spill] sm:$0xff] %v15977_v44  ;;  %v15979_v1 = vpop.f32.mrb[131].mxu0 }
 0xa67   : > { %17530 = vst [vmem:[#allocation57_spill] sm:$0xff] %v15979_v1 }
 0xa69   : > { %v10032_v27 = vpop.f32.mrb[132].mxu0 }
 0xa6a   : > { %v15988_v43 = vadd.f32 %v10032_v27, %v15983_v56  ;;  %v5855_v42 = vpop.f32.mrb[133].mxu0 }
 0xa6b   : > { %v15991_v48 = vadd.f32 %v5855_v42, %v15985_v45 }
 0xa6c   : > { %v6404_v11 = vsel %vm1517_vm2, %v15988_v43, -inf }
 0xa6d   : > { %6405 = vmax.xlane.f32.xlu1 %v6404_v11  ;;  %v10035_v62 = vpop.f32.mrb[134].mxu0  ;;  %v6401_v0 = vsel %vm1517_vm2, %v15991_v48, -inf  ;;  %v16022_v11 = vld [vmem:[#allocation8 + $0xe8] sm:$0xff] }
 0xa6e   : > { %v5865_v33 = vpop.f32.mrb[135].mxu0  ;;  %6402 = vmax.xlane.f32.xlu0 %v6401_v0  ;;  %v16009_v0 = vld [vmem:[#allocation8 + $0xd8] sm:$0xff] }
 0xa6f   : > { %v16020_v19 = vadd.f32 %v10035_v62, %v16009_v0  ;;  %v16041_v61 = vadd.f32 %v5865_v33, %v16026_v60 }
 0xa71   : > { %v10038_v41 = vpop.f32.mrb[136].mxu0 }
 0xa72   : > { %v5875_v55 = vpop.f32.mrb[137].mxu0  ;;  %v16034_v50 = vadd.f32 %v10038_v41, %v16022_v11 }
 0xa73   : > { %v16069_v2 = vadd.f32 %v5875_v55, %v16061_v8  ;;  %v5723_v55 = vld [vmem:[#allocation8 + $0xf0] sm:$0xff] }
 0xa74   : > { %v6416_v39 = vsel %vm1517_vm2, %v16034_v50, -inf }
 0xa75   : > { %v10041_v23 = vpop.f32.mrb[138].mxu0  ;;  %v6413_v14 = vsel %vm1517_vm2, %v16069_v2, -inf }
 0xa76   : > { %v5885_v51 = vpop.f32.mrb[139].mxu0  ;;  %v16064_v53 = vadd.f32 %v10041_v23, %v16054_v4 }
 0xa99   : > { %v10088_v10 = vpop.f32.mrb[140].mxu0 }
 0xa9a   : > { %v15997_v26 = vpop.f32.mrb[154].mxu1  ;;  %v15999_v27 = vpop.f32.mrb[141].mxu0 }
 0xa9b   : > { %17531 = vst [vmem:[#allocation16_spill] sm:$0xff] %v15997_v26  ;;  %v16001_v42 = vpop.f32.mrb[155].mxu1 }
 0xa9c   : > { %17532 = vst [vmem:[#allocation29_spill] sm:$0xff] %v16001_v42 }
 0xa9d   : > { %v16005_v34 = vpop.f32.mrb[142].mxu0 }
 0xa9e   : > { %v10060_v5 = vpop.f32.mrb[156].mxu1  ;;  %v16007_v22 = vpop.f32.mrb[143].mxu0 }
 0xa9f   : > { %v16012_v47 = vadd.f32 %v10060_v5, %v15983_v56  ;;  %v6024_v57 = vpop.f32.mrb[157].mxu1 }
 0xaa0   : > { %v16015_v32 = vadd.f32 %v6024_v57, %v15985_v45 }
 0xaa1   : > { %v6428_v49 = vsel %vm1517_vm2, %v16012_v47, -inf }
 0xaa2   : > { %6429 = vmax.xlane.f32.xlu1 %v6428_v49  ;;  %v10063_v13 = vpop.f32.mrb[158].mxu1  ;;  %v6425_v12 = vsel %vm1517_vm2, %v16015_v32, -inf }
 0xaa3   : > { %v16029_v5 = vadd.f32 %v10063_v13, %v16009_v0  ;;  %v6034_v57 = vpop.f32.mrb[159].mxu1  ;;  %6426 = vmax.xlane.f32.xlu0 %v6425_v12  ;;  %v6410_v13 = vsel %vm1517_vm2, %v16020_v19, -inf }
 0xaa4   : > { %v16031_v15 = vpop.f32.mrb[144].mxu0  ;;  %v16057_v33 = vadd.f32 %v6034_v57, %v16026_v60 }
 0xaa5   : > { %v16036_v62 = vpop.f32.mrb[145].mxu0  ;;  %v6434_v49 = vsel %vm1517_vm2, %v16029_v5, -inf }
 0xaa6   : > { %6435 = vmax.xlane.f32.xlu1 %v6434_v49  ;;  %v10066_v31 = vpop.f32.mrb[160].mxu1 }
 0xaa7   : > { %6411 = vmax.xlane.f32.xlu0 %v6410_v13  ;;  %v6044_v12 = vpop.f32.mrb[161].mxu1  ;;  %v16048_v41 = vadd.f32 %v10066_v31, %v16022_v11  ;;  %v6407_v13 = vsel %vm1517_vm2, %v16041_v61, -inf }
 0xaa8   : > { %v16045_v42 = vpop.f32.mrb[146].mxu0  ;;  %v16079_v23 = vadd.f32 %v6044_v12, %v16061_v8 }
 0xaa9   : > { %v16050_v26 = vpop.f32.mrb[147].mxu0  ;;  %v6440_v29 = vsel %vm1517_vm2, %v16048_v41, -inf }
 0xaaa   : > { %6417 = vmax.xlane.f32.xlu1 %v6416_v39  ;;  %v10069_v49 = vpop.f32.mrb[162].mxu1  ;;  %v6431_v39 = vsel %vm1517_vm2, %v16057_v33, -inf  ;;  %v6437_v18 = vsel %vm1517_vm2, %v16079_v23, -inf }
 0xaab   : > { %6408 = vmax.xlane.f32.xlu0 %v6407_v13  ;;  %v6054_v31 = vpop.f32.mrb[163].mxu1  ;;  %v16074_v57 = vadd.f32 %v10069_v49, %v16054_v4  ;;  %v6422_v13 = vsel %vm1517_vm2, %v16064_v53, -inf  ;;  %v16088_v49 = vadd.f32 %v5885_v51, %v5723_v55 }
 0xaae   : > { %6441 = vmax.xlane.f32.xlu1 %v6440_v29  ;;  %v16084_v29 = vadd.f32 %v10088_v10, %v15983_v56  ;;  %v16100_v10 = vadd.f32 %v15999_v27, %v15985_v45 }
 0xaaf   : > { %6432 = vmax.xlane.f32.xlu0 %v6431_v39  ;;  %v6446_v39 = vsel %vm1517_vm2, %v16074_v57, -inf }
 0xab0   : > { %v6452_v12 = vsel %vm1517_vm2, %v16084_v29, -inf  ;;  %v6449_v44 = vsel %vm1517_vm2, %v16100_v10, -inf }
 0xab2   : > { %6423 = vmax.xlane.f32.xlu1 %v6422_v13  ;;  %v16094_v13 = vadd.f32 %v6054_v31, %v5723_v55  ;;  %v16109_v31 = vadd.f32 %v16005_v34, %v16009_v0 }
 0xab3   : > { %6414 = vmax.xlane.f32.xlu0 %v6413_v14  ;;  %v6419_v14 = vsel %vm1517_vm2, %v16088_v49, -inf }
 0xab4   : > { %v6458_v34 = vsel %vm1517_vm2, %v16109_v31, -inf }
 0xab6   : > { %6447 = vmax.xlane.f32.xlu1 %v6446_v39  ;;  %v6443_v39 = vsel %vm1517_vm2, %v16094_v13, -inf }
 0xab7   : > { %6438 = vmax.xlane.f32.xlu0 %v6437_v18 }
 0xaba   : > { %6453 = vmax.xlane.f32.xlu1 %v6452_v12 }
 0xabb   : > { %6420 = vmax.xlane.f32.xlu0 %v6419_v14 }
 0xabe   : > { %v10116_v51 = vpop.f32.mrb[164].mxu1 }
 0xabf   : > { %v16105_v18 = vadd.f32 %v10116_v51, %v15983_v56  ;;  %v6362_v1 = vpop.f32.mrb[165].mxu1  ;;  %6444 = vmax.xlane.f32.xlu0 %v6443_v39  ;;  %v16125_v51 = vadd.f32 %v16007_v22, %v16026_v60 }
 0xac0   : > { %v16114_v14 = vadd.f32 %v6362_v1, %v15985_v45 }
 0xac1   : > { %v6476_v12 = vsel %vm1517_vm2, %v16105_v18, -inf  ;;  %v6455_v22 = vsel %vm1517_vm2, %v16125_v51, -inf }
 0xac2   : > { %v10119_v27 = vpop.f32.mrb[166].mxu1  ;;  %6477 = vmax.xlane.f32.xlu1 %v6476_v12  ;;  %v6473_v1 = vsel %vm1517_vm2, %v16114_v14, -inf }
 0xac3   : > { %v6372_v35 = vpop.f32.mrb[167].mxu1  ;;  %6450 = vmax.xlane.f32.xlu0 %v6449_v44  ;;  %v16119_v56 = vadd.f32 %v10119_v27, %v16009_v0  ;;  %v16131_v44 = vadd.f32 %v16031_v15, %v16022_v11 }
 0xac4   : > { %v16136_v12 = vadd.f32 %v6372_v35, %v16026_v60  ;;  %v16153_v35 = vadd.f32 %v16045_v42, %v16054_v4  ;;  %v16168_v42 = vadd.f32 %v16050_v26, %v5723_v55  ;;  %v16180_v26 = vpop.permute.xlu0 %11603 }
 0xac5   : > { %v6482_v0 = vsel %vm1517_vm2, %v16119_v56, -inf  ;;  %v6464_v15 = vsel %vm1517_vm2, %v16131_v44, -inf }
 0xac6   : > { %v10122_v39 = vpop.f32.mrb[168].mxu1  ;;  %6459 = vmax.xlane.f32.xlu1 %v6458_v34  ;;  %v6479_v60 = vsel %vm1517_vm2, %v16136_v12, -inf }
 0xac7   : > { %v6382_v45 = vpop.f32.mrb[169].mxu1  ;;  %6474 = vmax.xlane.f32.xlu0 %v6473_v1  ;;  %v16141_v38 = vadd.f32 %v10122_v39, %v16022_v11  ;;  %v16147_v1 = vadd.f32 %v16036_v62, %v16061_v8 }
 0xac8   : > { %v16158_v39 = vadd.f32 %v6382_v45, %v16061_v8 }
 0xac9   : > { %v6488_v11 = vsel %vm1517_vm2, %v16141_v38, -inf  ;;  %v6461_v62 = vsel %vm1517_vm2, %v16147_v1, -inf }
 0xaca   : > { %v10125_v27 = vpop.f32.mrb[170].mxu1  ;;  %6483 = vmax.xlane.f32.xlu1 %v6482_v0 }
 0xacb   : > { %v6392_v34 = vpop.f32.mrb[171].mxu1  ;;  %6456 = vmax.xlane.f32.xlu0 %v6455_v22  ;;  %v16163_v0 = vadd.f32 %v10125_v27, %v16054_v4  ;;  %v6470_v22 = vsel %vm1517_vm2, %v16153_v35, -inf  ;;  %v6467_v4 = vsel %vm1517_vm2, %v16168_v42, -inf }
 0xacc   : > { %v16174_v45 = vadd.f32 %v6392_v34, %v5723_v55 }
 0xacd   : > { %v6494_v8 = vsel %vm1517_vm2, %v16163_v0, -inf }
 0xace   : > { %6465 = vmax.xlane.f32.xlu1 %v6464_v15  ;;  %v6485_v15 = vsel %vm1517_vm2, %v16158_v39, -inf  ;;  %v6491_v27 = vsel %vm1517_vm2, %v16174_v45, -inf }
 0xacf   : > { %6480 = vmax.xlane.f32.xlu0 %v6479_v60  ;;  %v17533_v60 = vld [vmem:[#allocation74_spill] sm:$0xff] }
 0xad2   : > { %6489 = vmax.xlane.f32.xlu1 %v6488_v11  ;;  %v16184_v11 = vpop.permute.xlu0 %11613 }
 0xad3   : > { %6462 = vmax.xlane.f32.xlu0 %v6461_v62  ;;  %17534 = vst [vmem:[#allocation51_spill] sm:$0xff] %v16184_v11 }
 0xad6   : > { %6471 = vmax.xlane.f32.xlu1 %v6470_v22 }
 0xad7   : > { %6486 = vmax.xlane.f32.xlu0 %v6485_v15 }
 0xada   : > { %6495 = vmax.xlane.f32.xlu1 %v6494_v8 }
 0xadb   : > { %6468 = vmax.xlane.f32.xlu0 %v6467_v4 }
 0xadf   : > { %6492 = vmax.xlane.f32.xlu0 %v6491_v27 }
 0xaf5   : > { %11623 = vrot.lane.b32.xlu0 %v17533_v60, %s12590_s11 }
 0xafa   : > { %v6406_v62 = vpop.xlane.xlu1 %6405 }
 0xafb   : > { %v6498_v55 = vsub.f32 %v15988_v43, %v6406_v62  ;;  %v6403_v34 = vpop.xlane.xlu0 %6402 }
 0xafc   : > { %v6497_v15 = vsub.f32 %v15991_v48, %v6403_v34 }
 0xafd   : > { %v6531_v22 = vmul.f32 1.442695, %v6498_v55 }
 0xafe   : > { %v6529_v8 = vmul.f32 1.442695, %v6497_v15 }
 0xaff   : > { %12261 = vpow2.f32 %v6531_v22 }
 0xb00   : > { %12263 = vpow2.f32 %v6529_v8 }
 0xb09   : > { %v16188_v4 = vpop.eup %12261 }
 0xb0a   : > { %v6596_v27 = vsel %vm1517_vm2, %v16188_v4, 0.0  ;;  %v16192_v20 = vpop.eup %12263 }
 0xb0b   : > { %6597 = vadd.xlane.f32.xlu1 %v6596_v27  ;;  %v6593_v60 = vsel %vm1517_vm2, %v16192_v20, 0.0 }
 0xb14   : > { %6594 = vadd.xlane.f32.xlu0 %v6593_v60 }
 0xb2f   : > { %v6430_v43 = vpop.xlane.xlu1 %6429 }
 0xb30   : > { %v6506_v62 = vsub.f32 %v16012_v47, %v6430_v43  ;;  %v6427_v55 = vpop.xlane.xlu0 %6426 }
 0xb31   : > { %v6505_v48 = vsub.f32 %v16015_v32, %v6427_v55 }
 0xb32   : > { %v6547_v34 = vmul.f32 1.442695, %v6506_v62 }
 0xb33   : > { %v6545_v22 = vmul.f32 1.442695, %v6505_v48  ;;  %v6436_v15 = vpop.xlane.xlu1 %6435 }
 0xb34   : > { %12265 = vpow2.f32 %v6547_v34  ;;  %v6508_v8 = vsub.f32 %v16029_v5, %v6436_v15  ;;  %v6412_v63 = vpop.xlane.xlu0 %6411 }
 0xb35   : > { %12267 = vpow2.f32 %v6545_v22  ;;  %v6500_v27 = vsub.f32 %v16020_v19, %v6412_v63 }
 0xb36   : > { %v6551_v21 = vmul.f32 1.442695, %v6508_v8 }
 0xb37   : > { %v6535_v11 = vmul.f32 1.442695, %v6500_v27  ;;  %v6418_v17 = vpop.xlane.xlu1 %6417 }
 0xb38   : > { %v6409_v60 = vpop.xlane.xlu0 %6408  ;;  %v6502_v32 = vsub.f32 %v16034_v50, %v6418_v17 }
 0xb39   : > { %12269 = vpow2.f32 %v6535_v11  ;;  %v6499_v47 = vsub.f32 %v16041_v61, %v6409_v60 }
 0xb3a   : > { %12271 = vpow2.f32 %v6551_v21  ;;  %v6539_v19 = vmul.f32 1.442695, %v6502_v32 }
 0xb3b   : > { %v6533_v43 = vmul.f32 1.442695, %v6499_v47  ;;  %v6442_v62 = vpop.xlane.xlu1 %6441 }
 0xb3c   : > { %v6433_v55 = vpop.xlane.xlu0 %6432  ;;  %v6510_v63 = vsub.f32 %v16048_v41, %v6442_v62 }
 0xb3d   : > { %12273 = vpow2.f32 %v6533_v43  ;;  %v6507_v5 = vsub.f32 %v16057_v33, %v6433_v55 }
 0xb3e   : > { %v16203_v48 = vpop.eup %12265  ;;  %v6555_v15 = vmul.f32 1.442695, %v6510_v63 }
 0xb3f   : > { %v16205_v34 = vpop.eup %12267  ;;  %v6549_v22 = vmul.f32 1.442695, %v6507_v5  ;;  %v6424_v11 = vpop.xlane.xlu1 %6423  ;;  %v6620_v21 = vsel %vm1517_vm2, %v16203_v48, 0.0 }
 0xb40   : > { %v6415_v61 = vpop.xlane.xlu0 %6414  ;;  %6621 = vadd.xlane.f32.xlu1 %v6620_v21  ;;  %v6617_v50 = vsel %vm1517_vm2, %v16205_v34, 0.0  ;;  %v6504_v41 = vsub.f32 %v16064_v53, %v6424_v11 }
 0xb41   : > { %12275 = vpow2.f32 %v6549_v22  ;;  %v6501_v17 = vsub.f32 %v16069_v2, %v6415_v61  ;;  %6618 = vadd.xlane.f32.xlu0 %v6617_v50 }
 0xb42   : > { %12277 = vpow2.f32 %v6539_v19  ;;  %v6543_v62 = vmul.f32 1.442695, %v6504_v41 }
 0xb43   : > { %v16213_v33 = vpop.eup %12269  ;;  %v6537_v8 = vmul.f32 1.442695, %v6501_v17  ;;  %v6448_v27 = vpop.xlane.xlu1 %6447 }
 0xb44   : > { %v6439_v60 = vpop.xlane.xlu0 %6438  ;;  %v6602_v47 = vsel %vm1517_vm2, %v16213_v33, 0.0  ;;  %v16218_v32 = vpop.eup %12271  ;;  %v6512_v55 = vsub.f32 %v16074_v57, %v6448_v27 }
 0xb45   : > { %12279 = vpow2.f32 %v6537_v8  ;;  %v6509_v43 = vsub.f32 %v16079_v23, %v6439_v60  ;;  %6603 = vadd.xlane.f32.xlu1 %v6602_v47  ;;  %v6626_v22 = vsel %vm1517_vm2, %v16218_v32, 0.0 }
 0xb46   : > { %12281 = vpow2.f32 %v6555_v15  ;;  %v6559_v61 = vmul.f32 1.442695, %v6512_v55 }
 0xb47   : > { %v16221_v2 = vpop.eup %12273  ;;  %v6553_v5 = vmul.f32 1.442695, %v6509_v43  ;;  %v6454_v53 = vpop.xlane.xlu1 %6453 }
 0xb48   : > { %v6514_v19 = vsub.f32 %v16084_v29, %v6454_v53  ;;  %v6421_v63 = vpop.xlane.xlu0 %6420  ;;  %v6599_v11 = vsel %vm1517_vm2, %v16221_v2, 0.0 }
 0xb49   : > { %12283 = vpow2.f32 %v6553_v5  ;;  %6627 = vadd.xlane.f32.xlu1 %v6626_v22  ;;  %6600 = vadd.xlane.f32.xlu0 %v6599_v11  ;;  %v6503_v57 = vsub.f32 %v16088_v49, %v6421_v63 }
 0xb4a   : > { %v6563_v23 = vmul.f32 1.442695, %v6514_v19  ;;  %12285 = vpow2.f32 %v6543_v62 }
 0xb4b   : > { %v16229_v21 = vpop.eup %12275  ;;  %v6541_v41 = vmul.f32 1.442695, %v6503_v57 }
 0xb4c   : > { %12287 = vpow2.f32 %v6563_v23  ;;  %v6445_v50 = vpop.xlane.xlu0 %6444  ;;  %v6623_v29 = vsel %vm1517_vm2, %v16229_v21, 0.0  ;;  %v16234_v17 = vpop.eup %12277 }
 0xb4d   : > { %6624 = vadd.xlane.f32.xlu1 %v6623_v29  ;;  %12289 = vpow2.f32 %v6559_v61  ;;  %v6511_v8 = vsub.f32 %v16094_v13, %v6445_v50  ;;  %v6608_v49 = vsel %vm1517_vm2, %v16234_v17, 0.0 }
 0xb4e   : > { %12291 = vpow2.f32 %v6541_v41 }
 0xb4f   : > { %v16236_v15 = vpop.eup %12279  ;;  %v6478_v27 = vpop.xlane.xlu1 %6477  ;;  %v6557_v53 = vmul.f32 1.442695, %v6511_v8 }
 0xb50   : > { %v6522_v60 = vsub.f32 %v16105_v18, %v6478_v27  ;;  %v6451_v47 = vpop.xlane.xlu0 %6450  ;;  %v6605_v43 = vsel %vm1517_vm2, %v16236_v15, 0.0  ;;  %v16244_v62 = vpop.eup %12281 }
 0xb51   : > { %6609 = vadd.xlane.f32.xlu1 %v6608_v49  ;;  %6606 = vadd.xlane.f32.xlu0 %v6605_v43  ;;  %v6513_v13 = vsub.f32 %v16100_v10, %v6451_v47  ;;  %v6632_v22 = vsel %vm1517_vm2, %v16244_v62, 0.0 }
 0xb52   : > { %v6579_v55 = vmul.f32 1.442695, %v6522_v60 }
 0xb53   : > { %v16246_v5 = vpop.eup %12283  ;;  %v6460_v19 = vpop.xlane.xlu1 %6459  ;;  %v6561_v10 = vmul.f32 1.442695, %v6513_v13 }
 0xb54   : > { %12293 = vpow2.f32 %v6579_v55  ;;  %v6516_v18 = vsub.f32 %v16109_v31, %v6460_v19  ;;  %v6475_v63 = vpop.xlane.xlu0 %6474  ;;  %v6629_v11 = vsel %vm1517_vm2, %v16246_v5, 0.0  ;;  %v16254_v23 = vpop.eup %12285 }
 0xb55   : > { %6633 = vadd.xlane.f32.xlu1 %v6632_v22  ;;  %6630 = vadd.xlane.f32.xlu0 %v6629_v11  ;;  %12295 = vpow2.f32 %v6557_v53  ;;  %v6521_v50 = vsub.f32 %v16114_v14, %v6475_v63  ;;  %v6614_v27 = vsel %vm1517_vm2, %v16254_v23, 0.0 }
 0xb56   : > { %v16256_v61 = vpop.eup %12287  ;;  %v6567_v57 = vmul.f32 1.442695, %v6516_v18 }
 0xb57   : > { %v6484_v29 = vpop.xlane.xlu1 %6483  ;;  %v6644_v31 = vsel %vm1517_vm2, %v16256_v61, 0.0  ;;  %v16264_v60 = vpop.eup %12289  ;;  %v6577_v49 = vmul.f32 1.442695, %v6521_v50 }
 0xb58   : > { %12297 = vpow2.f32 %v6567_v57  ;;  %v6524_v41 = vsub.f32 %v16119_v56, %v6484_v29  ;;  %v6457_v8 = vpop.xlane.xlu0 %6456  ;;  %v6638_v56 = vsel %vm1517_vm2, %v16264_v60, 0.0  ;;  %v16270_v13 = vpop.eup %12291 }
 0xb59   : > { %6615 = vadd.xlane.f32.xlu1 %v6614_v27  ;;  %6645 = vadd.xlane.f32.xlu0 %v6644_v31  ;;  %12299 = vpow2.f32 %v6561_v10  ;;  %v6515_v14 = vsub.f32 %v16125_v51, %v6457_v8  ;;  %v6611_v10 = vsel %vm1517_vm2, %v16270_v13, 0.0 }
 0xb5a   : > { %v6583_v47 = vmul.f32 1.442695, %v6524_v41 }
 0xb5b   : > { %v6466_v43 = vpop.xlane.xlu1 %6465  ;;  %v6565_v63 = vmul.f32 1.442695, %v6515_v14 }
 0xb5c   : > { %12301 = vpow2.f32 %v6583_v47  ;;  %v6518_v55 = vsub.f32 %v16131_v44, %v6466_v43  ;;  %v6481_v53 = vpop.xlane.xlu0 %6480 }
 0xb5d   : > { %6639 = vadd.xlane.f32.xlu1 %v6638_v56  ;;  %12303 = vpow2.f32 %v6577_v49  ;;  %v6523_v22 = vsub.f32 %v16136_v12, %v6481_v53 }
 0xb5e   : > { %v16272_v19 = vpop.eup %12293  ;;  %v6571_v18 = vmul.f32 1.442695, %v6518_v55 }
 0xb5f   : > { %v6490_v11 = vpop.xlane.xlu1 %6489  ;;  %v6668_v51 = vsel %vm1517_vm2, %v16272_v19, 0.0  ;;  %v16280_v50 = vpop.eup %12295  ;;  %v6581_v12 = vmul.f32 1.442695, %v6523_v22 }
 0xb60   : > { %12305 = vpow2.f32 %v6571_v18  ;;  %v6526_v44 = vsub.f32 %v16141_v38, %v6490_v11  ;;  %6669 = vadd.xlane.f32.xlu0 %v6668_v51  ;;  %v6463_v57 = vpop.xlane.xlu0 %6462  ;;  %v6635_v49 = vsel %vm1517_vm2, %v16280_v50, 0.0 }
 0xb61   : > { %6612 = vadd.xlane.f32.xlu1 %v6611_v10  ;;  %12307 = vpow2.f32 %v6565_v63  ;;  %v6517_v41 = vsub.f32 %v16147_v1, %v6463_v57 }
 0xb62   : > { %v16282_v29 = vpop.eup %12297  ;;  %v6587_v31 = vmul.f32 1.442695, %v6526_v44 }
 0xb63   : > { %v6472_v8 = vpop.xlane.xlu1 %6471  ;;  %v6650_v27 = vsel %vm1517_vm2, %v16282_v29, 0.0  ;;  %v16290_v14 = vpop.eup %12299  ;;  %v6569_v1 = vmul.f32 1.442695, %v6517_v41 }
 0xb64   : > { %12309 = vpow2.f32 %v6587_v31  ;;  %v6520_v38 = vsub.f32 %v16153_v35, %v6472_v8  ;;  %6651 = vadd.xlane.f32.xlu0 %v6650_v27  ;;  %v6487_v47 = vpop.xlane.xlu0 %6486  ;;  %v6641_v22 = vsel %vm1517_vm2, %v16290_v14, 0.0 }
 0xb65   : > { %6636 = vadd.xlane.f32.xlu1 %v6635_v49  ;;  %12311 = vpow2.f32 %v6581_v12  ;;  %v6525_v53 = vsub.f32 %v16158_v39, %v6487_v47 }
 0xb66   : > { %v16292_v43 = vpop.eup %12301  ;;  %v6575_v55 = vmul.f32 1.442695, %v6520_v38 }
 0xb67   : > { %v6496_v56 = vpop.xlane.xlu1 %6495  ;;  %v6674_v18 = vsel %vm1517_vm2, %v16292_v43, 0.0  ;;  %v16300_v11 = vpop.eup %12303  ;;  %v6585_v39 = vmul.f32 1.442695, %v6525_v53 }
 0xb68   : > { %12313 = vpow2.f32 %v6575_v55  ;;  %v6528_v35 = vsub.f32 %v16163_v0, %v6496_v56  ;;  %6675 = vadd.xlane.f32.xlu0 %v6674_v18  ;;  %v6469_v63 = vpop.xlane.xlu0 %6468  ;;  %v6665_v31 = vsel %vm1517_vm2, %v16300_v11, 0.0 }
 0xb69   : > { %6642 = vadd.xlane.f32.xlu1 %v6641_v22  ;;  %12315 = vpow2.f32 %v6569_v1  ;;  %v6519_v57 = vsub.f32 %v16168_v42, %v6469_v63 }
 0xb6a   : > { %v16302_v51 = vpop.eup %12305  ;;  %v6591_v44 = vmul.f32 1.442695, %v6528_v35 }
 0xb6b   : > { %v6656_v10 = vsel %vm1517_vm2, %v16302_v51, 0.0  ;;  %v16309_v12 = vpop.eup %12307  ;;  %v6573_v8 = vmul.f32 1.442695, %v6519_v57 }
 0xb6c   : > { %12317 = vpow2.f32 %v6591_v44  ;;  %6657 = vadd.xlane.f32.xlu0 %v6656_v10  ;;  %v6493_v0 = vpop.xlane.xlu0 %6492  ;;  %v6647_v38 = vsel %vm1517_vm2, %v16309_v12, 0.0 }
 0xb6d   : > { %6666 = vadd.xlane.f32.xlu1 %v6665_v31  ;;  %12319 = vpow2.f32 %v6585_v39  ;;  %v6527_v27 = vsub.f32 %v16174_v45, %v6493_v0  ;;  %v17535_v0 = vld [vmem:[#allocation78_spill] sm:$0xff] }
 0xb6e   : > { %v16311_v41 = vpop.eup %12309  ;;  %12321 = vpow2.f32 %v6573_v8  ;;  %v17536_v31 = vld [vmem:[#allocation34_spill] sm:$0xff]  ;;  %v17537_v8 = vld [vmem:[#allocation49_spill] sm:$0xff] }
 0xb6f   : > { %v6680_v42 = vsel %vm1517_vm2, %v16311_v41, 0.0  ;;  %v16318_v47 = vpop.eup %12311  ;;  %v6589_v55 = vmul.f32 1.442695, %v6527_v27  ;;  %v17538_v27 = vpack.i.bf16 %v17536_v31, %v17537_v8  ;;  %v17551_v31 = vld [vmem:[#allocation68_spill] sm:$0xff] }
 0xb70   : > { %6681 = vadd.xlane.f32.xlu0 %v6680_v42  ;;  %v6671_v45 = vsel %vm1517_vm2, %v16318_v47, 0.0  ;;  %v17539_v42 = vpack.i.bf16 %v15890_v28, %v15892_v59  ;;  %v17548_v59 = vpack.i.bf16 %v15917_v24, %v15919_v37  ;;  %v17556_v24 = vpack.i.bf16 %v15898_v36, %v15901_v30  ;;  %v17561_v30 = vld [vmem:[#allocation92_spill] sm:$0xff] }
 0xb71   : > { %6648 = vadd.xlane.f32.xlu1 %v6647_v38  ;;  %12323 = vpow2.f32 %v6589_v55  ;;  %v17540_v38 = vld [vmem:[#allocation76_spill] sm:$0xff]  ;;  %v17541_v55 = vpack.i.bf16 %v15905_v58, %v15907_v16  ;;  %v17549_v16 = vpack.i.bf16 %v15929_v9, %v15931_v52  ;;  %v17557_v37 = vpack.i.bf16 %v15911_v7, %v15913_v54  ;;  %v17558_v9 = vld [vmem:[#allocation85_spill] sm:$0xff]  ;;  %v17559_v52 = vld [vmem:[#allocation58_spill] sm:$0xff] }
 0xb72   : > { %v16320_v49 = vpop.eup %12313  ;;  %v17564_v54 = vpack.i.bf16 %v15923_v46, %v15925_v25  ;;  %v17567_v46 = vld [vmem:[#allocation118_spill] sm:$0xff]  ;;  %v17568_v25 = vld [vmem:[#allocation17_spill] sm:$0xff] }
 0xb73   : > { %v6662_v1 = vsel %vm1517_vm2, %v16320_v49, 0.0  ;;  %v16326_v53 = vpop.eup %12315 }
 0xb74   : > { %6663 = vadd.xlane.f32.xlu0 %v6662_v1  ;;  %v6653_v35 = vsel %vm1517_vm2, %v16326_v53, 0.0  ;;  %v17542_v1 = vld [vmem:[#allocation115_spill] sm:$0xff] }
 0xb75   : > { %6672 = vadd.xlane.f32.xlu1 %v6671_v45  ;;  %v17543_v45 = vld [vmem:[#allocation108_spill] sm:$0xff] }
 0xb76   : > { %v16328_v56 = vpop.eup %12317 }
 0xb77   : > { %v6686_v18 = vsel %vm1517_vm2, %v16328_v56, 0.0  ;;  %v16334_v63 = vpop.eup %12319 }
 0xb78   : > { %6687 = vadd.xlane.f32.xlu0 %v6686_v18  ;;  %v6677_v22 = vsel %vm1517_vm2, %v16334_v63, 0.0  ;;  %v16338_v44 = vpop.eup %12321  ;;  %v17544_v18 = vpack.i.bf16 %v17542_v1, %v17543_v45 }
 0xb79   : > { %6654 = vadd.xlane.f32.xlu1 %v6653_v35  ;;  %v6659_v39 = vsel %vm1517_vm2, %v16338_v44, 0.0  ;;  %v11624_v35 = vpop.permute.xlu0 %11623 }
 0xb7b   : > { %v16342_v57 = vpop.eup %12323 }
 0xb7c   : > { %v6683_v10 = vsel %vm1517_vm2, %v16342_v57, 0.0 }
 0xb7d   : > { %6678 = vadd.xlane.f32.xlu1 %v6677_v22 }
 0xb81   : > { %6660 = vadd.xlane.f32.xlu1 %v6659_v39  ;;  %v17545_v39 = vld [vmem:[#allocation116_spill] sm:$0xff] }
 0xb85   : > { %6684 = vadd.xlane.f32.xlu1 %v6683_v10  ;;  %v17546_v10 = vld [vmem:[#allocation110_spill] sm:$0xff] }
 0xb86   : > { %v17547_v28 = vpack.i.bf16 %v17545_v39, %v17546_v10  ;;  %v17562_v10 = vld [vmem:[#allocation111_spill] sm:$0xff] }
 0xb87   : > { %v17563_v7 = vpack.i.bf16 %v17561_v30, %v17562_v10 }
 0xb8e   : > { %11633 = vrot.lane.b32.xlu0 %v17535_v0, %s12590_s11  ;;  %v17550_v0 = vld [vmem:[#allocation109_spill] sm:$0xff] }
 0xb8f   : > { %v17552_v8 = vpack.i.bf16 %v17550_v0, %v17551_v31 }
 0xb92   : > { %11638 = vrot.lane.b32.xlu0 %v17538_v27, %s12590_s11  ;;  %v17553_v27 = vld [vmem:[#allocation26_spill] sm:$0xff] }
 0xb96   : > { %11643 = vrot.lane.b32.xlu0 %v17539_v42, %s12589_s20  ;;  %11628 = vrot.lane.b32.xlu1 %v17540_v38, %s12590_s11  ;;  %v17554_v42 = vld [vmem:[#allocation114_spill] sm:$0xff] }
 0xb97   : > { %v17555_v38 = vpack.i.bf16 %v17553_v27, %v17554_v42 }
 0xb98   : > { %v6598_v22 = vpop.xlane.xlu1 %6597 }
 0xb99   : > { %12325 = vrcp.f32 %v6598_v22  ;;  %v11605_v22 = vunpack.i.l.bf16 %v16180_v26 }
 0xb9a   : > { %11653 = vrot.lane.b32.xlu0 %v17541_v55, %s12589_s20  ;;  %11648 = vrot.lane.b32.xlu1 %v17544_v18, %s12590_s11  ;;  %v17560_v55 = vpack.i.bf16 %v17558_v9, %v17559_v52  ;;  %v11606_v18 = vunpack.i.h.bf16 %v16180_v26  ;;  %v11610_v26 = vunpack.i.l.bf16 %v15887_v40  ;;  %v11626_v9 = vunpack.i.h.bf16 %v11624_v35 }
 0xb9b   : > { %v11625_v52 = vunpack.i.l.bf16 %v11624_v35 }
 0xb9e   : > { %11658 = vrot.lane.b32.xlu0 %v17547_v28, %s12590_s11  ;;  %11663 = vrot.lane.b32.xlu1 %v17548_v59, %s12589_s20  ;;  %v11611_v28 = vunpack.i.h.bf16 %v15887_v40 }
 0xba0   : > { %v10998_v31 = vpack.c.bf16 %v11611_v28, %v11610_v26 }
 0xba1   : > { %v6595_v58 = vpop.xlane.xlu0 %6594 }
 0xba2   : > { %11673 = vrot.lane.b32.xlu0 %v17549_v16, %s12589_s20  ;;  %12327 = vrcp.f32 %v6595_v58  ;;  %11668 = vrot.lane.b32.xlu1 %v17552_v8, %s12590_s11  ;;  %v17569_v58 = vpack.i.bf16 %v17567_v46, %v17568_v25  ;;  %v17570_v16 = vld [vmem:[#allocation51_spill] sm:$0xff] }
 0xba3   : > { %v12326_v1 = vpop.eup %12325  ;;  %v11616_v0 = vunpack.i.h.bf16 %v17570_v16  ;;  %v11615_v40 = vunpack.i.l.bf16 %v17570_v16 }
 0xba4   : > { %v6722_v36 = vmul.f32 %v12326_v1, %v16188_v4  ;;  %v17565_v4 = vld [vmem:[#allocation38_spill] sm:$0xff] }
 0xba5   : > { %v17566_v59 = vpack.i.bf16 %v15935_v6, %v17565_v4  ;;  %v11002_v8 = vpack.c.bf16 %v11616_v0, %v11615_v40 }
 0xba6   : > { %11678 = vrot.lane.b32.xlu0 %v17555_v38, %s12590_s11  ;;  %11683 = vrot.lane.b32.xlu1 %v17556_v24, %s12589_s20 }
 0xbaa   : > { %11693 = vrot.lane.b32.xlu0 %v17557_v37, %s12589_s20  ;;  %11688 = vrot.lane.b32.xlu1 %v17560_v55, %s12590_s11 }
 0xbac   : > { %v12328_v45 = vpop.eup %12327 }
 0xbad   : > { %v6721_v39 = vmul.f32 %v12328_v45, %v16192_v20  ;;  %v10994_v20 = vpack.c.bf16 %v11606_v18, %v11605_v22  ;;  %v11010_v18 = vpack.c.bf16 %v11626_v9, %v11625_v52  ;;  %v17571_v22 = vld [vmem:[#allocation40_spill] sm:$0xff] }
 0xbae   : > { %11698 = vrot.lane.b32.xlu0 %v17563_v7, %s12590_s11  ;;  %11703 = vrot.lane.b32.xlu1 %v17564_v54, %s12589_s20 }
 0xbaf   : > { %10142 = vmatprep.mubr.msk.f32.mxu0 %vm1517_vm2, %v6721_v39 }
 0xbb0   : > { %10143 = vmatmul.mubr.msk.f32.vlgmr.msra.gmra.mrb[148].mxu0 %vm1517_vm2, %v6722_v36 }
 0xbb1   : > { %10993 = vmatpush3.bf16.msra.mxu0 %v15885_v3 }
 0xbb2   : > { %11713 = vrot.lane.b32.xlu0 %v17566_v59, %s12589_s20  ;;  %10995 = vmatprep.subr.bf16.mxu0 %v10994_v20 }
 0xbb3   : > { %11708 = vrot.lane.b32.xlu1 %v17569_v58, %s12590_s11 }
 0xbb5   : > { %10997 = vmatpush3.bf16.msra.mxu0 %v10994_v20 }
 0xbb6   : > { %10999 = vmatprep.subr.bf16.mxu0 %v10998_v31 }
 0xbb9   : > { %11001 = vmatpush3.bf16.msra.mxu0 %v10998_v31 }
 0xbba   : > { %11003 = vmatprep.subr.bf16.mxu0 %v11002_v8 }
 0xbbd   : > { %11005 = vmatpush3.bf16.msra.mxu0 %v11002_v8 }
 0xbcd   : > { %v6622_v3 = vpop.xlane.xlu1 %6621 }
 0xbce   : > { %12329 = vrcp.f32 %v6622_v3  ;;  %v6619_v6 = vpop.xlane.xlu0 %6618 }
 0xbcf   : > { %12331 = vrcp.f32 %v6619_v6 }
 0xbd2   : > { %v6604_v27 = vpop.xlane.xlu1 %6603 }
 0xbd3   : > { %12333 = vrcp.f32 %v6604_v27 }
 0xbd6   : > { %v6628_v42 = vpop.xlane.xlu1 %6627  ;;  %v6601_v38 = vpop.xlane.xlu0 %6600 }
 0xbd7   : > { %12335 = vrcp.f32 %v6601_v38 }
 0xbd8   : > { %v12330_v24 = vpop.eup %12329  ;;  %12337 = vrcp.f32 %v6628_v42 }
 0xbd9   : > { %v12332_v37 = vpop.eup %12331  ;;  %v6730_v45 = vmul.f32 %v12330_v24, %v16203_v48 }
 0xbda   : > { %v6625_v55 = vpop.xlane.xlu1 %6624  ;;  %v6729_v1 = vmul.f32 %v12332_v37, %v16205_v34 }
 0xbdb   : > { %12339 = vrcp.f32 %v6625_v55 }
 0xbdc   : > { %10170 = vmatprep.mubr.msk.f32.mxu1 %vm1517_vm2, %v6729_v1 }
 0xbdd   : > { %10171 = vmatmul.mubr.msk.f32.vlgmr.msra.gmra.mrb[172].mxu1 %vm1517_vm2, %v6730_v45  ;;  %v12334_v35 = vpop.eup %12333 }
 0xbde   : > { %11009 = vmatpush3.bf16.msra.mxu1 %v17571_v22  ;;  %v6610_v39 = vpop.xlane.xlu1 %6609  ;;  %v6607_v36 = vpop.xlane.xlu0 %6606  ;;  %v6724_v54 = vmul.f32 %v12334_v35, %v16213_v33 }
 0xbdf   : > { %12341 = vrcp.f32 %v6610_v39  ;;  %11011 = vmatprep.subr.bf16.mxu1 %v11010_v18 }
 0xbe0   : > { %12343 = vrcp.f32 %v6607_v36 }
 0xbe1   : > { %v12336_v30 = vpop.eup %12335 }
 0xbe2   : > { %11013 = vmatpush3.bf16.msra.mxu1 %v11010_v18  ;;  %v6634_v10 = vpop.xlane.xlu1 %6633  ;;  %v6631_v34 = vpop.xlane.xlu0 %6630  ;;  %v6723_v48 = vmul.f32 %v12336_v30, %v16221_v2 }
 0xbe3   : > { %12345 = vrcp.f32 %v6634_v10  ;;  %v12338_v7 = vpop.eup %12337 }
 0xbe4   : > { %12347 = vrcp.f32 %v6631_v34  ;;  %10145 = vmatprep.mubr.msk.f32.mxu0 %vm1517_vm2, %v6723_v48  ;;  %v6732_v4 = vmul.f32 %v12338_v7, %v16218_v32 }
 0xbe5   : > { %v12340_v28 = vpop.eup %12339  ;;  %10146 = vmatmul.mubr.msk.f32.gmra.mrb[150].mxu0 %vm1517_vm2, %v6724_v54 }
 0xbe6   : > { %v6616_v26 = vpop.xlane.xlu1 %6615  ;;  %v6731_v20 = vmul.f32 %v12340_v28, %v16229_v21  ;;  %v6646_v46 = vpop.xlane.xlu0 %6645 }
 0xbe7   : > { %12349 = vrcp.f32 %v6616_v26 }
 0xbe8   : > { %10173 = vmatprep.mubr.msk.f32.mxu1 %vm1517_vm2, %v6731_v20 }
 0xbe9   : > { %v12342_v59 = vpop.eup %12341  ;;  %10174 = vmatmul.mubr.msk.f32.gmra.mrb[174].mxu1 %vm1517_vm2, %v6732_v4 }
 0xbea   : > { %v12344_v2 = vpop.eup %12343  ;;  %v6640_v25 = vpop.xlane.xlu1 %6639  ;;  %v6726_v33 = vmul.f32 %v12342_v59, %v16234_v17 }
 0xbeb   : > { %v6725_v58 = vmul.f32 %v12344_v2, %v16236_v15 }
 0xbed   : > { %v12346_v16 = vpop.eup %12345  ;;  %10148 = vmatprep.mubr.msk.f32.mxu0 %vm1517_vm2, %v6725_v58  ;;  %v16441_v0 = vpop.xlane.xlu0 %6669 }
 0xbee   : > { %v12348_v21 = vpop.eup %12347  ;;  %10149 = vmatmul.mubr.msk.f32.gmra.mrb[152].mxu0 %vm1517_vm2, %v6726_v33  ;;  %v6613_v32 = vpop.xlane.xlu1 %6612  ;;  %v6734_v40 = vmul.f32 %v12346_v16, %v16244_v62 }
 0xbef   : > { %12351 = vrcp.f32 %v6613_v32  ;;  %v6733_v31 = vmul.f32 %v12348_v21, %v16246_v5 }
 0xbf0   : > { %12353 = vrcp.f32 %v6640_v25 }
 0xbf1   : > { %10176 = vmatprep.mubr.msk.f32.mxu1 %vm1517_vm2, %v6733_v31  ;;  %v6652_v17 = vpop.xlane.xlu0 %6651  ;;  %v12350_v6 = vpop.eup %12349 }
 0xbf2   : > { %10177 = vmatmul.mubr.msk.f32.gmra.mrb[176].mxu1 %vm1517_vm2, %v6734_v40  ;;  %v6637_v15 = vpop.xlane.xlu1 %6636  ;;  %v6728_v5 = vmul.f32 %v12350_v6, %v16254_v23 }
 0xbf3   : > { %12355 = vrcp.f32 %v6637_v15 }
 0xbf4   : > { %12357 = vrcp.f32 %v6646_v46 }
 0xbf5   : > { %v16448_v8 = vpop.xlane.xlu0 %6675 }
 0xbf6   : > { %v6643_v3 = vpop.xlane.xlu1 %6642 }
 0xbf7   : > { %12359 = vrcp.f32 %v6643_v3 }
 0xbf9   : > { %v12352_v27 = vpop.eup %12351  ;;  %v6658_v42 = vpop.xlane.xlu0 %6657 }
 0xbfa   : > { %v6667_v62 = vpop.xlane.xlu1 %6666  ;;  %v6727_v38 = vmul.f32 %v12352_v27, %v16270_v13  ;;  %v12354_v24 = vpop.eup %12353 }
 0xbfb   : > { %12361 = vrcp.f32 %v6667_v62  ;;  %v6736_v1 = vmul.f32 %v12354_v24, %v16264_v60  ;;  %v17575_v24 = vld [vmem:[#allocation86_spill] sm:$0xff] }
 0xbfc   : > { %10151 = vmatprep.mubr.msk.f32.mxu0 %vm1517_vm2, %v6727_v38  ;;  %12363 = vrcp.f32 %v6652_v17 }
 0xbfd   : > { %v12356_v37 = vpop.eup %12355  ;;  %v16453_v9 = vpop.xlane.xlu0 %6681  ;;  %10152 = vmatmul.mubr.msk.f32.gmra.mrb[154].mxu0 %vm1517_vm2, %v6728_v5 }
 0xbfe   : > { %v6649_v52 = vpop.xlane.xlu1 %6648  ;;  %v6735_v55 = vmul.f32 %v12356_v37, %v16280_v50  ;;  %v12358_v45 = vpop.eup %12357 }
 0xbff   : > { %12365 = vrcp.f32 %v6649_v52  ;;  %v6738_v39 = vmul.f32 %v12358_v45, %v16256_v61 }
 0xc00   : > { %10179 = vmatprep.mubr.msk.f32.mxu1 %vm1517_vm2, %v6735_v55  ;;  %12367 = vrcp.f32 %v6658_v42  ;;  %v17573_v42 = vld [vmem:[#allocation30_spill] sm:$0xff] }
 0xc01   : > { %v12360_v13 = vpop.eup %12359  ;;  %v6664_v23 = vpop.xlane.xlu0 %6663  ;;  %10180 = vmatmul.mubr.msk.f32.gmra.mrb[178].mxu1 %vm1517_vm2, %v6736_v1 }
 0xc02   : > { %v6673_v18 = vpop.xlane.xlu1 %6672  ;;  %v6737_v22 = vmul.f32 %v12360_v13, %v16290_v14 }
 0xc04   : > { %10198 = vmatprep.mubr.msk.f32.mxu0 %vm1517_vm2, %v6737_v22 }
 0xc05   : > { %v12362_v36 = vpop.eup %12361  ;;  %v16463_v35 = vpop.xlane.xlu0 %6687  ;;  %10199 = vmatmul.mubr.msk.f32.vlgmr.msra.gmra.mrb[156].mxu0 %vm1517_vm2, %v6738_v39 }
 0xc06   : > { %v6655_v60 = vpop.xlane.xlu1 %6654  ;;  %v6745_v50 = vmul.f32 %v12362_v36, %v16300_v11  ;;  %v12364_v30 = vpop.eup %12363 }
 0xc07   : > { %12369 = vrcp.f32 %v6655_v60  ;;  %v6740_v48 = vmul.f32 %v12364_v30, %v16282_v29 }
 0xc08   : > { %10226 = vmatprep.mubr.msk.f32.mxu1 %vm1517_vm2, %v6745_v50  ;;  %12371 = vrcp.f32 %v6664_v23 }
 0xc09   : > { %v12366_v10 = vpop.eup %12365  ;;  %v11634_v34 = vpop.permute.xlu0 %11633 }
 0xc0a   : > { %v6679_v14 = vpop.xlane.xlu1 %6678  ;;  %v6739_v61 = vmul.f32 %v12366_v10, %v16309_v12  ;;  %v12368_v11 = vpop.eup %12367  ;;  %v11636_v46 = vunpack.i.h.bf16 %v11634_v34  ;;  %v11635_v2 = vunpack.i.l.bf16 %v11634_v34 }
 0xc0b   : > { %v6742_v12 = vmul.f32 %v12368_v11, %v16302_v51  ;;  %v17578_v11 = vld [vmem:[#allocation88_spill] sm:$0xff] }
 0xc0c   : > { %10201 = vmatprep.mubr.msk.f32.mxu0 %vm1517_vm2, %v6739_v61  ;;  %v11018_v31 = vpack.c.bf16 %v11636_v46, %v11635_v2 }
 0xc0d   : > { %v16471_v7 = vpop.permute.xlu0 %11638  ;;  %10202 = vmatmul.mubr.msk.f32.gmra.mrb[158].mxu0 %vm1517_vm2, %v6740_v48 }
 0xc0e   : > { %v6661_v54 = vpop.xlane.xlu1 %6660 }
 0xc0f   : > { %12373 = vrcp.f32 %v6661_v54 }
 0xc10   : > { %12375 = vrcp.f32 %v16441_v0 }
 0xc11   : > { %v12370_v28 = vpop.eup %12369  ;;  %v16474_v26 = vpop.permute.xlu0 %11643  ;;  %12377 = vrcp.f32 %v6673_v18 }
 0xc12   : > { %v6685_v20 = vpop.xlane.xlu1 %6684  ;;  %v6741_v4 = vmul.f32 %v12370_v28, %v16326_v53  ;;  %v12372_v58 = vpop.eup %12371  ;;  %12379 = vrcp.f32 %v16448_v8  ;;  %v17572_v8 = vld [vmem:[#allocation32_spill] sm:$0xff] }
 0xc13   : > { %12381 = vrcp.f32 %v6679_v14  ;;  %v6744_v3 = vmul.f32 %v12372_v58, %v16320_v49  ;;  %v17574_v49 = vld [vmem:[#allocation77_spill] sm:$0xff] }
 0xc14   : > { %10204 = vmatprep.mubr.msk.f32.mxu0 %vm1517_vm2, %v6741_v4  ;;  %12383 = vrcp.f32 %v16453_v9 }
 0xc15   : > { %v11654_v29 = vpop.permute.xlu0 %11653  ;;  %10205 = vmatmul.mubr.msk.f32.gmra.mrb[160].mxu0 %vm1517_vm2, %v6742_v12  ;;  %12385 = vrcp.f32 %v6685_v20  ;;  %v17579_v20 = vld [vmem:[#allocation80_spill] sm:$0xff] }
 0xc16   : > { %v11629_v59 = vpop.permute.xlu1 %11628  ;;  %v11655_v6 = vunpack.i.l.bf16 %v11654_v29  ;;  %12387 = vrcp.f32 %v16463_v35  ;;  %v17576_v35 = vld [vmem:[#allocation89_spill] sm:$0xff] }
 0xc17   : > { %v11631_v25 = vunpack.i.h.bf16 %v11629_v59  ;;  %v11630_v33 = vunpack.i.l.bf16 %v11629_v59 }
 0xc19   : > { %v12374_v16 = vpop.eup %12373  ;;  %v11014_v53 = vpack.c.bf16 %v11631_v25, %v11630_v33  ;;  %v11659_v51 = vpop.permute.xlu0 %11658 }
 0xc1a   : > { %v11661_v21 = vunpack.i.h.bf16 %v11659_v51  ;;  %v11660_v0 = vunpack.i.l.bf16 %v11659_v51  ;;  %v11649_v32 = vpop.permute.xlu1 %11648  ;;  %v6743_v40 = vmul.f32 %v12374_v16, %v16338_v44  ;;  %v11656_v44 = vunpack.i.h.bf16 %v11654_v29  ;;  %v12376_v9 = vpop.eup %12375 }
 0xc1b   : > { %v11651_v17 = vunpack.i.h.bf16 %v11649_v32  ;;  %v11650_v15 = vunpack.i.l.bf16 %v11649_v32  ;;  %11015 = vmatprep.subr.bf16.mxu1 %v11014_v53  ;;  %v12378_v1 = vpop.eup %12377  ;;  %v6746_v13 = vmul.f32 %v12376_v9, %v16272_v19  ;;  %v17577_v19 = vld [vmem:[#allocation83_spill] sm:$0xff] }
 0xc1c   : > { %10207 = vmatprep.mubr.msk.f32.mxu0 %vm1517_vm2, %v6743_v40  ;;  %11017 = vmatpush3.bf16.msra.mxu1 %v11014_v53  ;;  %v16488_v27 = vsel %vm904_vm0, %v17572_v8, %v11660_v0  ;;  %v16492_v62 = vsel %vm904_vm0, %v17573_v42, %v11661_v21  ;;  %v12380_v18 = vpop.eup %12379  ;;  %v6747_v60 = vmul.f32 %v12378_v1, %v16318_v47  ;;  %v17583_v8 = vld [vmem:[#allocation90_spill] sm:$0xff]  ;;  %v7850_v1 = vld [vmem:[#allocation7 + $0x20] sm:$0xff] }
 0xc1d   : > { %v11674_v38 = vpop.permute.xlu0 %11673  ;;  %10208 = vmatmul.mubr.msk.f32.gmra.mrb[162].mxu0 %vm1517_vm2, %v6744_v3  ;;  %11019 = vmatprep.subr.bf16.mxu1 %v11018_v31  ;;  %v7751_v5 = vsel %vm904_vm0, %v17574_v49, %v11650_v15  ;;  %v7752_v37 = vsel %vm904_vm0, %v17575_v24, %v11651_v17  ;;  %v12382_v50 = vpop.eup %12381  ;;  %v6748_v47 = vmul.f32 %v12380_v18, %v16292_v43  ;;  %v17581_v15 = vld [vmem:[#allocation82_spill] sm:$0xff]  ;;  %v7846_v49 = vld [vmem:[#allocation7] sm:$0xff]  ;;  %v7852_v18 = vld [vmem:[#allocation7 + $0x30] sm:$0xff] }
 0xc1e   : > { %v16499_v52 = vpop.permute.xlu1 %11663  ;;  %v16502_v55 = vsel %vm1517_vm2, %v7751_v5, %v11655_v6  ;;  %v16505_v45 = vsel %vm1517_vm2, %v7752_v37, %v11656_v44  ;;  %v11676_v34 = vunpack.i.h.bf16 %v11674_v38  ;;  %v11675_v14 = vunpack.i.l.bf16 %v11674_v38  ;;  %v12384_v12 = vpop.eup %12383  ;;  %v17582_v6 = vld [vmem:[#allocation91_spill] sm:$0xff]  ;;  %v7847_v5 = vld [vmem:[#allocation7 + $0x8] sm:$0xff]  ;;  %v7849_v37 = vld [vmem:[#allocation7 + $0x18] sm:$0xff] }
 0xc1f   : > { %v6749_v59 = vmul.f32 %v12382_v50, %v16334_v63  ;;  %v12386_v25 = vpop.eup %12385  ;;  %v6750_v33 = vmul.f32 %v12384_v12, %v16311_v41  ;;  %v11022_v24 = vpack.c.bf16 %v7847_v5, %v7846_v49  ;;  %v17590_v5 = vld [vmem:[#allocation62_spill] sm:$0xff] }
 0xc20   : > { %11021 = vmatpush3.bf16.msra.mxu1 %v11018_v31  ;;  %v12388_v58 = vpop.eup %12387  ;;  %v6751_v63 = vmul.f32 %v12386_v25, %v16342_v57  ;;  %v17580_v31 = vld [vmem:[#allocation93_spill] sm:$0xff] }
 0xc21   : > { %v11679_v23 = vpop.permute.xlu0 %11678  ;;  %v6752_v3 = vmul.f32 %v12388_v58, %v16328_v56  ;;  %11023 = vmatprep.subr.bf16.mxu0 %v11022_v24  ;;  %v7848_v56 = vld [vmem:[#allocation7 + $0x10] sm:$0xff] }
 0xc22   : > { %v11681_v22 = vunpack.i.h.bf16 %v11679_v23  ;;  %v11680_v39 = vunpack.i.l.bf16 %v11679_v23  ;;  %v11669_v36 = vpop.permute.xlu1 %11668  ;;  %11025 = vmatpush3.bf16.msra.mxu0 %v11022_v24  ;;  %v11026_v9 = vpack.c.bf16 %v7849_v37, %v7848_v56  ;;  %v17591_v24 = vld [vmem:[#allocation66_spill] sm:$0xff] }
 0xc23   : > { %v11671_v30 = vunpack.i.h.bf16 %v11669_v36  ;;  %v11670_v10 = vunpack.i.l.bf16 %v11669_v36  ;;  %10227 = vmatmul.mubr.msk.f32.vlgmr.msra.gmra.mrb[180].mxu1 %vm1517_vm2, %v6746_v13  ;;  %v7851_v13 = vld [vmem:[#allocation7 + $0x28] sm:$0xff]  ;;  %v7854_v36 = vld [vmem:[#allocation7 + $0x40] sm:$0xff]  ;;  %v17592_v56 = vpack.i.bf16 %v17590_v5, %v17591_v24  ;;  %v11646_v5 = vunpack.i.h.bf16 %v16474_v26 }
 0xc24   : > { %10229 = vmatprep.mubr.msk.f32.mxu1 %vm1517_vm2, %v6747_v60  ;;  %v16514_v61 = vsel %vm904_vm0, %v17576_v35, %v11680_v39  ;;  %v16518_v48 = vsel %vm904_vm0, %v17577_v19, %v11681_v22  ;;  %11027 = vmatprep.subr.bf16.mxu0 %v11026_v9  ;;  %v11030_v23 = vpack.c.bf16 %v7851_v13, %v7850_v1  ;;  %v7853_v22 = vld [vmem:[#allocation7 + $0x38] sm:$0xff]  ;;  %v7855_v60 = vld [vmem:[#allocation7 + $0x48] sm:$0xff]  ;;  %v11645_v24 = vunpack.i.l.bf16 %v16474_v26 }
 0xc25   : > { %v11694_v54 = vpop.permute.xlu0 %11693  ;;  %v7755_v28 = vsel %vm904_vm0, %v17578_v11, %v11670_v10  ;;  %v7756_v4 = vsel %vm904_vm0, %v17579_v20, %v11671_v30  ;;  %v11034_v39 = vpack.c.bf16 %v7853_v22, %v7852_v18  ;;  %v11038_v50 = vpack.c.bf16 %v7855_v60, %v7854_v36  ;;  %v7856_v30 = vld [vmem:[#allocation7 + $0x50] sm:$0xff]  ;;  %v7857_v10 = vld [vmem:[#allocation7 + $0x58] sm:$0xff]  ;;  %v7859_v35 = vld [vmem:[#allocation7 + $0x68] sm:$0xff] }
 0xc26   : > { %v16525_v29 = vpop.permute.xlu1 %11683  ;;  %v16529_v46 = vsel %vm1517_vm2, %v7755_v28, %v11675_v14  ;;  %v16532_v2 = vsel %vm1517_vm2, %v7756_v4, %v11676_v34  ;;  %v11696_v32 = vunpack.i.h.bf16 %v11694_v54  ;;  %v11695_v40 = vunpack.i.l.bf16 %v11694_v54  ;;  %11029 = vmatpush3.bf16.msra.mxu0 %v11026_v9  ;;  %v7858_v14 = vld [vmem:[#allocation7 + $0x60] sm:$0xff]  ;;  %v7860_v54 = vld [vmem:[#allocation7 + $0x70] sm:$0xff]  ;;  %v17593_v13 = vld [vmem:[#allocation18_spill] sm:$0xff] }
 0xc27   : > { %10230 = vmatmul.mubr.msk.f32.gmra.mrb[182].mxu1 %vm1517_vm2, %v6748_v47  ;;  %11031 = vmatprep.subr.bf16.mxu0 %v11030_v23  ;;  %v11042_v34 = vpack.c.bf16 %v7857_v10, %v7856_v30  ;;  %v11046_v19 = vpack.c.bf16 %v7859_v35, %v7858_v14  ;;  %v7861_v47 = vld [vmem:[#allocation7 + $0x78] sm:$0xff]  ;;  %v17597_v60 = vld [vmem:[#allocation24_spill] sm:$0xff]  ;;  %v17599_v10 = vld [vmem:[#allocation35_spill] sm:$0xff] }
 0xc28   : > { %10232 = vmatprep.mubr.msk.f32.mxu1 %vm1517_vm2, %v6749_v59  ;;  %v11050_v11 = vpack.c.bf16 %v7861_v47, %v7860_v54  ;;  %v17596_v36 = vld [vmem:[#allocation50_spill] sm:$0xff]  ;;  %v17603_v47 = vld [vmem:[#allocation47_spill] sm:$0xff] }
 0xc29   : > { %v11699_v43 = vpop.permute.xlu0 %11698  ;;  %v17602_v54 = vld [vmem:[#allocation42_spill] sm:$0xff] }
 0xc2a   : > { %v11701_v16 = vunpack.i.h.bf16 %v11699_v43  ;;  %v11700_v53 = vunpack.i.l.bf16 %v11699_v43  ;;  %v11689_v51 = vpop.permute.xlu1 %11688  ;;  %11033 = vmatpush3.bf16.msra.mxu0 %v11030_v23  ;;  %v17594_v23 = vld [vmem:[#allocation20_spill] sm:$0xff] }
 0xc2b   : > { %v11691_v21 = vunpack.i.h.bf16 %v11689_v51  ;;  %v11690_v0 = vunpack.i.l.bf16 %v11689_v51  ;;  %10233 = vmatmul.mubr.msk.f32.gmra.mrb[184].mxu1 %vm1517_vm2, %v6750_v33  ;;  %11035 = vmatprep.subr.bf16.mxu0 %v11034_v39  ;;  %v17595_v18 = vpack.i.bf16 %v17593_v13, %v17594_v23 }
 0xc2c   : > { %10235 = vmatprep.mubr.msk.f32.mxu1 %vm1517_vm2, %v6751_v63  ;;  %v16542_v17 = vsel %vm904_vm0, %v17580_v31, %v11700_v53  ;;  %v16546_v41 = vsel %vm904_vm0, %v17581_v15, %v11701_v16 }
 0xc2d   : > { %v7759_v57 = vsel %vm904_vm0, %v17582_v6, %v11690_v0  ;;  %v7760_v42 = vsel %vm904_vm0, %v17583_v8, %v11691_v21  ;;  %v17588_v8 = vld [vmem:[#allocation117_spill] sm:$0xff] }
 0xc2e   : > { %v16554_v44 = vsel %vm1517_vm2, %v7759_v57, %v11695_v40  ;;  %v16557_v38 = vsel %vm1517_vm2, %v7760_v42, %v11696_v32  ;;  %11037 = vmatpush3.bf16.msra.mxu0 %v11034_v39  ;;  %v17584_v32 = vld [vmem:[#allocation23_spill] sm:$0xff] }
 0xc2f   : > { %10236 = vmatmul.mubr.msk.f32.gmra.mrb[186].mxu1 %vm1517_vm2, %v6752_v3  ;;  %11039 = vmatprep.subr.bf16.mxu0 %v11038_v50  ;;  %v17585_v40 = vld [vmem:[#allocation19_spill] sm:$0xff] }
 0xc30   : > { %v17586_v31 = vpack.i.bf16 %v17584_v32, %v17585_v40  ;;  %v17587_v57 = vld [vmem:[#allocation59_spill] sm:$0xff]  ;;  %v17614_v32 = vld [vmem:[#allocation44_spill] sm:$0xff]  ;;  %v17615_v40 = vld [vmem:[#allocation22_spill] sm:$0xff] }
 0xc31   : > { %v17589_v42 = vpack.i.bf16 %v17587_v57, %v17588_v8  ;;  %v16616_v57 = vpop.permute.xlu0 %11713  ;;  %v11641_v8 = vunpack.i.h.bf16 %v16471_v7 }
 0xc32   : > { %11041 = vmatpush3.bf16.msra.mxu0 %v11038_v50  ;;  %v17598_v50 = vpack.i.bf16 %v17596_v36, %v17597_v60 }
 0xc33   : > { %11043 = vmatprep.subr.bf16.mxu0 %v11042_v34 }
 0xc36   : > { %11045 = vmatpush3.bf16.msra.mxu0 %v11042_v34  ;;  %v17600_v34 = vld [vmem:[#allocation57_spill] sm:$0xff] }
 0xc37   : > { %11047 = vmatprep.subr.bf16.mxu0 %v11046_v19  ;;  %v17601_v14 = vpack.i.bf16 %v17599_v10, %v17600_v34  ;;  %v17619_v34 = vld [vmem:[#allocation25_spill] sm:$0xff] }
 0xc3a   : > { %11049 = vmatpush3.bf16.msra.mxu0 %v11046_v19 }
 0xc3b   : > { %11051 = vmatprep.subr.bf16.mxu0 %v11050_v11 }
 0xc3e   : > { %11053 = vmatpush3.bf16.msra.mxu0 %v11050_v11  ;;  %v17604_v11 = vpack.i.bf16 %v17602_v54, %v17603_v47 }
 0xc83   : > { %v10144_v28 = vpop.f32.mrb[148].mxu0 }
 0xc84   : > { %v6867_v20 = vpop.f32.mrb[149].mxu0 }
 0xc85   : > { %v11717_v4 = vpack.i.bf16 %v10144_v28, %v6867_v20  ;;  %v17605_v28 = vld [vmem:[#allocation28_spill] sm:$0xff]  ;;  %v17606_v20 = vld [vmem:[#allocation31_spill] sm:$0xff] }
 0xc87   : > { %11718 = vrot.lane.b32.xlu0 %v11717_v4, %s12588_s19  ;;  %v17607_v4 = vpack.i.bf16 %v17605_v28, %v17606_v20  ;;  %v17623_v28 = vld [vmem:[#allocation15_spill] sm:$0xff] }
 0xcb0   : > { %v10172_v12 = vpop.f32.mrb[172].mxu1 }
 0xcb1   : > { %v7020_v59 = vpop.f32.mrb[173].mxu1 }
 0xcb2   : > { %v11722_v25 = vpack.i.bf16 %v10172_v12, %v7020_v59  ;;  %v17608_v59 = vld [vmem:[#allocation112_spill] sm:$0xff] }
 0xcb4   : > { %11723 = vrot.lane.b32.xlu0 %v11722_v25, %s12588_s19  ;;  %v17609_v25 = vld [vmem:[#allocation37_spill] sm:$0xff] }
 0xcb8   : > { %v10147_v43 = vpop.f32.mrb[150].mxu0 }
 0xcb9   : > { %v6877_v33 = vpop.f32.mrb[151].mxu0 }
 0xcba   : > { %v11727_v58 = vpack.i.bf16 %v10147_v43, %v6877_v33  ;;  %v17610_v43 = vpack.i.bf16 %v17608_v59, %v17609_v25  ;;  %v17626_v59 = vld [vmem:[#allocation63_spill] sm:$0xff] }
 0xcbc   : > { %v10175_v16 = vpop.f32.mrb[174].mxu1  ;;  %11728 = vrot.lane.b32.xlu1 %v11727_v58, %s12588_s19 }
 0xcbd   : > { %v7030_v53 = vpop.f32.mrb[175].mxu1 }
 0xcbe   : > { %v11732_v51 = vpack.i.bf16 %v10175_v16, %v7030_v53  ;;  %v17611_v16 = vld [vmem:[#allocation41_spill] sm:$0xff] }
 0xcbf   : > { %v17612_v53 = vld [vmem:[#allocation45_spill] sm:$0xff] }
 0xcc0   : > { %11733 = vrot.lane.b32.xlu1 %v11732_v51, %s12588_s19  ;;  %v17613_v51 = vpack.i.bf16 %v17611_v16, %v17612_v53  ;;  %v17629_v16 = vld [vmem:[#allocation36_spill] sm:$0xff] }
 0xcc1   : > { %v10150_v63 = vpop.f32.mrb[152].mxu0 }
 0xcc2   : > { %v6887_v21 = vpop.f32.mrb[153].mxu0 }
 0xcc3   : > { %v11737_v0 = vpack.i.bf16 %v10150_v63, %v6887_v21 }
 0xcc4   : > { %11748 = vrot.lane.b32.xlu1 %v17586_v31, %s12589_s20  ;;  %v17616_v31 = vpack.i.bf16 %v17614_v32, %v17615_v40 }
 0xcc5   : > { %11738 = vrot.lane.b32.xlu0 %v11737_v0, %s12588_s19  ;;  %v10178_v15 = vpop.f32.mrb[176].mxu1 }
 0xcc6   : > { %v7040_v3 = vpop.f32.mrb[177].mxu1 }
 0xcc7   : > { %v11752_v6 = vpack.i.bf16 %v10178_v15, %v7040_v3 }
 0xcc9   : > { %11743 = vrot.lane.b32.xlu0 %v17589_v42, %s12590_s11  ;;  %v11640_v42 = vunpack.i.l.bf16 %v16471_v7 }
 0xccd   : > { %11753 = vrot.lane.b32.xlu0 %v11752_v6, %s12588_s19 }
 0xcd0   : > { %v10153_v49 = vpop.f32.mrb[154].mxu0 }
 0xcd1   : > { %11768 = vrot.lane.b32.xlu0 %v17592_v56, %s12589_s20  ;;  %v6897_v37 = vpop.f32.mrb[155].mxu0 }
 0xcd2   : > { %v11757_v9 = vpack.i.bf16 %v10153_v49, %v6897_v37 }
 0xcd4   : > { %11758 = vrot.lane.b32.xlu1 %v11757_v9, %s12588_s19  ;;  %v10181_v1 = vpop.f32.mrb[178].mxu1 }
 0xcd5   : > { %11773 = vrot.lane.b32.xlu0 %v17595_v18, %s12590_s11  ;;  %v7050_v22 = vpop.f32.mrb[179].mxu1 }
 0xcd6   : > { %v11792_v39 = vpack.i.bf16 %v10181_v1, %v7050_v22  ;;  %v17617_v1 = vld [vmem:[#allocation73_spill] sm:$0xff] }
 0xcd7   : > { %v7750_v13 = vsel %vm904_vm0, %v17617_v1, %v11641_v8 }
 0xcd8   : > { %11763 = vrot.lane.b32.xlu1 %v17598_v50, %s12590_s11  ;;  %v10200_v30 = vpop.f32.mrb[156].mxu0  ;;  %v7782_v36 = vsel %vm1517_vm2, %v7750_v13, %v11646_v5 }
 0xcd9   : > { %11788 = vrot.lane.b32.xlu0 %v17601_v14, %s12589_s20  ;;  %v7173_v35 = vpop.f32.mrb[157].mxu0  ;;  %v17620_v14 = vld [vmem:[#allocation54_spill] sm:$0xff] }
 0xcda   : > { %v11797_v19 = vpack.i.bf16 %v10200_v30, %v7173_v35  ;;  %v17621_v35 = vpack.i.bf16 %v17619_v34, %v17620_v14 }
 0xcdc   : > { %11778 = vrot.lane.b32.xlu1 %v17604_v11, %s12589_s20  ;;  %v17622_v11 = vld [vmem:[#allocation113_spill] sm:$0xff] }
 0xcdd   : > { %11798 = vrot.lane.b32.xlu0 %v11797_v19, %s12588_s19  ;;  %v17624_v20 = vpack.i.bf16 %v17622_v11, %v17623_v28 }
 0xce0   : > { %11783 = vrot.lane.b32.xlu1 %v17607_v4, %s12590_s11  ;;  %v10203_v12 = vpop.f32.mrb[158].mxu0 }
 0xce1   : > { %11803 = vrot.lane.b32.xlu0 %v17610_v43, %s12590_s11  ;;  %v7183_v33 = vpop.f32.mrb[159].mxu0 }
 0xce2   : > { %v11812_v58 = vpack.i.bf16 %v10203_v12, %v7183_v33  ;;  %v17625_v12 = vld [vmem:[#allocation48_spill] sm:$0xff] }
 0xce3   : > { %v17627_v25 = vpack.i.bf16 %v17625_v12, %v17626_v59 }
 0xce4   : > { %11793 = vrot.lane.b32.xlu1 %v11792_v39, %s12588_s19  ;;  %v17618_v39 = vld [vmem:[#allocation75_spill] sm:$0xff] }
 0xce5   : > { %v7749_v7 = vsel %vm904_vm0, %v17618_v39, %v11640_v42  ;;  %v11666_v42 = vunpack.i.h.bf16 %v16499_v52 }
 0xce6   : > { %v7781_v26 = vsel %vm1517_vm2, %v7749_v7, %v11645_v24 }
 0xce8   : > { %11808 = vrot.lane.b32.xlu1 %v17613_v51, %s12589_s20  ;;  %v10206_v63 = vpop.f32.mrb[160].mxu0  ;;  %v17631_v51 = vld [vmem:[#allocation16_spill] sm:$0xff] }
 0xce9   : > { %v7193_v21 = vpop.f32.mrb[161].mxu0 }
 0xcea   : > { %v11817_v0 = vpack.i.bf16 %v10206_v63, %v7193_v21  ;;  %v17632_v63 = vld [vmem:[#allocation29_spill] sm:$0xff] }
 0xceb   : > { %v17633_v21 = vpack.i.bf16 %v17631_v51, %v17632_v63  ;;  %v17635_v51 = vld [vmem:[#allocation81_spill] sm:$0xff] }
 0xcec   : > { %11813 = vrot.lane.b32.xlu1 %v11812_v58, %s12588_s19  ;;  %11818 = vrot.lane.b32.xlu0 %v11817_v0, %s12588_s19  ;;  %v17628_v58 = vld [vmem:[#allocation33_spill] sm:$0xff]  ;;  %v16654_v0 = vpop.permute.xlu1 %11703 }
 0xced   : > { %v17630_v53 = vpack.i.bf16 %v17628_v58, %v17629_v16  ;;  %v11706_v28 = vunpack.i.h.bf16 %v16654_v0  ;;  %v17634_v16 = vld [vmem:[#allocation79_spill] sm:$0xff] }
 0xcef   : > { %v7794_v58 = vsel %vm1517_vm2, %v16546_v41, %v11706_v28  ;;  %v17636_v41 = vld [vmem:[#allocation84_spill] sm:$0xff] }
 0xcf0   : > { %11828 = vrot.lane.b32.xlu1 %v17616_v31, %s12590_s11  ;;  %v10209_v15 = vpop.f32.mrb[162].mxu0  ;;  %v16656_v32 = vpop.permute.xlu1 %11708 }
 0xcf1   : > { %v7203_v3 = vpop.f32.mrb[163].mxu0 }
 0xcf2   : > { %v11837_v6 = vpack.i.bf16 %v10209_v15, %v7203_v3 }
 0xcf4   : > { %11838 = vrot.lane.b32.xlu1 %v11837_v6, %s12588_s19 }
 0xcf6   : > { %v10228_v49 = vpop.f32.mrb[180].mxu1 }
 0xcf7   : > { %v7326_v56 = vpop.f32.mrb[181].mxu1 }
 0xcf8   : > { %v11822_v37 = vpack.i.bf16 %v10228_v49, %v7326_v56  ;;  %v11665_v49 = vunpack.i.l.bf16 %v16499_v52 }
 0xcf9   : > { %v11719_v9 = vpop.permute.xlu0 %11718 }
 0xcfa   : > { %v11721_v23 = vunpack.i.h.bf16 %v11719_v9  ;;  %v11720_v18 = vunpack.i.l.bf16 %v11719_v9  ;;  %11823 = vrot.lane.b32.xlu0 %v11822_v37, %s12588_s19  ;;  %v10231_v22 = vpop.f32.mrb[182].mxu1  ;;  %v7785_v37 = vsel %vm1517_vm2, %v16488_v27, %v11665_v49  ;;  %v7786_v9 = vsel %vm1517_vm2, %v16492_v62, %v11666_v42 }
 0xcfb   : > { %v7336_v60 = vpop.f32.mrb[183].mxu1 }
 0xcfc   : > { %v11842_v50 = vpack.i.bf16 %v10231_v22, %v7336_v60  ;;  %v7814_v30 = vsel %vm7813_vm3, %v7781_v26, %v11720_v18  ;;  %v7815_v10 = vsel %vm7813_vm3, %v7782_v36, %v11721_v23  ;;  %v11685_v22 = vunpack.i.l.bf16 %v16525_v29 }
 0xcfd   : > { %10270 = vmatprep.mubr.f32.mxu0 %v7814_v30  ;;  %v11686_v60 = vunpack.i.h.bf16 %v16525_v29 }
 0xcfe   : > { %10271 = vmatmul.mubr.f32.vlgmr.msra.gmra.mrb[164].mxu0 %v7815_v10  ;;  %11833 = vrot.lane.b32.xlu0 %v17621_v35, %s12589_s20  ;;  %v10234_v19 = vpop.f32.mrb[184].mxu1  ;;  %v7789_v34 = vsel %vm1517_vm2, %v16514_v61, %v11685_v22 }
 0xcff   : > { %11843 = vrot.lane.b32.xlu1 %v11842_v50, %s12588_s19  ;;  %v7346_v54 = vpop.f32.mrb[185].mxu1  ;;  %v7790_v29 = vsel %vm1517_vm2, %v16518_v48, %v11686_v60  ;;  %v11710_v48 = vunpack.i.l.bf16 %v16656_v32 }
 0xd00   : > { %v11857_v47 = vpack.i.bf16 %v10234_v19, %v7346_v54 }
 0xd02   : > { %11848 = vrot.lane.b32.xlu0 %v17624_v20, %s12590_s11  ;;  %v10237_v4 = vpop.f32.mrb[186].mxu1  ;;  %v11711_v20 = vunpack.i.h.bf16 %v16656_v32 }
 0xd03   : > { %11853 = vrot.lane.b32.xlu1 %v17627_v25, %s12589_s20  ;;  %v7356_v43 = vpop.f32.mrb[187].mxu1 }
 0xd04   : > { %v11872_v33 = vpack.i.bf16 %v10237_v4, %v7356_v43  ;;  %v7764_v63 = vsel %vm904_vm0, %v17635_v51, %v11711_v20 }
 0xd06   : > { %11858 = vrot.lane.b32.xlu0 %v11857_v47, %s12588_s19 }
 0xd07   : > { %11863 = vrot.lane.b32.xlu1 %v17630_v53, %s12590_s11  ;;  %v7763_v53 = vsel %vm904_vm0, %v17634_v16, %v11710_v48  ;;  %v17643_v16 = vld [vmem:[#allocation102_spill] sm:$0xff] }
 0xd0a   : > { %11868 = vrot.lane.b32.xlu0 %v17633_v21, %s12589_s20 }
 0xd0b   : > { %11873 = vrot.lane.b32.xlu1 %v11872_v33, %s12588_s19 }
 0xd26   : > { %v11724_v8 = vpop.permute.xlu0 %11723 }
 0xd27   : > { %v11725_v39 = vunpack.i.l.bf16 %v11724_v8  ;;  %v11726_v30 = vunpack.i.h.bf16 %v11724_v8 }
 0xd29   : > { %v7822_v35 = vsel %vm7813_vm3, %v7789_v34, %v11725_v39  ;;  %v7823_v47 = vsel %vm7813_vm3, %v7790_v29, %v11726_v30  ;;  %v17638_v39 = vld [vmem:[#allocation97_spill] sm:$0xff] }
 0xd2e   : > { %v11729_v40 = vpop.permute.xlu1 %11728 }
 0xd2f   : > { %v11731_v31 = vunpack.i.h.bf16 %v11729_v40  ;;  %v11730_v15 = vunpack.i.l.bf16 %v11729_v40 }
 0xd31   : > { %v7816_v3 = vsel %vm7813_vm3, %v16502_v55, %v11730_v15  ;;  %v7817_v6 = vsel %vm7813_vm3, %v16505_v45, %v11731_v31 }
 0xd32   : > { %10273 = vmatprep.mubr.f32.mxu0 %v7816_v3  ;;  %v11734_v13 = vpop.permute.xlu1 %11733 }
 0xd33   : > { %10274 = vmatmul.mubr.f32.gmra.mrb[166].mxu0 %v7817_v6  ;;  %v11735_v14 = vunpack.i.l.bf16 %v11734_v13  ;;  %v11736_v19 = vunpack.i.h.bf16 %v11734_v13 }
 0xd35   : > { %v7824_v61 = vsel %vm7813_vm3, %v16554_v44, %v11735_v14  ;;  %v7825_v59 = vsel %vm7813_vm3, %v16557_v38, %v11736_v19  ;;  %v11716_v38 = vunpack.i.h.bf16 %v16616_v57 }
 0xd36   : > { %v16672_v52 = vpop.permute.xlu1 %11748 }
 0xd37   : > { %v11739_v5 = vpop.permute.xlu0 %11738  ;;  %v11750_v6 = vunpack.i.l.bf16 %v16672_v52  ;;  %v7796_v42 = vsel %vm1517_vm2, %v7764_v63, %v11716_v38  ;;  %v11751_v13 = vunpack.i.h.bf16 %v16672_v52 }
 0xd38   : > { %v11741_v24 = vunpack.i.h.bf16 %v11739_v5  ;;  %v11740_v56 = vunpack.i.l.bf16 %v11739_v5 }
 0xd3a   : > { %v7818_v55 = vsel %vm7813_vm3, %v7785_v37, %v11740_v56  ;;  %v7819_v45 = vsel %vm7813_vm3, %v7786_v9, %v11741_v24 }
 0xd3b   : > { %v16670_v1 = vpop.permute.xlu0 %11743  ;;  %10276 = vmatprep.mubr.f32.mxu0 %v7818_v55 }
 0xd3c   : > { %10277 = vmatmul.mubr.f32.gmra.mrb[168].mxu0 %v7819_v45  ;;  %v11745_v43 = vunpack.i.l.bf16 %v16670_v1  ;;  %v11746_v21 = vunpack.i.h.bf16 %v16670_v1  ;;  %v17637_v45 = vld [vmem:[#allocation87_spill] sm:$0xff] }
 0xd3e   : > { %v7765_v3 = vsel %vm904_vm0, %v17636_v41, %v11745_v43  ;;  %v7766_v1 = vsel %vm904_vm0, %v17637_v45, %v11746_v21  ;;  %v17641_v43 = vld [vmem:[#allocation100_spill] sm:$0xff] }
 0xd3f   : > { %v11754_v23 = vpop.permute.xlu0 %11753  ;;  %v7797_v55 = vsel %vm1517_vm2, %v7765_v3, %v11750_v6 }
 0xd40   : > { %v11755_v11 = vunpack.i.l.bf16 %v11754_v23  ;;  %v11756_v4 = vunpack.i.h.bf16 %v11754_v23 }
 0xd42   : > { %v7827_v32 = vsel %vm7813_vm3, %v7794_v58, %v11756_v4  ;;  %v17642_v58 = vld [vmem:[#allocation103_spill] sm:$0xff] }
 0xd43   : > { %v16674_v18 = vpop.permute.xlu0 %11768 }
 0xd46   : > { %v11759_v27 = vpop.permute.xlu1 %11758 }
 0xd47   : > { %v11761_v7 = vunpack.i.h.bf16 %v11759_v27  ;;  %v11760_v62 = vunpack.i.l.bf16 %v11759_v27  ;;  %v16677_v36 = vpop.permute.xlu0 %11773  ;;  %v7798_v27 = vsel %vm1517_vm2, %v7766_v1, %v11751_v13 }
 0xd48   : > { %v11775_v22 = vunpack.i.l.bf16 %v16677_v36  ;;  %v11776_v14 = vunpack.i.h.bf16 %v16677_v36 }
 0xd49   : > { %v7820_v26 = vsel %vm7813_vm3, %v16529_v46, %v11760_v62  ;;  %v7821_v50 = vsel %vm7813_vm3, %v16532_v2, %v11761_v7  ;;  %v11705_v46 = vunpack.i.l.bf16 %v16654_v0  ;;  %v17639_v62 = vld [vmem:[#allocation96_spill] sm:$0xff] }
 0xd4a   : > { %v16684_v10 = vpop.permute.xlu1 %11763  ;;  %10279 = vmatprep.mubr.f32.mxu0 %v7820_v26  ;;  %v11771_v26 = vunpack.i.h.bf16 %v16674_v18 }
 0xd4b   : > { %10280 = vmatmul.mubr.f32.gmra.mrb[170].mxu0 %v7821_v50  ;;  %v16692_v54 = vpop.permute.xlu0 %11788  ;;  %v7793_v25 = vsel %vm1517_vm2, %v16542_v17, %v11705_v46  ;;  %v11715_v17 = vunpack.i.l.bf16 %v16616_v57  ;;  %v11766_v57 = vunpack.i.h.bf16 %v16684_v10  ;;  %v11765_v49 = vunpack.i.l.bf16 %v16684_v10 }
 0xd4c   : > { %10282 = vmatprep.mubr.f32.mxu0 %v7822_v35  ;;  %v7826_v44 = vsel %vm7813_vm3, %v7793_v25, %v11755_v11  ;;  %v11770_v50 = vunpack.i.l.bf16 %v16674_v18  ;;  %v11791_v51 = vunpack.i.h.bf16 %v16692_v54  ;;  %v11790_v63 = vunpack.i.l.bf16 %v16692_v54 }
 0xd4d   : > { %v7795_v8 = vsel %vm1517_vm2, %v7763_v53, %v11715_v17  ;;  %v7767_v7 = vsel %vm904_vm0, %v17638_v39, %v11765_v49  ;;  %v7768_v60 = vsel %vm904_vm0, %v17639_v62, %v11766_v57  ;;  %v17644_v49 = vld [vmem:[#allocation95_spill] sm:$0xff] }
 0xd4e   : > { %v16694_v2 = vpop.permute.xlu1 %11778  ;;  %v7800_v11 = vsel %vm1517_vm2, %v7768_v60, %v11771_v26  ;;  %v17646_v60 = vld [vmem:[#allocation99_spill] sm:$0xff] }
 0xd4f   : > { %10283 = vmatmul.mubr.f32.gmra.mrb[172].mxu0 %v7823_v47  ;;  %v11799_v33 = vpop.permute.xlu0 %11798  ;;  %v11780_v52 = vunpack.i.l.bf16 %v16694_v2  ;;  %v11781_v19 = vunpack.i.h.bf16 %v16694_v2  ;;  %v7799_v47 = vsel %vm1517_vm2, %v7767_v7, %v11770_v50  ;;  %v17647_v50 = vld [vmem:[#allocation98_spill] sm:$0xff] }
 0xd50   : > { %10285 = vmatprep.mubr.f32.mxu0 %v7824_v61  ;;  %v11800_v40 = vunpack.i.l.bf16 %v11799_v33  ;;  %v11801_v56 = vunpack.i.h.bf16 %v11799_v33  ;;  %v17640_v61 = vld [vmem:[#allocation101_spill] sm:$0xff] }
 0xd51   : > { %v7769_v18 = vsel %vm904_vm0, %v17640_v61, %v11775_v22  ;;  %v17648_v61 = vld [vmem:[#allocation105_spill] sm:$0xff] }
 0xd52   : > { %v16702_v12 = vpop.permute.xlu1 %11783  ;;  %v7830_v23 = vsel %vm7813_vm3, %v7797_v55, %v11800_v40  ;;  %v7831_v34 = vsel %vm7813_vm3, %v7798_v27, %v11801_v56  ;;  %v7801_v2 = vsel %vm1517_vm2, %v7769_v18, %v11780_v52 }
 0xd53   : > { %10286 = vmatmul.mubr.f32.gmra.mrb[174].mxu0 %v7825_v59  ;;  %v16729_v37 = vpop.permute.xlu0 %11803  ;;  %v11786_v28 = vunpack.i.h.bf16 %v16702_v12  ;;  %v11785_v20 = vunpack.i.l.bf16 %v16702_v12 }
 0xd54   : > { %10288 = vmatprep.mubr.f32.mxu0 %v7826_v44  ;;  %v7770_v44 = vsel %vm904_vm0, %v17641_v43, %v11776_v14 }
 0xd55   : > { %v7802_v33 = vsel %vm1517_vm2, %v7770_v44, %v11781_v19  ;;  %v7771_v12 = vsel %vm904_vm0, %v17642_v58, %v11785_v20  ;;  %v7772_v53 = vsel %vm904_vm0, %v17643_v16, %v11786_v28  ;;  %v17649_v28 = vld [vmem:[#allocation104_spill] sm:$0xff] }
 0xd56   : > { %v11794_v0 = vpop.permute.xlu1 %11793  ;;  %v7804_v40 = vsel %vm1517_vm2, %v7772_v53, %v11791_v51 }
 0xd57   : > { %v11796_v31 = vunpack.i.h.bf16 %v11794_v0  ;;  %v11795_v15 = vunpack.i.l.bf16 %v11794_v0  ;;  %10289 = vmatmul.mubr.f32.gmra.mrb[176].mxu0 %v7827_v32  ;;  %v7803_v32 = vsel %vm1517_vm2, %v7771_v12, %v11790_v63 }
 0xd59   : > { %v7828_v5 = vsel %vm7813_vm3, %v7795_v8, %v11795_v15  ;;  %v7829_v24 = vsel %vm7813_vm3, %v7796_v42, %v11796_v31  ;;  %v11806_v31 = vunpack.i.h.bf16 %v16729_v37  ;;  %v11805_v15 = vunpack.i.l.bf16 %v16729_v37 }
 0xd5a   : > { %v16731_v9 = vpop.permute.xlu1 %11808  ;;  %10291 = vmatprep.mubr.f32.mxu0 %v7828_v5 }
 0xd5b   : > { %10292 = vmatmul.mubr.f32.gmra.mrb[178].mxu0 %v7829_v24  ;;  %v11811_v54 = vunpack.i.h.bf16 %v16731_v9  ;;  %v11810_v6 = vunpack.i.l.bf16 %v16731_v9  ;;  %v7773_v5 = vsel %vm904_vm0, %v17644_v49, %v11805_v15  ;;  %v17645_v24 = vld [vmem:[#allocation94_spill] sm:$0xff] }
 0xd5c   : > { %10294 = vmatprep.mubr.f32.mxu0 %v7830_v23  ;;  %v7774_v56 = vsel %vm904_vm0, %v17645_v24, %v11806_v31 }
 0xd5d   : > { %v7805_v45 = vsel %vm1517_vm2, %v7773_v5, %v11810_v6  ;;  %v7806_v1 = vsel %vm1517_vm2, %v7774_v56, %v11811_v54 }
 0xd5e   : > { %v11814_v30 = vpop.permute.xlu1 %11813  ;;  %v11819_v10 = vpop.permute.xlu0 %11818 }
 0xd5f   : > { %v11816_v35 = vunpack.i.h.bf16 %v11814_v30  ;;  %v11815_v29 = vunpack.i.l.bf16 %v11814_v30  ;;  %v11820_v46 = vunpack.i.l.bf16 %v11819_v10  ;;  %10295 = vmatmul.mubr.f32.gmra.mrb[180].mxu0 %v7831_v34  ;;  %v11821_v4 = vunpack.i.h.bf16 %v11819_v10 }
 0xd61   : > { %v7832_v48 = vsel %vm7813_vm3, %v7799_v47, %v11815_v29  ;;  %v7833_v36 = vsel %vm7813_vm3, %v7800_v11, %v11816_v35  ;;  %v7834_v25 = vsel %vm7813_vm3, %v7801_v2, %v11820_v46  ;;  %v7835_v17 = vsel %vm7813_vm3, %v7802_v33, %v11821_v4 }
 0xd62   : > { %v11829_v59 = vpop.permute.xlu1 %11828  ;;  %10297 = vmatprep.mubr.f32.mxu0 %v7832_v48 }
 0xd63   : > { %10298 = vmatmul.mubr.f32.gmra.mrb[182].mxu0 %v7833_v36  ;;  %v11831_v37 = vunpack.i.h.bf16 %v11829_v59  ;;  %v11830_v55 = vunpack.i.l.bf16 %v11829_v59 }
 0xd64   : > { %10300 = vmatprep.mubr.f32.mxu0 %v7834_v25 }
 0xd65   : > { %v7775_v26 = vsel %vm904_vm0, %v17646_v60, %v11830_v55  ;;  %v7776_v52 = vsel %vm904_vm0, %v17647_v50, %v11831_v37 }
 0xd66   : > { %v11839_v38 = vpop.permute.xlu1 %11838 }
 0xd67   : > { %v11841_v21 = vunpack.i.h.bf16 %v11839_v38  ;;  %v11840_v0 = vunpack.i.l.bf16 %v11839_v38  ;;  %10301 = vmatmul.mubr.f32.gmra.mrb[184].mxu0 %v7835_v17  ;;  %v17650_v17 = vld [vmem:[#allocation107_spill] sm:$0xff] }
 0xd69   : > { %v7836_v41 = vsel %vm7813_vm3, %v7803_v32, %v11840_v0  ;;  %v7837_v3 = vsel %vm7813_vm3, %v7804_v40, %v11841_v21  ;;  %v17651_v0 = vld [vmem:[#allocation106_spill] sm:$0xff] }
 0xd6a   : > { %10303 = vmatprep.mubr.f32.mxu0 %v7836_v41 }
 0xd6b   : > { %10304 = vmatmul.mubr.f32.gmra.mrb[186].mxu0 %v7837_v3  ;;  %v16813_v3 = vld [vmem:[%s16938_s4] ss:$0 sm:$0xff] }
 0xd6c   : > { %v11824_v8 = vpop.permute.xlu0 %11823 }
 0xd6d   : > { %v11826_v42 = vunpack.i.h.bf16 %v11824_v8  ;;  %v11825_v57 = vunpack.i.l.bf16 %v11824_v8 }
 0xd6f   : > { %v7838_v13 = vsel %vm7813_vm3, %v7805_v45, %v11825_v57  ;;  %v7839_v9 = vsel %vm7813_vm3, %v7806_v1, %v11826_v42 }
 0xd70   : > { %v11834_v23 = vpop.permute.xlu0 %11833  ;;  %10306 = vmatprep.mubr.f32.mxu0 %v7838_v13 }
 0xd71   : > { %v11836_v22 = vunpack.i.h.bf16 %v11834_v23  ;;  %v11835_v27 = vunpack.i.l.bf16 %v11834_v23  ;;  %v11844_v39 = vpop.permute.xlu1 %11843  ;;  %10307 = vmatmul.mubr.f32.gmra.mrb[188].mxu0 %v7839_v9 }
 0xd72   : > { %v11846_v7 = vunpack.i.h.bf16 %v11844_v39  ;;  %v11845_v62 = vunpack.i.l.bf16 %v11844_v39 }
 0xd73   : > { %v7807_v30 = vsel %vm1517_vm2, %v7775_v26, %v11835_v27  ;;  %v7808_v10 = vsel %vm1517_vm2, %v7776_v52, %v11836_v22 }
 0xd74   : > { %v11849_v34 = vpop.permute.xlu0 %11848  ;;  %v7840_v14 = vsel %vm7813_vm3, %v7807_v30, %v11845_v62  ;;  %v7841_v35 = vsel %vm7813_vm3, %v7808_v10, %v11846_v7 }
 0xd75   : > { %v11851_v29 = vunpack.i.h.bf16 %v11849_v34  ;;  %v11850_v46 = vunpack.i.l.bf16 %v11849_v34  ;;  %v11854_v19 = vpop.permute.xlu1 %11853  ;;  %10309 = vmatprep.mubr.f32.mxu0 %v7840_v14 }
 0xd76   : > { %v11856_v47 = vunpack.i.h.bf16 %v11854_v19  ;;  %v11855_v11 = vunpack.i.l.bf16 %v11854_v19  ;;  %10310 = vmatmul.mubr.f32.gmra.mrb[190].mxu0 %v7841_v35 }
 0xd77   : > { %v7777_v18 = vsel %vm904_vm0, %v17648_v61, %v11850_v46  ;;  %v7778_v20 = vsel %vm904_vm0, %v17649_v28, %v11851_v29 }
 0xd78   : > { %v11859_v48 = vpop.permute.xlu0 %11858  ;;  %v7809_v43 = vsel %vm1517_vm2, %v7777_v18, %v11855_v11  ;;  %v7810_v44 = vsel %vm1517_vm2, %v7778_v20, %v11856_v47 }
 0xd79   : > { %v11864_v36 = vpop.permute.xlu1 %11863  ;;  %v11861_v4 = vunpack.i.h.bf16 %v11859_v48  ;;  %v11860_v59 = vunpack.i.l.bf16 %v11859_v48 }
 0xd7a   : > { %v11866_v2 = vunpack.i.h.bf16 %v11864_v36  ;;  %v11865_v25 = vunpack.i.l.bf16 %v11864_v36 }
 0xd7b   : > { %v7842_v33 = vsel %vm7813_vm3, %v7809_v43, %v11860_v59  ;;  %v7843_v58 = vsel %vm7813_vm3, %v7810_v44, %v11861_v4 }
 0xd7c   : > { %v11869_v12 = vpop.permute.xlu0 %11868  ;;  %10312 = vmatprep.mubr.f32.mxu0 %v7842_v33  ;;  %v7779_v21 = vsel %vm904_vm0, %v17650_v17, %v11865_v25  ;;  %v7780_v32 = vsel %vm904_vm0, %v17651_v0, %v11866_v2 }
 0xd7d   : > { %v11871_v16 = vunpack.i.h.bf16 %v11869_v12  ;;  %v11870_v53 = vunpack.i.l.bf16 %v11869_v12  ;;  %v11874_v51 = vpop.permute.xlu1 %11873  ;;  %10313 = vmatmul.mubr.f32.gmra.mrb[192].mxu0 %v7843_v58 }
 0xd7e   : > { %v11876_v63 = vunpack.i.h.bf16 %v11874_v51  ;;  %v11875_v38 = vunpack.i.l.bf16 %v11874_v51 }
 0xd7f   : > { %v7811_v40 = vsel %vm1517_vm2, %v7779_v21, %v11870_v53  ;;  %v7812_v31 = vsel %vm1517_vm2, %v7780_v32, %v11871_v16 }
 0xd80   : > { %v7844_v15 = vsel %vm7813_vm3, %v7811_v40, %v11875_v38  ;;  %v7845_v41 = vsel %vm7813_vm3, %v7812_v31, %v11876_v63 }
 0xd81   : > { %10315 = vmatprep.mubr.f32.mxu0 %v7844_v15 }
 0xd82   : > { %10316 = vmatmul.mubr.f32.gmra.mrb[194].mxu0 %v7845_v41 }
 0xdd1   : > { %v10272_v54 = vpop.f32.mrb[164].mxu0 }
 0xdd2   : > { %v7941_v6 = vadd.f32 %v10272_v54, %v16813_v3  ;;  %v7935_v8 = vpop.f32.mrb[165].mxu0 }
 0xdd3   : > { %v7936_v42 = vadd.f32 %v16813_v3, %v7935_v8 }
 0xdd4   : > { %8095 = vst [vmem:[%s16819_s18 + $0x8] sm:$0xff] %v7941_v6 }
 0xdd5   : > { %8094 = vst [vmem:[%s16819_s18] sm:$0xff] %v7936_v42 }
 0xe06   : > { %v10275_v57 = vpop.f32.mrb[166].mxu0 }
 0xe07   : > { %v7951_v49 = vadd.f32 %v10275_v57, %v16813_v3  ;;  %v7945_v5 = vpop.f32.mrb[167].mxu0 }
 0xe08   : > { %v7946_v24 = vadd.f32 %v16813_v3, %v7945_v5 }
 0xe09   : > { %8097 = vst [vmem:[%s16819_s18 + $0x18] sm:$0xff] %v7951_v49 }
 0xe0a   : > { %8096 = vst [vmem:[%s16819_s18 + $0x10] sm:$0xff] %v7946_v24 }
 0xe0f   : > { %v10278_v56 = vpop.f32.mrb[168].mxu0 }
 0xe10   : > { %v7961_v37 = vadd.f32 %v10278_v56, %v16813_v3  ;;  %v7955_v55 = vpop.f32.mrb[169].mxu0 }
 0xe11   : > { %v7956_v45 = vadd.f32 %v16813_v3, %v7955_v55 }
 0xe12   : > { %8099 = vst [vmem:[%s16819_s18 + $0x28] sm:$0xff] %v7961_v37 }
 0xe13   : > { %8098 = vst [vmem:[%s16819_s18 + $0x20] sm:$0xff] %v7956_v45 }
 0xe1e   : > { %v10281_v1 = vpop.f32.mrb[170].mxu0 }
 0xe1f   : > { %v7971_v13 = vadd.f32 %v10281_v1, %v16813_v3  ;;  %v7965_v9 = vpop.f32.mrb[171].mxu0 }
 0xe20   : > { %v7966_v23 = vadd.f32 %v16813_v3, %v7965_v9 }
 0xe21   : > { %8101 = vst [vmem:[%s16819_s18 + $0x38] sm:$0xff] %v7971_v13 }
 0xe22   : > { %8100 = vst [vmem:[%s16819_s18 + $0x30] sm:$0xff] %v7966_v23  ;;  %v10284_v22 = vpop.f32.mrb[172].mxu0 }
 0xe23   : > { %v7981_v27 = vadd.f32 %v10284_v22, %v16813_v3  ;;  %v7975_v39 = vpop.f32.mrb[173].mxu0 }
 0xe24   : > { %v7976_v7 = vadd.f32 %v16813_v3, %v7975_v39 }
 0xe25   : > { %8103 = vst [vmem:[%s16819_s18 + $0x48] sm:$0xff] %v7981_v27 }
 0xe26   : > { %8102 = vst [vmem:[%s16819_s18 + $0x40] sm:$0xff] %v7976_v7  ;;  %v10287_v62 = vpop.f32.mrb[174].mxu0 }
 0xe27   : > { %v7991_v60 = vadd.f32 %v10287_v62, %v16813_v3  ;;  %v7985_v26 = vpop.f32.mrb[175].mxu0 }
 0xe28   : > { %v7986_v50 = vadd.f32 %v16813_v3, %v7985_v26 }
 0xe29   : > { %8105 = vst [vmem:[%s16819_s18 + $0x58] sm:$0xff] %v7991_v60 }
 0xe2a   : > { %8104 = vst [vmem:[%s16819_s18 + $0x50] sm:$0xff] %v7986_v50  ;;  %v10290_v52 = vpop.f32.mrb[176].mxu0 }
 0xe2b   : > { %v8001_v30 = vadd.f32 %v10290_v52, %v16813_v3  ;;  %v7995_v10 = vpop.f32.mrb[177].mxu0 }
 0xe2c   : > { %v7996_v34 = vadd.f32 %v16813_v3, %v7995_v10 }
 0xe2d   : > { %8107 = vst [vmem:[%s16819_s18 + $0x68] sm:$0xff] %v8001_v30 }
 0xe2e   : > { %8106 = vst [vmem:[%s16819_s18 + $0x60] sm:$0xff] %v7996_v34  ;;  %v10293_v14 = vpop.f32.mrb[178].mxu0 }
 0xe2f   : > { %v8011_v35 = vadd.f32 %v10293_v14, %v16813_v3  ;;  %v8005_v29 = vpop.f32.mrb[179].mxu0 }
 0xe30   : > { %v8006_v46 = vadd.f32 %v16813_v3, %v8005_v29 }
 0xe31   : > { %8109 = vst [vmem:[%s16819_s18 + $0x78] sm:$0xff] %v8011_v35 }
 0xe32   : > { %8108 = vst [vmem:[%s16819_s18 + $0x70] sm:$0xff] %v8006_v46  ;;  %v10296_v19 = vpop.f32.mrb[180].mxu0 }
 0xe33   : > { %v8021_v47 = vadd.f32 %v10296_v19, %v16813_v3  ;;  %v8015_v11 = vpop.f32.mrb[181].mxu0 }
 0xe34   : > { %v8016_v61 = vadd.f32 %v16813_v3, %v8015_v11 }
 0xe35   : > { %8111 = vst [vmem:[%s16819_s18 + $0x88] sm:$0xff] %v8021_v47 }
 0xe36   : > { %8110 = vst [vmem:[%s16819_s18 + $0x80] sm:$0xff] %v8016_v61  ;;  %v10299_v18 = vpop.f32.mrb[182].mxu0 }
 0xe37   : > { %v8031_v28 = vadd.f32 %v10299_v18, %v16813_v3  ;;  %v8025_v20 = vpop.f32.mrb[183].mxu0 }
 0xe38   : > { %v8026_v48 = vadd.f32 %v16813_v3, %v8025_v20 }
 0xe39   : > { %8113 = vst [vmem:[%s16819_s18 + $0x98] sm:$0xff] %v8031_v28 }
 0xe3a   : > { %8112 = vst [vmem:[%s16819_s18 + $0x90] sm:$0xff] %v8026_v48  ;;  %v10302_v36 = vpop.f32.mrb[184].mxu0 }
 0xe3b   : > { %v8041_v4 = vadd.f32 %v10302_v36, %v16813_v3  ;;  %v8035_v59 = vpop.f32.mrb[185].mxu0 }
 0xe3c   : > { %v8036_v2 = vadd.f32 %v16813_v3, %v8035_v59 }
 0xe3d   : > { %8115 = vst [vmem:[%s16819_s18 + $0xa8] sm:$0xff] %v8041_v4 }
 0xe3e   : > { %8114 = vst [vmem:[%s16819_s18 + $0xa0] sm:$0xff] %v8036_v2  ;;  %v10305_v25 = vpop.f32.mrb[186].mxu0 }
 0xe3f   : > { %v8051_v43 = vadd.f32 %v10305_v25, %v16813_v3  ;;  %v8045_v44 = vpop.f32.mrb[187].mxu0 }
 0xe40   : > { %v8046_v33 = vadd.f32 %v16813_v3, %v8045_v44 }
 0xe41   : > { %8117 = vst [vmem:[%s16819_s18 + $0xb8] sm:$0xff] %v8051_v43 }
 0xe42   : > { %8116 = vst [vmem:[%s16819_s18 + $0xb0] sm:$0xff] %v8046_v33 }
 0xe44   : > { %v10308_v58 = vpop.f32.mrb[188].mxu0 }
 0xe45   : > { %v8061_v12 = vadd.f32 %v10308_v58, %v16813_v3  ;;  %v8055_v16 = vpop.f32.mrb[189].mxu0 }
 0xe46   : > { %v8056_v53 = vadd.f32 %v16813_v3, %v8055_v16 }
 0xe47   : > { %8119 = vst [vmem:[%s16819_s18 + $0xc8] sm:$0xff] %v8061_v12 }
 0xe48   : > { %8118 = vst [vmem:[%s16819_s18 + $0xc0] sm:$0xff] %v8056_v53 }
 0xe49   : > { %v10311_v51 = vpop.f32.mrb[190].mxu0 }
 0xe4a   : > { %v8071_v63 = vadd.f32 %v10311_v51, %v16813_v3  ;;  %v8065_v38 = vpop.f32.mrb[191].mxu0 }
 0xe4b   : > { %v8066_v17 = vadd.f32 %v16813_v3, %v8065_v38 }
 0xe4c   : > { %8121 = vst [vmem:[%s16819_s18 + $0xd8] sm:$0xff] %v8071_v63 }
 0xe4d   : > { %8120 = vst [vmem:[%s16819_s18 + $0xd0] sm:$0xff] %v8066_v17 }
 0xe50   : > { %v10314_v21 = vpop.f32.mrb[192].mxu0 }
 0xe51   : > { %v8081_v0 = vadd.f32 %v10314_v21, %v16813_v3  ;;  %v8075_v32 = vpop.f32.mrb[193].mxu0 }
 0xe52   : > { %v8076_v40 = vadd.f32 %v16813_v3, %v8075_v32 }
 0xe53   : > { %8123 = vst [vmem:[%s16819_s18 + $0xe8] sm:$0xff] %v8081_v0 }
 0xe54   : > { %8122 = vst [vmem:[%s16819_s18 + $0xe0] sm:$0xff] %v8076_v40 }
 0xe55   : > { %v10317_v31 = vpop.f32.mrb[194].mxu0 }
 0xe56   : > { %v8091_v15 = vadd.f32 %v10317_v31, %v16813_v3  ;;  %v8085_v41 = vpop.f32.mrb[195].mxu0 }
 0xe57   : > { %v8086_v54 = vadd.f32 %v16813_v3, %v8085_v41 }
 0xe58   : > { %8125 = vst [vmem:[%s16819_s18 + $0xf8] sm:$0xff] %v8091_v15 }
 0xe59   : > { %8124 = vst [vmem:[%s16819_s18 + $0xf0] sm:$0xff] %v8086_v54 }
 0xe5a   : > { %12516 = shalt.err (!%p12513_p4)
}
 0xe5b   : > { %s12517_s19 = scalar_lea.hbm %s16885_s15, 4096  ;;  %s12521_s10 = scalar_lea.hbm %s16940_s6, 8192 }
 0xe5c   : > { %p12518_p9 = scmp.ne.s32.totalorder %s16885_s15, %s12517_s19  ;;  %p12522_p8 = scmp.lt.u32.totalorder %s16885_s15, %s16940_s6 }
 0xe5d   : > { %p12523_p13 = scmp.lt.u32.totalorder %s12521_s10, %s12517_s19  ;;  %p12525_p10 = scmp.lt.u32.totalorder %s12517_s19, %s16885_s15 }
 0xe5e   : > { %p12519_p0 = pnand %p12518_p9, %p12777_p5 }
 0xe5f   : > { %p12524_p6 = por %p12523_p13, %p12522_p8 }
 0xe60   : > { %p12520_p11 = pneg %p12519_p0 }
 0xe61   : > { %p12526_p3 = por %p12525_p10, %p12524_p6 }
 0xe63   : > { %p12527_p7 = pnand %p12526_p3, %p12520_p11 }
 0xe65   : > { %12530 = shalt.err (!%p12527_p7)
}
 0xe66   : > { %s12592_s13 = smov 128   ;;  %s12593_s8 = smov 8  }
 0xe67   : > { %11084 = dma.vmem_to_hbm [thread:$0]  (%p12777_p5), %s16887_s7, 4096, %s16885_s15, %s8127_s25, %s12592_s13, %s12592_s13, %s12593_s8  }
 0xe68 PF: > { %s8156_s14 = sand.u32 1, %s12565_s21   ;;  %p17652_p12 = scmp.ne.s32.totalorder %s17140_s28, 0 }
 0xe69   : > { %p17653_p2 = scmp.ge.s32.totalorder %s12577_s24, 2  ;;  %s8157_s17 = scalar_lea.sflag [#allocation4], %s8156_s14 }
 0xe6b   : > { %p11101_p1 = pnand %p17653_p2, %p17652_p12 }
 0xe6d   : > { %12560 = dma.done.wait (!%p11101_p1), %s8157_s17, 4096  }
 0xe6e   : > { %12562 = vsyncadd (!%p11101_p1), %s8157_s17, 4294963200  ;;  %p21_p4 = scmp.ge.s32.totalorder %s12742_s12, 4   ;;  %s17654_s21 = smov %s12569_s22 }
 0xe6f   : > { %s17655_s22 = smov %s12573_s23  ;;  %s17656_s23 = smov %s12773_s30 }
 0xe70   : > { %s17657_s24 = smov %s12742_s12  ;;  %23 = sbr.rel (!%p21_p4) target bundleno = 9 (0x9), region = 104 }
 0xe77   :  { %8162 = vsyncpa [#allocation3], 1 }
 0xe78   :  { %8164 = vsyncpa [#allocation3 + $0x1], 1 }
 0xe79   :  { %8165 = vsyncpa [#allocation6], 1 }
 0xe7a   :  { %8166 = vsyncpa [#allocation9], 1 }
 0xe7b   :  { %8167 = vsyncpa [#allocation4], 1 }
 0xe7c   :  { %8169 = vsyncpa [#allocation4 + $0x1], 1 }

</bundles_post_ra>
